<compile_context>
chip_gen: v7x
topology: tpu7x:2x2x1
jax: 0.10.0
libtpu: 0.0.40
codegen_flags: <defaults>
</compile_context>

<pallas_src>
import math
import functools

import jax
import jax.numpy as jnp
from jax.experimental import pallas as pl
from jax.experimental.pallas import tpu as pltpu

_MIB = 1024 * 1024


def _siren_kernel(x_ref, w_ref, *rest, w0, apply_w0, has_bias, compute_dtype):
    if has_bias:
        b_ref, o_ref = rest
    else:
        (o_ref,) = rest

    x = x_ref[...]
    if compute_dtype is not None and x.dtype != compute_dtype:
        x = x.astype(compute_dtype)          # in-kernel cast: x stays f32 in HBM

    # (TM, Din) @ (Din, TN) -> (TM, TN); RHS already in (K, N) layout so the
    # MXU gets fed without any per-step transpose.  f32 accumulation.
    acc = jnp.dot(x, w_ref[...], preferred_element_type=jnp.float32)
    if has_bias:
        acc = acc + b_ref[...].astype(jnp.float32)    # (TM, TN) + (1, TN)
    if apply_w0:
        acc = acc * w0
    o_ref[...] = jnp.sin(acc).astype(o_ref.dtype)


def _round_up(v, m):
    return ((v + m - 1) // m) * m


def _vmem_limit_bytes():
    """Generation-aware VMEM ceiling (v5e/v6e: 128 MiB, v7x: 64 MiB phys)."""
    try:
        phys = int(pltpu.get_tpu_info().vmem_capacity_bytes)
    except Exception:
        phys = 64 * _MIB                      # v7x worst case -> safe everywhere
    return (phys * 7) // 8                    # headroom for compiler scratch


def _pick_tiles(B, Din, Dout, x_item, w_item, out_item, has_bias,
                block_rows, block_cols, vmem_limit):
    budget = vmem_limit - 2 * _MIB

    # ---- Dout (N) tile: keep the whole weight resident when it fits. ----
    if block_cols is not None:
        tn = int(block_cols)
        assert tn == Dout or tn % 128 == 0, "block_cols must be 128-aligned"
        tn = min(tn, Dout)
    elif Din * Dout * w_item <= budget // 2 or Dout % 128 != 0:
        tn = Dout
    else:
        col_bytes = Din * w_item
        tn = (budget // 2) // (2 * col_bytes)         # 2 pipeline buffers
        tn = max(128, min((tn // 256) * 256, Dout))   # MXU-friendly 256-multiples
        tn = max(128, (tn // 128) * 128)
    weight_resident = (tn == Dout)
    param_bufs = 1 if weight_resident else 2

    resident = param_bufs * Din * tn * w_item
    if has_bias:
        resident += param_bufs * tn * 4               # bias kept in f32

    # ---- batch (M) tile: remaining budget feeds the streamed x/out tiles. ----
    stream_budget = max(budget - resident, 1 * _MIB)
    per_row = 2 * (Din * x_item + tn * out_item)      # double-buffered x + out
    align = max(8, 32 // x_item, 32 // out_item)      # sublane packing f32:8 bf16:16

    if B <= align:
        tm = B                                        # full-extent tiny batch
    else:
        cap = block_rows if block_rows is not None else 8192
        tm = min(int(cap), stream_budget // per_row)
        # keep >= 2 batch tiles so both v7x TensorCores get work
        tm = min(tm, _round_up(pl.cdiv(B, 2), align))
        tm = max(align, (tm // align) * align)
        tm = min(tm, _round_up(B, align))
    return tm, tn, weight_resident


def siren_forward(x, weight, bias=None, w0=1.0, *,
                  block_rows=None, block_cols=None,
                  compute_dtype=None, out_dtype=None,
                  weight_is_transposed=False):
    """out = sin(w0 * (x @ weight.T + bias)), matching Siren.forward.

    x:      (..., dim_in) activations (arbitrary leading dims, like F.linear)
    weight: (dim_out, dim_in) nn.Linear layout, or (dim_in, dim_out) when
            weight_is_transposed=True (preferred: skips the wrapper transpose)
    bias:   (dim_out,) or None
    compute_dtype=jnp.bfloat16 casts the weight once in the wrapper and x
    per-tile inside the kernel; MXU accumulation stays f32.
    """
    orig_lead = x.shape[:-1]
    if x.ndim != 2:
        x = x.reshape(-1, x.shape[-1])
    B, Din = x.shape
    if weight_is_transposed:
        Din_w, Dout = weight.shape
        w_t = weight
    else:
        Dout, Din_w = weight.shape
        w_t = weight.T                       # one-time (K, N) layout for the MXU
    assert Din == Din_w, (Din, Din_w)

    if out_dtype is None:
        out_dtype = x.dtype
    if compute_dtype is not None:
        w_t = w_t.astype(compute_dtype)      # reused across all grid steps

    has_bias = bias is not None
    args = [x, w_t]
    if has_bias:
        args.append(jnp.asarray(bias, jnp.float32).reshape(1, Dout))  # f32 add post-MXU

    x_item = jnp.dtype(x.dtype).itemsize
    w_item = jnp.dtype(w_t.dtype).itemsize
    out_item = jnp.dtype(out_dtype).itemsize
    vmem_limit = _vmem_limit_bytes()
    tm, tn, weight_resident = _pick_tiles(
        B, Din, Dout, x_item, w_item, out_item, has_bias,
        block_rows, block_cols, vmem_limit)
    grid = (pl.cdiv(B, tm), pl.cdiv(Dout, tn))

    w0 = float(w0)
    kernel = functools.partial(
        _siren_kernel, w0=w0, apply_w0=(w0 != 1.0), has_bias=has_bias,
        compute_dtype=compute_dtype)

    cost = pl.CostEstimate(
        flops=2 * B * Din * Dout,
        transcendentals=B * Dout,
        bytes_accessed=(B * Din * x_item + Din * Dout * w_item
                        + (Dout * 4 if has_bias else 0) + B * Dout * out_item))

    def build(single_buffer_params):
        param_kwargs = (dict(pipeline_mode=pl.Buffered(1))
                        if single_buffer_params else {})
        in_specs = [
            pl.BlockSpec((tm, Din), lambda i, j: (i, 0)),            # streamed x
            pl.BlockSpec((Din, tn), lambda i, j: (0, j),
                         **param_kwargs),                            # weight (K, N)
        ]
        if has_bias:
            in_specs.append(pl.BlockSpec((1, tn), lambda i, j: (0, j),
                                         **param_kwargs))            # bias
        return pl.pallas_call(
            kernel,
            out_shape=jax.ShapeDtypeStruct((B, Dout), out_dtype),
            grid=grid,
            in_specs=in_specs,
            out_specs=pl.BlockSpec((tm, tn), lambda i, j: (i, j)),
            compiler_params=pltpu.CompilerParams(
                dimension_semantics=("parallel", "parallel"),
                vmem_limit_bytes=int(vmem_limit)),
            cost_estimate=cost,
        )

    # Grid-invariant (resident) params only need a single VMEM buffer; fall
    # back to default double-buffering if this JAX rejects Buffered(1).
    if weight_resident:
        try:
            out2d = build(True)(*args)
        except Exception:
            out2d = build(False)(*args)
    else:
        out2d = build(False)(*args)

    return out2d.reshape(orig_lead + (Dout,))


def fold_w0_into_params(weight, bias, w0):
    """sin(w0*(xW^T + b)) == sin(x(w0*W)^T + w0*b): fold w0 into the static
    params once, then call siren_forward(..., w0=1.0) to drop the in-kernel
    multiply.  (If you then cast to bf16, w0 is folded before quantization.)"""
    return w0 * weight, (None if bias is None else w0 * bias)


def init_siren_params(key, dim_in, dim_out, w0=1.0, c=6.0, is_first=False,
                      use_bias=True):
    """Deterministic re-implementation of Siren.__init__ / init_()."""
    w_std = (1.0 / dim_in) if is_first else (math.sqrt(c / dim_in) / w0)
    weight = jax.random.uniform(
        key, (dim_out, dim_in), minval=-w_std, maxval=w_std, dtype=jnp.float32)
    # NOTE: reference module creates bias as zeros and init_() never touches it.
    bias = jnp.zeros((dim_out,), dtype=jnp.float32) if use_bias else None
    return weight, bias


if __name__ == "__main__":
    # Small, lane-friendly shapes.  batch=200 is deliberately not a multiple of
    # the batch tile so the masked partial-tile path is exercised.
    dim_in, dim_out = 128, 256
    batch = 200
    w0, c = 30.0, 6.0

    key = jax.random.PRNGKey(0)
    k_w, k_b, k_x = jax.random.split(key, 3)

    weight, _ = init_siren_params(k_w, dim_in, dim_out, w0=w0, c=c,
                                  is_first=False)
    # Module init leaves bias at zero; use a nonzero bias here so the bias path
    # is actually validated (forward semantics are the same).
    bias = 0.1 * jax.random.normal(k_b, (dim_out,), dtype=jnp.float32)
    x = jax.random.normal(k_x, (batch, dim_in), dtype=jnp.float32)

    ref = jnp.sin(w0 * (x @ weight.T + bias[None, :]))

    # f32 path, budget-driven tiles (resident single-buffered weight, >=2 batch tiles)
    out = jax.block_until_ready(siren_forward(x, weight, bias, w0=w0))
    assert out.shape == (batch, dim_out)
    assert jnp.allclose(out, ref, atol=1e-4, rtol=1e-4)

    # forced Dout tiling (128-wide weight tiles) + small batch tiles
    out_t = jax.block_until_ready(
        siren_forward(x, weight, bias, w0=w0, block_rows=64, block_cols=128))
    assert jnp.allclose(out_t, ref, atol=1e-4, rtol=1e-4)

    # no-bias path (bias buffer / add skipped entirely)
    ref_nb = jnp.sin(w0 * (x @ weight.T))
    out_nb = jax.block_until_ready(siren_forward(x, weight, None, w0=w0))
    assert jnp.allclose(out_nb, ref_nb, atol=1e-4, rtol=1e-4)

    # w0 folded into params (drops the in-kernel multiply)
    w_f, b_f = fold_w0_into_params(weight, bias, w0)
    out_f = jax.block_until_ready(siren_forward(x, w_f, b_f, w0=1.0))
    assert jnp.allclose(out_f, ref, atol=1e-4, rtol=1e-4)

    # bf16 compute path (in-kernel x cast, bf16 resident weight, f32 accumulate);
    # loose tolerance because w0=30 amplifies bf16 input rounding.
    out_bf16 = jax.block_until_ready(
        siren_forward(x, weight, bias, w0=w0, compute_dtype=jnp.bfloat16))
    assert float(jnp.max(jnp.abs(out_bf16 - ref))) < 1e-1

    # batched (3-D) input, as F.linear allows arbitrary leading dims
    x3 = x.reshape(2, batch // 2, dim_in)
    out3 = jax.block_until_ready(siren_forward(x3, weight, bias, w0=w0))
    assert out3.shape == (2, batch // 2, dim_out)
    assert jnp.allclose(out3.reshape(batch, dim_out), ref, atol=1e-4, rtol=1e-4)

    print("KERNEL_OK")
</pallas_src>

<mosaic_0001>
module attributes {stable_mosaic.version = 11 : i64} {
  func.func @_siren_kernel(%arg0: i32, %arg1: i32, %arg2: memref<104x128xf32, #tpu.memory_space<vmem>>, %arg3: memref<128x256xf32, #tpu.memory_space<vmem>>, %arg4: memref<1x256xf32, #tpu.memory_space<vmem>>, %arg5: memref<104x256xf32, #tpu.memory_space<vmem>>) attributes {dimension_semantics = [#tpu.dimension_semantics<parallel>, #tpu.dimension_semantics<parallel>], iteration_bounds = array<i64: 2, 1>, scalar_prefetch = 0 : i64, scratch_operands = 0 : i64, tpu.core_type = #tpu.core_type<tc>, window_params = [{transform_indices = @transform_0, window_bounds = array<i64: 104, 128>}, {pipeline_mode = #tpu.pipeline_mode<synchronous>, transform_indices = @transform_1, window_bounds = array<i64: 128, 256>}, {pipeline_mode = #tpu.pipeline_mode<synchronous>, transform_indices = @transform_2, window_bounds = array<i64: 1, 256>}, {transform_indices = @transform_3, window_bounds = array<i64: 104, 256>}]} {
    %c0 = arith.constant 0 : index
    %c0_0 = arith.constant 0 : index
    %0 = vector.load %arg2[%c0, %c0_0] : memref<104x128xf32, #tpu.memory_space<vmem>>, vector<104x128xf32>
    %c0_1 = arith.constant 0 : index
    %c0_2 = arith.constant 0 : index
    %1 = vector.load %arg3[%c0_1, %c0_2] : memref<128x256xf32, #tpu.memory_space<vmem>>, vector<128x256xf32>
    %cst = arith.constant dense<0.000000e+00> : vector<104x256xf32>
    %2 = tpu.matmul %0, %1, %cst {dimension_numbers = #tpu.dot_dimension_numbers<[1], [0], [0], [1], [0, 0, 1, 1], [], []>} : vector<104x128xf32>, vector<128x256xf32>, vector<104x256xf32> -> vector<104x256xf32>
    %c0_3 = arith.constant 0 : index
    %c0_4 = arith.constant 0 : index
    %3 = vector.load %arg4[%c0_3, %c0_4] : memref<1x256xf32, #tpu.memory_space<vmem>>, vector<1x256xf32>
    %4 = vector.broadcast %3 : vector<1x256xf32> to vector<104x256xf32>
    %5 = arith.addf %2, %4 : vector<104x256xf32>
    %cst_5 = arith.constant 3.000000e+01 : f32
    %6 = vector.broadcast %cst_5 : f32 to vector<104x256xf32>
    %7 = arith.mulf %5, %6 : vector<104x256xf32>
    %8 = math.sin %7 : vector<104x256xf32>
    %c0_6 = arith.constant 0 : index
    %c0_7 = arith.constant 0 : index
    %9 = vector.load %arg5[%c0_6, %c0_7] : memref<104x256xf32, #tpu.memory_space<vmem>>, vector<104x256xf32>
    tpu.vector_store %arg5[%c0_6, %c0_7], %8 {strides = array<i32>} : memref<104x256xf32, #tpu.memory_space<vmem>>, vector<104x256xf32>,
    return
  }
  func.func @transform_0(%arg0: i32, %arg1: i32) -> (i32, i32) {
    %c0_i32 = arith.constant 0 : i32
    %c0_i32_0 = arith.constant 0 : i32
    return %arg0, %c0_i32 : i32, i32
  }
  func.func @transform_1(%arg0: i32, %arg1: i32) -> (i32, i32) {
    %c0_i32 = arith.constant 0 : i32
    %c0_i32_0 = arith.constant 0 : i32
    return %c0_i32, %arg1 : i32, i32
  }
  func.func @transform_2(%arg0: i32, %arg1: i32) -> (i32, i32) {
    %c0_i32 = arith.constant 0 : i32
    %c0_i32_0 = arith.constant 0 : i32
    return %c0_i32, %arg1 : i32, i32
  }
  func.func @transform_3(%arg0: i32, %arg1: i32) -> (i32, i32) {
    %c0_i32 = arith.constant 0 : i32
    return %arg0, %arg1 : i32, i32
  }
}

module attributes {stable_mosaic.version = 11 : i64} {
  func.func @_siren_kernel(%arg0: i32, %arg1: i32, %arg2: memref<104x128xf32, #tpu.memory_space<vmem>>, %arg3: memref<128x256xf32, #tpu.memory_space<vmem>>, %arg4: memref<1x256xf32, #tpu.memory_space<vmem>>, %arg5: memref<104x256xf32, #tpu.memory_space<vmem>>) attributes {dimension_semantics = [#tpu.dimension_semantics<parallel>, #tpu.dimension_semantics<parallel>], iteration_bounds = array<i64: 2, 1>, scalar_prefetch = 0 : i64, scratch_operands = 0 : i64, tpu.core_type = #tpu.core_type<tc>, window_params = [{transform_indices = @transform_0, window_bounds = array<i64: 104, 128>}, {transform_indices = @transform_1, window_bounds = array<i64: 128, 256>}, {transform_indices = @transform_2, window_bounds = array<i64: 1, 256>}, {transform_indices = @transform_3, window_bounds = array<i64: 104, 256>}]} {
    %c0 = arith.constant 0 : index
    %c0_0 = arith.constant 0 : index
    %0 = vector.load %arg2[%c0, %c0_0] : memref<104x128xf32, #tpu.memory_space<vmem>>, vector<104x128xf32>
    %c0_1 = arith.constant 0 : index
    %c0_2 = arith.constant 0 : index
    %1 = vector.load %arg3[%c0_1, %c0_2] : memref<128x256xf32, #tpu.memory_space<vmem>>, vector<128x256xf32>
    %cst = arith.constant dense<0.000000e+00> : vector<104x256xf32>
    %2 = tpu.matmul %0, %1, %cst {dimension_numbers = #tpu.dot_dimension_numbers<[1], [0], [0], [1], [0, 0, 1, 1], [], []>} : vector<104x128xf32>, vector<128x256xf32>, vector<104x256xf32> -> vector<104x256xf32>
    %c0_3 = arith.constant 0 : index
    %c0_4 = arith.constant 0 : index
    %3 = vector.load %arg4[%c0_3, %c0_4] : memref<1x256xf32, #tpu.memory_space<vmem>>, vector<1x256xf32>
    %4 = vector.broadcast %3 : vector<1x256xf32> to vector<104x256xf32>
    %5 = arith.addf %2, %4 : vector<104x256xf32>
    %cst_5 = arith.constant 3.000000e+01 : f32
    %6 = vector.broadcast %cst_5 : f32 to vector<104x256xf32>
    %7 = arith.mulf %5, %6 : vector<104x256xf32>
    %8 = math.sin %7 : vector<104x256xf32>
    %c0_6 = arith.constant 0 : index
    %c0_7 = arith.constant 0 : index
    %9 = vector.load %arg5[%c0_6, %c0_7] : memref<104x256xf32, #tpu.memory_space<vmem>>, vector<104x256xf32>
    tpu.vector_store %arg5[%c0_6, %c0_7], %8 {strides = array<i32>} : memref<104x256xf32, #tpu.memory_space<vmem>>, vector<104x256xf32>,
    return
  }
  func.func @transform_0(%arg0: i32, %arg1: i32) -> (i32, i32) {
    %c0_i32 = arith.constant 0 : i32
    %c0_i32_0 = arith.constant 0 : i32
    return %arg0, %c0_i32 : i32, i32
  }
  func.func @transform_1(%arg0: i32, %arg1: i32) -> (i32, i32) {
    %c0_i32 = arith.constant 0 : i32
    %c0_i32_0 = arith.constant 0 : i32
    return %c0_i32, %arg1 : i32, i32
  }
  func.func @transform_2(%arg0: i32, %arg1: i32) -> (i32, i32) {
    %c0_i32 = arith.constant 0 : i32
    %c0_i32_0 = arith.constant 0 : i32
    return %c0_i32, %arg1 : i32, i32
  }
  func.func @transform_3(%arg0: i32, %arg1: i32) -> (i32, i32) {
    %c0_i32 = arith.constant 0 : i32
    return %arg0, %arg1 : i32, i32
  }
}

</mosaic_0001>

<bundles_post_ra>
// kernel: tpu_custom_call.1
= control target key start
LH: loop header
LB: loop body
LE: loop exit
PB: predicated region body
PF: predicated region fallthrough
CT: control target
= control target key end

     0   :  { %8 = vsyncpa [#allocation3], 0  ;;  %s6354_s0 = inlined_call_operand.hbm [shape: f32[200,128], index: 0, kind: input, shape index: {}]   ;;  %s6355_s1 = inlined_call_operand.hbm [shape: f32[128,256], index: 1, kind: input, shape index: {}]   ;;  %s6356_s2 = inlined_call_operand.vmem [shape: f32[1,256], index: 2, kind: input, shape index: {}]   ;;  %s6357_s3 = inlined_call_operand.hbm [shape: f32[200,256], index: 3, kind: output, shape index: {}]  }
   0x1   :  { %10 = vsyncpa [#allocation3 + $0x1], 0 }
   0x2   :  { %11 = vsyncpa [#allocation6], 0 }
   0x3   :  { %12 = vsyncpa [#allocation4], 0 }
   0x4   :  { %14 = vsyncpa [#allocation4 + $0x1], 0  ;;  %s4001_s12 = smov 0   ;;  %s4003_s13 = smov 0  }
   0x5   :  { %s4005_s14 = smov 0   ;;  %s4007_s15 = smov 0  }
   0x6   :  { %s4009_s16 = smov 0   ;;  %s4011_s17 = smov 0  }
   0x7 LB: > { %s3352_s18 = sadd.s32 4294967295, %s3963_s17   ;;  %s3353_s19 = sadd.s32 4294967294, %s3963_s17   ;;  %s3963_s17 = sphi %s4011_s17, %s20_s17   ;;  %s3959_s16 = sphi %s4009_s16, %s6427_s16   ;;  %s3955_s15 = sphi %s4007_s15, %s6426_s15   ;;  %s3951_s14 = sphi %s4005_s14, %s6425_s14   ;;  %s3947_s13 = sphi %s4003_s13, %s6424_s13   ;;  %s3943_s12 = sphi %s4001_s12, %s6423_s12  }
   0x8   : > { %s32_s20 = sadd.s32 1, %s3959_s16  ;;  %s39_s21 = sadd.s32 1, %s3951_s14 }
   0x9   : > { %p34_p0 = scmp.ge.s32.totalorder %s32_s20, 2  ;;  %p46_p1 = scmp.ne.s32.totalorder %s3951_s14, %s3947_s13 }
   0xa   : > { %p47_p2 = scmp.eq.s32.totalorder %s3963_s17, 0  ;;  %p52_p3 = scmp.ne.s32.totalorder %s3947_s13, %s3943_s12 }
   0xb   : > { %s6429_s20 = smov (%p34_p0, %s32_s20), 0  ;;  %p4046_p5 = scmp.eq.s32.totalorder %s3352_s18, 0 }
   0xc   : > { %p4042_p4 = por %p47_p2, %p46_p1  ;;  %s36_s24 = ssub.s32 %s3959_s16, %s6429_s20 }
   0xd   : > { %s6363_s23 = scalar_select %p4046_p5, 1, 0 }
   0xe   : > { %s6362_s22 = scalar_select %p4042_p4, 1, 0 }
   0xf   : > { %p130_p6 = scmp.eq.s32.totalorder %s3352_s18, 1  ;;  %p37_p7 = scmp.eq.s32.totalorder %s36_s24, 0 }
  0x10   : > { %p4054_p8 = por %p4046_p5, %p52_p3  ;;  %p136_p10 = scmp.eq.s32.totalorder %s3353_s19, 1 }
  0x11   : > { %p4058_p9 = por %p130_p6, %p46_p1  ;;  %p3354_p12 = scmp.ge.s32.totalorder %s3963_s17, 1 }
  0x12   : > { %s6364_s25 = scalar_select %p4054_p8, 1, 0 }
  0x13   : > { %s6365_s26 = scalar_select %p4058_p9, 1, 0 }
  0x14   : > { %s4063_s27 = scalar_select %p37_p7, %s3951_s14, %s39_s21  }
  0x15   : > { %p4065_p11 = por %p136_p10, %p52_p3  ;;  %p143_p13 = scmp.lt.s32.totalorder %s3963_s17, 3 }
  0x16   : > { %s3965_s30 = smov [#allocation5]   ;;  %s3821_s8 = scalar_lea.hbm %s6355_s1, 4096 }
  0x17   : > { %s6366_s28 = scalar_select %p4065_p11, 1, 0 }
  0x18   : > { %p4071_p0 = pnand %p3354_p12, %p143_p13  ;;  %s158_s4 = sshll.u32 %s3965_s30, 4  ;;  %s159_s4 = int_to_ptr.vmem [resolvable:$true] %s158_s4 }
  0x19   : > { %p3822_p3 = scmp.ne.s32.totalorder %s6355_s1, %s3821_s8  ;;  %p3828_p12 = scmp.lt.u32.totalorder %s3821_s8, %s6355_s1 }
  0x1a   : > { %s6367_s29 = scalar_select %p4071_p0, 1, 0 }
  0x1b   : > { %p3644_p1 = pneg %p4071_p0 }
  0x1d   : > { %p4079_p2 = pnand %p3644_p1, %p4046_p5 }
  0x1f   : > { %p3823_p6 = pneg %p4079_p2 }
  0x21   : > { %p3824_p7 = pnand %p3823_p6, %p3822_p3 }
  0x23   : > { %p3825_p10 = pneg %p3824_p7 }
  0x25   : > { %p3830_p13 = pnand %p3828_p12, %p3825_p10 }
  0x27   : > { %3833 = shalt.err (!%p3830_p13)
}
  0x28   : > { %s3834_s19 = scalar_lea.vmem %s159_s4, 4096  ;;  %p3842_p5 = scmp.lt.s32.totalorder %s159_s4, %s159_s4 }
  0x29   : > { %p3835_p1 = scmp.ne.s32.totalorder %s159_s4, %s3834_s19  ;;  %p3843_p8 = scmp.lt.s32.totalorder %s3834_s19, %s3834_s19 }
  0x2b   : > { %p3837_p11 = pnand %p3835_p1, %p3823_p6  ;;  %p3844_p0 = por %p3843_p8, %p3842_p5 }
  0x2d   : > { %p3838_p9 = pneg %p3837_p11 }
  0x2f   : > { %p3845_p4 = pnand %p3844_p0, %p3838_p9 }
  0x31   : > { %3848 = shalt.err (!%p3845_p4)
}
  0x32   : > { %s3966_s21 = smov 256   ;;  %s3967_s24 = smov 16  }
  0x33   : > { %3647 = dma.hbm_to_vmem [thread:$0]  (!%p4079_p2), %s6355_s1, 4096, %s159_s4, [#allocation6], %s3966_s21, %s3966_s21, %s3967_s24  }
  0x34   : > { %p3357_p3 = scmp.ge.s32.totalorder %s3963_s17, 2 }
  0x35   : > { %p6369_p11 = scmp.ne.s32.totalorder (!%p3357_p3), %s6362_s22, 0 }
  0x36   : > { %176 = sbr.rel (%p3357_p3) target bundleno = 96 (0x60), region = 24 }
  0x3d   : > { %179 = sbr.rel (!%p6369_p11) target bundleno = 96 (0x60), region = 28  ;;  %s180_s7 = sand.u32 (%p6369_p11), 1, %s3951_s14  }
  0x3e   : > { %s185_s8 = smul.u32 (%p6369_p11), 13, %s3959_s16  ;;  %s4109_s11 = scalar_lea.sflag (%p6369_p11), [#allocation3], %s180_s7 }
  0x3f   : > { %s3531_s9 = smul.u32 (%p6369_p11), 104, %s180_s7 }
  0x40   : > { %s186_s10 = ssub.s32 (%p6369_p11), 25, %s185_s8 }
  0x41   : > { %p187_p4 = scmp.lt.s32.totalorder (%p6369_p11), %s186_s10, 13  ;;  %s184_s18 = scalar_lea.vmem (%p6369_p11), [#allocation2], %s3531_s9 }
  0x44   : > { %s6431_s10 = smov (!%p187_p4, %s186_s10), 13 }
  0x45   : > { %s4106_s5 = sshll.u32 %s6431_s10, 7 }
  0x46   : > { %s191_s4 = ssub.s32 1664, %s4106_s5 }
  0x47   : > { %192 = vsyncadd %s4109_s11, %s191_s4  ;;  %p3359_p5 = scmp.ne.s32.totalorder %s4106_s5, 0  ;;  %s3478_s22 = smul.u32 1664, %s3959_s16 }
  0x48   : > { %s197_s19 = sshll.u32 %s184_s18, 4  ;;  %s3853_s9 = scalar_lea.hbm %s6354_s0, 3200  ;;  %s4119_s19 = int_to_ptr.vmem [resolvable:$true] %s197_s19 }
  0x49   : > { %s4117_s30 = scalar_lea.hbm %s6354_s0, %s3478_s22 }
  0x4a   : > { %s3849_s6 = scalar_lea.hbm %s4117_s30, %s4106_s5  ;;  %p3854_p2 = scmp.lt.u32.totalorder %s4117_s30, %s6354_s0 }
  0x4b   : > { %p3850_p8 = scmp.ne.s32.totalorder %s4117_s30, %s3849_s6  ;;  %p3855_p6 = scmp.lt.u32.totalorder %s3853_s9, %s3849_s6 }
  0x4c   : > { %p3857_p10 = scmp.lt.u32.totalorder %s3849_s6, %s4117_s30 }
  0x4d   : > { %p3851_p9 = pnand %p3850_p8, %p3359_p5  ;;  %p3856_p7 = por %p3855_p6, %p3854_p2 }
  0x4f   : > { %p3852_p0 = pneg %p3851_p9  ;;  %p3858_p12 = por %p3857_p10, %p3856_p7 }
  0x51   : > { %p3859_p13 = pnand %p3858_p12, %p3852_p0 }
  0x53   : > { %3862 = shalt.err (!%p3859_p13)
}
  0x54   : > { %s3863_s18 = scalar_lea.vmem %s4119_s19, %s4106_s5  ;;  %s3968_s22 = smov [#allocation2]  }
  0x55   : > { %p3864_p1 = scmp.ne.s32.totalorder %s4119_s19, %s3863_s18  ;;  %s3867_s21 = sshll.u32 %s3968_s22, 4  ;;  %s3868_s21 = int_to_ptr.vmem [resolvable:$false] %s3867_s21 }
  0x56   : > { %s3869_s24 = scalar_lea.vmem %s3868_s21, 3328  ;;  %p3870_p8 = scmp.lt.s32.totalorder %s4119_s19, %s3868_s21 }
  0x57   : > { %p3865_p11 = pnand %p3864_p1, %p3359_p5  ;;  %p3871_p9 = scmp.lt.s32.totalorder %s3869_s24, %s3863_s18 }
  0x59   : > { %p3866_p4 = pneg %p3865_p11  ;;  %p3872_p2 = por %p3871_p9, %p3870_p8 }
  0x5b   : > { %p3873_p6 = pnand %p3872_p2, %p3866_p4 }
  0x5d   : > { %3876 = shalt.err (!%p3873_p6)
}
  0x5e   : > { %s3969_s6 = smov 128   ;;  %s3970_s7 = smov 8  }
  0x5f   : > { %203 = dma.hbm_to_vmem [thread:$0]  (%p3359_p5), %s4117_s30, %s4106_s5, %s4119_s19, %s4109_s11, %s3969_s6, %s3969_s6, %s3970_s7  }
  0x60 PF: > { %p6370_p0 = scmp.ne.s32.totalorder %s6367_s29, 0 }
  0x61   : > { %s4149_s8 = sand.u32 (!%p6370_p0), 1, %s3947_s13   ;;  %p6371_p7 = scmp.ne.s32.totalorder (!%p6370_p0), %s6364_s25, 0 }
  0x62   : > { %209 = sbr.rel (%p6370_p0) target bundleno = 1075 (0x433), region = 32  ;;  %s212_s10 = scalar_lea.sflag (!%p6370_p0), [#allocation3], %s4149_s8 }
  0x63   : > { %s3532_s9 = smul.u32 (!%p6370_p0), 104, %s4149_s8 }
  0x65   : > { %s4153_s4 = scalar_lea.vmem (!%p6370_p0), [#allocation2], %s3532_s9 }
  0x69   : > { %3930 = dma.done.wait (%p6371_p7), %s212_s10, 1664  }
  0x6a   : > { %3932 = vsyncadd (%p6371_p7), %s212_s10, 4294965632  ;;  %p6372_p5 = scmp.ne.s32.totalorder %s6363_s23, 0 }
  0x6c   : > { %3934 = dma.done.wait (%p6372_p5), [#allocation6], 4096  }
  0x6d   : > { %3936 = vsyncadd (%p6372_p5), [#allocation6], 4294963200  ;;  %v3971_v0 = vmov 0.0   ;;  %v278_v1 = vld [vmem:[#allocation5 + $0x8] sm:$0xff]  ;;  %v280_v2 = vld [vmem:[#allocation5 + $0x18] sm:$0xff]  ;;  %v311_v62 = vlaneseq  ;;  %s3533_s29 = smul.u32 208, %s4149_s8 }
  0x6e   : > { %385 = vmatprep.mubr.f32.mxu0 %v3971_v0  ;;  %427 = vmatprep.mubr.f32.mxu1 %v3971_v0  ;;  %v277_v3 = vld [vmem:[#allocation5] sm:$0xff]  ;;  %v3483_v4 = vpack.c.bf16 %v280_v2, %v278_v1  ;;  %v279_v5 = vld [vmem:[#allocation5 + $0x10] sm:$0xff]  ;;  %v282_v6 = vld [vmem:[#allocation5 + $0x28] sm:$0xff]  ;;  %s3221_s11 = scalar_lea.sflag [#allocation4], %s4149_s8  ;;  %p6421_p10 = scmp.ne.s32.totalorder %s6365_s26, 0 }
  0x6f   : > { %v284_v7 = vld [vmem:[#allocation5 + $0x38] sm:$0xff]  ;;  %v3485_v8 = vpack.c.bf16 %v279_v5, %v277_v3  ;;  %v281_v10 = vld [vmem:[#allocation5 + $0x20] sm:$0xff]  ;;  %v283_v11 = vld [vmem:[#allocation5 + $0x30] sm:$0xff]  ;;  %v312_v63 = vshrl.u32 %v311_v62, 7  ;;  %s4521_s5 = scalar_lea.vmem [#allocation7], %s3533_s29  ;;  %s3228_s19 = smul.u32 (%p6421_p10), 13, %s3955_s15 }
  0x70   : > { %v3487_v9 = vpack.c.bf16 %v284_v7, %v282_v6  ;;  %v286_v12 = vld [vmem:[#allocation5 + $0x48] sm:$0xff]  ;;  %3484 = vmatprep.subr.bf16.mxu0 %v3483_v4  ;;  %3515 = vmatprep.subr.bf16.mxu1 %v3483_v4  ;;  %v288_v13 = vld [vmem:[#allocation5 + $0x58] sm:$0xff]  ;;  %v3489_v14 = vpack.c.bf16 %v283_v11, %v281_v10  ;;  %v285_v16 = vld [vmem:[#allocation5 + $0x40] sm:$0xff] }
  0x71   : > { %3486 = vmatpush1.bf16.msra.mxu0 %v3485_v8  ;;  %3523 = vmatpush1.bf16.msra.mxu1 %v3485_v8  ;;  %v3491_v15 = vpack.c.bf16 %v288_v13, %v286_v12  ;;  %v287_v17 = vld [vmem:[#allocation5 + $0x50] sm:$0xff]  ;;  %v290_v18 = vld [vmem:[#allocation5 + $0x68] sm:$0xff]  ;;  %v292_v19 = vld [vmem:[#allocation5 + $0x78] sm:$0xff]  ;;  %v313_v1 = vsub.s32 0, %v312_v63  ;;  %v317_v3 = vsub.s32 1, %v312_v63  ;;  %s3230_s30 = ssub.s32 (%p6421_p10), 25, %s3228_s19 }
  0x72   : > { %3488 = vmatprep.subr.bf16.mxu0 %v3487_v9  ;;  %3516 = vmatprep.subr.bf16.mxu1 %v3487_v9  ;;  %v3493_v20 = vpack.c.bf16 %v287_v17, %v285_v16  ;;  %v3495_v21 = vpack.c.bf16 %v292_v19, %v290_v18  ;;  %v289_v22 = vld [vmem:[#allocation5 + $0x60] sm:$0xff]  ;;  %v291_v23 = vld [vmem:[#allocation5 + $0x70] sm:$0xff]  ;;  %v294_v24 = vld [vmem:[#allocation5 + $0x88] sm:$0xff]  ;;  %p3231_p12 = scmp.lt.s32.totalorder (%p6421_p10), %s3230_s30, 13 }
  0x73   : > { %v296_v25 = vld [vmem:[#allocation5 + $0x98] sm:$0xff]  ;;  %v3497_v26 = vpack.c.bf16 %v291_v23, %v289_v22  ;;  %v293_v28 = vld [vmem:[#allocation5 + $0x80] sm:$0xff]  ;;  %v295_v29 = vld [vmem:[#allocation5 + $0x90] sm:$0xff] }
  0x74   : > { %v3499_v27 = vpack.c.bf16 %v296_v25, %v294_v24  ;;  %v298_v30 = vld [vmem:[#allocation5 + $0xa8] sm:$0xff]  ;;  %v300_v31 = vld [vmem:[#allocation5 + $0xb8] sm:$0xff]  ;;  %v3501_v32 = vpack.c.bf16 %v295_v29, %v293_v28  ;;  %v297_v34 = vld [vmem:[#allocation5 + $0xa0] sm:$0xff] }
  0x75   : > { %3490 = vmatpush1.bf16.msra.mxu0 %v3489_v14  ;;  %3524 = vmatpush1.bf16.msra.mxu1 %v3489_v14  ;;  %v3503_v33 = vpack.c.bf16 %v300_v31, %v298_v30  ;;  %v299_v35 = vld [vmem:[#allocation5 + $0xb0] sm:$0xff]  ;;  %v302_v36 = vld [vmem:[#allocation5 + $0xc8] sm:$0xff]  ;;  %v304_v37 = vld [vmem:[#allocation5 + $0xd8] sm:$0xff] }
  0x76   : > { %3492 = vmatprep.subr.bf16.mxu0 %v3491_v15  ;;  %3517 = vmatprep.subr.bf16.mxu1 %v3491_v15  ;;  %v3505_v38 = vpack.c.bf16 %v299_v35, %v297_v34  ;;  %v3507_v39 = vpack.c.bf16 %v304_v37, %v302_v36  ;;  %v301_v40 = vld [vmem:[#allocation5 + $0xc0] sm:$0xff]  ;;  %v303_v41 = vld [vmem:[#allocation5 + $0xd0] sm:$0xff]  ;;  %v306_v42 = vld [vmem:[#allocation5 + $0xe8] sm:$0xff] }
  0x77   : > { %v308_v43 = vld [vmem:[#allocation5 + $0xf8] sm:$0xff]  ;;  %v3509_v44 = vpack.c.bf16 %v303_v41, %v301_v40  ;;  %v305_v46 = vld [vmem:[#allocation5 + $0xe0] sm:$0xff]  ;;  %v307_v47 = vld [vmem:[#allocation5 + $0xf0] sm:$0xff] }
  0x78   : > { %v3511_v45 = vpack.c.bf16 %v308_v43, %v306_v42  ;;  %v3513_v48 = vpack.c.bf16 %v307_v47, %v305_v46  ;;  %v264_v49 = vld [vmem:[%s4153_s4] sm:$0xff]  ;;  %v271_v50 = vld [vmem:[%s4153_s4 + $0x38] sm:$0xff]  ;;  %v265_v51 = vld [vmem:[%s4153_s4 + $0x8] sm:$0xff] }
  0x79   : > { %3494 = vmatpush1.bf16.msra.mxu0 %v3493_v20  ;;  %3525 = vmatpush1.bf16.msra.mxu1 %v3493_v20  ;;  %v272_v52 = vld [vmem:[%s4153_s4 + $0x40] sm:$0xff]  ;;  %v266_v53 = vld [vmem:[%s4153_s4 + $0x10] sm:$0xff]  ;;  %v273_v54 = vld [vmem:[%s4153_s4 + $0x48] sm:$0xff] }
  0x7a   : > { %3496 = vmatprep.subr.bf16.mxu0 %v3495_v21  ;;  %3518 = vmatprep.subr.bf16.mxu1 %v3495_v21  ;;  %v267_v55 = vld [vmem:[%s4153_s4 + $0x18] sm:$0xff]  ;;  %v274_v56 = vld [vmem:[%s4153_s4 + $0x50] sm:$0xff]  ;;  %v268_v57 = vld [vmem:[%s4153_s4 + $0x20] sm:$0xff] }
  0x7b   : > { %v275_v58 = vld [vmem:[%s4153_s4 + $0x58] sm:$0xff]  ;;  %v269_v59 = vld [vmem:[%s4153_s4 + $0x28] sm:$0xff]  ;;  %v276_v60 = vld [vmem:[%s4153_s4 + $0x60] sm:$0xff] }
  0x7c   : > { %v270_v61 = vld [vmem:[%s4153_s4 + $0x30] sm:$0xff]  ;;  %v309_v2 = vld [vmem:[%s6356_s2] sm:$0x3] }
  0x7d   : > { %3498 = vmatpush1.bf16.msra.mxu0 %v3497_v26  ;;  %3526 = vmatpush1.bf16.msra.mxu1 %v3497_v26  ;;  %v4192_v4 = vrot.slane %v309_v2, %v313_v1  ;;  %v4194_v5 = vrot.slane %v309_v2, %v317_v3  ;;  %v3977_v2 = vmov 1326507024  }
  0x7e   : > { %3500 = vmatprep.subr.bf16.mxu0 %v3499_v27  ;;  %3519 = vmatprep.subr.bf16.mxu1 %v3499_v27 }
  0x81   : > { %3502 = vmatpush1.bf16.msra.mxu0 %v3501_v32  ;;  %3527 = vmatpush1.bf16.msra.mxu1 %v3501_v32 }
  0x82   : > { %3504 = vmatprep.subr.bf16.mxu0 %v3503_v33  ;;  %3520 = vmatprep.subr.bf16.mxu1 %v3503_v33 }
  0x85   : > { %3506 = vmatpush1.bf16.msra.mxu0 %v3505_v38  ;;  %3528 = vmatpush1.bf16.msra.mxu1 %v3505_v38 }
  0x86   : > { %3508 = vmatprep.subr.bf16.mxu0 %v3507_v39  ;;  %3521 = vmatprep.subr.bf16.mxu1 %v3507_v39 }
  0x89   : > { %3510 = vmatpush1.bf16.msra.mxu0 %v3509_v44  ;;  %3529 = vmatpush1.bf16.msra.mxu1 %v3509_v44 }
  0x8a   : > { %3512 = vmatprep.subr.bf16.mxu0 %v3511_v45  ;;  %3522 = vmatprep.subr.bf16.mxu1 %v3511_v45 }
  0x8d   : > { %3514 = vmatpush1.bf16.msra.mxu0 %v3513_v48  ;;  %3530 = vmatpush1.bf16.msra.mxu1 %v3513_v48  ;;  %v3972_v48 = vmov 683565275  }
  0x90   : > { %386 = vmatmul.mubr.f32.vlgmr.msra.gmra.mrb[0].mxu0 %v264_v49  ;;  %428 = vmatmul.mubr.f32.vlgmr.msra.gmra.mrb[0].mxu1 %v271_v50 }
  0x91   : > { %391 = vmatprep.mubr.f32.mxu0 %v3971_v0  ;;  %433 = vmatprep.mubr.f32.mxu1 %v3971_v0 }
  0x94   : > { %392 = vmatmul.mubr.f32.gmra.mrb[2].mxu0 %v265_v51  ;;  %434 = vmatmul.mubr.f32.gmra.mrb[2].mxu1 %v272_v52  ;;  %v3973_v52 = vmov 2475754826  }
  0x95   : > { %397 = vmatprep.mubr.f32.mxu0 %v3971_v0  ;;  %439 = vmatprep.mubr.f32.mxu1 %v3971_v0 }
  0x98   : > { %398 = vmatmul.mubr.f32.gmra.mrb[4].mxu0 %v266_v53  ;;  %440 = vmatmul.mubr.f32.gmra.mrb[4].mxu1 %v273_v54  ;;  %v3974_v54 = vmov 2131351028  }
  0x99   : > { %403 = vmatprep.mubr.f32.mxu0 %v3971_v0  ;;  %445 = vmatprep.mubr.f32.mxu1 %v3971_v0 }
  0x9c   : > { %404 = vmatmul.mubr.f32.gmra.mrb[6].mxu0 %v267_v55  ;;  %446 = vmatmul.mubr.f32.gmra.mrb[6].mxu1 %v274_v56  ;;  %v3975_v56 = vmov 2102212464  }
  0x9d   : > { %409 = vmatprep.mubr.f32.mxu0 %v3971_v0  ;;  %451 = vmatprep.mubr.f32.mxu1 %v3971_v0 }
  0xa0   : > { %410 = vmatmul.mubr.f32.gmra.mrb[8].mxu0 %v268_v57  ;;  %452 = vmatmul.mubr.f32.gmra.mrb[8].mxu1 %v275_v58  ;;  %v3976_v58 = vmov 920167782  }
  0xa1   : > { %415 = vmatprep.mubr.f32.mxu0 %v3971_v0  ;;  %457 = vmatprep.mubr.f32.mxu1 %v3971_v0 }
  0xa4   : > { %416 = vmatmul.mubr.f32.gmra.mrb[10].mxu0 %v269_v59  ;;  %458 = vmatmul.mubr.f32.gmra.mrb[10].mxu1 %v276_v60 }
  0xa5   : > { %421 = vmatprep.mubr.f32.mxu0 %v3971_v0 }
  0xa8   : > { %422 = vmatmul.mubr.f32.gmra.mrb[12].mxu0 %v270_v61 }
 0x163   : > { %v387_v6 = vpop.f32.mrb[0].mxu0  ;;  %v429_v7 = vpop.f32.mrb[0].mxu1 }
 0x164   : > { %v388_v8 = vadd.f32 %v387_v6, %v4192_v4  ;;  %v430_v0 = vadd.f32 %v429_v7, %v4192_v4  ;;  %v389_v9 = vpop.f32.mrb[1].mxu0  ;;  %v431_v10 = vpop.f32.mrb[1].mxu1 }
 0x165   : > { %v390_v11 = vadd.f32 %v389_v9, %v4194_v5  ;;  %v432_v32 = vadd.f32 %v431_v10, %v4194_v5 }
 0x166   : > { %v4199_v12 = vmul.f32 30.0, %v388_v8  ;;  %v4201_v13 = vmul.f32 30.0, %v430_v0 }
 0x167   : > { %v4203_v14 = vmul.f32 30.0, %v390_v11  ;;  %v4205_v15 = vpop.f32.mrb[2].mxu0  ;;  %v4207_v16 = vpop.f32.mrb[2].mxu1  ;;  %v4224_v42 = vmul.f32 30.0, %v432_v32 }
 0x168   : > { %v490_v17 = vand.u32 2147483647, %v4199_v12  ;;  %v493_v18 = vand.u32 2139095040, %v4199_v12  ;;  %v4211_v19 = vpop.f32.mrb[3].mxu0  ;;  %v1946_v20 = vand.u32 2147483647, %v4201_v13 }
 0x169   : > { %v1949_v21 = vand.u32 2139095040, %v4201_v13  ;;  %v597_v26 = vand.u32 2139095040, %v4203_v14  ;;  %v594_v35 = vand.u32 2147483647, %v4203_v14  ;;  %v4222_v37 = vpop.f32.mrb[3].mxu1  ;;  %vm492_vm12 = vcmp.lt.s32.totalorder %v4199_v12, 0 }
 0x16a   : > { %v494_v22 = vshrl.u32 %v493_v18, 23  ;;  %v497_v23 = vand.u32 8388607, %v490_v17  ;;  %v1953_v25 = vand.u32 8388607, %v1946_v20 }
 0x16b   : > { %v1950_v24 = vshrl.u32 %v1949_v21, 23  ;;  %v598_v29 = vshrl.u32 %v597_v26, 23  ;;  %v4232_v45 = vand.u32 8388607, %v594_v35  ;;  %vm4310_vm13 = vcmp.le.f32.partialorder %v490_v17, 0.7853982 }
 0x16c   : > { %v3365_v27 = vadd.s32 4294967169, %v494_v22  ;;  %v498_v30 = vor.u32 8388608, %v497_v23  ;;  %v1954_v33 = vor.u32 8388608, %v1953_v25 }
 0x16d   : > { %v3421_v28 = vadd.s32 4294967169, %v1950_v24  ;;  %v3369_v36 = vadd.s32 4294967169, %v598_v29 }
 0x16e   : > { %v500_v31 = vadd.s32 1, %v3365_v27  ;;  %v4226_v43 = vshll.u32 %v498_v30, 8  ;;  %v4228_v44 = vshll.u32 %v1954_v33, 8 }
 0x16f   : > { %v1956_v34 = vadd.s32 1, %v3421_v28  ;;  %v4234_v46 = vadd.s32 1, %v3369_v36 }
 0x170   : > { %vm501_vm0 = vcmp.gt.s32.totalorder %v500_v31, 0 }
 0x171   : > { %v502_v38 = vsel %vm501_vm0, %v500_v31, 0  ;;  %vm1957_vm1 = vcmp.gt.s32.totalorder %v1956_v34, 0  ;;  %vm605_vm5 = vcmp.gt.s32.totalorder %v4234_v46, 0 }
 0x172   : > { %v503_v39 = vshrl.u32 %v502_v38, 5  ;;  %v504_v40 = vand.u32 31, %v502_v38  ;;  %v1958_v41 = vsel %vm1957_vm1, %v1956_v34, 0 }
 0x173   : > { %v4237_v50 = vshrl.u32 %v1958_v41, 5  ;;  %v1960_v51 = vand.u32 31, %v1958_v41 }
 0x174   : > { %v505_v47 = vsub.s32 32, %v504_v40  ;;  %v507_v49 = vshll.u32 %v3972_v48, %v504_v40  ;;  %v510_v53 = vshll.u32 %v3973_v52, %v504_v40  ;;  %v513_v55 = vshll.u32 %v3974_v54, %v504_v40 }
 0x175   : > { %v516_v57 = vshll.u32 %v3975_v56, %v504_v40  ;;  %v519_v59 = vshll.u32 %v3976_v58, %v504_v40  ;;  %vm522_vm2 = vcmp.lt.s32.totalorder %v503_v39, 1  ;;  %vm524_vm3 = vcmp.lt.s32.totalorder %v503_v39, 3 }
 0x176   : > { %v508_v60 = vshrl.u32 %v3973_v52, %v505_v47  ;;  %v511_v61 = vshrl.u32 %v3974_v54, %v505_v47  ;;  %v514_v62 = vshrl.u32 %v3975_v56, %v505_v47  ;;  %v506_v63 = vshrl.u32 %v3972_v48, %v505_v47 }
 0x177   : > { %v517_v1 = vshrl.u32 %v3976_v58, %v505_v47  ;;  %v520_v3 = vshrl.u32 %v3977_v2, %v505_v47  ;;  %v1961_v0 = vsub.s32 32, %v1960_v51  ;;  %vm525_vm4 = vcmp.lt.s32.totalorder %v503_v39, 4 }
 0x178   : > { %v509_v6 = vor.u32 %v508_v60, %v507_v49  ;;  %v512_v7 = vor.u32 %v511_v61, %v510_v53  ;;  %v515_v8 = vor.u32 %v514_v62, %v513_v55  ;;  %v1963_v11 = vshll.u32 %v3972_v48, %v1960_v51 }
 0x179   : > { %v518_v9 = vor.u32 %v517_v1, %v516_v57  ;;  %v521_v10 = vor.u32 %v520_v3, %v519_v59  ;;  %v1966_v27 = vshll.u32 %v3973_v52, %v1960_v51  ;;  %vm523_vm6 = vcmp.lt.s32.totalorder %v503_v39, 2 }
 0x17a   : > { %v526_v18 = vsel %vm522_vm2, %v506_v63, %v509_v6  ;;  %v527_v21 = vsel %vm525_vm4, %v515_v8, 2102212464  ;;  %v530_v22 = vsel %vm522_vm2, %v509_v6, %v512_v7  ;;  %v534_v23 = vsel %vm522_vm2, %v512_v7, %v515_v8 }
 0x17b   : > { %v528_v24 = vsel %vm524_vm3, %v512_v7, %v527_v21  ;;  %v531_v25 = vsel %vm525_vm4, %v518_v9, 920167782  ;;  %v535_v26 = vsel %vm525_vm4, %v521_v10, 1326507024  ;;  %v1964_v30 = vshrl.u32 %v3973_v52, %v1961_v0 }
 0x17c   : > { %v532_v28 = vsel %vm524_vm3, %v515_v8, %v531_v25  ;;  %v536_v29 = vsel %vm524_vm3, %v518_v9, %v535_v26  ;;  %v529_v31 = vsel %vm523_vm6, %v526_v18, %v528_v24  ;;  %v1967_v34 = vshrl.u32 %v3974_v54, %v1961_v0 }
 0x17d   : > { %v533_v32 = vsel %vm523_vm6, %v530_v22, %v532_v28  ;;  %v537_v33 = vsel %vm523_vm6, %v534_v23, %v536_v29  ;;  %v1965_v47 = vor.u32 %v1964_v30, %v1963_v11  ;;  %v1969_v39 = vshll.u32 %v3974_v54, %v1960_v51  ;;  %v4295_v29 = vpop.f32.mrb[4].mxu0 }
 0x17e   : > { %v4261_v36 = vmul.u32.u64.low %v4226_v43, %v537_v33  ;;  %v4262_v38 = vmul.u32.u64.high %v4226_v43, %v537_v33, %v4261_v36  ;;  %v4265_v40 = vmul.u32.u64.low %v4226_v43, %v533_v32  ;;  %v4266_v41 = vmul.u32.u64.high %v4226_v43, %v533_v32, %v4265_v40 }
 0x17f   : > { %v1968_v49 = vor.u32 %v1967_v34, %v1966_v27  ;;  %v1970_v53 = vshrl.u32 %v3975_v56, %v1961_v0  ;;  %v1972_v55 = vshll.u32 %v3975_v56, %v1960_v51  ;;  %v1973_v57 = vshrl.u32 %v3976_v58, %v1961_v0 }
 0x180   : > { %v1975_v59 = vshll.u32 %v3976_v58, %v1960_v51  ;;  %v1976_v60 = vshrl.u32 %v3977_v2, %v1961_v0  ;;  %v545_v61 = vmul.u32 %v4226_v43, %v529_v31  ;;  %v1962_v62 = vshrl.u32 %v3972_v48, %v1961_v0 }
 0x181   : > { %v1971_v63 = vor.u32 %v1970_v53, %v1969_v39  ;;  %vm1978_vm7 = vcmp.lt.s32.totalorder %v4237_v50, 1  ;;  %vm547_vm8 = vc.u32 %v4262_v38, %v4265_v40  ;;  %v548_v1 = vadd.s32 1, %v4266_v41 }
 0x182   : > { %v1974_v3 = vor.u32 %v1973_v57, %v1972_v55  ;;  %vm1979_vm9 = vcmp.lt.s32.totalorder %v4237_v50, 2  ;;  %v1977_v6 = vor.u32 %v1976_v60, %v1975_v59  ;;  %vm1980_vm10 = vcmp.lt.s32.totalorder %v4237_v50, 3 }
 0x183   : > { %vm1981_vm11 = vcmp.lt.s32.totalorder %v4237_v50, 4  ;;  %v1986_v51 = vsel %vm1978_vm7, %v1965_v47, %v1968_v49  ;;  %v549_v43 = vsel %vm547_vm8, %v548_v1, %v4266_v41  ;;  %v1990_v0 = vsel %vm1978_vm7, %v1968_v49, %v1971_v63 }
 0x184   : > { %v1983_v7 = vsel %vm1981_vm11, %v1971_v63, 2102212464  ;;  %v1987_v8 = vsel %vm1981_vm11, %v1974_v3, 920167782  ;;  %v550_v9 = vadd.s32 %v549_v43, %v545_v61  ;;  %v1982_v10 = vsel %vm1978_vm7, %v1962_v62, %v1965_v47 }
 0x185   : > { %v1988_v11 = vsel %vm1980_vm10, %v1971_v63, %v1987_v8  ;;  %v1991_v18 = vsel %vm1981_vm11, %v1977_v6, 1326507024  ;;  %v1984_v21 = vsel %vm1980_vm10, %v1968_v49, %v1983_v7  ;;  %v606_v24 = vsel %vm605_vm5, %v4234_v46, 0 }
 0x186   : > { %v1989_v22 = vsel %vm1979_vm9, %v1986_v51, %v1988_v11  ;;  %v1992_v23 = vsel %vm1980_vm10, %v1974_v3, %v1991_v18  ;;  %v551_v25 = vadd.s32 536870912, %v550_v9  ;;  %v2053_v32 = vand.u32 2139095040, %v4224_v42 }
 0x187   : > { %v1993_v26 = vsel %vm1979_vm9, %v1990_v0, %v1992_v23  ;;  %v4291_v27 = vmul.u32.u64.low %v4228_v44, %v1989_v22  ;;  %v4292_v28 = vmul.u32.u64.high %v4228_v44, %v1989_v22, %v4291_v27  ;;  %v1985_v46 = vsel %vm1979_vm9, %v1982_v10, %v1984_v21 }
 0x188   : > { %v4298_v30 = vmul.u32.u64.low %v4228_v44, %v1993_v26  ;;  %v4299_v31 = vmul.u32.u64.high %v4228_v44, %v1993_v26, %v4298_v30  ;;  %v552_v33 = vshrl.u32 %v551_v25, 30  ;;  %v608_v34 = vand.u32 31, %v606_v24 }
 0x189   : > { %v2050_v36 = vand.u32 2147483647, %v4224_v42  ;;  %v602_v41 = vor.u32 8388608, %v4232_v45  ;;  %v2004_v49 = vadd.s32 1, %v4292_v28  ;;  %v2001_v50 = vmul.u32 %v4228_v44, %v1985_v46 }
 0x18a   : > { %v553_v47 = vshll.u32 %v552_v33, 30  ;;  %v609_v39 = vsub.s32 32, %v608_v34  ;;  %vm2003_vm14 = vc.u32 %v4299_v31, %v4291_v27  ;;  %v2054_v55 = vshrl.u32 %v2053_v32, 23 }
 0x18b   : > { %v576_v45 = vsub.s32 4, %v552_v33  ;;  %v2005_v59 = vsel %vm2003_vm14, %v2004_v49, %v4292_v28  ;;  %v4322_v60 = vand.u32 8388607, %v2050_v36  ;;  %v546_v17 = vadd.s32 %v4265_v40, %v4262_v38 }
 0x18c   : > { %v4317_v57 = vsub.s32 %v550_v9, %v553_v47  ;;  %v2006_v61 = vadd.s32 %v2005_v59, %v2001_v50  ;;  %v612_v62 = vshrl.u32 %v3973_v52, %v609_v39  ;;  %v4326_v63 = vshll.u32 %v602_v41, 8 }
 0x18d   : > { %v4329_v1 = vshrl.u32 %v606_v24, 5  ;;  %v615_v3 = vshrl.u32 %v3974_v54, %v609_v39  ;;  %v618_v6 = vshrl.u32 %v3975_v56, %v609_v39  ;;  %v611_v43 = vshll.u32 %v3972_v48, %v608_v34 }
 0x18e   : > { %v556_v44 = vsub.s32 0, %v4317_v57  ;;  %v2007_v51 = vadd.s32 536870912, %v2006_v61  ;;  %v614_v7 = vshll.u32 %v3973_v52, %v608_v34  ;;  %v3425_v8 = vadd.s32 4294967169, %v2054_v55 }
 0x18f   : > { %v577_v40 = vsel %vm492_vm12, %v576_v45, %v552_v33  ;;  %v617_v0 = vshll.u32 %v3974_v54, %v608_v34  ;;  %v621_v9 = vshrl.u32 %v3976_v58, %v609_v39  ;;  %v613_v11 = vor.u32 %v612_v62, %v611_v43 }
 0x190   : > { %v3366_v38 = vmin.u32 %v556_v44, %v4317_v57  ;;  %v2008_v10 = vshrl.u32 %v2007_v51, 30  ;;  %v620_v18 = vshll.u32 %v3975_v56, %v608_v34  ;;  %v624_v21 = vshrl.u32 %v3977_v2, %v609_v39 }
 0x191   : > { %v616_v23 = vor.u32 %v615_v3, %v614_v7  ;;  %v619_v24 = vor.u32 %v618_v6, %v617_v0  ;;  %v623_v25 = vshll.u32 %v3976_v58, %v608_v34  ;;  %vm626_vm15 = vcmp.lt.s32.totalorder %v4329_v1, 1 }
 0x192   : > { %v558_v22 = vclz %v3366_v38  ;;  %v2009_v26 = vshll.u32 %v2008_v10, 30  ;;  %v622_v28 = vor.u32 %v621_v9, %v620_v18  ;;  %v2058_v30 = vor.u32 8388608, %v4322_v60 }
 0x193   : > { %v579_v33 = vsel %vm4310_vm13, 0, %v577_v40  ;;  %v625_v46 = vor.u32 %v624_v21, %v623_v25  ;;  %vm629_vm0 = vcmp.lt.s32.totalorder %v4329_v1, 4  ;;  %vm627_vm1 = vcmp.lt.s32.totalorder %v4329_v1, 2 }
 0x194   : > { %v3367_v32 = vadd.s32 4294967294, %v558_v22  ;;  %v4348_v41 = vsub.s32 %v2006_v61, %v2009_v26  ;;  %vm628_vm2 = vcmp.lt.s32.totalorder %v4329_v1, 3  ;;  %v635_v34 = vsel %vm629_vm0, %v622_v28, 920167782 }
 0x195   : > { %vm1948_vm4 = vcmp.lt.s32.totalorder %v4201_v13, 0  ;;  %v610_v47 = vshrl.u32 %v3972_v48, %v609_v39  ;;  %v634_v49 = vsel %vm626_vm15, %v613_v11, %v616_v23  ;;  %v636_v50 = vsel %vm628_vm2, %v619_v24, %v635_v34  ;;  %v4392_v34 = vpop.f32.mrb[4].mxu1 }
 0x196   : > { %vm3368_vm3 = vcmp.lt.s32.totalorder %v3367_v32, 0  ;;  %v583_v45 = vadd.s32 3, %v579_v33  ;;  %v2012_v59 = vsub.s32 0, %v4348_v41  ;;  %v638_v61 = vsel %vm626_vm15, %v616_v23, %v619_v24 }
 0x197   : > { %v561_v55 = vsel %vm3368_vm3, 0, %v3367_v32  ;;  %v631_v3 = vsel %vm629_vm0, %v619_v24, 2102212464  ;;  %v639_v39 = vsel %vm629_vm0, %v625_v46, 1326507024  ;;  %v637_v43 = vsel %vm627_vm1, %v634_v49, %v636_v50 }
 0x198   : > { %v562_v62 = vsub.s32 32, %v561_v55  ;;  %v566_v44 = vsub.s32 4294967266, %v561_v55  ;;  %v563_v6 = vshll.u32 %v4317_v57, %v561_v55  ;;  %v3422_v51 = vmin.u32 %v2012_v59, %v4348_v41 }
 0x199   : > { %v640_v7 = vsel %vm628_vm2, %v622_v28, %v639_v39  ;;  %v2060_v9 = vadd.s32 1, %v3425_v8  ;;  %v2032_v21 = vsub.s32 4, %v2008_v10  ;;  %v630_v22 = vsel %vm626_vm15, %v610_v47, %v613_v11 }
 0x19a   : > { %v564_v38 = vshrl.u32 %v546_v17, %v562_v62  ;;  %v567_v40 = vadd.s32 127, %v566_v44  ;;  %v641_v0 = vsel %vm627_vm1, %v638_v61, %v640_v7  ;;  %v2014_v18 = vclz %v3422_v51 }
 0x19b   : > { %v632_v57 = vsel %vm628_vm2, %v616_v23, %v631_v3  ;;  %v4380_v26 = vmul.u32.u64.low %v4326_v63, %v641_v0  ;;  %v4381_v32 = vmul.u32.u64.high %v4326_v63, %v641_v0, %v4380_v26  ;;  %vm2061_vm5 = vcmp.gt.s32.totalorder %v2060_v9, 0 }
 0x19c   : > { %v565_v24 = vor.u32 %v564_v38, %v563_v6  ;;  %v568_v25 = vshll.u32 %v567_v40, 23  ;;  %v3423_v17 = vadd.s32 4294967294, %v2014_v18  ;;  %v2002_v11 = vadd.s32 %v4291_v27, %v4299_v31 }
 0x19d   : > { %v4384_v28 = vmul.u32.u64.low %v4326_v63, %v637_v43  ;;  %v4385_v33 = vmul.u32.u64.high %v4326_v63, %v637_v43, %v4384_v28  ;;  %v633_v23 = vsel %vm627_vm1, %v630_v22, %v632_v57  ;;  %v2062_v46 = vsel %vm2061_vm5, %v2060_v9, 0 }
 0x19e   : > { %v569_v8 = vor.u32 4788187, %v568_v25  ;;  %v4394_v47 = vand.u32 3, %v583_v45  ;;  %vm3424_vm6 = vcmp.lt.s32.totalorder %v3423_v17, 0  ;;  %v4398_v49 = vsel %vm1948_vm4, %v2032_v21, %v2008_v10 }
 0x19f   : > { %v2064_v50 = vand.u32 31, %v2062_v46  ;;  %v572_v59 = vcvt.s32.f32 %v565_v24  ;;  %v2017_v61 = vsel %vm3424_vm6, 0, %v3423_v17  ;;  %vm651_vm7 = vc.u32 %v4381_v32, %v4384_v28 }
 0x1a0   : > { %v570_v55 = vand.u32 2147483647, %v569_v8  ;;  %v2018_v27 = vsub.s32 32, %v2017_v61  ;;  %v2022_v31 = vsub.s32 4294967266, %v2017_v61  ;;  %v649_v1 = vmul.u32 %v4326_v63, %v633_v23 }
 0x1a1   : > { %v652_v62 = vadd.s32 1, %v4385_v33  ;;  %v2019_v44 = vshll.u32 %v4348_v41, %v2017_v61  ;;  %v4405_v3 = vshrl.u32 %v2062_v46, 5  ;;  %v2065_v10 = vsub.s32 32, %v2064_v50 }
 0x1a2   : > { %v573_v45 = vmul.f32 %v572_v59, %v570_v55  ;;  %v2020_v39 = vshrl.u32 %v2002_v11, %v2018_v27  ;;  %v2023_v6 = vadd.s32 127, %v2022_v31  ;;  %v2067_v43 = vshll.u32 %v3972_v48, %v2064_v50 }
 0x1a3   : > { %v653_v51 = vsel %vm651_vm7, %v652_v62, %v4385_v33  ;;  %v2068_v40 = vshrl.u32 %v3973_v52, %v2065_v10  ;;  %v2070_v63 = vshll.u32 %v3973_v52, %v2064_v50  ;;  %v2071_v18 = vshrl.u32 %v3974_v54, %v2065_v10 }
 0x1a4   : > { %v574_v7 = vxor.u32 2147483648, %v573_v45  ;;  %v654_v38 = vadd.s32 %v653_v51, %v649_v1  ;;  %v2021_v0 = vor.u32 %v2020_v39, %v2019_v44  ;;  %v2024_v9 = vshll.u32 %v2023_v6, 23 }
 0x1a5   : > { %v2073_v41 = vshll.u32 %v3974_v54, %v2064_v50  ;;  %v2074_v57 = vshrl.u32 %v3975_v56, %v2065_v10  ;;  %v2076_v24 = vshll.u32 %v3975_v56, %v2064_v50  ;;  %v2069_v33 = vor.u32 %v2068_v40, %v2067_v43 }
 0x1a6   : > { %v575_v21 = vsel %vm492_vm12, %v574_v7, %v573_v45  ;;  %v655_v22 = vadd.s32 536870912, %v654_v38  ;;  %v2025_v26 = vor.u32 4788187, %v2024_v9  ;;  %v2028_v17 = vcvt.s32.f32 %v2021_v0 }
 0x1a7   : > { %v578_v25 = vsel %vm4310_vm13, %v4199_v12, %v575_v21  ;;  %v2072_v11 = vor.u32 %v2071_v18, %v2070_v63  ;;  %v2077_v23 = vshrl.u32 %v3976_v58, %v2065_v10  ;;  %v2079_v55 = vshll.u32 %v3976_v58, %v2064_v50 }
 0x1a8   : > { %3717 = vcosq.f32 %v578_v25  ;;  %v4420_v8 = vshrl.u32 %v655_v22, 30  ;;  %v2026_v46 = vand.u32 2147483647, %v2025_v26  ;;  %v2080_v59 = vshrl.u32 %v3977_v2, %v2065_v10 }
 0x1a9   : > { %3719 = vsinq.f32 %v578_v25  ;;  %v2078_v27 = vor.u32 %v2077_v23, %v2076_v24  ;;  %vm4428_vm8 = vcmp.le.f32.partialorder %v1946_v20, 0.7853982  ;;  %v2075_v1 = vor.u32 %v2074_v57, %v2073_v41 }
 0x1aa   : > { %v657_v61 = vshll.u32 %v4420_v8, 30  ;;  %v2029_v31 = vmul.f32 %v2028_v17, %v2026_v46  ;;  %vm589_vm9 = vcmp.eq.s32.totalorder %v4394_v47, 2  ;;  %v2035_v62 = vsel %vm4428_vm8, 0, %v4398_v49 }
 0x1ab   : > { %vm2082_vm10 = vcmp.lt.s32.totalorder %v4405_v3, 1  ;;  %v4441_v45 = vshll.u32 %v2058_v30, 8  ;;  %vm586_vm11 = vcmp.eq.s32.totalorder %v4394_v47, 0  ;;  %v2081_v44 = vor.u32 %v2080_v59, %v2079_v55 }
 0x1ac   : > { %v4436_v50 = vsub.s32 %v654_v38, %v657_v61  ;;  %v2030_v20 = vxor.u32 2147483648, %v2029_v31  ;;  %vm2085_vm12 = vcmp.lt.s32.totalorder %v4405_v3, 4  ;;  %v2090_v39 = vsel %vm2082_vm10, %v2069_v33, %v2072_v11 }
 0x1ad   : > { %vm585_vm13 = vcmp.lt.s32.totalorder %v4394_v47, 2  ;;  %v2066_v6 = vshrl.u32 %v3972_v48, %v2065_v10  ;;  %vm2084_vm14 = vcmp.lt.s32.totalorder %v4405_v3, 3  ;;  %v2091_v60 = vsel %vm2085_vm12, %v2078_v27, 920167782 }
 0x1ae   : > { %v660_v49 = vsub.s32 0, %v4436_v50  ;;  %vm582_vm15 = vweird.f32 %v4199_v12  ;;  %v2031_v30 = vsel %vm1948_vm4, %v2030_v20, %v2029_v31  ;;  %vm596_vm0 = vcmp.lt.s32.totalorder %v4203_v14, 0 }
 0x1af   : > { %vm2083_vm1 = vcmp.lt.s32.totalorder %v4405_v3, 2  ;;  %v2087_v51 = vsel %vm2085_vm12, %v2075_v1, 2102212464  ;;  %v2092_v10 = vsel %vm2084_vm14, %v2075_v1, %v2091_v60  ;;  %v2034_v43 = vsel %vm4428_vm8, %v4201_v13, %v2031_v30 }
 0x1b0   : > { %v3370_v7 = vmin.u32 %v660_v49, %v4436_v50  ;;  %v2093_v38 = vsel %vm2083_vm1, %v2090_v39, %v2092_v10  ;;  %v2094_v40 = vsel %vm2082_vm10, %v2072_v11, %v2075_v1  ;;  %3721 = vcosq.f32 %v2034_v43 }
 0x1b1   : > { %v2095_v63 = vsel %vm2085_vm12, %v2081_v44, 1326507024  ;;  %v4473_v0 = vmul.u32.u64.low %v4441_v45, %v2093_v38  ;;  %v4474_v9 = vmul.u32.u64.high %v4441_v45, %v2093_v38, %v4473_v0  ;;  %3723 = vsinq.f32 %v2034_v43 }
 0x1b2   : > { %v3718_v18 = vpop.eup %3717  ;;  %vm4480_vm2 = vcmp.le.f32.partialorder %v594_v35, 0.7853982  ;;  %v662_v21 = vclz %v3370_v7  ;;  %v2086_v22 = vsel %vm2082_vm10, %v2066_v6, %v2069_v33  ;;  %v2088_v57 = vsel %vm2084_vm14, %v2072_v11, %v2087_v51  ;;  %v4495_v33 = vpop.f32.mrb[5].mxu0 }
 0x1b3   : > { %v3720_v24 = vpop.eup %3719  ;;  %v590_v25 = vxor.u32 2147483648, %v3718_v18  ;;  %v2039_v26 = vadd.s32 3, %v2035_v62  ;;  %v680_v17 = vsub.s32 4, %v4420_v8  ;;  %v2096_v23 = vsel %vm2084_vm14, %v2078_v27, %v2095_v63 }
 0x1b4   : > { %v587_v46 = vxor.u32 2147483648, %v3720_v24  ;;  %v3371_v35 = vadd.s32 4294967294, %v662_v21  ;;  %v2097_v55 = vsel %vm2083_vm1, %v2094_v40, %v2096_v23  ;;  %v394_v59 = vadd.f32 %v4205_v15, %v4192_v4 }
 0x1b5   : > { %v591_v11 = vsel %vm589_vm9, %v590_v25, %v3720_v24  ;;  %v2089_v61 = vsel %vm2083_vm1, %v2086_v22, %v2088_v57  ;;  %v4502_v53 = vmul.u32.u64.low %v4441_v45, %v2097_v55  ;;  %v4503_v27 = vmul.u32.u64.high %v4441_v45, %v2097_v55, %v4502_v53 }
 0x1b6   : > { %v588_v31 = vsel %vm586_vm11, %v3718_v18, %v587_v46  ;;  %vm3372_vm3 = vcmp.lt.s32.totalorder %v3371_v35, 0  ;;  %v2108_v1 = vadd.s32 1, %v4474_v9  ;;  %v4508_v15 = vmul.f32 30.0, %v394_v59 }
 0x1b7   : > { %v592_v62 = vsel %vm585_vm13, %v588_v31, %v591_v11  ;;  %v2040_v20 = vand.u32 3, %v2039_v26  ;;  %v650_v3 = vadd.s32 %v4384_v28, %v4381_v32  ;;  %v665_v44 = vsel %vm3372_vm3, 0, %v3371_v35 }
 0x1b8   : > { %v593_v39 = vsel %vm582_vm15, nan, %v592_v62  ;;  %v666_v49 = vsub.s32 32, %v665_v44  ;;  %v670_v6 = vsub.s32 4294967266, %v665_v44  ;;  %v681_v60 = vsel %vm596_vm0, %v680_v17, %v4420_v8 }
 0x1b9   : > { %3194 = vst [vmem:[%s4521_s5] sm:$0xff] %v593_v39  ;;  %v667_v47 = vshll.u32 %v4436_v50, %v665_v44  ;;  %v2105_v30 = vmul.u32 %v4441_v45, %v2089_v61  ;;  %vm2107_vm4 = vc.u32 %v4503_v27, %v4473_v0  ;;  %v698_v12 = vand.u32 2147483647, %v4508_v15 }
 0x1ba   : > { %v668_v32 = vshrl.u32 %v650_v3, %v666_v49  ;;  %v671_v28 = vadd.s32 127, %v670_v6  ;;  %v2109_v51 = vsel %vm2107_vm4, %v2108_v1, %v4474_v9  ;;  %v701_v8 = vand.u32 2139095040, %v4508_v15  ;;  %v3722_v10 = vpop.eup %3721 }
 0x1bb   : > { %vm2038_vm5 = vweird.f32 %v4201_v13  ;;  %vm2042_vm6 = vcmp.eq.s32.totalorder %v2040_v20, 0  ;;  %v683_v50 = vsel %vm4480_vm2, 0, %v681_v60  ;;  %v2110_v43 = vadd.s32 %v2109_v51, %v2105_v30  ;;  %v3724_v45 = vpop.eup %3723 }
 0x1bc   : > { %v2046_v7 = vxor.u32 2147483648, %v3722_v10  ;;  %v669_v38 = vor.u32 %v668_v32, %v667_v47  ;;  %v672_v40 = vshll.u32 %v671_v28, 23  ;;  %v702_v63 = vshrl.u32 %v701_v8, 23 }
 0x1bd   : > { %v2043_v18 = vxor.u32 2147483648, %v3724_v45  ;;  %vm2045_vm7 = vcmp.eq.s32.totalorder %v2040_v20, 2  ;;  %v2111_v21 = vadd.s32 536870912, %v2110_v43  ;;  %v436_v9 = vadd.f32 %v4207_v16, %v4192_v4 }
 0x1be   : > { %v2047_v22 = vsel %vm2045_vm7, %v2046_v7, %v3724_v45  ;;  %v673_v57 = vor.u32 4788187, %v672_v40  ;;  %v3373_v24 = vadd.s32 4294967169, %v702_v63  ;;  %v705_v25 = vand.u32 8388607, %v698_v12 }
 0x1bf   : > { %vm2041_vm8 = vcmp.lt.s32.totalorder %v2040_v20, 2  ;;  %v2044_v26 = vsel %vm2042_vm6, %v3722_v10, %v2043_v18  ;;  %v687_v17 = vadd.s32 3, %v683_v50  ;;  %v2112_v23 = vshrl.u32 %v2111_v21, 30 }
 0x1c0   : > { %v2048_v46 = vsel %vm2041_vm8, %v2044_v26, %v2047_v22  ;;  %v674_v35 = vand.u32 2147483647, %v673_v57  ;;  %v676_v55 = vcvt.s32.f32 %v669_v38  ;;  %v708_v59 = vadd.s32 1, %v3373_v24 }
 0x1c1   : > { %v2049_v11 = vsel %vm2038_vm5, nan, %v2048_v46  ;;  %v2113_v16 = vshll.u32 %v2112_v23, 30  ;;  %v2136_v61 = vsub.s32 4, %v2112_v23  ;;  %v4541_v53 = vmul.f32 30.0, %v436_v9 }
 0x1c2   : > { %3208 = vst [vmem:[%s4521_s5 + $0x70] sm:$0xff] %v2049_v11  ;;  %v677_v31 = vmul.f32 %v676_v55, %v674_v35  ;;  %vm2052_vm9 = vcmp.lt.s32.totalorder %v4224_v42, 0  ;;  %v706_v1 = vor.u32 8388608, %v705_v25  ;;  %vm709_vm10 = vcmp.gt.s32.totalorder %v708_v59, 0 }
 0x1c3   : > { %v4545_v62 = vsub.s32 %v2110_v43, %v2113_v16  ;;  %v2137_v20 = vsel %vm2052_vm9, %v2136_v61, %v2112_v23  ;;  %v710_v3 = vsel %vm709_vm10, %v708_v59, 0  ;;  %v2154_v44 = vand.u32 2147483647, %v4541_v53 }
 0x1c4   : > { %v678_v13 = vxor.u32 2147483648, %v677_v31  ;;  %vm4552_vm11 = vcmp.le.f32.partialorder %v2050_v36, 0.7853982  ;;  %v712_v49 = vand.u32 31, %v710_v3  ;;  %v4556_v6 = vand.u32 3, %v687_v17 }
 0x1c5   : > { %v2116_v60 = vsub.s32 0, %v4545_v62  ;;  %v2139_v47 = vsel %vm4552_vm11, 0, %v2137_v20  ;;  %v2157_v30 = vand.u32 2139095040, %v4541_v53  ;;  %v2106_v28 = vadd.s32 %v4473_v0, %v4503_v27 }
 0x1c6   : > { %v679_v32 = vsel %vm596_vm0, %v678_v13, %v677_v31  ;;  %v713_v36 = vsub.s32 32, %v712_v49  ;;  %v4566_v51 = vshll.u32 %v706_v1, 8  ;;  %v4572_v50 = vshrl.u32 %v710_v3, 5 }
 0x1c7   : > { %v682_v8 = vsel %vm4480_vm2, %v4203_v14, %v679_v32  ;;  %v3426_v10 = vmin.u32 %v2116_v60, %v4545_v62  ;;  %v4576_v43 = vand.u32 8388607, %v2154_v44  ;;  %v4578_v45 = vadd.s32 3, %v2139_v47 }
 0x1c8   : > { %3725 = vcosq.f32 %v682_v8  ;;  %v716_v0 = vshrl.u32 %v3973_v52, %v713_v36  ;;  %v719_v27 = vshrl.u32 %v3974_v54, %v713_v36  ;;  %v715_v41 = vshll.u32 %v3972_v48, %v712_v49 }
 0x1c9   : > { %3727 = vsinq.f32 %v682_v8  ;;  %v2118_v7 = vclz %v3426_v10  ;;  %v2158_v38 = vshrl.u32 %v2157_v30, 23  ;;  %v714_v40 = vshrl.u32 %v3972_v48, %v713_v36 }
 0x1ca   : > { %v718_v63 = vshll.u32 %v3973_v52, %v712_v49  ;;  %v721_v18 = vshll.u32 %v3974_v54, %v712_v49  ;;  %v722_v21 = vshrl.u32 %v3975_v56, %v713_v36  ;;  %v717_v22 = vor.u32 %v716_v0, %v715_v41  ;;  %v4610_v41 = vpop.f32.mrb[5].mxu1 }
 0x1cb   : > { %v3427_v9 = vadd.s32 4294967294, %v2118_v7  ;;  %v724_v57 = vshll.u32 %v3975_v56, %v712_v49  ;;  %v725_v24 = vshrl.u32 %v3976_v58, %v713_v36  ;;  %vm693_vm12 = vcmp.eq.s32.totalorder %v4556_v6, 2 }
 0x1cc   : > { %v720_v25 = vor.u32 %v719_v27, %v718_v63  ;;  %v723_v26 = vor.u32 %v722_v21, %v721_v18  ;;  %v727_v17 = vshll.u32 %v3976_v58, %v712_v49  ;;  %v728_v23 = vshrl.u32 %v3977_v2, %v713_v36 }
 0x1cd   : > { %vm690_vm13 = vcmp.eq.s32.totalorder %v4556_v6, 0  ;;  %vm3428_vm14 = vcmp.lt.s32.totalorder %v3427_v9, 0  ;;  %v726_v46 = vor.u32 %v725_v24, %v724_v57  ;;  %vm730_vm15 = vcmp.lt.s32.totalorder %v4572_v50, 1 }
 0x1ce   : > { %vm731_vm0 = vcmp.lt.s32.totalorder %v4572_v50, 2  ;;  %vm689_vm1 = vcmp.lt.s32.totalorder %v4556_v6, 2  ;;  %v2121_v35 = vsel %vm3428_vm14, 0, %v3427_v9  ;;  %v729_v55 = vor.u32 %v728_v23, %v727_v17 }
 0x1cf   : > { %vm732_vm2 = vcmp.lt.s32.totalorder %v4572_v50, 3  ;;  %vm733_vm3 = vcmp.lt.s32.totalorder %v4572_v50, 4  ;;  %vm686_vm4 = vweird.f32 %v4203_v14  ;;  %v2122_v59 = vsub.s32 32, %v2121_v35 }
 0x1d0   : > { %v2126_v11 = vsub.s32 4294967266, %v2121_v35  ;;  %v734_v16 = vsel %vm730_vm15, %v714_v40, %v717_v22  ;;  %v735_v61 = vsel %vm733_vm3, %v723_v26, 2102212464  ;;  %v2123_v31 = vshll.u32 %v4545_v62, %v2121_v35 }
 0x1d1   : > { %v738_v1 = vsel %vm730_vm15, %v717_v22, %v720_v25  ;;  %v739_v20 = vsel %vm733_vm3, %v726_v46, 920167782  ;;  %v742_v3 = vsel %vm730_vm15, %v720_v25, %v723_v26  ;;  %v2124_v13 = vshrl.u32 %v2106_v28, %v2122_v59 }
 0x1d2   : > { %v2127_v49 = vadd.s32 127, %v2126_v11  ;;  %v740_v60 = vsel %vm732_vm2, %v723_v26, %v739_v20  ;;  %v743_v47 = vsel %vm733_vm3, %v729_v55, 1326507024  ;;  %v3726_v30 = vpop.eup %3725  ;;  %v736_v32 = vsel %vm732_vm2, %v720_v25, %v735_v61 }
 0x1d3   : > { %v741_v36 = vsel %vm731_vm0, %v738_v1, %v740_v60  ;;  %v744_v8 = vsel %vm732_vm2, %v726_v46, %v743_v47  ;;  %v3429_v62 = vadd.s32 4294967169, %v2158_v38  ;;  %v3728_v10 = vpop.eup %3727  ;;  %v694_v0 = vxor.u32 2147483648, %v3726_v30 }
 0x1d4   : > { %v2125_v27 = vor.u32 %v2124_v13, %v2123_v31  ;;  %v2128_v28 = vshll.u32 %v2127_v49, 23  ;;  %v745_v7 = vsel %vm731_vm0, %v742_v3, %v744_v8  ;;  %v691_v40 = vxor.u32 2147483648, %v3728_v10 }
 0x1d5   : > { %v4613_v63 = vmul.u32.u64.low %v4566_v51, %v745_v7  ;;  %v4614_v18 = vmul.u32.u64.high %v4566_v51, %v745_v7, %v4613_v63  ;;  %v2164_v21 = vadd.s32 1, %v3429_v62  ;;  %v695_v9 = vsel %vm693_vm12, %v694_v0, %v3728_v10 }
 0x1d6   : > { %v2129_v38 = vor.u32 4788187, %v2128_v28  ;;  %v737_v22 = vsel %vm731_vm0, %v734_v16, %v736_v32  ;;  %v2162_v57 = vor.u32 8388608, %v4576_v43  ;;  %v692_v24 = vsel %vm690_vm13, %v3726_v30, %v691_v40 }
 0x1d7   : > { %v4624_v25 = vmul.u32.u64.low %v4566_v51, %v741_v36  ;;  %v4625_v26 = vmul.u32.u64.high %v4566_v51, %v741_v36, %v4624_v25  ;;  %vm2165_vm5 = vcmp.gt.s32.totalorder %v2164_v21, 0  ;;  %v696_v17 = vsel %vm689_vm1, %v692_v24, %v695_v9 }
 0x1d8   : > { %v2130_v23 = vand.u32 2147483647, %v2129_v38  ;;  %v2132_v46 = vcvt.s32.f32 %v2125_v27  ;;  %v2166_v35 = vsel %vm2165_vm5, %v2164_v21, 0  ;;  %v697_v50 = vsel %vm686_vm4, nan, %v696_v17 }
 0x1d9   : > { %v396_v43 = vadd.f32 %v4211_v19, %v4194_v5  ;;  %3195 = vst [vmem:[%s4521_s5 + $0x8] sm:$0xff] %v697_v50  ;;  %v4636_v59 = vand.u32 3, %v4578_v45  ;;  %vm755_vm6 = vc.u32 %v4614_v18, %v4624_v25  ;;  %v2168_v11 = vand.u32 31, %v2166_v35 }
 0x1da   : > { %v2133_v55 = vmul.f32 %v2132_v46, %v2130_v23  ;;  %v753_v6 = vmul.u32 %v4566_v51, %v737_v22  ;;  %v756_v16 = vadd.s32 1, %v4625_v26  ;;  %v2167_v61 = vshrl.u32 %v2166_v35, 5 }
 0x1db   : > { %v4642_v31 = vshll.u32 %v2162_v57, 8  ;;  %v2169_v1 = vsub.s32 32, %v2168_v11  ;;  %v2171_v19 = vshll.u32 %v3972_v48, %v2168_v11  ;;  %v2174_v20 = vshll.u32 %v3973_v52, %v2168_v11 }
 0x1dc   : > { %v2134_v14 = vxor.u32 2147483648, %v2133_v55  ;;  %v757_v45 = vsel %vm755_vm6, %v756_v16, %v4625_v26  ;;  %v2177_v3 = vshll.u32 %v3974_v54, %v2168_v11  ;;  %v2180_v13 = vshll.u32 %v3975_v56, %v2168_v11 }
 0x1dd   : > { %v2183_v49 = vshll.u32 %v3976_v58, %v2168_v11  ;;  %v758_v60 = vadd.s32 %v757_v45, %v753_v6  ;;  %v2170_v47 = vshrl.u32 %v3972_v48, %v2169_v1  ;;  %v2172_v30 = vshrl.u32 %v3973_v52, %v2169_v1 }
 0x1de   : > { %v2135_v51 = vsel %vm2052_vm9, %v2134_v14, %v2133_v55  ;;  %v2175_v36 = vshrl.u32 %v3974_v54, %v2169_v1  ;;  %v2178_v8 = vshrl.u32 %v3975_v56, %v2169_v1  ;;  %v2181_v62 = vshrl.u32 %v3976_v58, %v2169_v1 }
 0x1df   : > { %v2138_v32 = vsel %vm4552_vm11, %v4224_v42, %v2135_v51  ;;  %v759_v10 = vadd.s32 536870912, %v758_v60  ;;  %v2173_v0 = vor.u32 %v2172_v30, %v2171_v19  ;;  %v2184_v27 = vshrl.u32 %v3977_v2, %v2169_v1 }
 0x1e0   : > { %3729 = vcosq.f32 %v2138_v32  ;;  %v2176_v28 = vor.u32 %v2175_v36, %v2174_v20  ;;  %v2179_v7 = vor.u32 %v2178_v8, %v2177_v3  ;;  %v2182_v40 = vor.u32 %v2181_v62, %v2180_v13  ;;  %v4694_v36 = vpop.f32.mrb[6].mxu0 }
 0x1e1   : > { %3731 = vsinq.f32 %v2138_v32  ;;  %v760_v63 = vshrl.u32 %v759_v10, 30  ;;  %v2185_v21 = vor.u32 %v2184_v27, %v2183_v49  ;;  %vm2186_vm7 = vcmp.lt.s32.totalorder %v2167_v61, 1 }
 0x1e2   : > { %vm2189_vm8 = vcmp.lt.s32.totalorder %v2167_v61, 4  ;;  %vm2188_vm9 = vcmp.lt.s32.totalorder %v2167_v61, 3  ;;  %v2194_v9 = vsel %vm2186_vm7, %v2173_v0, %v2176_v28  ;;  %vm2187_vm10 = vcmp.lt.s32.totalorder %v2167_v61, 2 }
 0x1e3   : > { %v2191_v39 = vsel %vm2189_vm8, %v2179_v7, 2102212464  ;;  %v2195_v38 = vsel %vm2189_vm8, %v2182_v40, 920167782  ;;  %v761_v22 = vshll.u32 %v760_v63, 30  ;;  %v2198_v24 = vsel %vm2186_vm7, %v2176_v28, %v2179_v7 }
 0x1e4   : > { %v2196_v57 = vsel %vm2188_vm9, %v2179_v7, %v2195_v38  ;;  %v2190_v26 = vsel %vm2186_vm7, %v2170_v47, %v2173_v0  ;;  %v2199_v23 = vsel %vm2189_vm8, %v2185_v21, 1326507024  ;;  %v4662_v46 = vmul.f32 30.0, %v396_v43 }
 0x1e5   : > { %v2197_v17 = vsel %vm2187_vm10, %v2194_v9, %v2196_v57  ;;  %v4664_v35 = vsub.s32 %v758_v60, %v761_v22  ;;  %v784_v50 = vsub.s32 4, %v760_v63  ;;  %v2192_v55 = vsel %vm2188_vm9, %v2176_v28, %v2191_v39 }
 0x1e6   : > { %v2200_v11 = vsel %vm2188_vm9, %v2182_v40, %v2199_v23  ;;  %v4668_v16 = vmul.u32.u64.low %v4642_v31, %v2197_v17  ;;  %v4669_v14 = vmul.u32.u64.high %v4642_v31, %v2197_v17, %v4668_v16  ;;  %v438_v43 = vadd.f32 %v4222_v37, %v4194_v5 }
 0x1e7   : > { %v2201_v6 = vsel %vm2187_vm10, %v2198_v24, %v2200_v11  ;;  %v764_v1 = vsub.s32 0, %v4664_v35  ;;  %vm700_vm11 = vcmp.lt.s32.totalorder %v4508_v15, 0  ;;  %v2193_v45 = vsel %vm2187_vm10, %v2190_v26, %v2192_v55 }
 0x1e8   : > { %v4673_v19 = vmul.u32.u64.low %v4642_v31, %v2201_v6  ;;  %v4674_v20 = vmul.u32.u64.high %v4642_v31, %v2201_v6, %v4673_v19  ;;  %v802_v3 = vand.u32 2147483647, %v4662_v46  ;;  %v805_v13 = vand.u32 2139095040, %v4662_v46 }
 0x1e9   : > { %vm2145_vm12 = vcmp.lt.s32.totalorder %v4636_v59, 2  ;;  %vm4685_vm13 = vcmp.le.f32.partialorder %v698_v12, 0.7853982  ;;  %v3374_v60 = vmin.u32 %v764_v1, %v4664_v35  ;;  %v785_v37 = vsel %vm700_vm11, %v784_v50, %v760_v63 }
 0x1ea   : > { %v3730_v49 = vpop.eup %3729  ;;  %vm2146_vm14 = vcmp.eq.s32.totalorder %v4636_v59, 0  ;;  %v2212_v30 = vadd.s32 1, %v4669_v14  ;;  %v806_v32 = vshrl.u32 %v805_v13, 23  ;;  %vm2149_vm15 = vcmp.eq.s32.totalorder %v4636_v59, 2 }
 0x1eb   : > { %v3732_v61 = vpop.eup %3731  ;;  %v2150_v47 = vxor.u32 2147483648, %v3730_v49  ;;  %v766_v12 = vclz %v3374_v60  ;;  %v2209_v62 = vmul.u32 %v4642_v31, %v2193_v45  ;;  %v787_v0 = vsel %vm4685_vm13, 0, %v785_v37 }
 0x1ec   : > { %v2147_v8 = vxor.u32 2147483648, %v3732_v61  ;;  %vm2211_vm0 = vc.u32 %v4674_v20, %v4668_v16  ;;  %v809_v27 = vand.u32 8388607, %v802_v3  ;;  %v3377_v63 = vadd.s32 4294967169, %v806_v32 }
 0x1ed   : > { %v2151_v10 = vsel %vm2149_vm15, %v2150_v47, %v3732_v61  ;;  %v3375_v7 = vadd.s32 4294967294, %v766_v12  ;;  %v2213_v40 = vsel %vm2211_vm0, %v2212_v30, %v4669_v14  ;;  %vm2142_vm1 = vweird.f32 %v4224_v42 }
 0x1ee   : > { %v2148_v28 = vsel %vm2146_vm14, %v3730_v49, %v2147_v8  ;;  %v2214_v21 = vadd.s32 %v2213_v40, %v2209_v62  ;;  %v4707_v39 = vmul.f32 30.0, %v438_v43  ;;  %v812_v38 = vadd.s32 1, %v3377_v63 }
 0x1ef   : > { %v2152_v31 = vsel %vm2145_vm12, %v2148_v28, %v2151_v10  ;;  %vm3376_vm2 = vcmp.lt.s32.totalorder %v3375_v7, 0  ;;  %v754_v22 = vadd.s32 %v4624_v25, %v4614_v18  ;;  %v791_v24 = vadd.s32 3, %v787_v0 }
 0x1f0   : > { %v2153_v9 = vsel %vm2142_vm1, nan, %v2152_v31  ;;  %v769_v57 = vsel %vm3376_vm2, 0, %v3375_v7  ;;  %v2215_v26 = vadd.s32 536870912, %v2214_v21  ;;  %v810_v50 = vor.u32 8388608, %v809_v27 }
 0x1f1   : > { %3209 = vst [vmem:[%s4521_s5 + $0x78] sm:$0xff] %v2153_v9  ;;  %v770_v17 = vsub.s32 32, %v769_v57  ;;  %v774_v23 = vsub.s32 4294967266, %v769_v57  ;;  %vm813_vm3 = vcmp.gt.s32.totalorder %v812_v38, 0  ;;  %v2258_v55 = vand.u32 2147483647, %v4707_v39 }
 0x1f2   : > { %v4712_v42 = vshrl.u32 %v2215_v26, 30  ;;  %v814_v59 = vsel %vm813_vm3, %v812_v38, 0  ;;  %v2261_v11 = vand.u32 2139095040, %v4707_v39  ;;  %v771_v6 = vshll.u32 %v4664_v35, %v769_v57 }
 0x1f3   : > { %v772_v14 = vshrl.u32 %v754_v22, %v770_v17  ;;  %v775_v1 = vadd.s32 127, %v774_v23  ;;  %v816_v19 = vand.u32 31, %v814_v59  ;;  %v4718_v13 = vand.u32 3, %v791_v24 }
 0x1f4   : > { %v2217_v18 = vshll.u32 %v4712_v42, 30  ;;  %v2210_v49 = vadd.s32 %v4668_v16, %v4674_v20  ;;  %v4723_v37 = vshll.u32 %v810_v50, 8  ;;  %v4725_v47 = vshrl.u32 %v814_v59, 5 }
 0x1f5   : > { %v773_v25 = vor.u32 %v772_v14, %v771_v6  ;;  %v776_v43 = vshll.u32 %v775_v1, 23  ;;  %v817_v45 = vsub.s32 32, %v816_v19  ;;  %v2262_v35 = vshrl.u32 %v2261_v11, 23  ;;  %v4749_v11 = vpop.f32.mrb[6].mxu1 }
 0x1f6   : > { %v4721_v60 = vsub.s32 %v2214_v21, %v2217_v18  ;;  %v4729_v30 = vand.u32 8388607, %v2258_v55  ;;  %v825_v16 = vshll.u32 %v3974_v54, %v816_v19  ;;  %v819_v28 = vshll.u32 %v3972_v48, %v816_v19 }
 0x1f7   : > { %v777_v61 = vor.u32 4788187, %v776_v43  ;;  %v820_v8 = vshrl.u32 %v3973_v52, %v817_v45  ;;  %v823_v12 = vshrl.u32 %v3974_v54, %v817_v45  ;;  %v780_v62 = vcvt.s32.f32 %v773_v25 }
 0x1f8   : > { %v2220_v32 = vsub.s32 0, %v4721_v60  ;;  %v826_v10 = vshrl.u32 %v3975_v56, %v817_v45  ;;  %v829_v0 = vshrl.u32 %v3976_v58, %v817_v45  ;;  %v822_v7 = vshll.u32 %v3973_v52, %v816_v19 }
 0x1f9   : > { %v778_v20 = vand.u32 2147483647, %v777_v61  ;;  %v828_v40 = vshll.u32 %v3975_v56, %v816_v19  ;;  %v2240_v31 = vsub.s32 4, %v4712_v42  ;;  %v3433_v9 = vadd.s32 4294967169, %v2262_v35 }
 0x1fa   : > { %v3430_v27 = vmin.u32 %v2220_v32, %v4721_v60  ;;  %v827_v21 = vor.u32 %v826_v10, %v825_v16  ;;  %vm2156_vm4 = vcmp.lt.s32.totalorder %v4541_v53, 0  ;;  %v821_v22 = vor.u32 %v820_v8, %v819_v28 }
 0x1fb   : > { %v781_v63 = vmul.f32 %v780_v62, %v778_v20  ;;  %v824_v57 = vor.u32 %v823_v12, %v822_v7  ;;  %v830_v24 = vor.u32 %v829_v0, %v828_v40  ;;  %v818_v17 = vshrl.u32 %v3972_v48, %v817_v45 }
 0x1fc   : > { %v2222_v38 = vclz %v3430_v27  ;;  %v831_v23 = vshll.u32 %v3976_v58, %v816_v19  ;;  %v832_v50 = vshrl.u32 %v3977_v2, %v817_v45  ;;  %vm834_vm5 = vcmp.lt.s32.totalorder %v4725_v47, 1 }
 0x1fd   : > { %v782_v26 = vxor.u32 2147483648, %v781_v63  ;;  %vm835_vm6 = vcmp.lt.s32.totalorder %v4725_v47, 2  ;;  %vm837_vm7 = vcmp.lt.s32.totalorder %v4725_v47, 4  ;;  %vm4755_vm8 = vcmp.le.f32.partialorder %v2154_v44, 0.7853982 }
 0x1fe   : > { %v3431_v59 = vadd.s32 4294967294, %v2222_v38  ;;  %v833_v1 = vor.u32 %v832_v50, %v831_v23  ;;  %vm836_vm9 = vcmp.lt.s32.totalorder %v4725_v47, 3  ;;  %v839_v19 = vsel %vm837_vm7, %v827_v21, 2102212464 }
 0x1ff   : > { %v783_v6 = vsel %vm700_vm11, %v782_v26, %v781_v63  ;;  %v842_v25 = vsel %vm834_vm5, %v821_v22, %v824_v57  ;;  %v843_v44 = vsel %vm837_vm7, %v830_v24, 920167782  ;;  %v838_v45 = vsel %vm834_vm5, %v818_v17, %v821_v22 }
 0x200   : > { %v786_v18 = vsel %vm4685_vm13, %v4508_v15, %v783_v6  ;;  %vm3432_vm10 = vcmp.lt.s32.totalorder %v3431_v59, 0  ;;  %v844_v61 = vsel %vm836_vm9, %v827_v21, %v843_v44  ;;  %v840_v51 = vsel %vm836_vm9, %v824_v57, %v839_v19 }
 0x201   : > { %3733 = vcosq.f32 %v786_v18  ;;  %v2225_v43 = vsel %vm3432_vm10, 0, %v3431_v59  ;;  %v845_v12 = vsel %vm835_vm6, %v842_v25, %v844_v61  ;;  %v846_v16 = vsel %vm834_vm5, %v824_v57, %v827_v21 }
 0x202   : > { %3735 = vsinq.f32 %v786_v18  ;;  %v2226_v35 = vsub.s32 32, %v2225_v43  ;;  %v2230_v32 = vsub.s32 4294967266, %v2225_v43  ;;  %v2227_v8 = vshll.u32 %v4721_v60, %v2225_v43 }
 0x203   : > { %v847_v20 = vsel %vm837_vm7, %v833_v1, 1326507024  ;;  %v2268_v27 = vadd.s32 1, %v3433_v9  ;;  %v2241_v28 = vsel %vm2156_vm4, %v2240_v31, %v4712_v42  ;;  %vm793_vm11 = vcmp.lt.s32.totalorder %v4718_v13, 2 }
 0x204   : > { %v2228_v62 = vshrl.u32 %v2210_v49, %v2226_v35  ;;  %v2231_v10 = vadd.s32 127, %v2230_v32  ;;  %v848_v0 = vsel %vm836_vm9, %v830_v24, %v847_v20  ;;  %v841_v9 = vsel %vm835_vm6, %v838_v45, %v840_v51 }
 0x205   : > { %v849_v60 = vsel %vm835_vm6, %v846_v16, %v848_v0  ;;  %v4790_v7 = vmul.u32.u64.low %v4723_v37, %v845_v12  ;;  %v4791_v40 = vmul.u32.u64.high %v4723_v37, %v845_v12, %v4790_v7  ;;  %vm2269_vm12 = vcmp.gt.s32.totalorder %v2268_v27, 0 }
 0x206   : > { %v2229_v63 = vor.u32 %v2228_v62, %v2227_v8  ;;  %v2232_v21 = vshll.u32 %v2231_v10, 23  ;;  %v4795_v49 = vmul.u32.u64.low %v4723_v37, %v849_v60  ;;  %v4796_v38 = vmul.u32.u64.high %v4723_v37, %v849_v60, %v4795_v49 }
 0x207   : > { %v400_v42 = vadd.f32 %v4295_v29, %v4192_v4  ;;  %vm790_vm13 = vweird.f32 %v4508_v15  ;;  %vm794_vm14 = vcmp.eq.s32.totalorder %v4718_v13, 0  ;;  %v2243_v22 = vsel %vm4755_vm8, 0, %v2241_v28 }
 0x208   : > { %v2233_v31 = vor.u32 4788187, %v2232_v21  ;;  %v2270_v57 = vsel %vm2269_vm12, %v2268_v27, 0  ;;  %vm797_vm15 = vcmp.eq.s32.totalorder %v4718_v13, 2  ;;  %v860_v24 = vadd.s32 1, %v4791_v40 }
 0x209   : > { %v2266_v47 = vor.u32 8388608, %v4729_v30  ;;  %v2272_v26 = vand.u32 31, %v2270_v57  ;;  %v2236_v23 = vcvt.s32.f32 %v2229_v63  ;;  %v857_v29 = vmul.u32 %v4723_v37, %v841_v9 }
 0x20a   : > { %v2234_v17 = vand.u32 2147483647, %v2233_v31  ;;  %vm859_vm0 = vc.u32 %v4796_v38, %v4790_v7  ;;  %v2247_v59 = vadd.s32 3, %v2243_v22  ;;  %v4816_v61 = vshrl.u32 %v2270_v57, 5 }
 0x20b   : > { %v3734_v50 = vpop.eup %3733  ;;  %v861_v6 = vsel %vm859_vm0, %v860_v24, %v4791_v40  ;;  %v2273_v1 = vsub.s32 32, %v2272_v26  ;;  %v2275_v19 = vshll.u32 %v3972_v48, %v2272_v26  ;;  %v2278_v30 = vshll.u32 %v3973_v52, %v2272_v26 }
 0x20c   : > { %v3736_v18 = vpop.eup %3735  ;;  %v798_v25 = vxor.u32 2147483648, %v3734_v50  ;;  %v2237_v44 = vmul.f32 %v2236_v23, %v2234_v17  ;;  %v862_v43 = vadd.s32 %v861_v6, %v857_v29  ;;  %v2281_v12 = vshll.u32 %v3974_v54, %v2272_v26 }
 0x20d   : > { %v795_v45 = vxor.u32 2147483648, %v3736_v18  ;;  %v2276_v37 = vshrl.u32 %v3973_v52, %v2273_v1  ;;  %v2279_v35 = vshrl.u32 %v3974_v54, %v2273_v1  ;;  %v2282_v62 = vshrl.u32 %v3975_v56, %v2273_v1 }
 0x20e   : > { %v799_v32 = vsel %vm797_vm15, %v798_v25, %v3736_v18  ;;  %v2238_v51 = vxor.u32 2147483648, %v2237_v44  ;;  %v863_v8 = vadd.s32 536870912, %v862_v43  ;;  %v2284_v10 = vshll.u32 %v3975_v56, %v2272_v26 }
 0x20f   : > { %v796_v16 = vsel %vm794_vm14, %v3734_v50, %v795_v45  ;;  %v2277_v20 = vor.u32 %v2276_v37, %v2275_v19  ;;  %v2280_v60 = vor.u32 %v2279_v35, %v2278_v30  ;;  %v2285_v21 = vshrl.u32 %v3976_v58, %v2273_v1 }
 0x210   : > { %v800_v0 = vsel %vm793_vm11, %v796_v16, %v799_v32  ;;  %v2239_v27 = vsel %vm2156_vm4, %v2238_v51, %v2237_v44  ;;  %v864_v28 = vshrl.u32 %v863_v8, 30  ;;  %v2287_v49 = vshll.u32 %v3976_v58, %v2272_v26  ;;  %v4882_v8 = vpop.f32.mrb[7].mxu0 }
 0x211   : > { %v801_v40 = vsel %vm790_vm13, nan, %v800_v0  ;;  %v2242_v63 = vsel %vm4755_vm8, %v4541_v53, %v2239_v27  ;;  %v2288_v9 = vshrl.u32 %v3977_v2, %v2273_v1  ;;  %vm804_vm1 = vcmp.lt.s32.totalorder %v4662_v46, 0 }
 0x212   : > { %3196 = vst [vmem:[%s4521_s5 + $0x10] sm:$0xff] %v801_v40  ;;  %3737 = vcosq.f32 %v2242_v63  ;;  %v865_v13 = vshll.u32 %v864_v28, 30  ;;  %v2283_v31 = vor.u32 %v2282_v62, %v2281_v12  ;;  %v2286_v22 = vor.u32 %v2285_v21, %v2284_v10 }
 0x213   : > { %3739 = vsinq.f32 %v2242_v63  ;;  %v2248_v15 = vand.u32 3, %v2247_v59  ;;  %v2289_v24 = vor.u32 %v2288_v9, %v2287_v49  ;;  %vm2290_vm2 = vcmp.lt.s32.totalorder %v4816_v61, 1 }
 0x214   : > { %v4841_v57 = vsub.s32 %v862_v43, %v865_v13  ;;  %vm2293_vm3 = vcmp.lt.s32.totalorder %v4816_v61, 4  ;;  %v2298_v14 = vsel %vm2290_vm2, %v2277_v20, %v2280_v60  ;;  %v2306_v26 = vshll.u32 %v2266_v47, 8 }
 0x215   : > { %v4847_v17 = vmul.f32 30.0, %v400_v42  ;;  %vm4851_vm4 = vcmp.le.f32.partialorder %v802_v3, 0.7853982  ;;  %v2274_v50 = vshrl.u32 %v3972_v48, %v2273_v1  ;;  %vm2292_vm5 = vcmp.lt.s32.totalorder %v4816_v61, 3 }
 0x216   : > { %v868_v29 = vsub.s32 0, %v4841_v57  ;;  %v2299_v59 = vsel %vm2293_vm3, %v2286_v22, 920167782  ;;  %vm2291_vm6 = vcmp.lt.s32.totalorder %v4816_v61, 2  ;;  %v2295_v6 = vsel %vm2293_vm3, %v2283_v31, 2102212464 }
 0x217   : > { %v2300_v42 = vsel %vm2292_vm5, %v2283_v31, %v2299_v59  ;;  %v2303_v47 = vsel %vm2293_vm3, %v2289_v24, 1326507024  ;;  %v888_v3 = vsub.s32 4, %v864_v28  ;;  %v2302_v25 = vsel %vm2290_vm2, %v2280_v60, %v2283_v31 }
 0x218   : > { %v3378_v19 = vmin.u32 %v868_v29, %v4841_v57  ;;  %v2301_v18 = vsel %vm2291_vm6, %v2298_v14, %v2300_v42  ;;  %vm2246_vm7 = vweird.f32 %v4541_v53  ;;  %v2304_v1 = vsel %vm2292_vm5, %v2286_v22, %v2303_v47 }
 0x219   : > { %v4869_v44 = vmul.u32.u64.low %v2306_v26, %v2301_v18  ;;  %v4870_v43 = vmul.u32.u64.high %v2306_v26, %v2301_v18, %v4869_v44  ;;  %v442_v30 = vadd.f32 %v4392_v34, %v4192_v4  ;;  %vm2249_vm8 = vcmp.lt.s32.totalorder %v2248_v15, 2 }
 0x21a   : > { %v870_v45 = vclz %v3378_v19  ;;  %v2294_v37 = vsel %vm2290_vm2, %v2274_v50, %v2277_v20  ;;  %v2296_v35 = vsel %vm2292_vm5, %v2280_v60, %v2295_v6  ;;  %vm2250_vm9 = vcmp.eq.s32.totalorder %v2248_v15, 0 }
 0x21b   : > { %vm2253_vm10 = vcmp.eq.s32.totalorder %v2248_v15, 2  ;;  %v2305_v32 = vsel %vm2291_vm6, %v2302_v25, %v2304_v1  ;;  %v909_v51 = vand.u32 2139095040, %v4847_v17  ;;  %v889_v34 = vsel %vm804_vm1, %v888_v3, %v864_v28 }
 0x21c   : > { %v3738_v12 = vpop.eup %3737  ;;  %v3379_v16 = vadd.s32 4294967294, %v870_v45  ;;  %v4886_v62 = vmul.u32.u64.low %v2306_v26, %v2305_v32  ;;  %v4887_v10 = vmul.u32.u64.high %v2306_v26, %v2305_v32, %v4886_v62  ;;  %v2297_v27 = vsel %vm2291_vm6, %v2294_v37, %v2296_v35 }
 0x21d   : > { %v3740_v20 = vpop.eup %3739  ;;  %v2254_v0 = vxor.u32 2147483648, %v3738_v12  ;;  %v906_v60 = vand.u32 2147483647, %v4847_v17  ;;  %v910_v40 = vshrl.u32 %v909_v51, 23  ;;  %v858_v21 = vadd.s32 %v4790_v7, %v4796_v38 }
 0x21e   : > { %v2251_v63 = vxor.u32 2147483648, %v3740_v20  ;;  %vm3380_vm11 = vcmp.lt.s32.totalorder %v3379_v16, 0  ;;  %v2316_v49 = vadd.s32 1, %v4870_v43  ;;  %v891_v9 = vsel %vm4851_vm4, 0, %v889_v34 }
 0x21f   : > { %v2255_v28 = vsel %vm2253_vm10, %v2254_v0, %v3740_v20  ;;  %v873_v13 = vsel %vm3380_vm11, 0, %v3379_v16  ;;  %v3381_v31 = vadd.s32 4294967169, %v910_v40  ;;  %v2313_v14 = vmul.u32 %v2306_v26, %v2297_v27 }
 0x220   : > { %v2252_v61 = vsel %vm2250_vm9, %v3738_v12, %v2251_v63  ;;  %v874_v22 = vsub.s32 32, %v873_v13  ;;  %v878_v24 = vsub.s32 4294967266, %v873_v13  ;;  %v875_v7 = vshll.u32 %v4841_v57, %v873_v13 }
 0x221   : > { %v2256_v29 = vsel %vm2249_vm8, %v2252_v61, %v2255_v28  ;;  %vm2315_vm12 = vc.u32 %v4887_v10, %v4869_v44  ;;  %v916_v38 = vadd.s32 1, %v3381_v31  ;;  %v895_v47 = vadd.s32 3, %v891_v9 }
 0x222   : > { %v2257_v50 = vsel %vm2246_vm7, nan, %v2256_v29  ;;  %v876_v59 = vshrl.u32 %v858_v21, %v874_v22  ;;  %v879_v6 = vadd.s32 127, %v878_v24  ;;  %v2317_v42 = vsel %vm2315_vm12, %v2316_v49, %v4870_v43 }
 0x223   : > { %3210 = vst [vmem:[%s4521_s5 + $0x80] sm:$0xff] %v2257_v50  ;;  %v2318_v19 = vadd.s32 %v2317_v42, %v2313_v14  ;;  %vm917_vm13 = vcmp.gt.s32.totalorder %v916_v38, 0  ;;  %v913_v57 = vand.u32 8388607, %v906_v60  ;;  %v4909_v1 = vmul.f32 30.0, %v442_v30 }
 0x224   : > { %v877_v26 = vor.u32 %v876_v59, %v875_v7  ;;  %v880_v15 = vshll.u32 %v879_v6, 23  ;;  %v918_v3 = vsel %vm917_vm13, %v916_v38, 0  ;;  %v4913_v32 = vand.u32 3, %v895_v47 }
 0x225   : > { %v2319_v18 = vadd.s32 536870912, %v2318_v19  ;;  %v920_v25 = vand.u32 31, %v918_v3  ;;  %v914_v51 = vor.u32 8388608, %v913_v57  ;;  %v2365_v62 = vand.u32 2139095040, %v4909_v1 }
 0x226   : > { %v881_v53 = vor.u32 4788187, %v880_v15  ;;  %v884_v43 = vcvt.s32.f32 %v877_v26  ;;  %v919_v13 = vshrl.u32 %v918_v3, 5  ;;  %vm2260_vm0 = vcmp.lt.s32.totalorder %v4707_v39, 0 }
 0x227   : > { %v4911_v45 = vshrl.u32 %v2319_v18, 30  ;;  %v921_v37 = vsub.s32 32, %v920_v25  ;;  %v923_v16 = vshll.u32 %v3972_v48, %v920_v25  ;;  %v926_v63 = vshll.u32 %v3973_v52, %v920_v25 }
 0x228   : > { %v882_v35 = vand.u32 2147483647, %v881_v53  ;;  %v929_v21 = vshll.u32 %v3974_v54, %v920_v25  ;;  %v932_v9 = vshll.u32 %v3975_v56, %v920_v25  ;;  %v935_v31 = vshll.u32 %v3976_v58, %v920_v25 }
 0x229   : > { %v2321_v12 = vshll.u32 %v4911_v45, 30  ;;  %v924_v34 = vshrl.u32 %v3973_v52, %v921_v37  ;;  %v927_v30 = vshrl.u32 %v3974_v54, %v921_v37  ;;  %v930_v0 = vshrl.u32 %v3975_v56, %v921_v37 }
 0x22a   : > { %v885_v20 = vmul.f32 %v884_v43, %v882_v35  ;;  %v933_v27 = vshrl.u32 %v3976_v58, %v921_v37  ;;  %v936_v49 = vshrl.u32 %v3977_v2, %v921_v37  ;;  %v4932_v38 = vshll.u32 %v914_v51, 8  ;;  %v4941_v43 = vpop.f32.mrb[7].mxu1 }
 0x22b   : > { %v4922_v40 = vsub.s32 %v2318_v19, %v2321_v12  ;;  %v925_v22 = vor.u32 %v924_v34, %v923_v16  ;;  %v928_v24 = vor.u32 %v927_v30, %v926_v63  ;;  %v931_v14 = vor.u32 %v930_v0, %v929_v21 }
 0x22c   : > { %v886_v28 = vxor.u32 2147483648, %v885_v20  ;;  %v934_v7 = vor.u32 %v933_v27, %v932_v9  ;;  %v2366_v50 = vshrl.u32 %v2365_v62, 23  ;;  %v2344_v42 = vsub.s32 4, %v4911_v45 }
 0x22d   : > { %v2324_v61 = vsub.s32 0, %v4922_v40  ;;  %v937_v47 = vor.u32 %v936_v49, %v935_v31  ;;  %v922_v19 = vshrl.u32 %v3972_v48, %v921_v37  ;;  %vm938_vm14 = vcmp.lt.s32.totalorder %v919_v13, 1 }
 0x22e   : > { %v887_v29 = vsel %vm804_vm1, %v886_v28, %v885_v20  ;;  %vm941_vm15 = vcmp.lt.s32.totalorder %v919_v13, 4  ;;  %v946_v57 = vsel %vm938_vm14, %v925_v22, %v928_v24  ;;  %vm939_vm1 = vcmp.lt.s32.totalorder %v919_v13, 2 }
 0x22f   : > { %v890_v59 = vsel %vm4851_vm4, %v4662_v46, %v887_v29  ;;  %v3434_v6 = vmin.u32 %v2324_v61, %v4922_v40  ;;  %v943_v15 = vsel %vm941_vm15, %v931_v14, 2102212464  ;;  %vm940_vm2 = vcmp.lt.s32.totalorder %v919_v13, 3 }
 0x230   : > { %3741 = vcosq.f32 %v890_v59  ;;  %v947_v23 = vsel %vm941_vm15, %v934_v7, 920167782  ;;  %v950_v3 = vsel %vm938_vm14, %v928_v24, %v931_v14  ;;  %v942_v25 = vsel %vm938_vm14, %v922_v19, %v925_v22 }
 0x231   : > { %3743 = vsinq.f32 %v890_v59  ;;  %v2326_v26 = vclz %v3434_v6  ;;  %v948_v53 = vsel %vm940_vm2, %v931_v14, %v947_v23  ;;  %v951_v35 = vsel %vm941_vm15, %v937_v47, 1326507024 }
 0x232   : > { %vm4945_vm3 = vcmp.le.f32.partialorder %v2258_v55, 0.7853982  ;;  %v944_v51 = vsel %vm940_vm2, %v928_v24, %v943_v15  ;;  %v949_v12 = vsel %vm939_vm1, %v946_v57, %v948_v53  ;;  %v952_v16 = vsel %vm940_vm2, %v934_v7, %v951_v35 }
 0x233   : > { %v3435_v18 = vadd.s32 4294967294, %v2326_v26  ;;  %v3437_v34 = vadd.s32 4294967169, %v2366_v50  ;;  %vm898_vm4 = vcmp.eq.s32.totalorder %v4913_v32, 0  ;;  %v953_v62 = vsel %vm939_vm1, %v950_v3, %v952_v16 }
 0x234   : > { %v4953_v20 = vmul.u32.u64.low %v4932_v38, %v949_v12  ;;  %v4954_v30 = vmul.u32.u64.high %v4932_v38, %v949_v12, %v4953_v20  ;;  %vm897_vm6 = vcmp.lt.s32.totalorder %v4913_v32, 2  ;;  %vm894_vm7 = vweird.f32 %v4662_v46 }
 0x235   : > { %vm3436_vm5 = vcmp.lt.s32.totalorder %v3435_v18, 0  ;;  %v4959_v0 = vmul.u32.u64.low %v4932_v38, %v953_v62  ;;  %v4960_v27 = vmul.u32.u64.high %v4932_v38, %v953_v62, %v4959_v0  ;;  %v2372_v63 = vadd.s32 1, %v3437_v34 }
 0x236   : > { %v2329_v55 = vsel %vm3436_vm5, 0, %v3435_v18  ;;  %v2314_v21 = vadd.s32 %v4869_v44, %v4887_v10  ;;  %v945_v9 = vsel %vm939_vm1, %v942_v25, %v944_v51  ;;  %vm901_vm8 = vcmp.eq.s32.totalorder %v4913_v32, 2 }
 0x237   : > { %v2330_v49 = vsub.s32 32, %v2329_v55  ;;  %v2334_v28 = vsub.s32 4294967266, %v2329_v55  ;;  %v2331_v31 = vshll.u32 %v4922_v40, %v2329_v55  ;;  %v2362_v61 = vand.u32 2147483647, %v4909_v1 }
 0x238   : > { %vm2373_vm9 = vcmp.gt.s32.totalorder %v2372_v63, 0  ;;  %v964_v14 = vadd.s32 1, %v4954_v30  ;;  %v2345_v44 = vsel %vm2260_vm0, %v2344_v42, %v4911_v45  ;;  %v961_v10 = vmul.u32 %v4932_v38, %v945_v9 }
 0x239   : > { %v2332_v22 = vshrl.u32 %v2314_v21, %v2330_v49  ;;  %v2335_v24 = vadd.s32 127, %v2334_v28  ;;  %v2374_v29 = vsel %vm2373_vm9, %v2372_v63, 0  ;;  %vm963_vm10 = vc.u32 %v4960_v27, %v4953_v20 }
 0x23a   : > { %v3742_v7 = vpop.eup %3741  ;;  %v2376_v13 = vand.u32 31, %v2374_v29  ;;  %v965_v47 = vsel %vm963_vm10, %v964_v14, %v4954_v30  ;;  %v2369_v15 = vand.u32 8388607, %v2362_v61  ;;  %v2347_v42 = vsel %vm4945_vm3, 0, %v2345_v44 }
 0x23b   : > { %v3744_v40 = vpop.eup %3743  ;;  %v902_v50 = vxor.u32 2147483648, %v3742_v7  ;;  %v2333_v59 = vor.u32 %v2332_v22, %v2331_v31  ;;  %v2336_v6 = vshll.u32 %v2335_v24, 23  ;;  %v966_v26 = vadd.s32 %v965_v47, %v961_v10 }
 0x23c   : > { %v899_v19 = vxor.u32 2147483648, %v3744_v40  ;;  %v2377_v57 = vsub.s32 32, %v2376_v13  ;;  %v2379_v23 = vshll.u32 %v3972_v48, %v2376_v13  ;;  %v2382_v53 = vshll.u32 %v3973_v52, %v2376_v13 }
 0x23d   : > { %v903_v45 = vsel %vm901_vm8, %v902_v50, %v3744_v40  ;;  %v2337_v38 = vor.u32 4788187, %v2336_v6  ;;  %v2340_v18 = vcvt.s32.f32 %v2333_v59  ;;  %v967_v25 = vadd.s32 536870912, %v966_v26 }
 0x23e   : > { %v900_v3 = vsel %vm898_vm4, %v3742_v7, %v899_v19  ;;  %v2380_v12 = vshrl.u32 %v3973_v52, %v2377_v57  ;;  %v2383_v16 = vshrl.u32 %v3974_v54, %v2377_v57  ;;  %v2385_v30 = vshll.u32 %v3974_v54, %v2376_v13 }
 0x23f   : > { %v904_v35 = vsel %vm897_vm6, %v900_v3, %v903_v45  ;;  %v2338_v51 = vand.u32 2147483647, %v2337_v38  ;;  %v968_v62 = vshrl.u32 %v967_v25, 30  ;;  %v2386_v55 = vshrl.u32 %v3975_v56, %v2377_v57 }
 0x240   : > { %v905_v34 = vsel %vm894_vm7, nan, %v904_v35  ;;  %v2351_v63 = vadd.s32 3, %v2347_v42  ;;  %v2388_v21 = vshll.u32 %v3975_v56, %v2376_v13  ;;  %v2389_v32 = vshrl.u32 %v3976_v58, %v2377_v57 }
 0x241   : > { %3197 = vst [vmem:[%s4521_s5 + $0x18] sm:$0xff] %v905_v34  ;;  %v2341_v0 = vmul.f32 %v2340_v18, %v2338_v51  ;;  %v969_v49 = vshll.u32 %v968_v62, 30  ;;  %v2375_v28 = vshrl.u32 %v2374_v29, 5  ;;  %v2391_v9 = vshll.u32 %v3976_v58, %v2376_v13 }
 0x242   : > { %v2390_v22 = vor.u32 %v2389_v32, %v2388_v21  ;;  %v2392_v46 = vshrl.u32 %v3977_v2, %v2377_v57  ;;  %v402_v24 = vadd.f32 %v4495_v33, %v4194_v5  ;;  %v2381_v7 = vor.u32 %v2380_v12, %v2379_v23 }
 0x243   : > { %v2342_v31 = vxor.u32 2147483648, %v2341_v0  ;;  %v5002_v14 = vsub.s32 %v966_v26, %v969_v49  ;;  %v2384_v44 = vor.u32 %v2383_v16, %v2382_v53  ;;  %v2387_v10 = vor.u32 %v2386_v55, %v2385_v30 }
 0x244   : > { %v5006_v50 = vand.u32 3, %v2351_v63  ;;  %v2370_v29 = vor.u32 8388608, %v2369_v15  ;;  %v2393_v59 = vor.u32 %v2392_v46, %v2391_v9  ;;  %vm908_vm11 = vcmp.lt.s32.totalorder %v4847_v17, 0 }
 0x245   : > { %v2343_v40 = vsel %vm2260_vm0, %v2342_v31, %v2341_v0  ;;  %v972_v33 = vsub.s32 0, %v5002_v14  ;;  %v2378_v6 = vshrl.u32 %v3972_v48, %v2377_v57  ;;  %vm2397_vm12 = vcmp.lt.s32.totalorder %v2375_v28, 4 }
 0x246   : > { %v2346_v13 = vsel %vm4945_vm3, %v4707_v39, %v2343_v40  ;;  %vm2394_vm13 = vcmp.lt.s32.totalorder %v2375_v28, 1  ;;  %vm2396_vm14 = vcmp.lt.s32.totalorder %v2375_v28, 3  ;;  %v2403_v47 = vsel %vm2397_vm12, %v2390_v22, 920167782 }
 0x247   : > { %3745 = vcosq.f32 %v2346_v13  ;;  %v3382_v19 = vmin.u32 %v972_v33, %v5002_v14  ;;  %v2399_v26 = vsel %vm2397_vm12, %v2387_v10, 2102212464  ;;  %v2402_v15 = vsel %vm2394_vm13, %v2381_v7, %v2384_v44 }
 0x248   : > { %3747 = vsinq.f32 %v2346_v13  ;;  %v2404_v45 = vsel %vm2396_vm14, %v2387_v10, %v2403_v47  ;;  %v2406_v37 = vsel %vm2394_vm13, %v2384_v44, %v2387_v10  ;;  %v2407_v38 = vsel %vm2397_vm12, %v2393_v59, 1326507024 }
 0x249   : > { %v2410_v42 = vshll.u32 %v2370_v29, 8  ;;  %v974_v23 = vclz %v3382_v19  ;;  %v992_v3 = vsub.s32 4, %v968_v62  ;;  %vm2395_vm15 = vcmp.lt.s32.totalorder %v2375_v28, 2 }
 0x24a   : > { %v5016_v18 = vmul.f32 30.0, %v402_v24  ;;  %v2398_v57 = vsel %vm2394_vm13, %v2378_v6, %v2381_v7  ;;  %v2400_v25 = vsel %vm2396_vm14, %v2384_v44, %v2399_v26  ;;  %v2405_v53 = vsel %vm2395_vm15, %v2402_v15, %v2404_v45  ;;  %v5043_v24 = vpop.f32.mrb[8].mxu0 }
 0x24b   : > { %v2408_v35 = vsel %vm2396_vm14, %v2390_v22, %v2407_v38  ;;  %v3383_v51 = vadd.s32 4294967294, %v974_v23  ;;  %v5020_v16 = vmul.u32.u64.low %v2410_v42, %v2405_v53  ;;  %v5021_v34 = vmul.u32.u64.high %v2410_v42, %v2405_v53, %v5020_v16 }
 0x24c   : > { %v2409_v12 = vsel %vm2395_vm15, %v2406_v37, %v2408_v35  ;;  %vm2354_vm0 = vcmp.eq.s32.totalorder %v5006_v50, 0  ;;  %vm5026_vm1 = vcmp.le.f32.partialorder %v906_v60, 0.7853982  ;;  %vm2357_vm2 = vcmp.eq.s32.totalorder %v5006_v50, 2 }
 0x24d   : > { %v5030_v55 = vmul.u32.u64.low %v2410_v42, %v2409_v12  ;;  %v5031_v0 = vmul.u32.u64.high %v2410_v42, %v2409_v12, %v5030_v55  ;;  %vm3384_vm3 = vcmp.lt.s32.totalorder %v3383_v51, 0  ;;  %v2401_v63 = vsel %vm2395_vm15, %v2398_v57, %v2400_v25 }
 0x24e   : > { %v1013_v21 = vand.u32 2139095040, %v5016_v18  ;;  %v962_v32 = vadd.s32 %v4953_v20, %v4960_v27  ;;  %v977_v49 = vsel %vm3384_vm3, 0, %v3383_v51  ;;  %v993_v28 = vsel %vm908_vm11, %v992_v3, %v968_v62 }
 0x24f   : > { %v444_v60 = vadd.f32 %v4610_v41, %v4194_v5  ;;  %v978_v9 = vsub.s32 32, %v977_v49  ;;  %v982_v31 = vsub.s32 4294967266, %v977_v49  ;;  %v2420_v22 = vadd.s32 1, %v5021_v34 }
 0x250   : > { %v1010_v46 = vand.u32 2147483647, %v5016_v18  ;;  %v979_v44 = vshll.u32 %v5002_v14, %v977_v49  ;;  %v2417_v10 = vmul.u32 %v2410_v42, %v2401_v63  ;;  %vm2419_vm4 = vc.u32 %v5031_v0, %v5020_v16 }
 0x251   : > { %v3746_v7 = vpop.eup %3745  ;;  %v1014_v20 = vshrl.u32 %v1013_v21, 23  ;;  %v980_v40 = vshrl.u32 %v962_v32, %v978_v9  ;;  %v983_v29 = vadd.s32 127, %v982_v31  ;;  %v2421_v41 = vsel %vm2419_vm4, %v2420_v22, %v5021_v34 }
 0x252   : > { %v3748_v27 = vpop.eup %3747  ;;  %v2358_v62 = vxor.u32 2147483648, %v3746_v7  ;;  %v995_v13 = vsel %vm5026_vm1, 0, %v993_v28  ;;  %v2422_v33 = vadd.s32 %v2421_v41, %v2417_v10  ;;  %v1017_v26 = vand.u32 8388607, %v1010_v46 }
 0x253   : > { %v2355_v59 = vxor.u32 2147483648, %v3748_v27  ;;  %v3385_v6 = vadd.s32 4294967169, %v1014_v20  ;;  %v981_v14 = vor.u32 %v980_v40, %v979_v44  ;;  %v984_v19 = vshll.u32 %v983_v29, 23 }
 0x254   : > { %v2359_v47 = vsel %vm2357_vm2, %v2358_v62, %v3748_v27  ;;  %vm2353_vm5 = vcmp.lt.s32.totalorder %v5006_v50, 2  ;;  %v2423_v45 = vadd.s32 536870912, %v2422_v33  ;;  %vm2350_vm6 = vweird.f32 %v4707_v39 }
 0x255   : > { %v2356_v15 = vsel %vm2354_vm0, %v3746_v7, %v2355_v59  ;;  %v1020_v37 = vadd.s32 1, %v3385_v6  ;;  %v985_v42 = vor.u32 4788187, %v984_v19  ;;  %v999_v23 = vadd.s32 3, %v995_v13 }
 0x256   : > { %v2360_v38 = vsel %vm2353_vm5, %v2356_v15, %v2359_v47  ;;  %v5058_v57 = vshrl.u32 %v2423_v45, 30  ;;  %v5060_v25 = vmul.f32 30.0, %v444_v60  ;;  %v988_v35 = vcvt.s32.f32 %v981_v14  ;;  %v5095_v45 = vpop.f32.mrb[8].mxu1 }
 0x257   : > { %v2361_v3 = vsel %vm2350_vm6, nan, %v2360_v38  ;;  %vm1021_vm7 = vcmp.gt.s32.totalorder %v1020_v37, 0  ;;  %v986_v53 = vand.u32 2147483647, %v985_v42  ;;  %v1018_v51 = vor.u32 8388608, %v1017_v26 }
 0x258   : > { %3211 = vst [vmem:[%s4521_s5 + $0x88] sm:$0xff] %v2361_v3  ;;  %v1022_v12 = vsel %vm1021_vm7, %v1020_v37, 0  ;;  %v2425_v50 = vshll.u32 %v5058_v57, 30  ;;  %v5064_v63 = vand.u32 3, %v999_v23  ;;  %v5070_v32 = vadd.f32 %v4694_v36, %v4192_v4 }
 0x259   : > { %v1024_v34 = vand.u32 31, %v1022_v12  ;;  %v989_v55 = vmul.f32 %v988_v35, %v986_v53  ;;  %v2418_v28 = vadd.s32 %v5020_v16, %v5031_v0  ;;  %v5073_v60 = vshll.u32 %v1018_v51, 8 }
 0x25a   : > { %v5066_v39 = vsub.s32 %v2422_v33, %v2425_v50  ;;  %v2469_v9 = vand.u32 2139095040, %v5060_v25  ;;  %v1023_v22 = vshrl.u32 %v1022_v12, 5  ;;  %v2466_v6 = vand.u32 2147483647, %v5060_v25 }
 0x25b   : > { %v1025_v21 = vsub.s32 32, %v1024_v34  ;;  %v990_v49 = vxor.u32 2147483648, %v989_v55  ;;  %v1027_v7 = vshll.u32 %v3972_v48, %v1024_v34  ;;  %v1030_v36 = vshll.u32 %v3973_v52, %v1024_v34 }
 0x25c   : > { %v2428_v31 = vsub.s32 0, %v5066_v39  ;;  %v1033_v62 = vshll.u32 %v3974_v54, %v1024_v34  ;;  %v1036_v40 = vshll.u32 %v3975_v56, %v1024_v34  ;;  %v1039_v14 = vshll.u32 %v3976_v58, %v1024_v34 }
 0x25d   : > { %v1028_v44 = vshrl.u32 %v3973_v52, %v1025_v21  ;;  %v991_v10 = vsel %vm908_vm11, %v990_v49, %v989_v55  ;;  %v1031_v20 = vshrl.u32 %v3974_v54, %v1025_v21  ;;  %v1034_v16 = vshrl.u32 %v3975_v56, %v1025_v21 }
 0x25e   : > { %v994_v0 = vsel %vm5026_vm1, %v4847_v17, %v991_v10  ;;  %v3438_v27 = vmin.u32 %v2428_v31, %v5066_v39  ;;  %v1037_v59 = vshrl.u32 %v3976_v58, %v1025_v21  ;;  %v1026_v47 = vshrl.u32 %v3972_v48, %v1025_v21 }
 0x25f   : > { %3749 = vcosq.f32 %v994_v0  ;;  %v1029_v29 = vor.u32 %v1028_v44, %v1027_v7  ;;  %v1032_v41 = vor.u32 %v1031_v20, %v1030_v36  ;;  %v1035_v33 = vor.u32 %v1034_v16, %v1033_v62 }
 0x260   : > { %3751 = vsinq.f32 %v994_v0  ;;  %v2430_v13 = vclz %v3438_v27  ;;  %v1038_v30 = vor.u32 %v1037_v59, %v1036_v40  ;;  %v1040_v19 = vshrl.u32 %v3977_v2, %v1025_v21 }
 0x261   : > { %vm1042_vm8 = vcmp.lt.s32.totalorder %v1023_v22, 1  ;;  %vm1044_vm9 = vcmp.lt.s32.totalorder %v1023_v22, 3  ;;  %v2470_v15 = vshrl.u32 %v2469_v9, 23  ;;  %vm2364_vm10 = vcmp.lt.s32.totalorder %v4909_v1, 0 }
 0x262   : > { %v3439_v26 = vadd.s32 4294967294, %v2430_v13  ;;  %v1041_v37 = vor.u32 %v1040_v19, %v1039_v14  ;;  %vm1045_vm11 = vcmp.lt.s32.totalorder %v1023_v22, 4  ;;  %v1046_v38 = vsel %vm1042_vm8, %v1026_v47, %v1029_v29 }
 0x263   : > { %v1050_v42 = vsel %vm1042_vm8, %v1029_v29, %v1032_v41  ;;  %vm1002_vm12 = vcmp.eq.s32.totalorder %v5064_v63, 0  ;;  %v1047_v23 = vsel %vm1045_vm11, %v1035_v33, 2102212464  ;;  %v1051_v3 = vsel %vm1045_vm11, %v1038_v30, 920167782 }
 0x264   : > { %vm3440_vm13 = vcmp.lt.s32.totalorder %v3439_v26, 0  ;;  %v1054_v53 = vsel %vm1042_vm8, %v1032_v41, %v1035_v33  ;;  %vm1001_vm14 = vcmp.lt.s32.totalorder %v5064_v63, 2  ;;  %v1048_v51 = vsel %vm1044_vm9, %v1032_v41, %v1047_v23 }
 0x265   : > { %v2433_v35 = vsel %vm3440_vm13, 0, %v3439_v26  ;;  %v1052_v12 = vsel %vm1044_vm9, %v1035_v33, %v1051_v3  ;;  %v1055_v50 = vsel %vm1045_vm11, %v1041_v37, 1326507024  ;;  %vm998_vm15 = vweird.f32 %v4847_v17 }
 0x266   : > { %v2434_v34 = vsub.s32 32, %v2433_v35  ;;  %v2438_v55 = vsub.s32 4294967266, %v2433_v35  ;;  %v2448_v21 = vsub.s32 4, %v5058_v57  ;;  %vm1043_vm0 = vcmp.lt.s32.totalorder %v1023_v22, 2 }
 0x267   : > { %vm5106_vm1 = vcmp.le.f32.partialorder %v2362_v61, 0.7853982  ;;  %v2435_v9 = vshll.u32 %v5066_v39, %v2433_v35  ;;  %v1053_v31 = vsel %vm1043_vm0, %v1050_v42, %v1052_v12  ;;  %v1056_v7 = vsel %vm1044_vm9, %v1038_v30, %v1055_v50 }
 0x268   : > { %v3441_v44 = vadd.s32 4294967169, %v2470_v15  ;;  %v2436_v10 = vshrl.u32 %v2418_v28, %v2434_v34  ;;  %v2439_v36 = vadd.s32 127, %v2438_v55  ;;  %v1049_v20 = vsel %vm1043_vm0, %v1046_v38, %v1048_v51 }
 0x269   : > { %v1057_v16 = vsel %vm1043_vm0, %v1054_v53, %v1056_v7  ;;  %v3750_v0 = vpop.eup %3749  ;;  %v5117_v61 = vmul.u32.u64.low %v5073_v60, %v1053_v31  ;;  %v5118_v40 = vmul.u32.u64.high %v5073_v60, %v1053_v31, %v5117_v61  ;;  %vm1005_vm2 = vcmp.eq.s32.totalorder %v5064_v63, 2 }
 0x26a   : > { %v5113_v27 = vmul.u32.u64.low %v5073_v60, %v1057_v16  ;;  %v5114_v62 = vmul.u32.u64.high %v5073_v60, %v1057_v16, %v5113_v27  ;;  %v3752_v29 = vpop.eup %3751  ;;  %v1006_v39 = vxor.u32 2147483648, %v3750_v0  ;;  %v2437_v41 = vor.u32 %v2436_v10, %v2435_v9 }
 0x26b   : > { %v2440_v22 = vshll.u32 %v2439_v36, 23  ;;  %v2476_v59 = vadd.s32 1, %v3441_v44  ;;  %v1003_v13 = vxor.u32 2147483648, %v3752_v29  ;;  %v2473_v28 = vand.u32 8388607, %v2466_v6 }
 0x26c   : > { %v5125_v33 = vmul.f32 30.0, %v5070_v32  ;;  %v1007_v47 = vsel %vm1005_vm2, %v1006_v39, %v3752_v29  ;;  %v2449_v14 = vsel %vm2364_vm10, %v2448_v21, %v5058_v57  ;;  %v1065_v26 = vmul.u32 %v5073_v60, %v1049_v20 }
 0x26d   : > { %v2441_v30 = vor.u32 4788187, %v2440_v22  ;;  %vm2477_vm3 = vcmp.gt.s32.totalorder %v2476_v59, 0  ;;  %v1004_v19 = vsel %vm1002_vm12, %v3750_v0, %v1003_v13  ;;  %vm1067_vm4 = vc.u32 %v5114_v62, %v5117_v61 }
 0x26e   : > { %v1068_v15 = vadd.s32 1, %v5118_v40  ;;  %v1008_v32 = vsel %vm1001_vm14, %v1004_v19, %v1007_v47  ;;  %v2444_v38 = vcvt.s32.f32 %v2437_v41  ;;  %v2478_v42 = vsel %vm2477_vm3, %v2476_v59, 0 }
 0x26f   : > { %v2442_v37 = vand.u32 2147483647, %v2441_v30  ;;  %v1009_v57 = vsel %vm998_vm15, nan, %v1008_v32  ;;  %v2474_v3 = vor.u32 8388608, %v2473_v28  ;;  %v2480_v53 = vand.u32 31, %v2478_v42 }
 0x270   : > { %v1069_v23 = vsel %vm1067_vm4, %v1068_v15, %v5118_v40  ;;  %3198 = vst [vmem:[%s4521_s5 + $0x20] sm:$0xff] %v1009_v57  ;;  %v2451_v35 = vsel %vm5106_vm1, 0, %v2449_v14  ;;  %v1117_v12 = vand.u32 2139095040, %v5125_v33  ;;  %v5145_v63 = vshrl.u32 %v2478_v42, 5 }
 0x271   : > { %v2445_v60 = vmul.f32 %v2444_v38, %v2442_v37  ;;  %v1070_v51 = vadd.s32 %v1069_v23, %v1065_v26  ;;  %v2481_v50 = vsub.s32 32, %v2480_v53  ;;  %v2483_v34 = vshll.u32 %v3972_v48, %v2480_v53 }
 0x272   : > { %v2486_v17 = vshll.u32 %v3973_v52, %v2480_v53  ;;  %v2489_v9 = vshll.u32 %v3974_v54, %v2480_v53  ;;  %v2492_v31 = vshll.u32 %v3975_v56, %v2480_v53  ;;  %v2495_v36 = vshll.u32 %v3976_v58, %v2480_v53 }
 0x273   : > { %v2446_v55 = vxor.u32 2147483648, %v2445_v60  ;;  %v1071_v21 = vadd.s32 536870912, %v1070_v51  ;;  %v2484_v7 = vshrl.u32 %v3973_v52, %v2481_v50  ;;  %v2487_v44 = vshrl.u32 %v3974_v54, %v2481_v50 }
 0x274   : > { %v2490_v10 = vshrl.u32 %v3975_v56, %v2481_v50  ;;  %v2493_v0 = vshrl.u32 %v3976_v58, %v2481_v50  ;;  %v2496_v27 = vshrl.u32 %v3977_v2, %v2481_v50  ;;  %v1118_v41 = vshrl.u32 %v1117_v12, 23 }
 0x275   : > { %v2447_v20 = vsel %vm2364_vm10, %v2446_v55, %v2445_v60  ;;  %v5157_v16 = vshrl.u32 %v1071_v21, 30  ;;  %v2485_v29 = vor.u32 %v2484_v7, %v2483_v34  ;;  %v2488_v39 = vor.u32 %v2487_v44, %v2486_v17  ;;  %v5201_v44 = vpop.f32.mrb[9].mxu0 }
 0x276   : > { %v2450_v40 = vsel %vm5106_vm1, %v4909_v1, %v2447_v20  ;;  %v2494_v59 = vor.u32 %v2493_v0, %v2492_v31  ;;  %v2491_v13 = vor.u32 %v2490_v10, %v2489_v9  ;;  %v2497_v28 = vor.u32 %v2496_v27, %v2495_v36 }
 0x277   : > { %3753 = vcosq.f32 %v2450_v40  ;;  %v1073_v22 = vshll.u32 %v5157_v16, 30  ;;  %v2455_v47 = vadd.s32 3, %v2451_v35  ;;  %vm2498_vm5 = vcmp.lt.s32.totalorder %v5145_v63, 1 }
 0x278   : > { %3755 = vsinq.f32 %v2450_v40  ;;  %v2514_v14 = vshll.u32 %v2474_v3, 8  ;;  %v2482_v19 = vshrl.u32 %v3972_v48, %v2481_v50  ;;  %vm2501_vm6 = vcmp.lt.s32.totalorder %v5145_v63, 4 }
 0x279   : > { %v5165_v30 = vsub.s32 %v1070_v51, %v1073_v22  ;;  %v2506_v49 = vsel %vm2498_vm5, %v2485_v29, %v2488_v39  ;;  %v3389_v26 = vadd.s32 4294967169, %v1118_v41  ;;  %vm2499_vm7 = vcmp.lt.s32.totalorder %v5145_v63, 2 }
 0x27a   : > { %vm2500_vm8 = vcmp.lt.s32.totalorder %v5145_v63, 3  ;;  %v2507_v32 = vsel %vm2501_vm6, %v2494_v59, 920167782  ;;  %v2503_v37 = vsel %vm2501_vm6, %v2491_v13, 2102212464  ;;  %v2510_v42 = vsel %vm2498_vm5, %v2488_v39, %v2491_v13 }
 0x27b   : > { %v1076_v15 = vsub.s32 0, %v5165_v30  ;;  %v2508_v38 = vsel %vm2500_vm8, %v2491_v13, %v2507_v32  ;;  %v2511_v57 = vsel %vm2501_vm6, %v2497_v28, 1326507024  ;;  %v2456_v23 = vand.u32 3, %v2455_v47 }
 0x27c   : > { %v2509_v53 = vsel %vm2499_vm7, %v2506_v49, %v2508_v38  ;;  %v2512_v60 = vsel %vm2500_vm8, %v2494_v59, %v2511_v57  ;;  %vm2454_vm9 = vweird.f32 %v4909_v1  ;;  %vm1012_vm10 = vcmp.lt.s32.totalorder %v5016_v18, 0 }
 0x27d   : > { %v3386_v3 = vmin.u32 %v1076_v15, %v5165_v30  ;;  %v2513_v35 = vsel %vm2499_vm7, %v2510_v42, %v2512_v60  ;;  %v5188_v51 = vmul.u32.u64.low %v2514_v14, %v2509_v53  ;;  %v5189_v12 = vmul.u32.u64.high %v2514_v14, %v2509_v53, %v5188_v51 }
 0x27e   : > { %v2502_v34 = vsel %vm2498_vm5, %v2482_v19, %v2485_v29  ;;  %v2504_v17 = vsel %vm2500_vm8, %v2488_v39, %v2503_v37  ;;  %v1114_v55 = vand.u32 2147483647, %v5125_v33  ;;  %v1096_v21 = vsub.s32 4, %v5157_v16 }
 0x27f   : > { %v1078_v50 = vclz %v3386_v3  ;;  %v5198_v9 = vmul.u32.u64.low %v2514_v14, %v2513_v35  ;;  %v5199_v31 = vmul.u32.u64.high %v2514_v14, %v2513_v35, %v5198_v9  ;;  %v1124_v7 = vadd.s32 1, %v3389_v26 }
 0x280   : > { %vm2457_vm11 = vcmp.lt.s32.totalorder %v2456_v23, 2  ;;  %vm2458_vm12 = vcmp.eq.s32.totalorder %v2456_v23, 0  ;;  %vm2461_vm13 = vcmp.eq.s32.totalorder %v2456_v23, 2  ;;  %v2505_v27 = vsel %vm2499_vm7, %v2502_v34, %v2504_v17 }
 0x281   : > { %v3754_v10 = vpop.eup %3753  ;;  %v3387_v36 = vadd.s32 4294967294, %v1078_v50  ;;  %v2524_v40 = vadd.s32 1, %v5189_v12  ;;  %vm1125_vm14 = vcmp.gt.s32.totalorder %v1124_v7, 0  ;;  %v1066_v39 = vadd.s32 %v5117_v61, %v5114_v62 }
 0x282   : > { %v3756_v20 = vpop.eup %3755  ;;  %v2462_v0 = vxor.u32 2147483648, %v3754_v10  ;;  %v1126_v41 = vsel %vm1125_vm14, %v1124_v7, 0  ;;  %v1097_v13 = vsel %vm1012_vm10, %v1096_v21, %v5157_v16  ;;  %vm2523_vm0 = vc.u32 %v5199_v31, %v5188_v51 }
 0x283   : > { %v2459_v29 = vxor.u32 2147483648, %v3756_v20  ;;  %vm3388_vm15 = vcmp.lt.s32.totalorder %v3387_v36, 0  ;;  %v2521_v19 = vmul.u32 %v2514_v14, %v2505_v27  ;;  %v2525_v61 = vsel %vm2523_vm0, %v2524_v40, %v5189_v12 }
 0x284   : > { %v2463_v22 = vsel %vm2461_vm13, %v2462_v0, %v3756_v20  ;;  %v1081_v59 = vsel %vm3388_vm15, 0, %v3387_v36  ;;  %v1128_v26 = vand.u32 31, %v1126_v41  ;;  %vm5222_vm1 = vcmp.le.f32.partialorder %v1010_v46, 0.7853982 }
 0x285   : > { %v2460_v63 = vsel %vm2458_vm12, %v3754_v10, %v2459_v29  ;;  %v1082_v28 = vsub.s32 32, %v1081_v59  ;;  %v1086_v47 = vsub.s32 4294967266, %v1081_v59  ;;  %v1083_v62 = vshll.u32 %v5165_v30, %v1081_v59 }
 0x286   : > { %v2464_v49 = vsel %vm2457_vm11, %v2460_v63, %v2463_v22  ;;  %v2526_v37 = vadd.s32 %v2525_v61, %v2521_v19  ;;  %v1129_v14 = vsub.s32 32, %v1128_v26  ;;  %v448_v30 = vadd.f32 %v4749_v11, %v4192_v4 }
 0x287   : > { %v2465_v15 = vsel %vm2454_vm9, nan, %v2464_v49  ;;  %v1084_v32 = vshrl.u32 %v1066_v39, %v1082_v28  ;;  %v1087_v16 = vadd.s32 127, %v1086_v47  ;;  %v1121_v1 = vand.u32 8388607, %v1114_v55 }
 0x288   : > { %3212 = vst [vmem:[%s4521_s5 + $0x90] sm:$0xff] %v2465_v15  ;;  %v2527_v23 = vadd.s32 536870912, %v2526_v37  ;;  %v1099_v3 = vsel %vm5222_vm1, 0, %v1097_v13  ;;  %v1131_v53 = vshll.u32 %v3972_v48, %v1128_v26  ;;  %v1132_v46 = vshrl.u32 %v3973_v52, %v1129_v14 }
 0x289   : > { %v1085_v42 = vor.u32 %v1084_v32, %v1083_v62  ;;  %v1088_v57 = vshll.u32 %v1087_v16, 23  ;;  %v1135_v60 = vshrl.u32 %v3974_v54, %v1129_v14  ;;  %v1138_v50 = vshrl.u32 %v3975_v56, %v1129_v14 }
 0x28a   : > { %v2528_v12 = vshrl.u32 %v2527_v23, 30  ;;  %v1141_v11 = vshrl.u32 %v3976_v58, %v1129_v14  ;;  %v1127_v34 = vshrl.u32 %v1126_v41, 5  ;;  %v1134_v17 = vshll.u32 %v3973_v52, %v1128_v26 }
 0x28b   : > { %v1089_v35 = vor.u32 4788187, %v1088_v57  ;;  %v1137_v21 = vshll.u32 %v3974_v54, %v1128_v26  ;;  %v1140_v9 = vshll.u32 %v3975_v56, %v1128_v26  ;;  %v1092_v10 = vcvt.s32.f32 %v1085_v42 }
 0x28c   : > { %v2529_v36 = vshll.u32 %v2528_v12, 30  ;;  %v1133_v20 = vor.u32 %v1132_v46, %v1131_v53  ;;  %v1136_v0 = vor.u32 %v1135_v60, %v1134_v17  ;;  %v1143_v40 = vshll.u32 %v3976_v58, %v1128_v26 }
 0x28d   : > { %v1090_v7 = vand.u32 2147483647, %v1089_v35  ;;  %v1142_v27 = vor.u32 %v1141_v11, %v1140_v9  ;;  %v1144_v29 = vshrl.u32 %v3977_v2, %v1129_v14  ;;  %v1103_v22 = vadd.s32 3, %v1099_v3  ;;  %v5258_v3 = vpop.f32.mrb[9].mxu1 }
 0x28e   : > { %v5242_v59 = vsub.s32 %v2526_v37, %v2529_v36  ;;  %v1139_v41 = vor.u32 %v1138_v50, %v1137_v21  ;;  %v1122_v13 = vor.u32 8388608, %v1121_v1  ;;  %v1130_v63 = vshrl.u32 %v3972_v48, %v1129_v14 }
 0x28f   : > { %v1093_v39 = vmul.f32 %v1092_v10, %v1090_v7  ;;  %v1145_v28 = vor.u32 %v1144_v29, %v1143_v40  ;;  %v5245_v47 = vmul.f32 30.0, %v448_v30  ;;  %vm1146_vm2 = vcmp.lt.s32.totalorder %v1127_v34, 1 }
 0x290   : > { %v2532_v49 = vsub.s32 0, %v5242_v59  ;;  %vm1149_vm3 = vcmp.lt.s32.totalorder %v1127_v34, 4  ;;  %vm1147_vm4 = vcmp.lt.s32.totalorder %v1127_v34, 2  ;;  %vm1148_vm5 = vcmp.lt.s32.totalorder %v1127_v34, 3 }
 0x291   : > { %v1094_v19 = vxor.u32 2147483648, %v1093_v39  ;;  %v1154_v62 = vsel %vm1146_vm2, %v1133_v20, %v1136_v0  ;;  %v1155_v61 = vsel %vm1149_vm3, %v1142_v27, 920167782  ;;  %v1151_v32 = vsel %vm1149_vm3, %v1139_v41, 2102212464 }
 0x292   : > { %v3442_v15 = vmin.u32 %v2532_v49, %v5242_v59  ;;  %v1156_v16 = vsel %vm1148_vm5, %v1139_v41, %v1155_v61  ;;  %v1158_v30 = vsel %vm1146_vm2, %v1136_v0, %v1139_v41  ;;  %v1159_v42 = vsel %vm1149_vm3, %v1145_v28, 1326507024 }
 0x293   : > { %v1095_v26 = vsel %vm1012_vm10, %v1094_v19, %v1093_v39  ;;  %v1157_v14 = vsel %vm1147_vm4, %v1154_v62, %v1156_v16  ;;  %v2552_v23 = vsub.s32 4, %v2528_v12  ;;  %v1162_v1 = vshll.u32 %v1122_v13, 8 }
 0x294   : > { %v1098_v37 = vsel %vm5222_vm1, %v5016_v18, %v1095_v26  ;;  %v2534_v57 = vclz %v3442_v15  ;;  %v1150_v53 = vsel %vm1146_vm2, %v1130_v63, %v1133_v20  ;;  %v1152_v46 = vsel %vm1148_vm5, %v1136_v0, %v1151_v32 }
 0x295   : > { %3757 = vcosq.f32 %v1098_v37  ;;  %v1160_v60 = vsel %vm1148_vm5, %v1142_v27, %v1159_v42  ;;  %v5264_v50 = vmul.u32.u64.low %v1162_v1, %v1157_v14  ;;  %v5265_v11 = vmul.u32.u64.high %v1162_v1, %v1157_v14, %v5264_v50 }
 0x296   : > { %3759 = vsinq.f32 %v1098_v37  ;;  %v3443_v38 = vadd.s32 4294967294, %v2534_v57  ;;  %v1161_v35 = vsel %vm1147_vm4, %v1158_v30, %v1160_v60  ;;  %vm2468_vm6 = vcmp.lt.s32.totalorder %v5060_v25, 0 }
 0x297   : > { %v5268_v17 = vmul.u32.u64.low %v1162_v1, %v1161_v35  ;;  %v5269_v21 = vmul.u32.u64.high %v1162_v1, %v1161_v35, %v5268_v17  ;;  %v2573_v9 = vand.u32 2139095040, %v5245_v47  ;;  %v2553_v7 = vsel %vm2468_vm6, %v2552_v23, %v2528_v12 }
 0x298   : > { %vm3444_vm7 = vcmp.lt.s32.totalorder %v3443_v38, 0  ;;  %v1153_v10 = vsel %vm1147_vm4, %v1150_v53, %v1152_v46  ;;  %v1104_v36 = vand.u32 3, %v1103_v22  ;;  %vm5277_vm8 = vcmp.le.f32.partialorder %v2466_v6, 0.7853982 }
 0x299   : > { %v2537_v0 = vsel %vm3444_vm7, 0, %v3443_v38  ;;  %v2574_v27 = vshrl.u32 %v2573_v9, 23  ;;  %v2522_v40 = vadd.s32 %v5188_v51, %v5199_v31  ;;  %v1172_v41 = vadd.s32 1, %v5265_v11 }
 0x29a   : > { %v2538_v29 = vsub.s32 32, %v2537_v0  ;;  %v2542_v39 = vsub.s32 4294967266, %v2537_v0  ;;  %vm1102_vm9 = vweird.f32 %v5016_v18  ;;  %v2555_v12 = vsel %vm5277_vm8, 0, %v2553_v7 }
 0x29b   : > { %v1169_v34 = vmul.u32 %v1162_v1, %v1153_v10  ;;  %vm1171_vm10 = vc.u32 %v5269_v21, %v5264_v50  ;;  %v3445_v6 = vadd.s32 4294967169, %v2574_v27  ;;  %v2539_v22 = vshll.u32 %v5242_v59, %v2537_v0 }
 0x29c   : > { %v2540_v13 = vshrl.u32 %v2522_v40, %v2538_v29  ;;  %v2543_v63 = vadd.s32 127, %v2542_v39  ;;  %v1173_v28 = vsel %vm1171_vm10, %v1172_v41, %v5265_v11  ;;  %vm1105_vm11 = vcmp.lt.s32.totalorder %v1104_v36, 2 }
 0x29d   : > { %v1174_v51 = vadd.s32 %v1173_v28, %v1169_v34  ;;  %v2570_v31 = vand.u32 2147483647, %v5245_v47  ;;  %v2580_v19 = vadd.s32 1, %v3445_v6  ;;  %vm1106_vm12 = vcmp.eq.s32.totalorder %v1104_v36, 0 }
 0x29e   : > { %v2541_v62 = vor.u32 %v2540_v13, %v2539_v22  ;;  %v2544_v61 = vshll.u32 %v2543_v63, 23  ;;  %v408_v26 = vadd.f32 %v4882_v8, %v4194_v5  ;;  %v2559_v16 = vadd.s32 3, %v2555_v12 }
 0x29f   : > { %v3758_v49 = vpop.eup %3757  ;;  %v1175_v59 = vadd.s32 536870912, %v1174_v51  ;;  %vm2581_vm13 = vcmp.gt.s32.totalorder %v2580_v19, 0  ;;  %vm1109_vm14 = vcmp.eq.s32.totalorder %v1104_v36, 2  ;;  %v2577_v23 = vand.u32 8388607, %v2570_v31 }
 0x2a0   : > { %v3760_v15 = vpop.eup %3759  ;;  %v1110_v32 = vxor.u32 2147483648, %v3758_v49  ;;  %v2545_v14 = vor.u32 4788187, %v2544_v61  ;;  %v2582_v30 = vsel %vm2581_vm13, %v2580_v19, 0  ;;  %v2548_v8 = vcvt.s32.f32 %v2541_v62 }
 0x2a1   : > { %v1107_v37 = vxor.u32 2147483648, %v3760_v15  ;;  %v1176_v57 = vshrl.u32 %v1175_v59, 30  ;;  %v2584_v1 = vand.u32 31, %v2582_v30  ;;  %v5296_v60 = vmul.f32 30.0, %v408_v26 }
 0x2a2   : > { %v1111_v42 = vsel %vm1109_vm14, %v1110_v32, %v3760_v15  ;;  %v2546_v46 = vand.u32 2147483647, %v2545_v14  ;;  %v5299_v35 = vand.u32 3, %v2559_v16  ;;  %vm1116_vm15 = vcmp.lt.s32.totalorder %v5125_v33, 0 }
 0x2a3   : > { %v1108_v53 = vsel %vm1106_vm12, %v3758_v49, %v1107_v37  ;;  %v1177_v11 = vshll.u32 %v1176_v57, 30  ;;  %v2585_v17 = vsub.s32 32, %v2584_v1  ;;  %v1170_v10 = vadd.s32 %v5264_v50, %v5269_v21 }
 0x2a4   : > { %v1112_v38 = vsel %vm1105_vm11, %v1108_v53, %v1111_v42  ;;  %v2549_v7 = vmul.f32 %v2548_v8, %v2546_v46  ;;  %v2587_v0 = vshll.u32 %v3972_v48, %v2584_v1  ;;  %v2578_v40 = vor.u32 8388608, %v2577_v23 }
 0x2a5   : > { %v1113_v9 = vsel %vm1102_vm9, nan, %v1112_v38  ;;  %v5307_v27 = vsub.s32 %v1174_v51, %v1177_v11  ;;  %v2588_v36 = vshrl.u32 %v3973_v52, %v2585_v17  ;;  %v2590_v29 = vshll.u32 %v3973_v52, %v2584_v1 }
 0x2a6   : > { %3199 = vst [vmem:[%s4521_s5 + $0x28] sm:$0xff] %v1113_v9  ;;  %v2550_v39 = vxor.u32 2147483648, %v2549_v7  ;;  %v2591_v41 = vshrl.u32 %v3974_v54, %v2585_v17  ;;  %v2593_v12 = vshll.u32 %v3974_v54, %v2584_v1  ;;  %v1221_v18 = vand.u32 2139095040, %v5296_v60 }
 0x2a7   : > { %v1180_v34 = vsub.s32 0, %v5307_v27  ;;  %v1200_v50 = vsub.s32 4, %v1176_v57  ;;  %v2583_v21 = vshrl.u32 %v2582_v30, 5  ;;  %v2594_v6 = vshrl.u32 %v3975_v56, %v2585_v17 }
 0x2a8   : > { %v2551_v22 = vsel %vm2468_vm6, %v2550_v39, %v2549_v7  ;;  %v2589_v13 = vor.u32 %v2588_v36, %v2587_v0  ;;  %v2596_v63 = vshll.u32 %v3975_v56, %v2584_v1  ;;  %v2597_v28 = vshrl.u32 %v3976_v58, %v2585_v17 }
 0x2a9   : > { %v2554_v51 = vsel %vm5277_vm8, %v5060_v25, %v2551_v22  ;;  %v3390_v19 = vmin.u32 %v1180_v34, %v5307_v27  ;;  %v2592_v49 = vor.u32 %v2591_v41, %v2590_v29  ;;  %v2595_v62 = vor.u32 %v2594_v6, %v2593_v12 }
 0x2aa   : > { %3761 = vcosq.f32 %v2554_v51  ;;  %v2598_v61 = vor.u32 %v2597_v28, %v2596_v63  ;;  %v2599_v26 = vshll.u32 %v3976_v58, %v2584_v1  ;;  %v2600_v15 = vshrl.u32 %v3977_v2, %v2585_v17  ;;  %v5360_v28 = vpop.f32.mrb[10].mxu0 }
 0x2ab   : > { %3763 = vsinq.f32 %v2554_v51  ;;  %vm5328_vm0 = vcmp.le.f32.partialorder %v1114_v55, 0.7853982  ;;  %v1182_v16 = vclz %v3390_v19  ;;  %v5332_v20 = vshll.u32 %v2578_v40, 8 }
 0x2ac   : > { %v1218_v59 = vand.u32 2147483647, %v5296_v60  ;;  %v1201_v37 = vsel %vm1116_vm15, %v1200_v50, %v1176_v57  ;;  %v2586_v14 = vshrl.u32 %v3972_v48, %v2585_v17  ;;  %v2601_v30 = vor.u32 %v2600_v15, %v2599_v26 }
 0x2ad   : > { %v1222_v42 = vshrl.u32 %v1221_v18, 23  ;;  %v3391_v23 = vadd.s32 4294967294, %v1182_v16  ;;  %vm2602_vm1 = vcmp.lt.s32.totalorder %v2583_v21, 1  ;;  %vm2604_vm2 = vcmp.lt.s32.totalorder %v2583_v21, 3 }
 0x2ae   : > { %vm2605_vm3 = vcmp.lt.s32.totalorder %v2583_v21, 4  ;;  %v2610_v1 = vsel %vm2602_vm1, %v2589_v13, %v2592_v49  ;;  %v2614_v46 = vsel %vm2602_vm1, %v2592_v49, %v2595_v62  ;;  %vm2603_vm5 = vcmp.lt.s32.totalorder %v2583_v21, 2 }
 0x2af   : > { %v2607_v55 = vsel %vm2605_vm3, %v2595_v62, 2102212464  ;;  %v2611_v53 = vsel %vm2605_vm3, %v2598_v61, 920167782  ;;  %vm3392_vm4 = vcmp.lt.s32.totalorder %v3391_v23, 0  ;;  %vm2561_vm6 = vcmp.lt.s32.totalorder %v5299_v35, 2 }
 0x2b0   : > { %v2612_v8 = vsel %vm2604_vm2, %v2595_v62, %v2611_v53  ;;  %v2615_v38 = vsel %vm2605_vm3, %v2601_v30, 1326507024  ;;  %v1185_v57 = vsel %vm3392_vm4, 0, %v3391_v23  ;;  %v2606_v11 = vsel %vm2602_vm1, %v2586_v14, %v2589_v13 }
 0x2b1   : > { %v2613_v17 = vsel %vm2603_vm5, %v2610_v1, %v2612_v8  ;;  %v2616_v9 = vsel %vm2604_vm2, %v2598_v61, %v2615_v38  ;;  %vm2558_vm7 = vweird.f32 %v5060_v25  ;;  %v1186_v7 = vsub.s32 32, %v1185_v57 }
 0x2b2   : > { %v1190_v0 = vsub.s32 4294967266, %v1185_v57  ;;  %v2608_v40 = vsel %vm2604_vm2, %v2592_v49, %v2607_v55  ;;  %v2617_v36 = vsel %vm2603_vm5, %v2614_v46, %v2616_v9  ;;  %v1187_v18 = vshll.u32 %v5307_v27, %v1185_v57 }
 0x2b3   : > { %v5346_v29 = vmul.u32.u64.low %v5332_v20, %v2617_v36  ;;  %v5347_v39 = vmul.u32.u64.high %v5332_v20, %v2617_v36, %v5346_v29  ;;  %v5350_v41 = vmul.u32.u64.low %v5332_v20, %v2613_v17  ;;  %v5351_v12 = vmul.u32.u64.high %v5332_v20, %v2613_v17, %v5350_v41 }
 0x2b4   : > { %v1188_v34 = vshrl.u32 %v1170_v10, %v1186_v7  ;;  %v1191_v50 = vadd.s32 127, %v1190_v0  ;;  %v3393_v6 = vadd.s32 4294967169, %v1222_v42  ;;  %v3762_v22 = vpop.eup %3761  ;;  %vm2562_vm8 = vcmp.eq.s32.totalorder %v5299_v35, 0 }
 0x2b5   : > { %vm2565_vm9 = vcmp.eq.s32.totalorder %v5299_v35, 2  ;;  %v1203_v13 = vsel %vm5328_vm0, 0, %v1201_v37  ;;  %v2609_v63 = vsel %vm2603_vm5, %v2606_v11, %v2608_v40  ;;  %v3764_v51 = vpop.eup %3763  ;;  %v2566_v19 = vxor.u32 2147483648, %v3762_v22 }
 0x2b6   : > { %v1189_v49 = vor.u32 %v1188_v34, %v1187_v18  ;;  %v1192_v62 = vshll.u32 %v1191_v50, 23  ;;  %v1228_v27 = vadd.s32 1, %v3393_v6  ;;  %v2563_v10 = vxor.u32 2147483648, %v3764_v51 }
 0x2b7   : > { %vm2627_vm10 = vc.u32 %v5347_v39, %v5350_v41  ;;  %v2628_v61 = vadd.s32 1, %v5351_v12  ;;  %v5367_v26 = vand.u32 8388607, %v1218_v59  ;;  %v2567_v21 = vsel %vm2565_vm9, %v2566_v19, %v3764_v51 }
 0x2b8   : > { %v1193_v15 = vor.u32 4788187, %v1192_v62  ;;  %v2625_v16 = vmul.u32 %v5332_v20, %v2609_v63  ;;  %vm1229_vm11 = vcmp.gt.s32.totalorder %v1228_v27, 0  ;;  %v2564_v37 = vsel %vm2562_vm8, %v3762_v22, %v2563_v10 }
 0x2b9   : > { %v1207_v14 = vadd.s32 3, %v1203_v13  ;;  %v2629_v30 = vsel %vm2627_vm10, %v2628_v61, %v5351_v12  ;;  %v1230_v42 = vsel %vm1229_vm11, %v1228_v27, 0  ;;  %v2568_v23 = vsel %vm2561_vm6, %v2564_v37, %v2567_v21 }
 0x2ba   : > { %v1194_v55 = vand.u32 2147483647, %v1193_v15  ;;  %v1196_v1 = vcvt.s32.f32 %v1189_v49  ;;  %v2630_v53 = vadd.s32 %v2629_v30, %v2625_v16  ;;  %v2569_v46 = vsel %vm2558_vm7, nan, %v2568_v23 }
 0x2bb   : > { %v1232_v8 = vand.u32 31, %v1230_v42  ;;  %3213 = vst [vmem:[%s4521_s5 + $0x98] sm:$0xff] %v2569_v46  ;;  %v450_v57 = vadd.f32 %v4941_v43, %v4194_v5  ;;  %v5382_v11 = vadd.f32 %v5043_v24, %v4192_v4  ;;  %v5384_v17 = vand.u32 3, %v1207_v14 }
 0x2bc   : > { %v1197_v20 = vmul.f32 %v1196_v1, %v1194_v55  ;;  %v2631_v38 = vadd.s32 536870912, %v2630_v53  ;;  %v1226_v35 = vor.u32 8388608, %v5367_v26  ;;  %v1231_v9 = vshrl.u32 %v1230_v42, 5 }
 0x2bd   : > { %v1233_v7 = vsub.s32 32, %v1232_v8  ;;  %v1235_v40 = vshll.u32 %v3972_v48, %v1232_v8  ;;  %v1238_v36 = vshll.u32 %v3973_v52, %v1232_v8  ;;  %v1241_v12 = vshll.u32 %v3974_v54, %v1232_v8 }
 0x2be   : > { %v1198_v0 = vxor.u32 2147483648, %v1197_v20  ;;  %v2632_v25 = vshrl.u32 %v2631_v38, 30  ;;  %v1244_v50 = vshll.u32 %v3975_v56, %v1232_v8  ;;  %vm2572_vm12 = vcmp.lt.s32.totalorder %v5245_v47, 0 }
 0x2bf   : > { %v1236_v29 = vshrl.u32 %v3973_v52, %v1233_v7  ;;  %v1239_v43 = vshrl.u32 %v3974_v54, %v1233_v7  ;;  %v1242_v24 = vshrl.u32 %v3975_v56, %v1233_v7  ;;  %v1245_v6 = vshrl.u32 %v3976_v58, %v1233_v7 }
 0x2c0   : > { %v1199_v18 = vsel %vm1116_vm15, %v1198_v0, %v1197_v20  ;;  %v2633_v34 = vshll.u32 %v2632_v25, 30  ;;  %v5403_v62 = vmul.f32 30.0, %v450_v57  ;;  %v1247_v27 = vshll.u32 %v3976_v58, %v1232_v8 }
 0x2c1   : > { %v1202_v22 = vsel %vm5328_vm0, %v5125_v33, %v1199_v18  ;;  %v1237_v13 = vor.u32 %v1236_v29, %v1235_v40  ;;  %v1240_v63 = vor.u32 %v1239_v43, %v1238_v36  ;;  %v1243_v51 = vor.u32 %v1242_v24, %v1241_v12  ;;  %v5433_v36 = vpop.f32.mrb[10].mxu1 }
 0x2c2   : > { %3765 = vcosq.f32 %v1202_v22  ;;  %v5401_v19 = vsub.s32 %v2630_v53, %v2633_v34  ;;  %v1246_v49 = vor.u32 %v1245_v6, %v1244_v50  ;;  %v1248_v10 = vshrl.u32 %v3977_v2, %v1233_v7 }
 0x2c3   : > { %3767 = vsinq.f32 %v1202_v22  ;;  %vm1250_vm13 = vcmp.lt.s32.totalorder %v1231_v9, 1  ;;  %vm5409_vm14 = vcmp.le.f32.partialorder %v2570_v31, 0.7853982  ;;  %vm1251_vm15 = vcmp.lt.s32.totalorder %v1231_v9, 2 }
 0x2c4   : > { %v2636_v61 = vsub.s32 0, %v5401_v19  ;;  %vm1252_vm0 = vcmp.lt.s32.totalorder %v1231_v9, 3  ;;  %vm1253_vm1 = vcmp.lt.s32.totalorder %v1231_v9, 4  ;;  %v1249_v26 = vor.u32 %v1248_v10, %v1247_v27 }
 0x2c5   : > { %v1255_v21 = vsel %vm1253_vm1, %v1243_v51, 2102212464  ;;  %v1258_v15 = vsel %vm1250_vm13, %v1237_v13, %v1240_v63  ;;  %v1259_v16 = vsel %vm1253_vm1, %v1246_v49, 920167782  ;;  %v2656_v14 = vsub.s32 4, %v2632_v25 }
 0x2c6   : > { %v3446_v37 = vmin.u32 %v2636_v61, %v5401_v19  ;;  %v1234_v30 = vshrl.u32 %v3972_v48, %v1233_v7  ;;  %v1260_v31 = vsel %vm1252_vm0, %v1243_v51, %v1259_v16  ;;  %v1262_v23 = vsel %vm1250_vm13, %v1240_v63, %v1243_v51 }
 0x2c7   : > { %v1261_v42 = vsel %vm1251_vm15, %v1258_v15, %v1260_v31  ;;  %v1263_v55 = vsel %vm1253_vm1, %v1249_v26, 1326507024  ;;  %v1266_v1 = vshll.u32 %v1226_v35, 8  ;;  %vm1209_vm2 = vcmp.lt.s32.totalorder %v5384_v17, 2 }
 0x2c8   : > { %v2638_v53 = vclz %v3446_v37  ;;  %v1254_v46 = vsel %vm1250_vm13, %v1234_v30, %v1237_v13  ;;  %v1256_v8 = vsel %vm1252_vm0, %v1240_v63, %v1255_v21  ;;  %vm1206_vm3 = vweird.f32 %v5125_v33 }
 0x2c9   : > { %vm1210_vm4 = vcmp.eq.s32.totalorder %v5384_v17, 0  ;;  %v1264_v20 = vsel %vm1252_vm0, %v1246_v49, %v1263_v55  ;;  %v5426_v38 = vmul.u32.u64.low %v1266_v1, %v1261_v42  ;;  %v5427_v57 = vmul.u32.u64.high %v1266_v1, %v1261_v42, %v5426_v38 }
 0x2ca   : > { %v3447_v7 = vadd.s32 4294967294, %v2638_v53  ;;  %v2657_v35 = vsel %vm2572_vm12, %v2656_v14, %v2632_v25  ;;  %v1265_v0 = vsel %vm1251_vm15, %v1262_v23, %v1264_v20  ;;  %v2677_v40 = vand.u32 2139095040, %v5403_v62 }
 0x2cb   : > { %vm1213_vm5 = vcmp.eq.s32.totalorder %v5384_v17, 2  ;;  %v1257_v29 = vsel %vm1251_vm15, %v1254_v46, %v1256_v8  ;;  %v5437_v43 = vmul.u32.u64.low %v1266_v1, %v1265_v0  ;;  %v5438_v12 = vmul.u32.u64.high %v1266_v1, %v1265_v0, %v5437_v43 }
 0x2cc   : > { %v3766_v24 = vpop.eup %3765  ;;  %v2626_v18 = vadd.s32 %v5350_v41, %v5347_v39  ;;  %vm3448_vm6 = vcmp.lt.s32.totalorder %v3447_v7, 0  ;;  %v2674_v25 = vand.u32 2147483647, %v5403_v62  ;;  %v2678_v34 = vshrl.u32 %v2677_v40, 23 }
 0x2cd   : > { %v3768_v50 = vpop.eup %3767  ;;  %v1214_v6 = vxor.u32 2147483648, %v3766_v24  ;;  %v2641_v22 = vsel %vm3448_vm6, 0, %v3447_v7  ;;  %v2659_v13 = vsel %vm5409_vm14, 0, %v2657_v35  ;;  %v1276_v9 = vadd.s32 1, %v5427_v57 }
 0x2ce   : > { %v1211_v63 = vxor.u32 2147483648, %v3768_v50  ;;  %v2642_v51 = vsub.s32 32, %v2641_v22  ;;  %v2646_v49 = vsub.s32 4294967266, %v2641_v22  ;;  %v1273_v27 = vmul.u32 %v1266_v1, %v1257_v29 }
 0x2cf   : > { %v1215_v10 = vsel %vm1213_vm5, %v1214_v6, %v3768_v50  ;;  %v2643_v39 = vshll.u32 %v5401_v19, %v2641_v22  ;;  %vm1275_vm7 = vc.u32 %v5438_v12, %v5426_v38  ;;  %v3449_v41 = vadd.s32 4294967169, %v2678_v34 }
 0x2d0   : > { %v1212_v61 = vsel %vm1210_vm4, %v3766_v24, %v1211_v63  ;;  %v2644_v26 = vshrl.u32 %v2626_v18, %v2642_v51  ;;  %v2647_v21 = vadd.s32 127, %v2646_v49  ;;  %v1277_v15 = vsel %vm1275_vm7, %v1276_v9, %v5427_v57 }
 0x2d1   : > { %v1216_v16 = vsel %vm1209_vm2, %v1212_v61, %v1215_v10  ;;  %v1278_v37 = vadd.s32 %v1277_v15, %v1273_v27  ;;  %v2684_v14 = vadd.s32 1, %v3449_v41  ;;  %v5456_v30 = vmul.f32 30.0, %v5382_v11 }
 0x2d2   : > { %v1217_v19 = vsel %vm1206_vm3, nan, %v1216_v16  ;;  %v2645_v31 = vor.u32 %v2644_v26, %v2643_v39  ;;  %v2648_v42 = vshll.u32 %v2647_v21, 23  ;;  %v2663_v23 = vadd.s32 3, %v2659_v13 }
 0x2d3   : > { %3200 = vst [vmem:[%s4521_s5 + $0x30] sm:$0xff] %v1217_v19  ;;  %v1279_v55 = vadd.s32 536870912, %v1278_v37  ;;  %v2681_v1 = vand.u32 8388607, %v2674_v25  ;;  %vm2685_vm8 = vcmp.gt.s32.totalorder %v2684_v14, 0  ;;  %vm1220_vm9 = vcmp.lt.s32.totalorder %v5296_v60, 0 }
 0x2d4   : > { %v2649_v53 = vor.u32 4788187, %v2648_v42  ;;  %v2686_v17 = vsel %vm2685_vm8, %v2684_v14, 0  ;;  %v2652_v20 = vcvt.s32.f32 %v2645_v31  ;;  %v5464_v57 = vand.u32 3, %v2663_v23 }
 0x2d5   : > { %v1280_v46 = vshrl.u32 %v1279_v55, 30  ;;  %v2688_v8 = vand.u32 31, %v2686_v17  ;;  %v1322_v33 = vand.u32 2147483647, %v5456_v30  ;;  %vm5469_vm10 = vcmp.le.f32.partialorder %v1218_v59, 0.7853982 }
 0x2d6   : > { %v2650_v11 = vand.u32 2147483647, %v2649_v53  ;;  %v2682_v0 = vor.u32 8388608, %v2681_v1  ;;  %v1325_v29 = vand.u32 2139095040, %v5456_v30  ;;  %v1274_v24 = vadd.s32 %v5426_v38, %v5438_v12 }
 0x2d7   : > { %v1281_v35 = vshll.u32 %v1280_v46, 30  ;;  %v2689_v40 = vsub.s32 32, %v2688_v8  ;;  %v1304_v18 = vsub.s32 4, %v1280_v46  ;;  %v2691_v34 = vshll.u32 %v3972_v48, %v2688_v8 }
 0x2d8   : > { %v2653_v43 = vmul.f32 %v2652_v20, %v2650_v11  ;;  %v2694_v59 = vshll.u32 %v3973_v52, %v2688_v8  ;;  %v2697_v22 = vshll.u32 %v3974_v54, %v2688_v8  ;;  %v2700_v51 = vshll.u32 %v3975_v56, %v2688_v8 }
 0x2d9   : > { %v5476_v50 = vsub.s32 %v1278_v37, %v1281_v35  ;;  %v2692_v6 = vshrl.u32 %v3973_v52, %v2689_v40  ;;  %v2695_v9 = vshrl.u32 %v3974_v54, %v2689_v40  ;;  %v2698_v63 = vshrl.u32 %v3975_v56, %v2689_v40 }
 0x2da   : > { %v2654_v13 = vxor.u32 2147483648, %v2653_v43  ;;  %v2701_v12 = vshrl.u32 %v3976_v58, %v2689_v40  ;;  %v5486_v49 = vshll.u32 %v2682_v0, 8  ;;  %v1326_v27 = vshrl.u32 %v1325_v29, 23 }
 0x2db   : > { %v1284_v38 = vsub.s32 0, %v5476_v50  ;;  %v1305_v39 = vsel %vm1220_vm9, %v1304_v18, %v1280_v46  ;;  %v2687_v41 = vshrl.u32 %v2686_v17, 5  ;;  %v2703_v61 = vshll.u32 %v3976_v58, %v2688_v8  ;;  %v5506_v46 = vpop.f32.mrb[11].mxu0 }
 0x2dc   : > { %v2655_v10 = vsel %vm2572_vm12, %v2654_v13, %v2653_v43  ;;  %v2693_v15 = vor.u32 %v2692_v6, %v2691_v34  ;;  %v2696_v16 = vor.u32 %v2695_v9, %v2694_v59  ;;  %v2699_v37 = vor.u32 %v2698_v63, %v2697_v22 }
 0x2dd   : > { %v2658_v26 = vsel %vm5409_vm14, %v5245_v47, %v2655_v10  ;;  %v3394_v21 = vmin.u32 %v1284_v38, %v5476_v50  ;;  %v2702_v14 = vor.u32 %v2701_v12, %v2700_v51  ;;  %v2704_v19 = vshrl.u32 %v3977_v2, %v2689_v40 }
 0x2de   : > { %3769 = vcosq.f32 %v2658_v26  ;;  %v3397_v42 = vadd.s32 4294967169, %v1326_v27  ;;  %v5500_v23 = vand.u32 8388607, %v1322_v33  ;;  %v1307_v32 = vsel %vm5469_vm10, 0, %v1305_v39 }
 0x2df   : > { %3771 = vsinq.f32 %v2658_v26  ;;  %v1286_v31 = vclz %v3394_v21  ;;  %v2690_v55 = vshrl.u32 %v3972_v48, %v2689_v40  ;;  %v2705_v1 = vor.u32 %v2704_v19, %v2703_v61 }
 0x2e0   : > { %vm2706_vm11 = vcmp.lt.s32.totalorder %v2687_v41, 1  ;;  %vm2708_vm12 = vcmp.lt.s32.totalorder %v2687_v41, 3  ;;  %vm2709_vm13 = vcmp.lt.s32.totalorder %v2687_v41, 4  ;;  %vm2707_vm15 = vcmp.lt.s32.totalorder %v2687_v41, 2 }
 0x2e1   : > { %v3395_v53 = vadd.s32 4294967294, %v1286_v31  ;;  %v2714_v17 = vsel %vm2706_vm11, %v2693_v15, %v2696_v16  ;;  %v2711_v8 = vsel %vm2709_vm13, %v2699_v37, 2102212464  ;;  %v2715_v11 = vsel %vm2709_vm13, %v2702_v14, 920167782 }
 0x2e2   : > { %v2718_v20 = vsel %vm2706_vm11, %v2696_v16, %v2699_v37  ;;  %v2719_v35 = vsel %vm2709_vm13, %v2705_v1, 1326507024  ;;  %v2716_v0 = vsel %vm2708_vm12, %v2699_v37, %v2715_v11  ;;  %vm2665_vm0 = vcmp.lt.s32.totalorder %v5464_v57, 2 }
 0x2e3   : > { %vm3396_vm14 = vcmp.lt.s32.totalorder %v3395_v53, 0  ;;  %v2720_v40 = vsel %vm2708_vm12, %v2702_v14, %v2719_v35  ;;  %v2710_v43 = vsel %vm2706_vm11, %v2690_v55, %v2693_v15  ;;  %v2717_v18 = vsel %vm2707_vm15, %v2714_v17, %v2716_v0 }
 0x2e4   : > { %v1289_v29 = vsel %vm3396_vm14, 0, %v3395_v53  ;;  %v2721_v34 = vsel %vm2707_vm15, %v2718_v20, %v2720_v40  ;;  %vm2662_vm1 = vweird.f32 %v5245_v47  ;;  %v2712_v22 = vsel %vm2708_vm12, %v2696_v16, %v2711_v8 }
 0x2e5   : > { %v1290_v6 = vsub.s32 32, %v1289_v29  ;;  %v1294_v59 = vsub.s32 4294967266, %v1289_v29  ;;  %v1332_v13 = vadd.s32 1, %v3397_v42  ;;  %v1291_v12 = vshll.u32 %v5476_v50, %v1289_v29 }
 0x2e6   : > { %v5518_v9 = vmul.u32.u64.low %v5486_v49, %v2721_v34  ;;  %v5519_v63 = vmul.u32.u64.high %v5486_v49, %v2721_v34, %v5518_v9  ;;  %v5522_v51 = vmul.u32.u64.low %v5486_v49, %v2717_v18  ;;  %v5523_v38 = vmul.u32.u64.high %v5486_v49, %v2717_v18, %v5522_v51 }
 0x2e7   : > { %v1292_v27 = vshrl.u32 %v1274_v24, %v1290_v6  ;;  %v1295_v10 = vadd.s32 127, %v1294_v59  ;;  %vm1333_vm2 = vcmp.gt.s32.totalorder %v1332_v13, 0  ;;  %vm2666_vm3 = vcmp.eq.s32.totalorder %v5464_v57, 0 }
 0x2e8   : > { %v3770_v39 = vpop.eup %3769  ;;  %vm2669_vm4 = vcmp.eq.s32.totalorder %v5464_v57, 2  ;;  %v2713_v61 = vsel %vm2707_vm15, %v2710_v43, %v2712_v22  ;;  %v1334_v26 = vsel %vm1333_vm2, %v1332_v13, 0  ;;  %v1330_v14 = vor.u32 8388608, %v5500_v23 }
 0x2e9   : > { %v3772_v21 = vpop.eup %3771  ;;  %v2670_v15 = vxor.u32 2147483648, %v3770_v39  ;;  %v1293_v16 = vor.u32 %v1292_v27, %v1291_v12  ;;  %v1296_v37 = vshll.u32 %v1295_v10, 23  ;;  %v1311_v31 = vadd.s32 3, %v1307_v32 }
 0x2ea   : > { %v2667_v19 = vxor.u32 2147483648, %v3772_v21  ;;  %vm2731_vm5 = vc.u32 %v5519_v63, %v5522_v51  ;;  %v2732_v24 = vadd.s32 1, %v5523_v38  ;;  %v2729_v41 = vmul.u32 %v5486_v49, %v2713_v61 }
 0x2eb   : > { %v2671_v50 = vsel %vm2669_vm4, %v2670_v15, %v3772_v21  ;;  %v1297_v42 = vor.u32 4788187, %v1296_v37  ;;  %v1336_v55 = vand.u32 31, %v1334_v26  ;;  %v1300_v53 = vcvt.s32.f32 %v1293_v16 }
 0x2ec   : > { %v2668_v1 = vsel %vm2666_vm3, %v3770_v39, %v2667_v19  ;;  %v2733_v17 = vsel %vm2731_vm5, %v2732_v24, %v5523_v38  ;;  %v454_v23 = vadd.f32 %v5095_v45, %v4192_v4  ;;  %v5544_v49 = vand.u32 3, %v1311_v31 }
 0x2ed   : > { %v2672_v32 = vsel %vm2665_vm0, %v2668_v1, %v2671_v50  ;;  %v1298_v8 = vand.u32 2147483647, %v1297_v42  ;;  %v2734_v11 = vadd.s32 %v2733_v17, %v2729_v41  ;;  %v1337_v20 = vsub.s32 32, %v1336_v55 }
 0x2ee   : > { %v2673_v35 = vsel %vm2662_vm1, nan, %v2672_v32  ;;  %v1335_v0 = vshrl.u32 %v1334_v26, 5  ;;  %v5548_v40 = vadd.f32 %v5201_v44, %v4194_v5  ;;  %v1339_v45 = vshll.u32 %v3972_v48, %v1336_v55 }
 0x2ef   : > { %3214 = vst [vmem:[%s4521_s5 + $0xa0] sm:$0xff] %v2673_v35  ;;  %v1301_v29 = vmul.f32 %v1300_v53, %v1298_v8  ;;  %v2735_v43 = vadd.s32 536870912, %v2734_v11  ;;  %v1340_v57 = vshrl.u32 %v3973_v52, %v1337_v20  ;;  %v1342_v18 = vshll.u32 %v3973_v52, %v1336_v55 }
 0x2f0   : > { %v1343_v34 = vshrl.u32 %v3974_v54, %v1337_v20  ;;  %v1346_v47 = vshrl.u32 %v3975_v56, %v1337_v20  ;;  %v1349_v6 = vshrl.u32 %v3976_v58, %v1337_v20  ;;  %v1345_v44 = vshll.u32 %v3974_v54, %v1336_v55 }
 0x2f1   : > { %v1302_v59 = vxor.u32 2147483648, %v1301_v29  ;;  %v2736_v22 = vshrl.u32 %v2735_v43, 30  ;;  %v1348_v13 = vshll.u32 %v3975_v56, %v1336_v55  ;;  %v1341_v9 = vor.u32 %v1340_v57, %v1339_v45  ;;  %v5582_v43 = vpop.f32.mrb[11].mxu1 }
 0x2f2   : > { %v1344_v38 = vor.u32 %v1343_v34, %v1342_v18  ;;  %v1351_v12 = vshll.u32 %v3976_v58, %v1336_v55  ;;  %v1352_v27 = vshrl.u32 %v3977_v2, %v1337_v20  ;;  %v1347_v61 = vor.u32 %v1346_v47, %v1345_v44 }
 0x2f3   : > { %v1303_v10 = vsel %vm1220_vm9, %v1302_v59, %v1301_v29  ;;  %v2737_v39 = vshll.u32 %v2736_v22, 30  ;;  %v1350_v26 = vor.u32 %v1349_v6, %v1348_v13  ;;  %v5566_v16 = vshll.u32 %v1330_v14, 8 }
 0x2f4   : > { %v1306_v21 = vsel %vm5469_vm10, %v5296_v60, %v1303_v10  ;;  %v1353_v15 = vor.u32 %v1352_v27, %v1351_v12  ;;  %v5568_v37 = vmul.f32 30.0, %v454_v23  ;;  %vm1354_vm6 = vcmp.lt.s32.totalorder %v1335_v0, 1 }
 0x2f5   : > { %3773 = vcosq.f32 %v1306_v21  ;;  %v5570_v19 = vsub.s32 %v2734_v11, %v2737_v39  ;;  %vm1355_vm7 = vcmp.lt.s32.totalorder %v1335_v0, 2  ;;  %v1338_v31 = vshrl.u32 %v3972_v48, %v1337_v20 }
 0x2f6   : > { %3775 = vsinq.f32 %v1306_v21  ;;  %vm1357_vm8 = vcmp.lt.s32.totalorder %v1335_v0, 4  ;;  %v1362_v24 = vsel %vm1354_vm6, %v1341_v9, %v1344_v38  ;;  %vm1356_vm9 = vcmp.lt.s32.totalorder %v1335_v0, 3 }
 0x2f7   : > { %v2740_v50 = vsub.s32 0, %v5570_v19  ;;  %v1359_v7 = vsel %vm1357_vm8, %v1347_v61, 2102212464  ;;  %v1363_v42 = vsel %vm1357_vm8, %v1350_v26, 920167782  ;;  %v2760_v41 = vsub.s32 4, %v2736_v22 }
 0x2f8   : > { %v1364_v14 = vsel %vm1356_vm9, %v1347_v61, %v1363_v42  ;;  %v1366_v55 = vsel %vm1354_vm6, %v1344_v38, %v1347_v61  ;;  %v1367_v1 = vsel %vm1357_vm8, %v1353_v15, 1326507024  ;;  %v1358_v17 = vsel %vm1354_vm6, %v1338_v31, %v1341_v9 }
 0x2f9   : > { %v3450_v53 = vmin.u32 %v2740_v50, %v5570_v19  ;;  %v1365_v23 = vsel %vm1355_vm7, %v1362_v24, %v1364_v14  ;;  %v1368_v32 = vsel %vm1356_vm9, %v1350_v26, %v1367_v1  ;;  %v1360_v8 = vsel %vm1356_vm9, %v1344_v38, %v1359_v7 }
 0x2fa   : > { %v1369_v11 = vsel %vm1355_vm7, %v1366_v55, %v1368_v32  ;;  %v5578_v20 = vmul.u32.u64.low %v5566_v16, %v1365_v23  ;;  %v5579_v35 = vmul.u32.u64.high %v5566_v16, %v1365_v23, %v5578_v20  ;;  %vm2676_vm10 = vcmp.lt.s32.totalorder %v5403_v62, 0 }
 0x2fb   : > { %v2742_v29 = vclz %v3450_v53  ;;  %vm1310_vm11 = vweird.f32 %v5296_v60  ;;  %vm5587_vm12 = vcmp.le.f32.partialorder %v2674_v25, 0.7853982  ;;  %v2761_v57 = vsel %vm2676_vm10, %v2760_v41, %v2736_v22 }
 0x2fc   : > { %v5594_v18 = vmul.u32.u64.low %v5566_v16, %v1369_v11  ;;  %v5595_v34 = vmul.u32.u64.high %v5566_v16, %v1369_v11, %v5594_v18  ;;  %vm1313_vm13 = vcmp.lt.s32.totalorder %v5544_v49, 2  ;;  %v1361_v6 = vsel %vm1355_vm7, %v1358_v17, %v1360_v8 }
 0x2fd   : > { %v3451_v47 = vadd.s32 4294967294, %v2742_v29  ;;  %v2781_v59 = vand.u32 2139095040, %v5568_v37  ;;  %vm1314_vm14 = vcmp.eq.s32.totalorder %v5544_v49, 0  ;;  %vm1317_vm15 = vcmp.eq.s32.totalorder %v5544_v49, 2 }
 0x2fe   : > { %v1380_v25 = vadd.s32 1, %v5579_v35  ;;  %v5604_v44 = vmul.f32 30.0, %v5548_v40  ;;  %v2730_v13 = vadd.s32 %v5522_v51, %v5519_v63  ;;  %v2763_v0 = vsel %vm5587_vm12, 0, %v2761_v57 }
 0x2ff   : > { %v3774_v22 = vpop.eup %3773  ;;  %vm3452_vm0 = vcmp.lt.s32.totalorder %v3451_v47, 0  ;;  %v2782_v9 = vshrl.u32 %v2781_v59, 23  ;;  %v1377_v10 = vmul.u32 %v5566_v16, %v1361_v6  ;;  %vm1379_vm1 = vc.u32 %v5595_v34, %v5578_v20 }
 0x300   : > { %v3776_v38 = vpop.eup %3775  ;;  %v1318_v12 = vxor.u32 2147483648, %v3774_v22  ;;  %v2745_v27 = vsel %vm3452_vm0, 0, %v3451_v47  ;;  %v2778_v26 = vand.u32 2147483647, %v5568_v37  ;;  %v1381_v21 = vsel %vm1379_vm1, %v1380_v25, %v5579_v35 }
 0x301   : > { %v1315_v39 = vxor.u32 2147483648, %v3776_v38  ;;  %v2746_v61 = vsub.s32 32, %v2745_v27  ;;  %v2750_v40 = vsub.s32 4294967266, %v2745_v27  ;;  %v2747_v51 = vshll.u32 %v5570_v19, %v2745_v27 }
 0x302   : > { %v1319_v63 = vsel %vm1317_vm15, %v1318_v12, %v3776_v38  ;;  %v3453_v15 = vadd.s32 4294967169, %v2782_v9  ;;  %v1382_v50 = vadd.s32 %v1381_v21, %v1377_v10  ;;  %v2767_v42 = vadd.s32 3, %v2763_v0 }
 0x303   : > { %v1316_v31 = vsel %vm1314_vm14, %v3774_v22, %v1315_v39  ;;  %v2748_v16 = vshrl.u32 %v2730_v13, %v2746_v61  ;;  %v2751_v24 = vadd.s32 127, %v2750_v40  ;;  %v1429_v14 = vand.u32 2139095040, %v5604_v44 }
 0x304   : > { %v1320_v7 = vsel %vm1313_vm13, %v1316_v31, %v1319_v63  ;;  %v2788_v41 = vadd.s32 1, %v3453_v15  ;;  %v1383_v53 = vadd.s32 536870912, %v1382_v50  ;;  %v2785_v17 = vand.u32 8388607, %v2778_v26 }
 0x305   : > { %v1321_v55 = vsel %vm1310_vm11, nan, %v1320_v7  ;;  %v2749_v19 = vor.u32 %v2748_v16, %v2747_v51  ;;  %v2752_v1 = vshll.u32 %v2751_v24, 23  ;;  %v5627_v49 = vand.u32 3, %v2767_v42 }
 0x306   : > { %3201 = vst [vmem:[%s4521_s5 + $0x38] sm:$0xff] %v1321_v55  ;;  %vm2789_vm2 = vcmp.gt.s32.totalorder %v2788_v41, 0  ;;  %v1384_v32 = vshrl.u32 %v1383_v53, 30  ;;  %v5631_v35 = vadd.f32 %v5258_v3, %v4194_v5  ;;  %vm1324_vm3 = vcmp.lt.s32.totalorder %v5456_v30, 0 }
 0x307   : > { %v2753_v23 = vor.u32 4788187, %v2752_v1  ;;  %v2790_v8 = vsel %vm2789_vm2, %v2788_v41, 0  ;;  %v2756_v29 = vcvt.s32.f32 %v2749_v19  ;;  %v1430_v18 = vshrl.u32 %v1429_v14, 23 }
 0x308   : > { %v2792_v11 = vand.u32 31, %v2790_v8  ;;  %v1385_v57 = vshll.u32 %v1384_v32, 30  ;;  %v1378_v47 = vadd.s32 %v5578_v20, %v5595_v34  ;;  %v2786_v6 = vor.u32 8388608, %v2785_v17 }
 0x309   : > { %v2754_v60 = vand.u32 2147483647, %v2753_v23  ;;  %v1426_v25 = vand.u32 2147483647, %v5604_v44  ;;  %v3401_v39 = vadd.s32 4294967169, %v1430_v18  ;;  %v1408_v61 = vsub.s32 4, %v1384_v32 }
 0x30a   : > { %v2793_v59 = vsub.s32 32, %v2792_v11  ;;  %v5636_v13 = vsub.s32 %v1382_v50, %v1385_v57  ;;  %v2795_v0 = vshll.u32 %v3972_v48, %v2792_v11  ;;  %v2798_v3 = vshll.u32 %v3973_v52, %v2792_v11 }
 0x30b   : > { %v2757_v22 = vmul.f32 %v2756_v29, %v2754_v60  ;;  %v2801_v12 = vshll.u32 %v3974_v54, %v2792_v11  ;;  %v2804_v27 = vshll.u32 %v3975_v56, %v2792_v11  ;;  %v2791_v40 = vshrl.u32 %v2790_v8, 5  ;;  %v5666_v29 = vpop.f32.mrb[12].mxu0 }
 0x30c   : > { %v2796_v9 = vshrl.u32 %v3973_v52, %v2793_v59  ;;  %v2799_v38 = vshrl.u32 %v3974_v54, %v2793_v59  ;;  %v1388_v34 = vsub.s32 0, %v5636_v13  ;;  %v2802_v10 = vshrl.u32 %v3975_v56, %v2793_v59 }
 0x30d   : > { %v2758_v20 = vxor.u32 2147483648, %v2757_v22  ;;  %v2805_v63 = vshrl.u32 %v3976_v58, %v2793_v59  ;;  %v2807_v51 = vshll.u32 %v3976_v58, %v2792_v11  ;;  %v2808_v42 = vshrl.u32 %v3977_v2, %v2793_v59 }
 0x30e   : > { %v3398_v15 = vmin.u32 %v1388_v34, %v5636_v13  ;;  %v2797_v31 = vor.u32 %v2796_v9, %v2795_v0  ;;  %v2800_v16 = vor.u32 %v2799_v38, %v2798_v3  ;;  %v2803_v50 = vor.u32 %v2802_v10, %v2801_v12 }
 0x30f   : > { %v2759_v21 = vsel %vm2676_vm10, %v2758_v20, %v2757_v22  ;;  %v2806_v7 = vor.u32 %v2805_v63, %v2804_v27  ;;  %v5655_v14 = vshll.u32 %v2786_v6, 8  ;;  %v1436_v55 = vadd.s32 1, %v3401_v39 }
 0x310   : > { %v2762_v24 = vsel %vm5587_vm12, %v5403_v62, %v2759_v21  ;;  %v1390_v41 = vclz %v3398_v15  ;;  %v1409_v19 = vsel %vm1324_vm3, %v1408_v61, %v1384_v32  ;;  %v2794_v1 = vshrl.u32 %v3972_v48, %v2793_v59 }
 0x311   : > { %3777 = vcosq.f32 %v2762_v24  ;;  %v2809_v53 = vor.u32 %v2808_v42, %v2807_v51  ;;  %vm5662_vm4 = vcmp.le.f32.partialorder %v1322_v33, 0.7853982  ;;  %vm2810_vm5 = vcmp.lt.s32.totalorder %v2791_v40, 1 }
 0x312   : > { %3779 = vsinq.f32 %v2762_v24  ;;  %v3399_v17 = vadd.s32 4294967294, %v1390_v41  ;;  %vm2812_vm6 = vcmp.lt.s32.totalorder %v2791_v40, 3  ;;  %vm2813_vm7 = vcmp.lt.s32.totalorder %v2791_v40, 4 }
 0x313   : > { %v2815_v23 = vsel %vm2813_vm7, %v2803_v50, 2102212464  ;;  %v2818_v8 = vsel %vm2810_vm5, %v2797_v31, %v2800_v16  ;;  %v2819_v11 = vsel %vm2813_vm7, %v2806_v7, 920167782  ;;  %v2822_v60 = vsel %vm2810_vm5, %v2800_v16, %v2803_v50 }
 0x314   : > { %vm3400_vm8 = vcmp.lt.s32.totalorder %v3399_v17, 0  ;;  %vm2811_vm9 = vcmp.lt.s32.totalorder %v2791_v40, 2  ;;  %v2820_v32 = vsel %vm2812_vm6, %v2803_v50, %v2819_v11  ;;  %v2823_v57 = vsel %vm2813_vm7, %v2809_v53, 1326507024 }
 0x315   : > { %v1393_v18 = vsel %vm3400_vm8, 0, %v3399_v17  ;;  %v2814_v33 = vsel %vm2810_vm5, %v2794_v1, %v2797_v31  ;;  %v2821_v6 = vsel %vm2811_vm9, %v2818_v8, %v2820_v32  ;;  %v2824_v59 = vsel %vm2812_vm6, %v2806_v7, %v2823_v57 }
 0x316   : > { %v1394_v22 = vsub.s32 32, %v1393_v18  ;;  %v1398_v0 = vsub.s32 4294967266, %v1393_v18  ;;  %v2816_v3 = vsel %vm2812_vm6, %v2800_v16, %v2815_v23  ;;  %v2825_v9 = vsel %vm2811_vm9, %v2822_v60, %v2824_v59 }
 0x317   : > { %vm2766_vm10 = vweird.f32 %v5403_v62  ;;  %v5675_v38 = vmul.u32.u64.low %v5655_v14, %v2825_v9  ;;  %v5676_v12 = vmul.u32.u64.high %v5655_v14, %v2825_v9, %v5675_v38  ;;  %v1395_v34 = vshll.u32 %v5636_v13, %v1393_v18 }
 0x318   : > { %v5679_v27 = vmul.u32.u64.low %v5655_v14, %v2821_v6  ;;  %v5680_v20 = vmul.u32.u64.high %v5655_v14, %v2821_v6, %v5679_v27  ;;  %v1396_v10 = vshrl.u32 %v1378_v47, %v1394_v22  ;;  %v1399_v39 = vadd.s32 127, %v1398_v0 }
 0x319   : > { %vm1437_vm11 = vcmp.gt.s32.totalorder %v1436_v55, 0  ;;  %vm2769_vm12 = vcmp.lt.s32.totalorder %v5627_v49, 2  ;;  %v2817_v61 = vsel %vm2811_vm9, %v2814_v33, %v2816_v3  ;;  %v1433_v63 = vand.u32 8388607, %v1426_v25 }
 0x31a   : > { %v1438_v51 = vsel %vm1437_vm11, %v1436_v55, 0  ;;  %vm2773_vm13 = vcmp.eq.s32.totalorder %v5627_v49, 2  ;;  %v1397_v15 = vor.u32 %v1396_v10, %v1395_v34  ;;  %v1400_v31 = vshll.u32 %v1399_v39, 23 }
 0x31b   : > { %v3778_v21 = vpop.eup %3777  ;;  %v1440_v16 = vand.u32 31, %v1438_v51  ;;  %v1411_v47 = vsel %vm5662_vm4, 0, %v1409_v19  ;;  %vm2835_vm14 = vc.u32 %v5676_v12, %v5679_v27  ;;  %v2836_v13 = vadd.s32 1, %v5680_v20 }
 0x31c   : > { %v3780_v24 = vpop.eup %3779  ;;  %v2774_v50 = vxor.u32 2147483648, %v3778_v21  ;;  %v1401_v7 = vor.u32 4788187, %v1400_v31  ;;  %v2833_v42 = vmul.u32 %v5655_v14, %v2817_v61  ;;  %vm2770_vm15 = vcmp.eq.s32.totalorder %v5627_v49, 0 }
 0x31d   : > { %v2771_v40 = vxor.u32 2147483648, %v3780_v24  ;;  %v1441_v41 = vsub.s32 32, %v1440_v16  ;;  %v2837_v1 = vsel %vm2835_vm14, %v2836_v13, %v5680_v20  ;;  %v1434_v53 = vor.u32 8388608, %v1433_v63 }
 0x31e   : > { %v2775_v55 = vsel %vm2773_vm13, %v2774_v50, %v3780_v24  ;;  %v1402_v23 = vand.u32 2147483647, %v1401_v7  ;;  %v1404_v19 = vcvt.s32.f32 %v1397_v15  ;;  %v2838_v8 = vadd.s32 %v2837_v1, %v2833_v42 }
 0x31f   : > { %v2772_v17 = vsel %vm2770_vm15, %v3778_v21, %v2771_v40  ;;  %v1415_v60 = vadd.s32 3, %v1411_v47  ;;  %v1444_v32 = vshrl.u32 %v3973_v52, %v1441_v41  ;;  %v1447_v14 = vshrl.u32 %v3974_v54, %v1441_v41 }
 0x320   : > { %v2776_v11 = vsel %vm2769_vm12, %v2772_v17, %v2775_v55  ;;  %v1405_v18 = vmul.f32 %v1404_v19, %v1402_v23  ;;  %v2839_v33 = vadd.s32 536870912, %v2838_v8  ;;  %v1439_v6 = vshrl.u32 %v1438_v51, 5 }
 0x321   : > { %v2777_v57 = vsel %vm2766_vm10, nan, %v2776_v11  ;;  %v1443_v59 = vshll.u32 %v3972_v48, %v1440_v16  ;;  %v1446_v22 = vshll.u32 %v3973_v52, %v1440_v16  ;;  %v1450_v0 = vshrl.u32 %v3975_v56, %v1441_v41 }
 0x322   : > { %3215 = vst [vmem:[%s4521_s5 + $0xa8] sm:$0xff] %v2777_v57  ;;  %v1453_v49 = vshrl.u32 %v3976_v58, %v1441_v41  ;;  %v1406_v3 = vxor.u32 2147483648, %v1405_v18  ;;  %v2840_v9 = vshrl.u32 %v2839_v33, 30  ;;  %v1449_v38 = vshll.u32 %v3974_v54, %v1440_v16 }
 0x323   : > { %v1452_v20 = vshll.u32 %v3975_v56, %v1440_v16  ;;  %v1445_v62 = vor.u32 %v1444_v32, %v1443_v59  ;;  %v1448_v34 = vor.u32 %v1447_v14, %v1446_v22  ;;  %v1455_v10 = vshll.u32 %v3976_v58, %v1440_v16 }
 0x324   : > { %v1456_v39 = vshrl.u32 %v3977_v2, %v1441_v41  ;;  %v1407_v61 = vsel %vm1324_vm3, %v1406_v3, %v1405_v18  ;;  %v2841_v63 = vshll.u32 %v2840_v9, 30  ;;  %v5715_v21 = vmul.f32 30.0, %v5631_v35 }
 0x325   : > { %v1454_v51 = vor.u32 %v1453_v49, %v1452_v20  ;;  %v1410_v15 = vsel %vm5662_vm4, %v5456_v30, %v1407_v61  ;;  %v5720_v31 = vand.u32 3, %v1415_v60  ;;  %v1451_v24 = vor.u32 %v1450_v0, %v1449_v38 }
 0x326   : > { %v1457_v50 = vor.u32 %v1456_v39, %v1455_v10  ;;  %3781 = vcosq.f32 %v1410_v15  ;;  %v5722_v16 = vsub.s32 %v2838_v8, %v2841_v63  ;;  %vm1458_vm0 = vcmp.lt.s32.totalorder %v1439_v6, 1  ;;  %v5757_v10 = vpop.f32.mrb[13].mxu0 }
 0x327   : > { %v1474_v47 = vshll.u32 %v1434_v53, 8  ;;  %3783 = vsinq.f32 %v1410_v15  ;;  %v1442_v13 = vshrl.u32 %v3972_v48, %v1441_v41  ;;  %vm1461_vm1 = vcmp.lt.s32.totalorder %v1439_v6, 4 }
 0x328   : > { %v1466_v35 = vsel %vm1458_vm0, %v1445_v62, %v1448_v34  ;;  %v2844_v40 = vsub.s32 0, %v5722_v16  ;;  %vm1459_vm2 = vcmp.lt.s32.totalorder %v1439_v6, 2  ;;  %vm1460_vm3 = vcmp.lt.s32.totalorder %v1439_v6, 3 }
 0x329   : > { %v1467_v45 = vsel %vm1461_vm1, %v1454_v51, 920167782  ;;  %v1463_v7 = vsel %vm1461_vm1, %v1451_v24, 2102212464  ;;  %v1470_v55 = vsel %vm1458_vm0, %v1448_v34, %v1451_v24  ;;  %v1471_v1 = vsel %vm1461_vm1, %v1457_v50, 1326507024 }
 0x32a   : > { %v1468_v42 = vsel %vm1460_vm3, %v1451_v24, %v1467_v45  ;;  %v3454_v17 = vmin.u32 %v2844_v40, %v5722_v16  ;;  %v2864_v23 = vsub.s32 4, %v2840_v9  ;;  %v1472_v19 = vsel %vm1460_vm3, %v1454_v51, %v1471_v1 }
 0x32b   : > { %v1469_v53 = vsel %vm1459_vm2, %v1466_v35, %v1468_v42  ;;  %v1473_v41 = vsel %vm1459_vm2, %v1470_v55, %v1472_v19  ;;  %v2885_v60 = vand.u32 2139095040, %v5715_v21  ;;  %v1462_v14 = vsel %vm1458_vm0, %v1442_v13, %v1445_v62 }
 0x32c   : > { %v5731_v8 = vmul.u32.u64.low %v1474_v47, %v1469_v53  ;;  %v5732_v11 = vmul.u32.u64.high %v1474_v47, %v1469_v53, %v5731_v8  ;;  %v2846_v32 = vclz %v3454_v17  ;;  %v1464_v57 = vsel %vm1460_vm3, %v1448_v34, %v1463_v7 }
 0x32d   : > { %vm1414_vm4 = vweird.f32 %v5456_v30  ;;  %vm2780_vm5 = vcmp.lt.s32.totalorder %v5568_v37, 0  ;;  %v5738_v18 = vmul.u32.u64.low %v1474_v47, %v1473_v41  ;;  %v5739_v33 = vmul.u32.u64.high %v1474_v47, %v1473_v41, %v5738_v18 }
 0x32e   : > { %v2886_v59 = vshrl.u32 %v2885_v60, 23  ;;  %vm5743_vm6 = vcmp.le.f32.partialorder %v2778_v26, 0.7853982  ;;  %v3455_v0 = vadd.s32 4294967294, %v2846_v32  ;;  %v2865_v49 = vsel %vm2780_vm5, %v2864_v23, %v2840_v9 }
 0x32f   : > { %v2882_v3 = vand.u32 2147483647, %v5715_v21  ;;  %vm1417_vm7 = vcmp.lt.s32.totalorder %v5720_v31, 2  ;;  %v1465_v38 = vsel %vm1459_vm2, %v1462_v14, %v1464_v57  ;;  %v1484_v20 = vadd.s32 1, %v5732_v11 }
 0x330   : > { %v3457_v62 = vadd.s32 4294967169, %v2886_v59  ;;  %v3782_v34 = vpop.eup %3781  ;;  %vm1418_vm8 = vcmp.eq.s32.totalorder %v5720_v31, 0  ;;  %vm1421_vm9 = vcmp.eq.s32.totalorder %v5720_v31, 2  ;;  %v2834_v26 = vadd.s32 %v5679_v27, %v5676_v12 }
 0x331   : > { %vm3456_vm10 = vcmp.lt.s32.totalorder %v3455_v0, 0  ;;  %v3784_v9 = vpop.eup %3783  ;;  %v1422_v39 = vxor.u32 2147483648, %v3782_v34  ;;  %v2867_v6 = vsel %vm5743_vm6, 0, %v2865_v49  ;;  %vm1483_vm11 = vc.u32 %v5739_v33, %v5731_v8 }
 0x332   : > { %v2849_v61 = vsel %vm3456_vm10, 0, %v3455_v0  ;;  %v1419_v63 = vxor.u32 2147483648, %v3784_v9  ;;  %v1481_v24 = vmul.u32 %v1474_v47, %v1465_v38  ;;  %v1485_v12 = vsel %vm1483_vm11, %v1484_v20, %v5732_v11 }
 0x333   : > { %v2850_v51 = vsub.s32 32, %v2849_v61  ;;  %v2854_v15 = vsub.s32 4294967266, %v2849_v61  ;;  %v1423_v50 = vsel %vm1421_vm9, %v1422_v39, %v3784_v9  ;;  %v2851_v13 = vshll.u32 %v5722_v16, %v2849_v61 }
 0x334   : > { %v2892_v27 = vadd.s32 1, %v3457_v62  ;;  %v1420_v35 = vsel %vm1418_vm8, %v3782_v34, %v1419_v63  ;;  %v1486_v7 = vadd.s32 %v1485_v12, %v1481_v24  ;;  %v2871_v55 = vadd.s32 3, %v2867_v6 }
 0x335   : > { %v2852_v40 = vshrl.u32 %v2834_v26, %v2850_v51  ;;  %v2855_v45 = vadd.s32 127, %v2854_v15  ;;  %v1424_v42 = vsel %vm1417_vm7, %v1420_v35, %v1423_v50  ;;  %v418_v47 = vadd.f32 %v5360_v28, %v4192_v4 }
 0x336   : > { %vm2893_vm12 = vcmp.gt.s32.totalorder %v2892_v27, 0  ;;  %v1425_v16 = vsel %vm1414_vm4, nan, %v1424_v42  ;;  %v1487_v23 = vadd.s32 536870912, %v1486_v7  ;;  %v2889_v53 = vand.u32 8388607, %v2882_v3 }
 0x337   : > { %v2853_v1 = vor.u32 %v2852_v40, %v2851_v13  ;;  %v2856_v17 = vshll.u32 %v2855_v45, 23  ;;  %3202 = vst [vmem:[%s4521_s5 + $0x40] sm:$0xff] %v1425_v16  ;;  %v2894_v19 = vsel %vm2893_vm12, %v2892_v27, 0  ;;  %v5777_v31 = vand.u32 3, %v2871_v55 }
 0x338   : > { %v5775_v11 = vshrl.u32 %v1487_v23, 30  ;;  %v2896_v60 = vand.u32 31, %v2894_v19  ;;  %v5780_v30 = vmul.f32 30.0, %v418_v47  ;;  %v1482_v57 = vadd.s32 %v5731_v8, %v5739_v33 }
 0x339   : > { %v2857_v41 = vor.u32 4788187, %v2856_v17  ;;  %v2860_v14 = vcvt.s32.f32 %v2853_v1  ;;  %v2890_v18 = vor.u32 8388608, %v2889_v53  ;;  %v5785_v0 = vadd.f32 %v5433_v36, %v4192_v4 }
 0x33a   : > { %v1489_v28 = vshll.u32 %v5775_v11, 30  ;;  %v2897_v59 = vsub.s32 32, %v2896_v60  ;;  %v2899_v20 = vshll.u32 %v3972_v48, %v2896_v60  ;;  %v2902_v62 = vshll.u32 %v3973_v52, %v2896_v60 }
 0x33b   : > { %v2858_v32 = vand.u32 2147483647, %v2857_v41  ;;  %v2905_v9 = vshll.u32 %v3974_v54, %v2896_v60  ;;  %v2908_v8 = vshll.u32 %v3975_v56, %v2896_v60  ;;  %v1533_v61 = vand.u32 2139095040, %v5780_v30 }
 0x33c   : > { %v5787_v38 = vsub.s32 %v1486_v7, %v1489_v28  ;;  %v2900_v34 = vshrl.u32 %v3973_v52, %v2897_v59  ;;  %v2903_v26 = vshrl.u32 %v3974_v54, %v2897_v59  ;;  %v2906_v36 = vshrl.u32 %v3975_v56, %v2897_v59 }
 0x33d   : > { %v2861_v49 = vmul.f32 %v2860_v14, %v2858_v32  ;;  %v2895_v6 = vshrl.u32 %v2894_v19, 5  ;;  %v2909_v63 = vshrl.u32 %v3976_v58, %v2897_v59  ;;  %v2911_v51 = vshll.u32 %v3976_v58, %v2896_v60 }
 0x33e   : > { %v1492_v39 = vsub.s32 0, %v5787_v38  ;;  %v5800_v15 = vshll.u32 %v2890_v18, 8  ;;  %v2901_v13 = vor.u32 %v2900_v34, %v2899_v20  ;;  %v2904_v12 = vor.u32 %v2903_v26, %v2902_v62 }
 0x33f   : > { %v2862_v33 = vxor.u32 2147483648, %v2861_v49  ;;  %v2907_v35 = vor.u32 %v2906_v36, %v2905_v9  ;;  %v2910_v40 = vor.u32 %v2909_v63, %v2908_v8  ;;  %v2912_v45 = vshrl.u32 %v3977_v2, %v2897_v59 }
 0x340   : > { %v3402_v50 = vmin.u32 %v1492_v39, %v5787_v38  ;;  %v1530_v42 = vand.u32 2147483647, %v5780_v30  ;;  %v1534_v55 = vshrl.u32 %v1533_v61, 23  ;;  %vm1428_vm13 = vcmp.lt.s32.totalorder %v5604_v44, 0 }
 0x341   : > { %v2863_v24 = vsel %vm2780_vm5, %v2862_v33, %v2861_v49  ;;  %v2898_v47 = vshrl.u32 %v3972_v48, %v2897_v59  ;;  %v2913_v16 = vor.u32 %v2912_v45, %v2911_v51  ;;  %vm2914_vm14 = vcmp.lt.s32.totalorder %v2895_v6, 1 }
 0x342   : > { %v2866_v27 = vsel %vm5743_vm6, %v5568_v37, %v2863_v24  ;;  %v1494_v7 = vclz %v3402_v50  ;;  %vm2916_vm15 = vcmp.lt.s32.totalorder %v2895_v6, 3  ;;  %vm2917_vm0 = vcmp.lt.s32.totalorder %v2895_v6, 4 }
 0x343   : > { %3785 = vcosq.f32 %v2866_v27  ;;  %v2922_v22 = vsel %vm2914_vm14, %v2901_v13, %v2904_v12  ;;  %v2919_v17 = vsel %vm2917_vm0, %v2907_v35, 2102212464  ;;  %v2923_v23 = vsel %vm2917_vm0, %v2910_v40, 920167782 }
 0x344   : > { %3787 = vsinq.f32 %v2866_v27  ;;  %v3403_v1 = vadd.s32 4294967294, %v1494_v7  ;;  %v2926_v53 = vsel %vm2914_vm14, %v2904_v12, %v2907_v35  ;;  %v2927_v19 = vsel %vm2917_vm0, %v2913_v16, 1326507024 }
 0x345   : > { %vm5816_vm1 = vcmp.le.f32.partialorder %v1426_v25, 0.7853982  ;;  %vm2915_vm3 = vcmp.lt.s32.totalorder %v2895_v6, 2  ;;  %v2924_v60 = vsel %vm2916_vm15, %v2907_v35, %v2923_v23  ;;  %v2928_v32 = vsel %vm2916_vm15, %v2910_v40, %v2927_v19 }
 0x346   : > { %vm3404_vm2 = vcmp.lt.s32.totalorder %v3403_v1, 0  ;;  %v1512_v28 = vsub.s32 4, %v5775_v11  ;;  %v2925_v18 = vsel %vm2915_vm3, %v2922_v22, %v2924_v60  ;;  %v2929_v59 = vsel %vm2915_vm3, %v2926_v53, %v2928_v32 }
 0x347   : > { %v1497_v14 = vsel %vm3404_vm2, 0, %v3403_v1  ;;  %vm2873_vm4 = vcmp.lt.s32.totalorder %v5777_v31, 2  ;;  %v2918_v20 = vsel %vm2914_vm14, %v2898_v47, %v2901_v13  ;;  %v2920_v62 = vsel %vm2916_vm15, %v2904_v12, %v2919_v17 }
 0x348   : > { %v1498_v49 = vsub.s32 32, %v1497_v14  ;;  %v1502_v25 = vsub.s32 4294967266, %v1497_v14  ;;  %v5829_v34 = vmul.u32.u64.low %v5800_v15, %v2929_v59  ;;  %v5830_v26 = vmul.u32.u64.high %v5800_v15, %v2929_v59, %v5829_v34 }
 0x349   : > { %v5833_v9 = vmul.u32.u64.low %v5800_v15, %v2925_v18  ;;  %v5834_v8 = vmul.u32.u64.high %v5800_v15, %v2925_v18, %v5833_v9  ;;  %v1499_v33 = vshll.u32 %v5787_v38, %v1497_v14  ;;  %v3405_v61 = vadd.s32 4294967169, %v1534_v55 }
 0x34a   : > { %v1500_v39 = vshrl.u32 %v1482_v57, %v1498_v49  ;;  %v1503_v36 = vadd.s32 127, %v1502_v25  ;;  %vm2874_vm5 = vcmp.eq.s32.totalorder %v5777_v31, 0  ;;  %vm2877_vm6 = vcmp.eq.s32.totalorder %v5777_v31, 2 }
 0x34b   : > { %v2921_v63 = vsel %vm2915_vm3, %v2918_v20, %v2920_v62  ;;  %v5842_v51 = vmul.f32 30.0, %v5785_v0  ;;  %v1513_v12 = vsel %vm1428_vm13, %v1512_v28, %v5775_v11  ;;  %v1540_v38 = vadd.s32 1, %v3405_v61 }
 0x34c   : > { %v1501_v50 = vor.u32 %v1500_v39, %v1499_v33  ;;  %v1504_v13 = vshll.u32 %v1503_v36, 23  ;;  %vm2939_vm7 = vc.u32 %v5830_v26, %v5833_v9  ;;  %v2940_v35 = vadd.s32 1, %v5834_v8 }
 0x34d   : > { %v3786_v24 = vpop.eup %3785  ;;  %v1537_v6 = vand.u32 8388607, %v1530_v42  ;;  %v2937_v45 = vmul.u32 %v5800_v15, %v2921_v63  ;;  %vm1541_vm8 = vcmp.gt.s32.totalorder %v1540_v38, 0  ;;  %v1515_v7 = vsel %vm5816_vm1, 0, %v1513_v12 }
 0x34e   : > { %v3788_v57 = vpop.eup %3787  ;;  %v2878_v27 = vxor.u32 2147483648, %v3786_v24  ;;  %v1505_v40 = vor.u32 4788187, %v1504_v13  ;;  %v2941_v55 = vsel %vm2939_vm7, %v2940_v35, %v5834_v8  ;;  %v1542_v47 = vsel %vm1541_vm8, %v1540_v38, 0 }
 0x34f   : > { %v2875_v0 = vxor.u32 2147483648, %v3788_v57  ;;  %v1508_v22 = vcvt.s32.f32 %v1501_v50  ;;  %v2942_v17 = vadd.s32 %v2941_v55, %v2937_v45  ;;  %vm2870_vm9 = vweird.f32 %v5568_v37 }
 0x350   : > { %v2879_v11 = vsel %vm2877_vm6, %v2878_v27, %v3788_v57  ;;  %v1506_v1 = vand.u32 2147483647, %v1505_v40  ;;  %v1544_v23 = vand.u32 31, %v1542_v47  ;;  %v1538_v32 = vor.u32 8388608, %v1537_v6 }
 0x351   : > { %v2876_v16 = vsel %vm2874_vm5, %v3786_v24, %v2875_v0  ;;  %v2943_v60 = vadd.s32 536870912, %v2942_v17  ;;  %v1519_v14 = vadd.s32 3, %v1515_v7  ;;  %v1543_v28 = vshrl.u32 %v1542_v47, 5 }
 0x352   : > { %v2880_v15 = vsel %vm2873_vm4, %v2876_v16, %v2879_v11  ;;  %v1509_v19 = vmul.f32 %v1508_v22, %v1506_v1  ;;  %v1545_v18 = vsub.s32 32, %v1544_v23  ;;  %v2989_v59 = vand.u32 2139095040, %v5842_v51 }
 0x353   : > { %v2881_v53 = vsel %vm2870_vm9, nan, %v2880_v15  ;;  %v5865_v25 = vshrl.u32 %v2943_v60, 30  ;;  %v1547_v20 = vshll.u32 %v3972_v48, %v1544_v23  ;;  %v1550_v37 = vshll.u32 %v3973_v52, %v1544_v23 }
 0x354   : > { %3216 = vst [vmem:[%s4521_s5 + $0xb0] sm:$0xff] %v2881_v53  ;;  %v1510_v49 = vxor.u32 2147483648, %v1509_v19  ;;  %v1548_v31 = vshrl.u32 %v3973_v52, %v1545_v18  ;;  %v1551_v62 = vshrl.u32 %v3974_v54, %v1545_v18  ;;  %v1553_v34 = vshll.u32 %v3974_v54, %v1544_v23 }
 0x355   : > { %v1554_v8 = vshrl.u32 %v3975_v56, %v1545_v18  ;;  %v2945_v39 = vshll.u32 %v5865_v25, 30  ;;  %v1556_v36 = vshll.u32 %v3975_v56, %v1544_v23  ;;  %v1557_v61 = vshrl.u32 %v3976_v58, %v1545_v18 }
 0x356   : > { %v1511_v33 = vsel %vm1428_vm13, %v1510_v49, %v1509_v19  ;;  %v1549_v24 = vor.u32 %v1548_v31, %v1547_v20  ;;  %v5883_v13 = vadd.f32 %v5506_v46, %v4194_v5  ;;  %v1552_v38 = vor.u32 %v1551_v62, %v1550_v37 }
 0x357   : > { %v1514_v63 = vsel %vm5816_vm1, %v5604_v44, %v1511_v33  ;;  %v1555_v50 = vor.u32 %v1554_v8, %v1553_v34  ;;  %v5885_v12 = vsub.s32 %v2942_v17, %v2945_v39  ;;  %v1558_v57 = vor.u32 %v1557_v61, %v1556_v36 }
 0x358   : > { %3789 = vcosq.f32 %v1514_v63  ;;  %v5887_v27 = vand.u32 3, %v1519_v14  ;;  %v1559_v35 = vshll.u32 %v3976_v58, %v1544_v23  ;;  %v1560_v6 = vshrl.u32 %v3977_v2, %v1545_v18 }
 0x359   : > { %3791 = vsinq.f32 %v1514_v63  ;;  %vm2884_vm10 = vcmp.lt.s32.totalorder %v5715_v21, 0  ;;  %v2948_v41 = vsub.s32 0, %v5885_v12  ;;  %vm1565_vm11 = vcmp.lt.s32.totalorder %v1543_v28, 4 }
 0x35a   : > { %v5893_v0 = vshll.u32 %v1538_v32, 8  ;;  %v2990_v46 = vshrl.u32 %v2989_v59, 23  ;;  %v1546_v40 = vshrl.u32 %v3972_v48, %v1545_v18  ;;  %v1561_v45 = vor.u32 %v1560_v6, %v1559_v35 }
 0x35b   : > { %vm1562_vm12 = vcmp.lt.s32.totalorder %v1543_v28, 1  ;;  %v1567_v11 = vsel %vm1565_vm11, %v1555_v50, 2102212464  ;;  %v3458_v7 = vmin.u32 %v2948_v41, %v5885_v12  ;;  %vm1564_vm13 = vcmp.lt.s32.totalorder %v1543_v28, 3 }
 0x35c   : > { %v1570_v55 = vsel %vm1562_vm12, %v1549_v24, %v1552_v38  ;;  %v1571_v47 = vsel %vm1565_vm11, %v1558_v57, 920167782  ;;  %vm1522_vm14 = vcmp.eq.s32.totalorder %v5887_v27, 0  ;;  %v1574_v1 = vsel %vm1562_vm12, %v1552_v38, %v1555_v50 }
 0x35d   : > { %v1572_v16 = vsel %vm1564_vm13, %v1555_v50, %v1571_v47  ;;  %v1575_v22 = vsel %vm1565_vm11, %v1561_v45, 1326507024  ;;  %v2986_v17 = vand.u32 2147483647, %v5842_v51  ;;  %vm1521_vm15 = vcmp.lt.s32.totalorder %v5887_v27, 2 }
 0x35e   : > { %v2950_v15 = vclz %v3458_v7  ;;  %vm1563_vm0 = vcmp.lt.s32.totalorder %v1543_v28, 2  ;;  %v1566_v23 = vsel %vm1562_vm12, %v1546_v40, %v1549_v24  ;;  %v1568_v53 = vsel %vm1564_vm13, %v1552_v38, %v1567_v11 }
 0x35f   : > { %vm1518_vm1 = vweird.f32 %v5604_v44  ;;  %v2968_v19 = vsub.s32 4, %v5865_v25  ;;  %v1573_v60 = vsel %vm1563_vm0, %v1570_v55, %v1572_v16  ;;  %v1576_v32 = vsel %vm1564_vm13, %v1558_v57, %v1575_v22 }
 0x360   : > { %v3461_v14 = vadd.s32 4294967169, %v2990_v46  ;;  %vm5907_vm2 = vcmp.le.f32.partialorder %v2882_v3, 0.7853982  ;;  %v3459_v59 = vadd.s32 4294967294, %v2950_v15  ;;  %v1577_v49 = vsel %vm1563_vm0, %v1574_v1, %v1576_v32 }
 0x361   : > { %v5912_v20 = vmul.u32.u64.low %v5893_v0, %v1573_v60  ;;  %v5913_v37 = vmul.u32.u64.high %v5893_v0, %v1573_v60, %v5912_v20  ;;  %v1569_v31 = vsel %vm1563_vm0, %v1566_v23, %v1568_v53  ;;  %vm1525_vm3 = vcmp.eq.s32.totalorder %v5887_v27, 2 }
 0x362   : > { %v5917_v62 = vmul.u32.u64.low %v5893_v0, %v1577_v49  ;;  %v5918_v34 = vmul.u32.u64.high %v5893_v0, %v1577_v49, %v5917_v62  ;;  %v2996_v28 = vadd.s32 1, %v3461_v14  ;;  %v3790_v8 = vpop.eup %3789  ;;  %v2938_v3 = vadd.s32 %v5833_v9, %v5830_v26 }
 0x363   : > { %vm3460_vm4 = vcmp.lt.s32.totalorder %v3459_v59, 0  ;;  %v2993_v33 = vand.u32 8388607, %v2986_v17  ;;  %v3792_v39 = vpop.eup %3791  ;;  %v1526_v36 = vxor.u32 2147483648, %v3790_v8  ;;  %v2969_v63 = vsel %vm2884_vm10, %v2968_v19, %v5865_v25 }
 0x364   : > { %v2953_v61 = vsel %vm3460_vm4, 0, %v3459_v59  ;;  %vm2997_vm5 = vcmp.gt.s32.totalorder %v2996_v28, 0  ;;  %v1523_v24 = vxor.u32 2147483648, %v3792_v39  ;;  %v1585_v57 = vmul.u32 %v5893_v0, %v1569_v31 }
 0x365   : > { %v2954_v50 = vsub.s32 32, %v2953_v61  ;;  %v2958_v38 = vsub.s32 4294967266, %v2953_v61  ;;  %v1527_v35 = vsel %vm1525_vm3, %v1526_v36, %v3792_v39  ;;  %v2955_v26 = vshll.u32 %v5885_v12, %v2953_v61 }
 0x366   : > { %vm1587_vm6 = vc.u32 %v5918_v34, %v5912_v20  ;;  %v1588_v9 = vadd.s32 1, %v5913_v37  ;;  %v1524_v6 = vsel %vm1522_vm14, %v3790_v8, %v1523_v24  ;;  %v2998_v46 = vsel %vm2997_vm5, %v2996_v28, 0 }
 0x367   : > { %v2956_v41 = vshrl.u32 %v2938_v3, %v2954_v50  ;;  %v2959_v25 = vadd.s32 127, %v2958_v38  ;;  %v1528_v40 = vsel %vm1521_vm15, %v1524_v6, %v1527_v35  ;;  %v3000_v45 = vand.u32 31, %v2998_v46 }
 0x368   : > { %v1589_v0 = vsel %vm1587_vm6, %v1588_v9, %v5913_v37  ;;  %v5939_v11 = vmul.f32 30.0, %v5883_v13  ;;  %v1529_v12 = vsel %vm1518_vm1, nan, %v1528_v40  ;;  %v2971_v16 = vsel %vm5907_vm2, 0, %v2969_v63 }
 0x369   : > { %v2957_v7 = vor.u32 %v2956_v41, %v2955_v26  ;;  %v2960_v55 = vshll.u32 %v2959_v25, 23  ;;  %v1590_v47 = vadd.s32 %v1589_v0, %v1585_v57  ;;  %3203 = vst [vmem:[%s4521_s5 + $0x48] sm:$0xff] %v1529_v12  ;;  %v2994_v1 = vor.u32 8388608, %v2993_v33 }
 0x36a   : > { %v3001_v22 = vsub.s32 32, %v3000_v45  ;;  %v3003_v27 = vshll.u32 %v3972_v48, %v3000_v45  ;;  %v3006_v53 = vshll.u32 %v3973_v52, %v3000_v45  ;;  %v3009_v13 = vshll.u32 %v3974_v54, %v3000_v45 }
 0x36b   : > { %v2961_v15 = vor.u32 4788187, %v2960_v55  ;;  %v1591_v23 = vadd.s32 536870912, %v1590_v47  ;;  %v2964_v19 = vcvt.s32.f32 %v2957_v7  ;;  %v3012_v32 = vshll.u32 %v3975_v56, %v3000_v45 }
 0x36c   : > { %v3004_v44 = vshrl.u32 %v3973_v52, %v3001_v22  ;;  %v3007_v60 = vshrl.u32 %v3974_v54, %v3001_v22  ;;  %v3010_v49 = vshrl.u32 %v3975_v56, %v3001_v22  ;;  %v3013_v37 = vshrl.u32 %v3976_v58, %v3001_v22 }
 0x36d   : > { %v2962_v14 = vand.u32 2147483647, %v2961_v15  ;;  %v1592_v59 = vshrl.u32 %v1591_v23, 30  ;;  %v2999_v31 = vshrl.u32 %v2998_v46, 5  ;;  %v3015_v62 = vshll.u32 %v3976_v58, %v3000_v45 }
 0x36e   : > { %v3016_v28 = vshrl.u32 %v3977_v2, %v3001_v22  ;;  %v3005_v33 = vor.u32 %v3004_v44, %v3003_v27  ;;  %v3008_v39 = vor.u32 %v3007_v60, %v3006_v53  ;;  %v2975_v36 = vadd.s32 3, %v2971_v16 }
 0x36f   : > { %v2965_v8 = vmul.f32 %v2964_v19, %v2962_v14  ;;  %v1593_v3 = vshll.u32 %v1592_v59, 30  ;;  %vm1532_vm7 = vcmp.lt.s32.totalorder %v5780_v30, 0  ;;  %v3014_v61 = vor.u32 %v3013_v37, %v3012_v32 }
 0x370   : > { %v1637_v63 = vand.u32 2139095040, %v5939_v11  ;;  %v3011_v38 = vor.u32 %v3010_v49, %v3009_v13  ;;  %v3034_v57 = vshll.u32 %v2994_v1, 8  ;;  %v1616_v35 = vsub.s32 4, %v1592_v59 }
 0x371   : > { %v2966_v24 = vxor.u32 2147483648, %v2965_v8  ;;  %v5958_v50 = vsub.s32 %v1590_v47, %v1593_v3  ;;  %v3002_v26 = vshrl.u32 %v3972_v48, %v3001_v22  ;;  %v3017_v9 = vor.u32 %v3016_v28, %v3015_v62 }
 0x372   : > { %vm3018_vm8 = vcmp.lt.s32.totalorder %v2999_v31, 1  ;;  %vm3021_vm9 = vcmp.lt.s32.totalorder %v2999_v31, 4  ;;  %vm3019_vm11 = vcmp.lt.s32.totalorder %v2999_v31, 2  ;;  %vm3020_vm12 = vcmp.lt.s32.totalorder %v2999_v31, 3 }
 0x373   : > { %v2967_v6 = vsel %vm2884_vm10, %v2966_v24, %v2965_v8  ;;  %v1596_v41 = vsub.s32 0, %v5958_v50  ;;  %v3026_v25 = vsel %vm3018_vm8, %v3005_v33, %v3008_v39  ;;  %v3027_v40 = vsel %vm3021_vm9, %v3014_v61, 920167782 }
 0x374   : > { %v2970_v46 = vsel %vm5907_vm2, %v5715_v21, %v2967_v6  ;;  %v3023_v45 = vsel %vm3021_vm9, %v3011_v38, 2102212464  ;;  %v3028_v12 = vsel %vm3020_vm12, %v3011_v38, %v3027_v40  ;;  %v3030_v55 = vsel %vm3018_vm8, %v3008_v39, %v3011_v38 }
 0x375   : > { %3793 = vcosq.f32 %v2970_v46  ;;  %v3406_v0 = vmin.u32 %v1596_v41, %v5958_v50  ;;  %v3029_v7 = vsel %vm3019_vm11, %v3026_v25, %v3028_v12  ;;  %v3031_v47 = vsel %vm3021_vm9, %v3017_v9, 1326507024 }
 0x376   : > { %3795 = vsinq.f32 %v2970_v46  ;;  %v2976_v16 = vand.u32 3, %v2975_v36  ;;  %v1617_v18 = vsel %vm1532_vm7, %v1616_v35, %v1592_v59  ;;  %v3022_v22 = vsel %vm3018_vm8, %v3002_v26, %v3005_v33 }
 0x377   : > { %v1598_v1 = vclz %v3406_v0  ;;  %v3024_v27 = vsel %vm3020_vm12, %v3008_v39, %v3023_v45  ;;  %v3032_v15 = vsel %vm3020_vm12, %v3014_v61, %v3031_v47  ;;  %v1638_v44 = vshrl.u32 %v1637_v63, 23 }
 0x378   : > { %v5974_v23 = vmul.u32.u64.low %v3034_v57, %v3029_v7  ;;  %v5975_v53 = vmul.u32.u64.high %v3034_v57, %v3029_v7, %v5974_v23  ;;  %v3033_v19 = vsel %vm3019_vm11, %v3030_v55, %v3032_v15  ;;  %vm5981_vm10 = vcmp.le.f32.partialorder %v1530_v42, 0.7853982 }
 0x379   : > { %v3407_v13 = vadd.s32 4294967294, %v1598_v1  ;;  %v5985_v32 = vmul.u32.u64.low %v3034_v57, %v3033_v19  ;;  %v5986_v14 = vmul.u32.u64.high %v3034_v57, %v3033_v19, %v5985_v32  ;;  %v462_v59 = vadd.f32 %v5582_v43, %v4194_v5 }
 0x37a   : > { %v1619_v49 = vsel %vm5981_vm10, 0, %v1617_v18  ;;  %v3025_v37 = vsel %vm3019_vm11, %v3022_v22, %v3024_v27  ;;  %v3409_v62 = vadd.s32 4294967169, %v1638_v44  ;;  %vm2974_vm14 = vweird.f32 %v5715_v21 }
 0x37b   : > { %vm3408_vm13 = vcmp.lt.s32.totalorder %v3407_v13, 0  ;;  %vm2978_vm15 = vcmp.eq.s32.totalorder %v2976_v16, 0  ;;  %v3044_v28 = vadd.s32 1, %v5975_v53  ;;  %v1634_v8 = vand.u32 2147483647, %v5939_v11 }
 0x37c   : > { %v1601_v42 = vsel %vm3408_vm13, 0, %v3407_v13  ;;  %v1586_v3 = vadd.s32 %v5912_v20, %v5918_v34  ;;  %v1644_v39 = vadd.s32 1, %v3409_v62  ;;  %v1623_v61 = vadd.s32 3, %v1619_v49 }
 0x37d   : > { %v1602_v33 = vsub.s32 32, %v1601_v42  ;;  %v1606_v43 = vsub.s32 4294967266, %v1601_v42  ;;  %v1603_v36 = vshll.u32 %v5958_v50, %v1601_v42  ;;  %v3041_v31 = vmul.u32 %v3034_v57, %v3025_v37 }
 0x37e   : > { %vm3043_vm0 = vc.u32 %v5986_v14, %v5974_v23  ;;  %vm1645_vm1 = vcmp.gt.s32.totalorder %v1644_v39, 0  ;;  %v1641_v20 = vand.u32 8388607, %v1634_v8  ;;  %vm2981_vm2 = vcmp.eq.s32.totalorder %v2976_v16, 2 }
 0x37f   : > { %v3794_v63 = vpop.eup %3793  ;;  %v1604_v24 = vshrl.u32 %v1586_v3, %v1602_v33  ;;  %v1607_v38 = vadd.s32 127, %v1606_v43  ;;  %v3045_v35 = vsel %vm3043_vm0, %v3044_v28, %v5975_v53  ;;  %v1646_v34 = vsel %vm1645_vm1, %v1644_v39, 0 }
 0x380   : > { %v3796_v26 = vpop.eup %3795  ;;  %v2982_v9 = vxor.u32 2147483648, %v3794_v63  ;;  %v3046_v6 = vadd.s32 %v3045_v35, %v3041_v31  ;;  %v1648_v40 = vand.u32 31, %v1646_v34  ;;  %v6004_v0 = vmul.f32 30.0, %v462_v59 }
 0x381   : > { %v2979_v41 = vxor.u32 2147483648, %v3796_v26  ;;  %v1605_v50 = vor.u32 %v1604_v24, %v1603_v36  ;;  %v1608_v57 = vshll.u32 %v1607_v38, 23  ;;  %vm2977_vm3 = vcmp.lt.s32.totalorder %v2976_v16, 2 }
 0x382   : > { %v2983_v25 = vsel %vm2981_vm2, %v2982_v9, %v3796_v26  ;;  %v3047_v46 = vadd.s32 536870912, %v3046_v6  ;;  %v6007_v7 = vand.u32 3, %v1623_v61  ;;  %v1642_v1 = vor.u32 8388608, %v1641_v20 }
 0x383   : > { %v2980_v45 = vsel %vm2978_vm15, %v3794_v63, %v2979_v41  ;;  %v1609_v12 = vor.u32 4788187, %v1608_v57  ;;  %v1649_v18 = vsub.s32 32, %v1648_v40  ;;  %v1612_v15 = vcvt.s32.f32 %v1605_v50 }
 0x384   : > { %v2984_v55 = vsel %vm2977_vm3, %v2980_v45, %v2983_v25  ;;  %v3048_v47 = vshrl.u32 %v3047_v46, 30  ;;  %vm2988_vm4 = vcmp.lt.s32.totalorder %v5842_v51, 0  ;;  %v3090_v53 = vand.u32 2147483647, %v6004_v0 }
 0x385   : > { %v2985_v22 = vsel %vm2974_vm14, nan, %v2984_v55  ;;  %v1610_v27 = vand.u32 2147483647, %v1609_v12  ;;  %v1647_v16 = vshrl.u32 %v1646_v34, 5  ;;  %v1652_v19 = vshrl.u32 %v3973_v52, %v1649_v18 }
 0x386   : > { %3217 = vst [vmem:[%s4521_s5 + $0xb8] sm:$0xff] %v2985_v22  ;;  %v3049_v13 = vshll.u32 %v3048_v47, 30  ;;  %v3093_v44 = vand.u32 2139095040, %v6004_v0  ;;  %v1651_v59 = vshll.u32 %v3972_v48, %v1648_v40  ;;  %v1655_v49 = vshrl.u32 %v3974_v54, %v1649_v18 }
 0x387   : > { %v1613_v32 = vmul.f32 %v1612_v15, %v1610_v27  ;;  %v1658_v21 = vshrl.u32 %v3975_v56, %v1649_v18  ;;  %v1654_v62 = vshll.u32 %v3973_v52, %v1648_v40  ;;  %v1657_v42 = vshll.u32 %v3974_v54, %v1648_v40 }
 0x388   : > { %v6019_v37 = vsub.s32 %v3046_v6, %v3049_v13  ;;  %v1661_v28 = vshrl.u32 %v3976_v58, %v1649_v18  ;;  %v3072_v33 = vsub.s32 4, %v3048_v47  ;;  %v1660_v43 = vshll.u32 %v3975_v56, %v1648_v40 }
 0x389   : > { %v1614_v3 = vxor.u32 2147483648, %v1613_v32  ;;  %v6025_v39 = vshll.u32 %v1642_v1, 8  ;;  %v1653_v61 = vor.u32 %v1652_v19, %v1651_v59  ;;  %v1656_v31 = vor.u32 %v1655_v49, %v1654_v62 }
 0x38a   : > { %v3052_v36 = vsub.s32 0, %v6019_v37  ;;  %v1659_v63 = vor.u32 %v1658_v21, %v1657_v42  ;;  %vm6032_vm5 = vcmp.le.f32.partialorder %v2986_v17, 0.7853982  ;;  %v1662_v35 = vor.u32 %v1661_v28, %v1660_v43 }
 0x38b   : > { %v1615_v24 = vsel %vm1532_vm7, %v1614_v3, %v1613_v32  ;;  %v1663_v26 = vshll.u32 %v3976_v58, %v1648_v40  ;;  %v1664_v9 = vshrl.u32 %v3977_v2, %v1649_v18  ;;  %vm1666_vm6 = vcmp.lt.s32.totalorder %v1647_v16, 1 }
 0x38c   : > { %v1618_v6 = vsel %vm5981_vm10, %v5780_v30, %v1615_v24  ;;  %v3462_v20 = vmin.u32 %v3052_v36, %v6019_v37  ;;  %v3094_v34 = vshrl.u32 %v3093_v44, 23  ;;  %v1650_v41 = vshrl.u32 %v3972_v48, %v1649_v18 }
 0x38d   : > { %3797 = vcosq.f32 %v1618_v6  ;;  %v1665_v17 = vor.u32 %v1664_v9, %v1663_v26  ;;  %vm1669_vm7 = vcmp.lt.s32.totalorder %v1647_v16, 4  ;;  %v3073_v57 = vsel %vm2988_vm4, %v3072_v33, %v3048_v47 }
 0x38e   : > { %3799 = vsinq.f32 %v1618_v6  ;;  %v3054_v50 = vclz %v3462_v20  ;;  %v1671_v25 = vsel %vm1669_vm7, %v1659_v63, 2102212464  ;;  %vm1667_vm8 = vcmp.lt.s32.totalorder %v1647_v16, 2 }
 0x38f   : > { %vm1668_vm9 = vcmp.lt.s32.totalorder %v1647_v16, 3  ;;  %v1674_v60 = vsel %vm1666_vm6, %v1653_v61, %v1656_v31  ;;  %v1675_v46 = vsel %vm1669_vm7, %v1662_v35, 920167782  ;;  %v1670_v45 = vsel %vm1666_vm6, %v1650_v41, %v1653_v61 }
 0x390   : > { %v3463_v40 = vadd.s32 4294967294, %v3054_v50  ;;  %v1676_v12 = vsel %vm1668_vm9, %v1659_v63, %v1675_v46  ;;  %v1678_v55 = vsel %vm1666_vm6, %v1656_v31, %v1659_v63  ;;  %v1672_v1 = vsel %vm1668_vm9, %v1656_v31, %v1671_v25 }
 0x391   : > { %v1677_v18 = vsel %vm1667_vm8, %v1674_v60, %v1676_v12  ;;  %v1679_v22 = vsel %vm1669_vm7, %v1665_v17, 1326507024  ;;  %v3465_v27 = vadd.s32 4294967169, %v3094_v34  ;;  %v3042_v19 = vadd.s32 %v5974_v23, %v5986_v14 }
 0x392   : > { %vm3464_vm11 = vcmp.lt.s32.totalorder %v3463_v40, 0  ;;  %v1680_v15 = vsel %vm1668_vm9, %v1662_v35, %v1679_v22  ;;  %v6050_v47 = vmul.u32.u64.low %v6025_v39, %v1677_v18  ;;  %v6051_v13 = vmul.u32.u64.high %v6025_v39, %v1677_v18, %v6050_v47 }
 0x393   : > { %v3057_v44 = vsel %vm3464_vm11, 0, %v3463_v40  ;;  %v1681_v32 = vsel %vm1667_vm8, %v1678_v55, %v1680_v15  ;;  %v3100_v59 = vadd.s32 1, %v3465_v27  ;;  %vm1622_vm12 = vweird.f32 %v5780_v30 }
 0x394   : > { %v3058_v49 = vsub.s32 32, %v3057_v44  ;;  %v3062_v21 = vsub.s32 4294967266, %v3057_v44  ;;  %v3075_v62 = vsel %vm6032_vm5, 0, %v3073_v57  ;;  %v1673_v42 = vsel %vm1667_vm8, %v1670_v45, %v1672_v1 }
 0x395   : > { %v3059_v28 = vshll.u32 %v6019_v37, %v3057_v44  ;;  %v6063_v3 = vmul.u32.u64.low %v6025_v39, %v1681_v32  ;;  %v6064_v33 = vmul.u32.u64.high %v6025_v39, %v1681_v32, %v6063_v3  ;;  %vm3101_vm10 = vcmp.gt.s32.totalorder %v3100_v59, 0 }
 0x396   : > { %v3060_v23 = vshrl.u32 %v3042_v19, %v3058_v49  ;;  %v3063_v14 = vadd.s32 127, %v3062_v21  ;;  %v1692_v43 = vadd.s32 1, %v6051_v13  ;;  %v3102_v36 = vsel %vm3101_vm10, %v3100_v59, 0 }
 0x397   : > { %v3798_v61 = vpop.eup %3797  ;;  %vm1625_vm13 = vcmp.lt.s32.totalorder %v6007_v7, 2  ;;  %vm1626_vm14 = vcmp.eq.s32.totalorder %v6007_v7, 0  ;;  %vm1629_vm15 = vcmp.eq.s32.totalorder %v6007_v7, 2  ;;  %v3104_v16 = vand.u32 31, %v3102_v36 }
 0x398   : > { %v3800_v31 = vpop.eup %3799  ;;  %v1630_v37 = vxor.u32 2147483648, %v3798_v61  ;;  %v3061_v63 = vor.u32 %v3060_v23, %v3059_v28  ;;  %v3064_v24 = vshll.u32 %v3063_v14, 23  ;;  %v3079_v35 = vadd.s32 3, %v3075_v62 }
 0x399   : > { %v1627_v26 = vxor.u32 2147483648, %v3800_v31  ;;  %v1689_v9 = vmul.u32 %v6025_v39, %v1673_v42  ;;  %vm1691_vm0 = vc.u32 %v6064_v33, %v6050_v47  ;;  %v3105_v6 = vsub.s32 32, %v3104_v16 }
 0x39a   : > { %v1631_v20 = vsel %vm1629_vm15, %v1630_v37, %v3800_v31  ;;  %v3065_v34 = vor.u32 4788187, %v3064_v24  ;;  %v1693_v41 = vsel %vm1691_vm0, %v1692_v43, %v6051_v13  ;;  %v3097_v17 = vand.u32 8388607, %v3090_v53 }
 0x39b   : > { %v1628_v50 = vsel %vm1626_vm14, %v3798_v61, %v1627_v26  ;;  %v3068_v57 = vcvt.s32.f32 %v3061_v63  ;;  %v1694_v25 = vadd.s32 %v1693_v41, %v1689_v9  ;;  %v3107_v60 = vshll.u32 %v3972_v48, %v3104_v16 }
 0x39c   : > { %v1632_v39 = vsel %vm1625_vm13, %v1628_v50, %v1631_v20  ;;  %v3066_v46 = vand.u32 2147483647, %v3065_v34  ;;  %v3108_v40 = vshrl.u32 %v3973_v52, %v3105_v6  ;;  %v3110_v45 = vshll.u32 %v3973_v52, %v3104_v16 }
 0x39d   : > { %v1633_v12 = vsel %vm1622_vm12, nan, %v1632_v39  ;;  %v1695_v55 = vadd.s32 536870912, %v1694_v25  ;;  %v3111_v1 = vshrl.u32 %v3974_v54, %v3105_v6  ;;  %v3113_v18 = vshll.u32 %v3974_v54, %v3104_v16 }
 0x39e   : > { %3204 = vst [vmem:[%s4521_s5 + $0x50] sm:$0xff] %v1633_v12  ;;  %v3069_v22 = vmul.f32 %v3068_v57, %v3066_v46  ;;  %v3098_v27 = vor.u32 8388608, %v3097_v17  ;;  %v3114_v15 = vshrl.u32 %v3975_v56, %v3105_v6  ;;  %v3116_v7 = vshll.u32 %v3975_v56, %v3104_v16 }
 0x39f   : > { %v1696_v13 = vshrl.u32 %v1695_v55, 30  ;;  %v3117_v19 = vshrl.u32 %v3976_v58, %v3105_v6  ;;  %v3119_v44 = vshll.u32 %v3976_v58, %v3104_v16  ;;  %v424_v30 = vadd.f32 %v5666_v29, %v4192_v4 }
 0x3a0   : > { %v3070_v32 = vxor.u32 2147483648, %v3069_v22  ;;  %v6094_v59 = vand.u32 3, %v3079_v35  ;;  %vm1636_vm1 = vcmp.lt.s32.totalorder %v5939_v11, 0  ;;  %v3103_v49 = vshrl.u32 %v3102_v36, 5 }
 0x3a1   : > { %v3120_v21 = vshrl.u32 %v3977_v2, %v3105_v6  ;;  %v1697_v62 = vshll.u32 %v1696_v13, 30  ;;  %v3109_v42 = vor.u32 %v3108_v40, %v3107_v60  ;;  %v3112_v28 = vor.u32 %v3111_v1, %v3110_v45 }
 0x3a2   : > { %v3115_v3 = vor.u32 %v3114_v15, %v3113_v18  ;;  %v3071_v23 = vsel %vm2988_vm4, %v3070_v32, %v3069_v22  ;;  %v3118_v14 = vor.u32 %v3117_v19, %v3116_v7  ;;  %v3138_v61 = vshll.u32 %v3098_v27, 8 }
 0x3a3   : > { %v3121_v43 = vor.u32 %v3120_v21, %v3119_v44  ;;  %v3074_v4 = vsel %vm6032_vm5, %v5842_v51, %v3071_v23  ;;  %v6103_v29 = vsub.s32 %v1694_v25, %v1697_v62  ;;  %v3106_v36 = vshrl.u32 %v3972_v48, %v3105_v6 }
 0x3a4   : > { %v6106_v16 = vmul.f32 30.0, %v424_v30  ;;  %3801 = vcosq.f32 %v3074_v4  ;;  %v1720_v31 = vsub.s32 4, %v1696_v13  ;;  %vm3122_vm2 = vcmp.lt.s32.totalorder %v3103_v49, 1 }
 0x3a5   : > { %vm3125_vm3 = vcmp.lt.s32.totalorder %v3103_v49, 4  ;;  %3803 = vsinq.f32 %v3074_v4  ;;  %v1700_v37 = vsub.s32 0, %v6103_v29  ;;  %v3130_v24 = vsel %vm3122_vm2, %v3109_v42, %v3112_v28 }
 0x3a6   : > { %v3127_v63 = vsel %vm3125_vm3, %v3115_v3, 2102212464  ;;  %vm3124_vm4 = vcmp.lt.s32.totalorder %v3103_v49, 3  ;;  %v3131_v35 = vsel %vm3125_vm3, %v3118_v14, 920167782  ;;  %v3134_v26 = vsel %vm3122_vm2, %v3112_v28, %v3115_v3 }
 0x3a7   : > { %v3135_v38 = vsel %vm3125_vm3, %v3121_v43, 1326507024  ;;  %v3410_v9 = vmin.u32 %v1700_v37, %v6103_v29  ;;  %vm3123_vm5 = vcmp.lt.s32.totalorder %v3103_v49, 2  ;;  %v3132_v20 = vsel %vm3124_vm4, %v3115_v3, %v3131_v35 }
 0x3a8   : > { %v3136_v6 = vsel %vm3124_vm4, %v3118_v14, %v3135_v38  ;;  %v3126_v34 = vsel %vm3122_vm2, %v3106_v36, %v3109_v42  ;;  %v3128_v41 = vsel %vm3124_vm4, %v3112_v28, %v3127_v63  ;;  %v3133_v17 = vsel %vm3123_vm5, %v3130_v24, %v3132_v20 }
 0x3a9   : > { %v3137_v50 = vsel %vm3123_vm5, %v3134_v26, %v3136_v6  ;;  %v1702_v57 = vclz %v3410_v9  ;;  %v1721_v25 = vsel %vm1636_vm1, %v1720_v31, %v1696_v13  ;;  %v3129_v12 = vsel %vm3123_vm5, %v3126_v34, %v3128_v41 }
 0x3aa   : > { %v6112_v60 = vmul.u32.u64.low %v3138_v61, %v3137_v50  ;;  %v6113_v39 = vmul.u32.u64.high %v3138_v61, %v3137_v50, %v6112_v60  ;;  %v6115_v46 = vmul.u32.u64.low %v3138_v61, %v3133_v17  ;;  %v6116_v40 = vmul.u32.u64.high %v3138_v61, %v3133_v17, %v6115_v46 }
 0x3ab   : > { %v3411_v45 = vadd.s32 4294967294, %v1702_v57  ;;  %v1741_v55 = vand.u32 2139095040, %v6106_v16  ;;  %vm3082_vm6 = vcmp.eq.s32.totalorder %v6094_v59, 0  ;;  %vm3085_vm7 = vcmp.eq.s32.totalorder %v6094_v59, 2 }
 0x3ac   : > { %vm6124_vm8 = vcmp.le.f32.partialorder %v1634_v8, 0.7853982  ;;  %v1690_v18 = vadd.s32 %v6050_v47, %v6064_v33  ;;  %v3145_v13 = vmul.u32 %v3138_v61, %v3129_v12  ;;  %vm3147_vm11 = vc.u32 %v6113_v39, %v6115_v46 }
 0x3ad   : > { %vm3412_vm9 = vcmp.lt.s32.totalorder %v3411_v45, 0  ;;  %v1723_v22 = vsel %vm6124_vm8, 0, %v1721_v25  ;;  %v1742_v27 = vshrl.u32 %v1741_v55, 23  ;;  %v3148_v19 = vadd.s32 1, %v6116_v40 }
 0x3ae   : > { %v3802_v15 = vpop.eup %3801  ;;  %v1705_v7 = vsel %vm3412_vm9, 0, %v3411_v45  ;;  %v1738_v49 = vand.u32 2147483647, %v6106_v16  ;;  %vm3078_vm12 = vweird.f32 %v5842_v51  ;;  %vm3081_vm10 = vcmp.lt.s32.totalorder %v6094_v59, 2 }
 0x3af   : > { %v3804_v8 = vpop.eup %3803  ;;  %v3086_v44 = vxor.u32 2147483648, %v3802_v15  ;;  %v1706_v30 = vsub.s32 32, %v1705_v7  ;;  %v1710_v32 = vsub.s32 4294967266, %v1705_v7  ;;  %v1707_v33 = vshll.u32 %v6103_v29, %v1705_v7 }
 0x3b0   : > { %v3083_v47 = vxor.u32 2147483648, %v3804_v8  ;;  %v3149_v21 = vsel %vm3147_vm11, %v3148_v19, %v6116_v40  ;;  %v3413_v62 = vadd.s32 4294967169, %v1742_v27  ;;  %v1727_v37 = vadd.s32 3, %v1723_v22 }
 0x3b1   : > { %v3087_v42 = vsel %vm3085_vm7, %v3086_v44, %v3804_v8  ;;  %v1708_v28 = vshrl.u32 %v1690_v18, %v1706_v30  ;;  %v1711_v3 = vadd.s32 127, %v1710_v32  ;;  %v3150_v23 = vadd.s32 %v3149_v21, %v3145_v13 }
 0x3b2   : > { %v3084_v14 = vsel %vm3082_vm6, %v3802_v15, %v3083_v47  ;;  %v1748_v43 = vadd.s32 1, %v3413_v62  ;;  %v426_v63 = vadd.f32 %v5757_v10, %v4194_v5  ;;  %v1745_v51 = vand.u32 8388607, %v1738_v49 }
 0x3b3   : > { %v3088_v61 = vsel %vm3081_vm10, %v3084_v14, %v3087_v42  ;;  %v1709_v4 = vor.u32 %v1708_v28, %v1707_v33  ;;  %v1712_v29 = vshll.u32 %v1711_v3, 23  ;;  %v3151_v36 = vadd.s32 536870912, %v3150_v23 }
 0x3b4   : > { %v3089_v31 = vsel %vm3078_vm12, nan, %v3088_v61  ;;  %vm1749_vm13 = vcmp.gt.s32.totalorder %v1748_v43, 0  ;;  %v6152_v6 = vand.u32 3, %v1727_v37  ;;  %v1746_v5 = vor.u32 8388608, %v1745_v51 }
 0x3b5   : > { %3218 = vst [vmem:[%s4521_s5 + $0xc0] sm:$0xff] %v3089_v31  ;;  %v1713_v24 = vor.u32 4788187, %v1712_v29  ;;  %v6147_v35 = vshrl.u32 %v3151_v36, 30  ;;  %v1750_v59 = vsel %vm1749_vm13, %v1748_v43, 0  ;;  %v1716_v9 = vcvt.s32.f32 %v1709_v4 }
 0x3b6   : > { %v1752_v26 = vand.u32 31, %v1750_v59  ;;  %v6156_v10 = vmul.f32 30.0, %v426_v63  ;;  %v1751_v50 = vshrl.u32 %v1750_v59, 5  ;;  %v3146_v33 = vadd.s32 %v6115_v46, %v6113_v39 }
 0x3b7   : > { %v1714_v38 = vand.u32 2147483647, %v1713_v24  ;;  %v3153_v20 = vshll.u32 %v6147_v35, 30  ;;  %v1786_v62 = vshll.u32 %v1746_v5, 8  ;;  %vm1726_vm4 = vweird.f32 %v5939_v11 }
 0x3b8   : > { %v1753_v34 = vsub.s32 32, %v1752_v26  ;;  %v1755_v57 = vshll.u32 %v3972_v48, %v1752_v26  ;;  %v1758_v12 = vshll.u32 %v3973_v52, %v1752_v26  ;;  %v1761_v22 = vshll.u32 %v3974_v54, %v1752_v26 }
 0x3b9   : > { %v1717_v41 = vmul.f32 %v1716_v9, %v1714_v38  ;;  %v6154_v17 = vsub.s32 %v3150_v23, %v3153_v20  ;;  %v1764_v27 = vshll.u32 %v3975_v56, %v1752_v26  ;;  %v1767_v8 = vshll.u32 %v3976_v58, %v1752_v26 }
 0x3ba   : > { %v1756_v25 = vshrl.u32 %v3973_v52, %v1753_v34  ;;  %v1759_v60 = vshrl.u32 %v3974_v54, %v1753_v34  ;;  %v1762_v55 = vshrl.u32 %v3975_v56, %v1753_v34  ;;  %v1765_v15 = vshrl.u32 %v3976_v58, %v1753_v34 }
 0x3bb   : > { %v1718_v40 = vxor.u32 2147483648, %v1717_v41  ;;  %v3156_v45 = vsub.s32 0, %v6154_v17  ;;  %v1768_v47 = vshrl.u32 %v3977_v2, %v1753_v34  ;;  %v1754_v42 = vshrl.u32 %v3972_v48, %v1753_v34 }
 0x3bc   : > { %v1757_v18 = vor.u32 %v1756_v25, %v1755_v57  ;;  %v1760_v19 = vor.u32 %v1759_v60, %v1758_v12  ;;  %v1763_v30 = vor.u32 %v1762_v55, %v1761_v22  ;;  %v1766_v32 = vor.u32 %v1765_v15, %v1764_v27 }
 0x3bd   : > { %v1719_v7 = vsel %vm1636_vm1, %v1718_v40, %v1717_v41  ;;  %v3466_v13 = vmin.u32 %v3156_v45, %v6154_v17  ;;  %v1769_v28 = vor.u32 %v1768_v47, %v1767_v8  ;;  %v1845_v3 = vand.u32 2139095040, %v6156_v10 }
 0x3be   : > { %v1722_v44 = vsel %vm6124_vm8, %v5939_v11, %v1719_v7  ;;  %vm1770_vm14 = vcmp.lt.s32.totalorder %v1751_v50, 1  ;;  %vm1772_vm15 = vcmp.lt.s32.totalorder %v1751_v50, 3  ;;  %vm1773_vm0 = vcmp.lt.s32.totalorder %v1751_v50, 4 }
 0x3bf   : > { %3805 = vcosq.f32 %v1722_v44  ;;  %v3158_v21 = vclz %v3466_v13  ;;  %v1775_v1 = vsel %vm1773_vm0, %v1763_v30, 2102212464  ;;  %v1778_v14 = vsel %vm1770_vm14, %v1757_v18, %v1760_v19 }
 0x3c0   : > { %3807 = vsinq.f32 %v1722_v44  ;;  %v1779_v43 = vsel %vm1773_vm0, %v1766_v32, 920167782  ;;  %v1782_v61 = vsel %vm1770_vm14, %v1760_v19, %v1763_v30  ;;  %vm3092_vm1 = vcmp.lt.s32.totalorder %v6004_v0, 0 }
 0x3c1   : > { %v3467_v23 = vadd.s32 4294967294, %v3158_v21  ;;  %vm1771_vm3 = vcmp.lt.s32.totalorder %v1751_v50, 2  ;;  %v1780_v39 = vsel %vm1772_vm15, %v1763_v30, %v1779_v43  ;;  %v1783_v46 = vsel %vm1773_vm0, %v1769_v28, 1326507024 }
 0x3c2   : > { %v1774_v29 = vsel %vm1770_vm14, %v1754_v42, %v1757_v18  ;;  %v1781_v36 = vsel %vm1771_vm3, %v1778_v14, %v1780_v39  ;;  %v1784_v31 = vsel %vm1772_vm15, %v1766_v32, %v1783_v46  ;;  %v1776_v24 = vsel %vm1772_vm15, %v1760_v19, %v1775_v1 }
 0x3c3   : > { %vm3468_vm2 = vcmp.lt.s32.totalorder %v3467_v23, 0  ;;  %v1785_v51 = vsel %vm1771_vm3, %v1782_v61, %v1784_v31  ;;  %v6189_v38 = vmul.u32.u64.low %v1786_v62, %v1781_v36  ;;  %v6190_v9 = vmul.u32.u64.high %v1786_v62, %v1781_v36, %v6189_v38 }
 0x3c4   : > { %v3161_v4 = vsel %vm3468_vm2, 0, %v3467_v23  ;;  %v6186_v59 = vmul.u32.u64.low %v1786_v62, %v1785_v51  ;;  %v6187_v26 = vmul.u32.u64.high %v1786_v62, %v1785_v51, %v6186_v59  ;;  %v1846_v5 = vshrl.u32 %v1845_v3, 23 }
 0x3c5   : > { %v3162_v37 = vsub.s32 32, %v3161_v4  ;;  %v3166_v63 = vsub.s32 4294967266, %v3161_v4  ;;  %v3163_v20 = vshll.u32 %v6154_v17, %v3161_v4  ;;  %vm1729_vm5 = vcmp.lt.s32.totalorder %v6152_v6, 2 }
 0x3c6   : > { %vm1730_vm6 = vcmp.eq.s32.totalorder %v6152_v6, 0  ;;  %v3176_v57 = vsub.s32 4, %v6147_v35  ;;  %v1777_v25 = vsel %vm1771_vm3, %v1774_v29, %v1776_v24  ;;  %vm1733_vm7 = vcmp.eq.s32.totalorder %v6152_v6, 2 }
 0x3c7   : > { %v3164_v34 = vshrl.u32 %v3146_v33, %v3162_v37  ;;  %v3167_v41 = vadd.s32 127, %v3166_v63  ;;  %v3417_v12 = vadd.s32 4294967169, %v1846_v5  ;;  %vm1795_vm8 = vc.u32 %v6187_v26, %v6189_v38 }
 0x3c8   : > { %v1796_v17 = vadd.s32 1, %v6190_v9  ;;  %v1842_v22 = vand.u32 2147483647, %v6156_v10  ;;  %v1793_v7 = vmul.u32 %v1786_v62, %v1777_v25  ;;  %v3177_v8 = vsel %vm3092_vm1, %v3176_v57, %v6147_v35 }
 0x3c9   : > { %v3806_v60 = vpop.eup %3805  ;;  %v3165_v40 = vor.u32 %v3164_v34, %v3163_v20  ;;  %v3168_v45 = vshll.u32 %v3167_v41, 23  ;;  %v1852_v50 = vadd.s32 1, %v3417_v12  ;;  %vm6213_vm11 = vcmp.le.f32.partialorder %v3090_v53, 0.7853982 }
 0x3ca   : > { %v3808_v55 = vpop.eup %3807  ;;  %v1734_v18 = vxor.u32 2147483648, %v3806_v60  ;;  %v1797_v44 = vsel %vm1795_vm8, %v1796_v17, %v6190_v9  ;;  %v1849_v35 = vand.u32 8388607, %v1842_v22  ;;  %v3179_v3 = vsel %vm6213_vm11, 0, %v3177_v8 }
 0x3cb   : > { %v1731_v27 = vxor.u32 2147483648, %v3808_v55  ;;  %v3169_v15 = vor.u32 4788187, %v3168_v45  ;;  %v3172_v19 = vcvt.s32.f32 %v3165_v40  ;;  %v1798_v47 = vadd.s32 %v1797_v44, %v1793_v7 }
 0x3cc   : > { %v1735_v13 = vsel %vm1733_vm7, %v1734_v18, %v3808_v55  ;;  %vm1853_vm9 = vcmp.gt.s32.totalorder %v1852_v50, 0  ;;  %v3183_v53 = vadd.s32 3, %v3179_v3  ;;  %v1850_v46 = vor.u32 8388608, %v1849_v35 }
 0x3cd   : > { %v1732_v30 = vsel %vm1730_vm6, %v3806_v60, %v1731_v27  ;;  %v3170_v32 = vand.u32 2147483647, %v3169_v15  ;;  %v1854_v62 = vsel %vm1853_vm9, %v1852_v50, 0  ;;  %v1799_v23 = vadd.s32 536870912, %v1798_v47 }
 0x3ce   : > { %v1736_v33 = vsel %vm1729_vm5, %v1732_v30, %v1735_v13  ;;  %v1856_v6 = vand.u32 31, %v1854_v62  ;;  %v1855_v51 = vshrl.u32 %v1854_v62, 5  ;;  %v3184_v25 = vand.u32 3, %v3183_v53 }
 0x3cf   : > { %v1737_v42 = vsel %vm1726_vm4, nan, %v1736_v33  ;;  %v3173_v28 = vmul.f32 %v3172_v19, %v3170_v32  ;;  %v6224_v14 = vshrl.u32 %v1799_v23, 30  ;;  %v1890_v45 = vshll.u32 %v1850_v46, 8 }
 0x3d0   : > { %3205 = vst [vmem:[%s4521_s5 + $0x58] sm:$0xff] %v1737_v42  ;;  %v1857_v43 = vsub.s32 32, %v1856_v6  ;;  %v1859_v11 = vshll.u32 %v3972_v48, %v1856_v6  ;;  %v1862_v36 = vshll.u32 %v3973_v52, %v1856_v6  ;;  %v1865_v63 = vshll.u32 %v3974_v54, %v1856_v6 }
 0x3d1   : > { %v3174_v1 = vxor.u32 2147483648, %v3173_v28  ;;  %v1801_v39 = vshll.u32 %v6224_v14, 30  ;;  %v1868_v9 = vshll.u32 %v3975_v56, %v1856_v6  ;;  %v1871_v5 = vshll.u32 %v3976_v58, %v1856_v6 }
 0x3d2   : > { %v1860_v29 = vshrl.u32 %v3973_v52, %v1857_v43  ;;  %v1863_v31 = vshrl.u32 %v3974_v54, %v1857_v43  ;;  %v1866_v24 = vshrl.u32 %v3975_v56, %v1857_v43  ;;  %v1869_v52 = vshrl.u32 %v3976_v58, %v1857_v43 }
 0x3d3   : > { %v3175_v61 = vsel %vm3092_vm1, %v3174_v1, %v3173_v28  ;;  %v6236_v37 = vsub.s32 %v1798_v47, %v1801_v39  ;;  %v1872_v57 = vshrl.u32 %v3977_v2, %v1857_v43  ;;  %vm1874_vm12 = vcmp.lt.s32.totalorder %v1855_v51, 1 }
 0x3d4   : > { %v3178_v4 = vsel %vm6213_vm11, %v6004_v0, %v3175_v61  ;;  %v1861_v59 = vor.u32 %v1860_v29, %v1859_v11  ;;  %v1864_v34 = vor.u32 %v1863_v31, %v1862_v36  ;;  %v1867_v41 = vor.u32 %v1866_v24, %v1865_v63 }
 0x3d5   : > { %3809 = vcosq.f32 %v3178_v4  ;;  %v1804_v20 = vsub.s32 0, %v6236_v37  ;;  %v1870_v60 = vor.u32 %v1869_v52, %v1868_v9  ;;  %v1873_v40 = vor.u32 %v1872_v57, %v1871_v5 }
 0x3d6   : > { %3811 = vsinq.f32 %v3178_v4  ;;  %vm1876_vm10 = vcmp.lt.s32.totalorder %v1855_v51, 3  ;;  %vm1877_vm13 = vcmp.lt.s32.totalorder %v1855_v51, 4  ;;  %v1882_v56 = vsel %vm1874_vm12, %v1861_v59, %v1864_v34 }
 0x3d7   : > { %v3414_v54 = vmin.u32 %v1804_v20, %v6236_v37  ;;  %v1886_v55 = vsel %vm1874_vm12, %v1864_v34, %v1867_v41  ;;  %v1858_v18 = vshrl.u32 %v3972_v48, %v1857_v43  ;;  %v1879_v17 = vsel %vm1877_vm13, %v1867_v41, 2102212464 }
 0x3d8   : > { %v1883_v58 = vsel %vm1877_vm13, %v1870_v60, 920167782  ;;  %v1887_v27 = vsel %vm1877_vm13, %v1873_v40, 1326507024  ;;  %vm1875_vm14 = vcmp.lt.s32.totalorder %v1855_v51, 2  ;;  %vm3189_vm15 = vcmp.eq.s32.totalorder %v3184_v25, 2 }
 0x3d9   : > { %v1806_v12 = vclz %v3414_v54  ;;  %v1884_v15 = vsel %vm1876_vm10, %v1867_v41, %v1883_v58  ;;  %v1888_v7 = vsel %vm1876_vm10, %v1870_v60, %v1887_v27  ;;  %v1878_v50 = vsel %vm1874_vm12, %v1858_v18, %v1861_v59 }
 0x3da   : > { %v1885_v13 = vsel %vm1875_vm14, %v1882_v56, %v1884_v15  ;;  %v1889_v19 = vsel %vm1875_vm14, %v1886_v55, %v1888_v7  ;;  %v1880_v48 = vsel %vm1876_vm10, %v1864_v34, %v1879_v17  ;;  %v1794_v42 = vadd.s32 %v6189_v38, %v6187_v26 }
 0x3db   : > { %v3415_v2 = vadd.s32 4294967294, %v1806_v12  ;;  %v6255_v44 = vmul.u32.u64.low %v1890_v45, %v1889_v19  ;;  %v6256_v30 = vmul.u32.u64.high %v1890_v45, %v1889_v19, %v6255_v44  ;;  %vm3185_vm1 = vcmp.lt.s32.totalorder %v3184_v25, 2 }
 0x3dc   : > { %v6258_v21 = vmul.u32.u64.low %v1890_v45, %v1885_v13  ;;  %v6259_v35 = vmul.u32.u64.high %v1890_v45, %v1885_v13, %v6258_v21  ;;  %vm3186_vm2 = vcmp.eq.s32.totalorder %v3184_v25, 0  ;;  %v1881_v6 = vsel %vm1875_vm14, %v1878_v50, %v1880_v48 }
 0x3dd   : > { %vm3416_vm0 = vcmp.lt.s32.totalorder %v3415_v2, 0  ;;  %vm3182_vm3 = vweird.f32 %v6004_v0  ;;  %v1897_v4 = vmul.u32 %v1890_v45, %v1881_v6  ;;  %v1824_v51 = vsub.s32 4, %v6224_v14 }
 0x3de   : > { %v1809_v33 = vsel %vm3416_vm0, 0, %v3415_v2  ;;  %vm1899_vm4 = vc.u32 %v6256_v30, %v6258_v21  ;;  %v1900_v26 = vadd.s32 1, %v6259_v35  ;;  %vm1740_vm5 = vcmp.lt.s32.totalorder %v6106_v16, 0 }
 0x3df   : > { %v3810_v8 = vpop.eup %3809  ;;  %v1810_v28 = vsub.s32 32, %v1809_v33  ;;  %v1814_v3 = vsub.s32 4294967266, %v1809_v33  ;;  %v1811_v53 = vshll.u32 %v6236_v37, %v1809_v33  ;;  %v1825_v34 = vsel %vm1740_vm5, %v1824_v51, %v6224_v14 }
 0x3e0   : > { %v3812_v32 = vpop.eup %3811  ;;  %v3190_v47 = vxor.u32 2147483648, %v3810_v8  ;;  %v1901_v29 = vsel %vm1899_vm4, %v1900_v26, %v6259_v35  ;;  %vm1739_vm6 = vcmp.le.f32.partialorder %v1738_v49, 0.7853982  ;;  %v1898_v14 = vadd.s32 %v6258_v21, %v6256_v30 }
 0x3e1   : > { %v3187_v62 = vxor.u32 2147483648, %v3812_v32  ;;  %v1812_v43 = vshrl.u32 %v1794_v42, %v1810_v28  ;;  %v1815_v61 = vadd.s32 127, %v1814_v3  ;;  %v1902_v31 = vadd.s32 %v1901_v29, %v1897_v4 }
 0x3e2   : > { %v3191_v23 = vsel %vm3189_vm15, %v3190_v47, %v3812_v32  ;;  %v1827_v57 = vsel %vm1739_vm6, 0, %v1825_v34  ;;  %vm1830_vm12 = vweird.f32 %v6106_v16  ;;  %vm1844_vm10 = vcmp.lt.s32.totalorder %v6156_v10, 0 }
 0x3e3   : > { %v3188_v1 = vsel %vm3186_vm2, %v3810_v8, %v3187_v62  ;;  %v1813_v46 = vor.u32 %v1812_v43, %v1811_v53  ;;  %v1816_v11 = vshll.u32 %v1815_v61, 23  ;;  %v1903_v24 = vadd.s32 536870912, %v1902_v31 }
 0x3e4   : > { %v3192_v39 = vsel %vm3185_vm1, %v3188_v1, %v3191_v23  ;;  %v1831_v60 = vadd.s32 3, %v1827_v57  ;;  %vm1843_vm13 = vcmp.le.f32.partialorder %v1842_v22, 0.7853982  ;;  %vm1934_vm1 = vweird.f32 %v6156_v10 }
 0x3e5   : > { %v3193_v38 = vsel %vm3182_vm3, nan, %v3192_v39  ;;  %v1817_v36 = vor.u32 4788187, %v1816_v11  ;;  %v1820_v37 = vcvt.s32.f32 %v1813_v46  ;;  %v1904_v59 = vshrl.u32 %v1903_v24, 30 }
 0x3e6   : > { %3219 = vst [vmem:[%s4521_s5 + $0xc8] sm:$0xff] %v3193_v38  ;;  %v1832_v12 = vand.u32 3, %v1831_v60 }
 0x3e7   : > { %v1818_v63 = vand.u32 2147483647, %v1817_v36  ;;  %v1905_v20 = vshll.u32 %v1904_v59, 30  ;;  %v1928_v21 = vsub.s32 4, %v1904_v59 }
 0x3e8   : > { %vm1837_vm8 = vcmp.eq.s32.totalorder %v1832_v12, 2  ;;  %vm1834_vm9 = vcmp.eq.s32.totalorder %v1832_v12, 0  ;;  %vm1833_vm11 = vcmp.lt.s32.totalorder %v1832_v12, 2 }
 0x3e9   : > { %v1821_v0 = vmul.f32 %v1820_v37, %v1818_v63  ;;  %v1906_v52 = vsub.s32 %v1902_v31, %v1905_v20  ;;  %v1929_v42 = vsel %vm1844_vm10, %v1928_v21, %v1904_v59 }
 0x3eb   : > { %v1822_v9 = vxor.u32 2147483648, %v1821_v0  ;;  %v1908_v25 = vsub.s32 0, %v1906_v52 }
 0x3ed   : > { %v1823_v41 = vsel %vm1740_vm5, %v1822_v9, %v1821_v0  ;;  %v3418_v54 = vmin.u32 %v1908_v25, %v1906_v52 }
 0x3ee   : > { %v1826_v5 = vsel %vm1739_vm6, %v6106_v16, %v1823_v41  ;;  %v1931_v16 = vsel %vm1843_vm13, 0, %v1929_v42 }
 0x3ef   : > { %3813 = vcosq.f32 %v1826_v5  ;;  %v1910_v40 = vclz %v3418_v54  ;;  %v1935_v3 = vadd.s32 3, %v1931_v16 }
 0x3f0   : > { %3815 = vsinq.f32 %v1826_v5 }
 0x3f1   : > { %v3419_v45 = vadd.s32 4294967294, %v1910_v40  ;;  %v1936_v23 = vand.u32 3, %v1935_v3 }
 0x3f3   : > { %vm3420_vm7 = vcmp.lt.s32.totalorder %v3419_v45, 0  ;;  %vm1941_vm14 = vcmp.eq.s32.totalorder %v1936_v23, 2  ;;  %vm1938_vm15 = vcmp.eq.s32.totalorder %v1936_v23, 0  ;;  %vm1937_vm0 = vcmp.lt.s32.totalorder %v1936_v23, 2 }
 0x3f4   : > { %v1913_v56 = vsel %vm3420_vm7, 0, %v3419_v45 }
 0x3f5   : > { %v1914_v18 = vsub.s32 32, %v1913_v56  ;;  %v1918_v49 = vsub.s32 4294967266, %v1913_v56  ;;  %v1915_v2 = vshll.u32 %v1906_v52, %v1913_v56 }
 0x3f7   : > { %v1916_v15 = vshrl.u32 %v1898_v14, %v1914_v18  ;;  %v1919_v7 = vadd.s32 127, %v1918_v49 }
 0x3f9   : > { %v3814_v55 = vpop.eup %3813  ;;  %v1917_v19 = vor.u32 %v1916_v15, %v1915_v2  ;;  %v1920_v8 = vshll.u32 %v1919_v7, 23 }
 0x3fa   : > { %v3816_v17 = vpop.eup %3815  ;;  %v1838_v58 = vxor.u32 2147483648, %v3814_v55 }
 0x3fb   : > { %v1835_v27 = vxor.u32 2147483648, %v3816_v17  ;;  %v1921_v30 = vor.u32 4788187, %v1920_v8  ;;  %v1924_v47 = vcvt.s32.f32 %v1917_v19 }
 0x3fc   : > { %v1839_v50 = vsel %vm1837_vm8, %v1838_v58, %v3816_v17 }
 0x3fd   : > { %v1836_v13 = vsel %vm1834_vm9, %v3814_v55, %v1835_v27  ;;  %v1922_v32 = vand.u32 2147483647, %v1921_v30 }
 0x3fe   : > { %v1840_v48 = vsel %vm1833_vm11, %v1836_v13, %v1839_v50 }
 0x3ff   : > { %v1841_v44 = vsel %vm1830_vm12, nan, %v1840_v48  ;;  %v1925_v33 = vmul.f32 %v1924_v47, %v1922_v32 }
 0x400   : > { %3206 = vst [vmem:[%s4521_s5 + $0x60] sm:$0xff] %v1841_v44 }
 0x401   : > { %v1926_v35 = vxor.u32 2147483648, %v1925_v33 }
 0x403   : > { %v1927_v62 = vsel %vm1844_vm10, %v1926_v35, %v1925_v33 }
 0x404   : > { %v1930_v28 = vsel %vm1843_vm13, %v6156_v10, %v1927_v62 }
 0x405   : > { %3817 = vcosq.f32 %v1930_v28 }
 0x406   : > { %3819 = vsinq.f32 %v1930_v28 }
 0x40f   : > { %v3818_v6 = vpop.eup %3817 }
 0x410   : > { %v3820_v1 = vpop.eup %3819  ;;  %v1942_v53 = vxor.u32 2147483648, %v3818_v6  ;;  %3227 = sbr.rel (!%p6421_p10) target bundleno = 1075 (0x433), region = 44 }
 0x411   : > { %v1939_v43 = vxor.u32 2147483648, %v3820_v1 }
 0x412   : > { %v1943_v61 = vsel %vm1941_vm14, %v1942_v53, %v3820_v1 }
 0x413   : > { %v1940_v22 = vsel %vm1938_vm15, %v3818_v6, %v1939_v43 }
 0x414   : > { %v1944_v39 = vsel %vm1937_vm0, %v1940_v22, %v1943_v61 }
 0x415   : > { %v1945_v26 = vsel %vm1934_vm1, nan, %v1944_v39 }
 0x416   : > { %3207 = vst [vmem:[%s4521_s5 + $0x68] sm:$0xff] %v1945_v26 }
 0x417   : > { %s6433_s30 = smov (!%p3231_p12, %s3230_s30), 13 }
 0x418   : > { %s6290_s18 = sshll.u32 %s6433_s30, 8 }
 0x419   : > { %s3236_s22 = ssub.s32 3328, %s6290_s18 }
 0x41a   : > { %3237 = vsyncadd %s3221_s11, %s3236_s22  ;;  %p3471_p13 = scmp.ne.s32.totalorder %s6290_s18, 0  ;;  %s3482_s26 = smul.u32 3328, %s3955_s15 }
 0x41b   : > { %s3244_s21 = sshll.u32 %s4521_s5, 4  ;;  %s3978_s10 = smov [#allocation7]   ;;  %s6303_s21 = int_to_ptr.vmem [resolvable:$true] %s3244_s21 }
 0x41c   : > { %s6301_s7 = scalar_lea.hbm %s6357_s3, %s3482_s26  ;;  %s3877_s9 = scalar_lea.vmem %s6303_s21, %s6290_s18 }
 0x41d   : > { %p3878_p1 = scmp.ne.s32.totalorder %s6303_s21, %s3877_s9  ;;  %s3881_s4 = sshll.u32 %s3978_s10, 4  ;;  %s3882_s4 = int_to_ptr.vmem [resolvable:$false] %s3881_s4 }
 0x41e   : > { %s3883_s15 = scalar_lea.vmem %s3882_s4, 6656  ;;  %p3884_p8 = scmp.lt.s32.totalorder %s6303_s21, %s3882_s4 }
 0x41f   : > { %p3879_p11 = pnand %p3878_p1, %p3471_p13  ;;  %p3885_p9 = scmp.lt.s32.totalorder %s3883_s15, %s3877_s9 }
 0x421   : > { %p3880_p4 = pneg %p3879_p11  ;;  %p3886_p2 = por %p3885_p9, %p3884_p8 }
 0x423   : > { %p3887_p6 = pnand %p3886_p2, %p3880_p4 }
 0x425   : > { %3890 = shalt.err (!%p3887_p6)
}
 0x426   : > { %s3891_s23 = scalar_lea.hbm %s6301_s7, %s6290_s18  ;;  %s3895_s5 = scalar_lea.hbm %s6357_s3, 6400 }
 0x427   : > { %p3892_p0 = scmp.ne.s32.totalorder %s6301_s7, %s3891_s23  ;;  %p3896_p10 = scmp.lt.u32.totalorder %s6301_s7, %s6357_s3 }
 0x428   : > { %p3897_p12 = scmp.lt.u32.totalorder %s3895_s5, %s3891_s23  ;;  %p3899_p11 = scmp.lt.u32.totalorder %s3891_s23, %s6301_s7 }
 0x429   : > { %p3893_p7 = pnand %p3892_p0, %p3471_p13 }
 0x42a   : > { %p3898_p1 = por %p3897_p12, %p3896_p10 }
 0x42b   : > { %p3894_p5 = pneg %p3893_p7 }
 0x42c   : > { %p3900_p4 = por %p3899_p11, %p3898_p1 }
 0x42e   : > { %p3901_p8 = pnand %p3900_p4, %p3894_p5 }
 0x430   : > { %3904 = shalt.err (!%p3901_p8)
}
 0x431   : > { %s3979_s22 = smov 256   ;;  %s3980_s26 = smov 16  }
 0x432   : > { %3250 = dma.vmem_to_hbm [thread:$0]  (%p3471_p13), %s6303_s21, %s6290_s18, %s6301_s7, %s3221_s11, %s3979_s22, %s3979_s22, %s3980_s26  }
 0x433 PF: > { %s3259_s24 = sand.u32 1, %s3943_s12   ;;  %p6422_p9 = scmp.ne.s32.totalorder %s6366_s28, 0 }
 0x434   : > { %s3260_s6 = scalar_lea.sflag [#allocation4], %s3259_s24 }
 0x435   : > { %p3649_p2 = pnand %p3357_p3, %p6422_p9 }
 0x437   : > { %3938 = dma.done.wait (!%p3649_p2), %s3260_s6, 3328  }
 0x438   : > { %3940 = vsyncadd (!%p3649_p2), %s3260_s6, 4294963968  ;;  %s20_s17 = sadd.s32 1, %s3963_s17   ;;  %s6423_s12 = smov %s3947_s13 }
 0x439   : > { %p17_p6 = scmp.ge.s32.totalorder %s20_s17, 4   ;;  %s6424_s13 = smov %s3951_s14 }
 0x43a   : > { %s6425_s14 = smov %s4063_s27  ;;  %s6426_s15 = smov %s3959_s16 }
 0x43b   : > { %s6427_s16 = smov %s6429_s20  ;;  %19 = sbr.rel (!%p17_p6) target bundleno = 7 (0x7), region = 85 }
 0x442   :  { %3265 = vsyncpa [#allocation3], 1 }
 0x443   :  { %3267 = vsyncpa [#allocation3 + $0x1], 1 }
 0x444   :  { %3268 = vsyncpa [#allocation6], 1 }
 0x445   :  { %3269 = vsyncpa [#allocation4], 1 }
 0x446   :  { %3271 = vsyncpa [#allocation4 + $0x1], 1 }

// kernel: tpu_custom_call.1
= control target key start
LH: loop header
LB: loop body
LE: loop exit
PB: predicated region body
PF: predicated region fallthrough
CT: control target
= control target key end

     0   :  { %8 = vsyncpa [#allocation3], 0  ;;  %s6354_s0 = inlined_call_operand.hbm [shape: f32[200,128], index: 0, kind: input, shape index: {}]   ;;  %s6355_s1 = inlined_call_operand.hbm [shape: f32[128,256], index: 1, kind: input, shape index: {}]   ;;  %s6356_s2 = inlined_call_operand.vmem [shape: f32[1,256], index: 2, kind: input, shape index: {}]   ;;  %s6357_s3 = inlined_call_operand.hbm [shape: f32[200,256], index: 3, kind: output, shape index: {}]  }
   0x1   :  { %10 = vsyncpa [#allocation3 + $0x1], 0 }
   0x2   :  { %11 = vsyncpa [#allocation6], 0 }
   0x3   :  { %12 = vsyncpa [#allocation4], 0 }
   0x4   :  { %14 = vsyncpa [#allocation4 + $0x1], 0  ;;  %s4001_s12 = smov 0   ;;  %s4003_s13 = smov 0  }
   0x5   :  { %s4005_s14 = smov 0   ;;  %s4007_s15 = smov 0  }
   0x6   :  { %s4009_s16 = smov 0   ;;  %s4011_s17 = smov 0  }
   0x7 LB: > { %s3352_s18 = sadd.s32 4294967295, %s3963_s17   ;;  %s3353_s19 = sadd.s32 4294967294, %s3963_s17   ;;  %s3963_s17 = sphi %s4011_s17, %s20_s17   ;;  %s3959_s16 = sphi %s4009_s16, %s6427_s16   ;;  %s3955_s15 = sphi %s4007_s15, %s6426_s15   ;;  %s3951_s14 = sphi %s4005_s14, %s6425_s14   ;;  %s3947_s13 = sphi %s4003_s13, %s6424_s13   ;;  %s3943_s12 = sphi %s4001_s12, %s6423_s12  }
   0x8   : > { %s32_s20 = sadd.s32 1, %s3959_s16  ;;  %s39_s21 = sadd.s32 1, %s3951_s14 }
   0x9   : > { %p34_p0 = scmp.ge.s32.totalorder %s32_s20, 2  ;;  %p46_p1 = scmp.ne.s32.totalorder %s3951_s14, %s3947_s13 }
   0xa   : > { %p47_p2 = scmp.eq.s32.totalorder %s3963_s17, 0  ;;  %p52_p3 = scmp.ne.s32.totalorder %s3947_s13, %s3943_s12 }
   0xb   : > { %s6429_s20 = smov (%p34_p0, %s32_s20), 0  ;;  %p4046_p5 = scmp.eq.s32.totalorder %s3352_s18, 0 }
   0xc   : > { %p4042_p4 = por %p47_p2, %p46_p1  ;;  %s36_s24 = ssub.s32 %s3959_s16, %s6429_s20 }
   0xd   : > { %s6363_s23 = scalar_select %p4046_p5, 1, 0 }
   0xe   : > { %s6362_s22 = scalar_select %p4042_p4, 1, 0 }
   0xf   : > { %p130_p6 = scmp.eq.s32.totalorder %s3352_s18, 1  ;;  %p37_p7 = scmp.eq.s32.totalorder %s36_s24, 0 }
  0x10   : > { %p4054_p8 = por %p4046_p5, %p52_p3  ;;  %p136_p10 = scmp.eq.s32.totalorder %s3353_s19, 1 }
  0x11   : > { %p4058_p9 = por %p130_p6, %p46_p1  ;;  %p3354_p12 = scmp.ge.s32.totalorder %s3963_s17, 1 }
  0x12   : > { %s6364_s25 = scalar_select %p4054_p8, 1, 0 }
  0x13   : > { %s6365_s26 = scalar_select %p4058_p9, 1, 0 }
  0x14   : > { %s4063_s27 = scalar_select %p37_p7, %s3951_s14, %s39_s21  }
  0x15   : > { %p4065_p11 = por %p136_p10, %p52_p3  ;;  %p143_p13 = scmp.lt.s32.totalorder %s3963_s17, 3 }
  0x16   : > { %s3965_s30 = smov [#allocation5]   ;;  %s3821_s8 = scalar_lea.hbm %s6355_s1, 4096 }
  0x17   : > { %s6366_s28 = scalar_select %p4065_p11, 1, 0 }
  0x18   : > { %p4071_p0 = pnand %p3354_p12, %p143_p13  ;;  %s158_s4 = sshll.u32 %s3965_s30, 4  ;;  %s159_s4 = int_to_ptr.vmem [resolvable:$true] %s158_s4 }
  0x19   : > { %p3822_p3 = scmp.ne.s32.totalorder %s6355_s1, %s3821_s8  ;;  %p3828_p12 = scmp.lt.u32.totalorder %s3821_s8, %s6355_s1 }
  0x1a   : > { %s6367_s29 = scalar_select %p4071_p0, 1, 0 }
  0x1b   : > { %p3644_p1 = pneg %p4071_p0 }
  0x1d   : > { %p4079_p2 = pnand %p3644_p1, %p4046_p5 }
  0x1f   : > { %p3823_p6 = pneg %p4079_p2 }
  0x21   : > { %p3824_p7 = pnand %p3823_p6, %p3822_p3 }
  0x23   : > { %p3825_p10 = pneg %p3824_p7 }
  0x25   : > { %p3830_p13 = pnand %p3828_p12, %p3825_p10 }
  0x27   : > { %3833 = shalt.err (!%p3830_p13)
}
  0x28   : > { %s3834_s19 = scalar_lea.vmem %s159_s4, 4096  ;;  %p3842_p5 = scmp.lt.s32.totalorder %s159_s4, %s159_s4 }
  0x29   : > { %p3835_p1 = scmp.ne.s32.totalorder %s159_s4, %s3834_s19  ;;  %p3843_p8 = scmp.lt.s32.totalorder %s3834_s19, %s3834_s19 }
  0x2b   : > { %p3837_p11 = pnand %p3835_p1, %p3823_p6  ;;  %p3844_p0 = por %p3843_p8, %p3842_p5 }
  0x2d   : > { %p3838_p9 = pneg %p3837_p11 }
  0x2f   : > { %p3845_p4 = pnand %p3844_p0, %p3838_p9 }
  0x31   : > { %3848 = shalt.err (!%p3845_p4)
}
  0x32   : > { %s3966_s21 = smov 256   ;;  %s3967_s24 = smov 16  }
  0x33   : > { %3647 = dma.hbm_to_vmem [thread:$0]  (!%p4079_p2), %s6355_s1, 4096, %s159_s4, [#allocation6], %s3966_s21, %s3966_s21, %s3967_s24  }
  0x34   : > { %p3357_p3 = scmp.ge.s32.totalorder %s3963_s17, 2 }
  0x35   : > { %p6369_p11 = scmp.ne.s32.totalorder (!%p3357_p3), %s6362_s22, 0 }
  0x36   : > { %176 = sbr.rel (%p3357_p3) target bundleno = 96 (0x60), region = 24 }
  0x3d   : > { %179 = sbr.rel (!%p6369_p11) target bundleno = 96 (0x60), region = 28  ;;  %s180_s7 = sand.u32 (%p6369_p11), 1, %s3951_s14  }
  0x3e   : > { %s185_s8 = smul.u32 (%p6369_p11), 13, %s3959_s16  ;;  %s4109_s11 = scalar_lea.sflag (%p6369_p11), [#allocation3], %s180_s7 }
  0x3f   : > { %s3531_s9 = smul.u32 (%p6369_p11), 104, %s180_s7 }
  0x40   : > { %s186_s10 = ssub.s32 (%p6369_p11), 25, %s185_s8 }
  0x41   : > { %p187_p4 = scmp.lt.s32.totalorder (%p6369_p11), %s186_s10, 13  ;;  %s184_s18 = scalar_lea.vmem (%p6369_p11), [#allocation2], %s3531_s9 }
  0x44   : > { %s6431_s10 = smov (!%p187_p4, %s186_s10), 13 }
  0x45   : > { %s4106_s5 = sshll.u32 %s6431_s10, 7 }
  0x46   : > { %s191_s4 = ssub.s32 1664, %s4106_s5 }
  0x47   : > { %192 = vsyncadd %s4109_s11, %s191_s4  ;;  %p3359_p5 = scmp.ne.s32.totalorder %s4106_s5, 0  ;;  %s3478_s22 = smul.u32 1664, %s3959_s16 }
  0x48   : > { %s197_s19 = sshll.u32 %s184_s18, 4  ;;  %s3853_s9 = scalar_lea.hbm %s6354_s0, 3200  ;;  %s4119_s19 = int_to_ptr.vmem [resolvable:$true] %s197_s19 }
  0x49   : > { %s4117_s30 = scalar_lea.hbm %s6354_s0, %s3478_s22 }
  0x4a   : > { %s3849_s6 = scalar_lea.hbm %s4117_s30, %s4106_s5  ;;  %p3854_p2 = scmp.lt.u32.totalorder %s4117_s30, %s6354_s0 }
  0x4b   : > { %p3850_p8 = scmp.ne.s32.totalorder %s4117_s30, %s3849_s6  ;;  %p3855_p6 = scmp.lt.u32.totalorder %s3853_s9, %s3849_s6 }
  0x4c   : > { %p3857_p10 = scmp.lt.u32.totalorder %s3849_s6, %s4117_s30 }
  0x4d   : > { %p3851_p9 = pnand %p3850_p8, %p3359_p5  ;;  %p3856_p7 = por %p3855_p6, %p3854_p2 }
  0x4f   : > { %p3852_p0 = pneg %p3851_p9  ;;  %p3858_p12 = por %p3857_p10, %p3856_p7 }
  0x51   : > { %p3859_p13 = pnand %p3858_p12, %p3852_p0 }
  0x53   : > { %3862 = shalt.err (!%p3859_p13)
}
  0x54   : > { %s3863_s18 = scalar_lea.vmem %s4119_s19, %s4106_s5  ;;  %s3968_s22 = smov [#allocation2]  }
  0x55   : > { %p3864_p1 = scmp.ne.s32.totalorder %s4119_s19, %s3863_s18  ;;  %s3867_s21 = sshll.u32 %s3968_s22, 4  ;;  %s3868_s21 = int_to_ptr.vmem [resolvable:$false] %s3867_s21 }
  0x56   : > { %s3869_s24 = scalar_lea.vmem %s3868_s21, 3328  ;;  %p3870_p8 = scmp.lt.s32.totalorder %s4119_s19, %s3868_s21 }
  0x57   : > { %p3865_p11 = pnand %p3864_p1, %p3359_p5  ;;  %p3871_p9 = scmp.lt.s32.totalorder %s3869_s24, %s3863_s18 }
  0x59   : > { %p3866_p4 = pneg %p3865_p11  ;;  %p3872_p2 = por %p3871_p9, %p3870_p8 }
  0x5b   : > { %p3873_p6 = pnand %p3872_p2, %p3866_p4 }
  0x5d   : > { %3876 = shalt.err (!%p3873_p6)
}
  0x5e   : > { %s3969_s6 = smov 128   ;;  %s3970_s7 = smov 8  }
  0x5f   : > { %203 = dma.hbm_to_vmem [thread:$0]  (%p3359_p5), %s4117_s30, %s4106_s5, %s4119_s19, %s4109_s11, %s3969_s6, %s3969_s6, %s3970_s7  }
  0x60 PF: > { %p6370_p0 = scmp.ne.s32.totalorder %s6367_s29, 0 }
  0x61   : > { %s4149_s8 = sand.u32 (!%p6370_p0), 1, %s3947_s13   ;;  %p6371_p7 = scmp.ne.s32.totalorder (!%p6370_p0), %s6364_s25, 0 }
  0x62   : > { %209 = sbr.rel (%p6370_p0) target bundleno = 1075 (0x433), region = 32  ;;  %s212_s10 = scalar_lea.sflag (!%p6370_p0), [#allocation3], %s4149_s8 }
  0x63   : > { %s3532_s9 = smul.u32 (!%p6370_p0), 104, %s4149_s8 }
  0x65   : > { %s4153_s4 = scalar_lea.vmem (!%p6370_p0), [#allocation2], %s3532_s9 }
  0x69   : > { %3930 = dma.done.wait (%p6371_p7), %s212_s10, 1664  }
  0x6a   : > { %3932 = vsyncadd (%p6371_p7), %s212_s10, 4294965632  ;;  %p6372_p5 = scmp.ne.s32.totalorder %s6363_s23, 0 }
  0x6c   : > { %3934 = dma.done.wait (%p6372_p5), [#allocation6], 4096  }
  0x6d   : > { %3936 = vsyncadd (%p6372_p5), [#allocation6], 4294963200  ;;  %v3971_v0 = vmov 0.0   ;;  %v278_v1 = vld [vmem:[#allocation5 + $0x8] sm:$0xff]  ;;  %v280_v2 = vld [vmem:[#allocation5 + $0x18] sm:$0xff]  ;;  %v311_v62 = vlaneseq  ;;  %s3533_s29 = smul.u32 208, %s4149_s8 }
  0x6e   : > { %385 = vmatprep.mubr.f32.mxu0 %v3971_v0  ;;  %427 = vmatprep.mubr.f32.mxu1 %v3971_v0  ;;  %v277_v3 = vld [vmem:[#allocation5] sm:$0xff]  ;;  %v3483_v4 = vpack.c.bf16 %v280_v2, %v278_v1  ;;  %v279_v5 = vld [vmem:[#allocation5 + $0x10] sm:$0xff]  ;;  %v282_v6 = vld [vmem:[#allocation5 + $0x28] sm:$0xff]  ;;  %s3221_s11 = scalar_lea.sflag [#allocation4], %s4149_s8  ;;  %p6421_p10 = scmp.ne.s32.totalorder %s6365_s26, 0 }
  0x6f   : > { %v284_v7 = vld [vmem:[#allocation5 + $0x38] sm:$0xff]  ;;  %v3485_v8 = vpack.c.bf16 %v279_v5, %v277_v3  ;;  %v281_v10 = vld [vmem:[#allocation5 + $0x20] sm:$0xff]  ;;  %v283_v11 = vld [vmem:[#allocation5 + $0x30] sm:$0xff]  ;;  %v312_v63 = vshrl.u32 %v311_v62, 7  ;;  %s4521_s5 = scalar_lea.vmem [#allocation7], %s3533_s29  ;;  %s3228_s19 = smul.u32 (%p6421_p10), 13, %s3955_s15 }
  0x70   : > { %v3487_v9 = vpack.c.bf16 %v284_v7, %v282_v6  ;;  %v286_v12 = vld [vmem:[#allocation5 + $0x48] sm:$0xff]  ;;  %3484 = vmatprep.subr.bf16.mxu0 %v3483_v4  ;;  %3515 = vmatprep.subr.bf16.mxu1 %v3483_v4  ;;  %v288_v13 = vld [vmem:[#allocation5 + $0x58] sm:$0xff]  ;;  %v3489_v14 = vpack.c.bf16 %v283_v11, %v281_v10  ;;  %v285_v16 = vld [vmem:[#allocation5 + $0x40] sm:$0xff] }
  0x71   : > { %3486 = vmatpush1.bf16.msra.mxu0 %v3485_v8  ;;  %3523 = vmatpush1.bf16.msra.mxu1 %v3485_v8  ;;  %v3491_v15 = vpack.c.bf16 %v288_v13, %v286_v12  ;;  %v287_v17 = vld [vmem:[#allocation5 + $0x50] sm:$0xff]  ;;  %v290_v18 = vld [vmem:[#allocation5 + $0x68] sm:$0xff]  ;;  %v292_v19 = vld [vmem:[#allocation5 + $0x78] sm:$0xff]  ;;  %v313_v1 = vsub.s32 0, %v312_v63  ;;  %v317_v3 = vsub.s32 1, %v312_v63  ;;  %s3230_s30 = ssub.s32 (%p6421_p10), 25, %s3228_s19 }
  0x72   : > { %3488 = vmatprep.subr.bf16.mxu0 %v3487_v9  ;;  %3516 = vmatprep.subr.bf16.mxu1 %v3487_v9  ;;  %v3493_v20 = vpack.c.bf16 %v287_v17, %v285_v16  ;;  %v3495_v21 = vpack.c.bf16 %v292_v19, %v290_v18  ;;  %v289_v22 = vld [vmem:[#allocation5 + $0x60] sm:$0xff]  ;;  %v291_v23 = vld [vmem:[#allocation5 + $0x70] sm:$0xff]  ;;  %v294_v24 = vld [vmem:[#allocation5 + $0x88] sm:$0xff]  ;;  %p3231_p12 = scmp.lt.s32.totalorder (%p6421_p10), %s3230_s30, 13 }
  0x73   : > { %v296_v25 = vld [vmem:[#allocation5 + $0x98] sm:$0xff]  ;;  %v3497_v26 = vpack.c.bf16 %v291_v23, %v289_v22  ;;  %v293_v28 = vld [vmem:[#allocation5 + $0x80] sm:$0xff]  ;;  %v295_v29 = vld [vmem:[#allocation5 + $0x90] sm:$0xff] }
  0x74   : > { %v3499_v27 = vpack.c.bf16 %v296_v25, %v294_v24  ;;  %v298_v30 = vld [vmem:[#allocation5 + $0xa8] sm:$0xff]  ;;  %v300_v31 = vld [vmem:[#allocation5 + $0xb8] sm:$0xff]  ;;  %v3501_v32 = vpack.c.bf16 %v295_v29, %v293_v28  ;;  %v297_v34 = vld [vmem:[#allocation5 + $0xa0] sm:$0xff] }
  0x75   : > { %3490 = vmatpush1.bf16.msra.mxu0 %v3489_v14  ;;  %3524 = vmatpush1.bf16.msra.mxu1 %v3489_v14  ;;  %v3503_v33 = vpack.c.bf16 %v300_v31, %v298_v30  ;;  %v299_v35 = vld [vmem:[#allocation5 + $0xb0] sm:$0xff]  ;;  %v302_v36 = vld [vmem:[#allocation5 + $0xc8] sm:$0xff]  ;;  %v304_v37 = vld [vmem:[#allocation5 + $0xd8] sm:$0xff] }
  0x76   : > { %3492 = vmatprep.subr.bf16.mxu0 %v3491_v15  ;;  %3517 = vmatprep.subr.bf16.mxu1 %v3491_v15  ;;  %v3505_v38 = vpack.c.bf16 %v299_v35, %v297_v34  ;;  %v3507_v39 = vpack.c.bf16 %v304_v37, %v302_v36  ;;  %v301_v40 = vld [vmem:[#allocation5 + $0xc0] sm:$0xff]  ;;  %v303_v41 = vld [vmem:[#allocation5 + $0xd0] sm:$0xff]  ;;  %v306_v42 = vld [vmem:[#allocation5 + $0xe8] sm:$0xff] }
  0x77   : > { %v308_v43 = vld [vmem:[#allocation5 + $0xf8] sm:$0xff]  ;;  %v3509_v44 = vpack.c.bf16 %v303_v41, %v301_v40  ;;  %v305_v46 = vld [vmem:[#allocation5 + $0xe0] sm:$0xff]  ;;  %v307_v47 = vld [vmem:[#allocation5 + $0xf0] sm:$0xff] }
  0x78   : > { %v3511_v45 = vpack.c.bf16 %v308_v43, %v306_v42  ;;  %v3513_v48 = vpack.c.bf16 %v307_v47, %v305_v46  ;;  %v264_v49 = vld [vmem:[%s4153_s4] sm:$0xff]  ;;  %v271_v50 = vld [vmem:[%s4153_s4 + $0x38] sm:$0xff]  ;;  %v265_v51 = vld [vmem:[%s4153_s4 + $0x8] sm:$0xff] }
  0x79   : > { %3494 = vmatpush1.bf16.msra.mxu0 %v3493_v20  ;;  %3525 = vmatpush1.bf16.msra.mxu1 %v3493_v20  ;;  %v272_v52 = vld [vmem:[%s4153_s4 + $0x40] sm:$0xff]  ;;  %v266_v53 = vld [vmem:[%s4153_s4 + $0x10] sm:$0xff]  ;;  %v273_v54 = vld [vmem:[%s4153_s4 + $0x48] sm:$0xff] }
  0x7a   : > { %3496 = vmatprep.subr.bf16.mxu0 %v3495_v21  ;;  %3518 = vmatprep.subr.bf16.mxu1 %v3495_v21  ;;  %v267_v55 = vld [vmem:[%s4153_s4 + $0x18] sm:$0xff]  ;;  %v274_v56 = vld [vmem:[%s4153_s4 + $0x50] sm:$0xff]  ;;  %v268_v57 = vld [vmem:[%s4153_s4 + $0x20] sm:$0xff] }
  0x7b   : > { %v275_v58 = vld [vmem:[%s4153_s4 + $0x58] sm:$0xff]  ;;  %v269_v59 = vld [vmem:[%s4153_s4 + $0x28] sm:$0xff]  ;;  %v276_v60 = vld [vmem:[%s4153_s4 + $0x60] sm:$0xff] }
  0x7c   : > { %v270_v61 = vld [vmem:[%s4153_s4 + $0x30] sm:$0xff]  ;;  %v309_v2 = vld [vmem:[%s6356_s2] sm:$0x3] }
  0x7d   : > { %3498 = vmatpush1.bf16.msra.mxu0 %v3497_v26  ;;  %3526 = vmatpush1.bf16.msra.mxu1 %v3497_v26  ;;  %v4192_v4 = vrot.slane %v309_v2, %v313_v1  ;;  %v4194_v5 = vrot.slane %v309_v2, %v317_v3  ;;  %v3977_v2 = vmov 1326507024  }
  0x7e   : > { %3500 = vmatprep.subr.bf16.mxu0 %v3499_v27  ;;  %3519 = vmatprep.subr.bf16.mxu1 %v3499_v27 }
  0x81   : > { %3502 = vmatpush1.bf16.msra.mxu0 %v3501_v32  ;;  %3527 = vmatpush1.bf16.msra.mxu1 %v3501_v32 }
  0x82   : > { %3504 = vmatprep.subr.bf16.mxu0 %v3503_v33  ;;  %3520 = vmatprep.subr.bf16.mxu1 %v3503_v33 }
  0x85   : > { %3506 = vmatpush1.bf16.msra.mxu0 %v3505_v38  ;;  %3528 = vmatpush1.bf16.msra.mxu1 %v3505_v38 }
  0x86   : > { %3508 = vmatprep.subr.bf16.mxu0 %v3507_v39  ;;  %3521 = vmatprep.subr.bf16.mxu1 %v3507_v39 }
  0x89   : > { %3510 = vmatpush1.bf16.msra.mxu0 %v3509_v44  ;;  %3529 = vmatpush1.bf16.msra.mxu1 %v3509_v44 }
  0x8a   : > { %3512 = vmatprep.subr.bf16.mxu0 %v3511_v45  ;;  %3522 = vmatprep.subr.bf16.mxu1 %v3511_v45 }
  0x8d   : > { %3514 = vmatpush1.bf16.msra.mxu0 %v3513_v48  ;;  %3530 = vmatpush1.bf16.msra.mxu1 %v3513_v48  ;;  %v3972_v48 = vmov 683565275  }
  0x90   : > { %386 = vmatmul.mubr.f32.vlgmr.msra.gmra.mrb[0].mxu0 %v264_v49  ;;  %428 = vmatmul.mubr.f32.vlgmr.msra.gmra.mrb[0].mxu1 %v271_v50 }
  0x91   : > { %391 = vmatprep.mubr.f32.mxu0 %v3971_v0  ;;  %433 = vmatprep.mubr.f32.mxu1 %v3971_v0 }
  0x94   : > { %392 = vmatmul.mubr.f32.gmra.mrb[2].mxu0 %v265_v51  ;;  %434 = vmatmul.mubr.f32.gmra.mrb[2].mxu1 %v272_v52  ;;  %v3973_v52 = vmov 2475754826  }
  0x95   : > { %397 = vmatprep.mubr.f32.mxu0 %v3971_v0  ;;  %439 = vmatprep.mubr.f32.mxu1 %v3971_v0 }
  0x98   : > { %398 = vmatmul.mubr.f32.gmra.mrb[4].mxu0 %v266_v53  ;;  %440 = vmatmul.mubr.f32.gmra.mrb[4].mxu1 %v273_v54  ;;  %v3974_v54 = vmov 2131351028  }
  0x99   : > { %403 = vmatprep.mubr.f32.mxu0 %v3971_v0  ;;  %445 = vmatprep.mubr.f32.mxu1 %v3971_v0 }
  0x9c   : > { %404 = vmatmul.mubr.f32.gmra.mrb[6].mxu0 %v267_v55  ;;  %446 = vmatmul.mubr.f32.gmra.mrb[6].mxu1 %v274_v56  ;;  %v3975_v56 = vmov 2102212464  }
  0x9d   : > { %409 = vmatprep.mubr.f32.mxu0 %v3971_v0  ;;  %451 = vmatprep.mubr.f32.mxu1 %v3971_v0 }
  0xa0   : > { %410 = vmatmul.mubr.f32.gmra.mrb[8].mxu0 %v268_v57  ;;  %452 = vmatmul.mubr.f32.gmra.mrb[8].mxu1 %v275_v58  ;;  %v3976_v58 = vmov 920167782  }
  0xa1   : > { %415 = vmatprep.mubr.f32.mxu0 %v3971_v0  ;;  %457 = vmatprep.mubr.f32.mxu1 %v3971_v0 }
  0xa4   : > { %416 = vmatmul.mubr.f32.gmra.mrb[10].mxu0 %v269_v59  ;;  %458 = vmatmul.mubr.f32.gmra.mrb[10].mxu1 %v276_v60 }
  0xa5   : > { %421 = vmatprep.mubr.f32.mxu0 %v3971_v0 }
  0xa8   : > { %422 = vmatmul.mubr.f32.gmra.mrb[12].mxu0 %v270_v61 }
 0x163   : > { %v387_v6 = vpop.f32.mrb[0].mxu0  ;;  %v429_v7 = vpop.f32.mrb[0].mxu1 }
 0x164   : > { %v388_v8 = vadd.f32 %v387_v6, %v4192_v4  ;;  %v430_v0 = vadd.f32 %v429_v7, %v4192_v4  ;;  %v389_v9 = vpop.f32.mrb[1].mxu0  ;;  %v431_v10 = vpop.f32.mrb[1].mxu1 }
 0x165   : > { %v390_v11 = vadd.f32 %v389_v9, %v4194_v5  ;;  %v432_v32 = vadd.f32 %v431_v10, %v4194_v5 }
 0x166   : > { %v4199_v12 = vmul.f32 30.0, %v388_v8  ;;  %v4201_v13 = vmul.f32 30.0, %v430_v0 }
 0x167   : > { %v4203_v14 = vmul.f32 30.0, %v390_v11  ;;  %v4205_v15 = vpop.f32.mrb[2].mxu0  ;;  %v4207_v16 = vpop.f32.mrb[2].mxu1  ;;  %v4224_v42 = vmul.f32 30.0, %v432_v32 }
 0x168   : > { %v490_v17 = vand.u32 2147483647, %v4199_v12  ;;  %v493_v18 = vand.u32 2139095040, %v4199_v12  ;;  %v4211_v19 = vpop.f32.mrb[3].mxu0  ;;  %v1946_v20 = vand.u32 2147483647, %v4201_v13 }
 0x169   : > { %v1949_v21 = vand.u32 2139095040, %v4201_v13  ;;  %v597_v26 = vand.u32 2139095040, %v4203_v14  ;;  %v594_v35 = vand.u32 2147483647, %v4203_v14  ;;  %v4222_v37 = vpop.f32.mrb[3].mxu1  ;;  %vm492_vm12 = vcmp.lt.s32.totalorder %v4199_v12, 0 }
 0x16a   : > { %v494_v22 = vshrl.u32 %v493_v18, 23  ;;  %v497_v23 = vand.u32 8388607, %v490_v17  ;;  %v1953_v25 = vand.u32 8388607, %v1946_v20 }
 0x16b   : > { %v1950_v24 = vshrl.u32 %v1949_v21, 23  ;;  %v598_v29 = vshrl.u32 %v597_v26, 23  ;;  %v4232_v45 = vand.u32 8388607, %v594_v35  ;;  %vm4310_vm13 = vcmp.le.f32.partialorder %v490_v17, 0.7853982 }
 0x16c   : > { %v3365_v27 = vadd.s32 4294967169, %v494_v22  ;;  %v498_v30 = vor.u32 8388608, %v497_v23  ;;  %v1954_v33 = vor.u32 8388608, %v1953_v25 }
 0x16d   : > { %v3421_v28 = vadd.s32 4294967169, %v1950_v24  ;;  %v3369_v36 = vadd.s32 4294967169, %v598_v29 }
 0x16e   : > { %v500_v31 = vadd.s32 1, %v3365_v27  ;;  %v4226_v43 = vshll.u32 %v498_v30, 8  ;;  %v4228_v44 = vshll.u32 %v1954_v33, 8 }
 0x16f   : > { %v1956_v34 = vadd.s32 1, %v3421_v28  ;;  %v4234_v46 = vadd.s32 1, %v3369_v36 }
 0x170   : > { %vm501_vm0 = vcmp.gt.s32.totalorder %v500_v31, 0 }
 0x171   : > { %v502_v38 = vsel %vm501_vm0, %v500_v31, 0  ;;  %vm1957_vm1 = vcmp.gt.s32.totalorder %v1956_v34, 0  ;;  %vm605_vm5 = vcmp.gt.s32.totalorder %v4234_v46, 0 }
 0x172   : > { %v503_v39 = vshrl.u32 %v502_v38, 5  ;;  %v504_v40 = vand.u32 31, %v502_v38  ;;  %v1958_v41 = vsel %vm1957_vm1, %v1956_v34, 0 }
 0x173   : > { %v4237_v50 = vshrl.u32 %v1958_v41, 5  ;;  %v1960_v51 = vand.u32 31, %v1958_v41 }
 0x174   : > { %v505_v47 = vsub.s32 32, %v504_v40  ;;  %v507_v49 = vshll.u32 %v3972_v48, %v504_v40  ;;  %v510_v53 = vshll.u32 %v3973_v52, %v504_v40  ;;  %v513_v55 = vshll.u32 %v3974_v54, %v504_v40 }
 0x175   : > { %v516_v57 = vshll.u32 %v3975_v56, %v504_v40  ;;  %v519_v59 = vshll.u32 %v3976_v58, %v504_v40  ;;  %vm522_vm2 = vcmp.lt.s32.totalorder %v503_v39, 1  ;;  %vm524_vm3 = vcmp.lt.s32.totalorder %v503_v39, 3 }
 0x176   : > { %v508_v60 = vshrl.u32 %v3973_v52, %v505_v47  ;;  %v511_v61 = vshrl.u32 %v3974_v54, %v505_v47  ;;  %v514_v62 = vshrl.u32 %v3975_v56, %v505_v47  ;;  %v506_v63 = vshrl.u32 %v3972_v48, %v505_v47 }
 0x177   : > { %v517_v1 = vshrl.u32 %v3976_v58, %v505_v47  ;;  %v520_v3 = vshrl.u32 %v3977_v2, %v505_v47  ;;  %v1961_v0 = vsub.s32 32, %v1960_v51  ;;  %vm525_vm4 = vcmp.lt.s32.totalorder %v503_v39, 4 }
 0x178   : > { %v509_v6 = vor.u32 %v508_v60, %v507_v49  ;;  %v512_v7 = vor.u32 %v511_v61, %v510_v53  ;;  %v515_v8 = vor.u32 %v514_v62, %v513_v55  ;;  %v1963_v11 = vshll.u32 %v3972_v48, %v1960_v51 }
 0x179   : > { %v518_v9 = vor.u32 %v517_v1, %v516_v57  ;;  %v521_v10 = vor.u32 %v520_v3, %v519_v59  ;;  %v1966_v27 = vshll.u32 %v3973_v52, %v1960_v51  ;;  %vm523_vm6 = vcmp.lt.s32.totalorder %v503_v39, 2 }
 0x17a   : > { %v526_v18 = vsel %vm522_vm2, %v506_v63, %v509_v6  ;;  %v527_v21 = vsel %vm525_vm4, %v515_v8, 2102212464  ;;  %v530_v22 = vsel %vm522_vm2, %v509_v6, %v512_v7  ;;  %v534_v23 = vsel %vm522_vm2, %v512_v7, %v515_v8 }
 0x17b   : > { %v528_v24 = vsel %vm524_vm3, %v512_v7, %v527_v21  ;;  %v531_v25 = vsel %vm525_vm4, %v518_v9, 920167782  ;;  %v535_v26 = vsel %vm525_vm4, %v521_v10, 1326507024  ;;  %v1964_v30 = vshrl.u32 %v3973_v52, %v1961_v0 }
 0x17c   : > { %v532_v28 = vsel %vm524_vm3, %v515_v8, %v531_v25  ;;  %v536_v29 = vsel %vm524_vm3, %v518_v9, %v535_v26  ;;  %v529_v31 = vsel %vm523_vm6, %v526_v18, %v528_v24  ;;  %v1967_v34 = vshrl.u32 %v3974_v54, %v1961_v0 }
 0x17d   : > { %v533_v32 = vsel %vm523_vm6, %v530_v22, %v532_v28  ;;  %v537_v33 = vsel %vm523_vm6, %v534_v23, %v536_v29  ;;  %v1965_v47 = vor.u32 %v1964_v30, %v1963_v11  ;;  %v1969_v39 = vshll.u32 %v3974_v54, %v1960_v51  ;;  %v4295_v29 = vpop.f32.mrb[4].mxu0 }
 0x17e   : > { %v4261_v36 = vmul.u32.u64.low %v4226_v43, %v537_v33  ;;  %v4262_v38 = vmul.u32.u64.high %v4226_v43, %v537_v33, %v4261_v36  ;;  %v4265_v40 = vmul.u32.u64.low %v4226_v43, %v533_v32  ;;  %v4266_v41 = vmul.u32.u64.high %v4226_v43, %v533_v32, %v4265_v40 }
 0x17f   : > { %v1968_v49 = vor.u32 %v1967_v34, %v1966_v27  ;;  %v1970_v53 = vshrl.u32 %v3975_v56, %v1961_v0  ;;  %v1972_v55 = vshll.u32 %v3975_v56, %v1960_v51  ;;  %v1973_v57 = vshrl.u32 %v3976_v58, %v1961_v0 }
 0x180   : > { %v1975_v59 = vshll.u32 %v3976_v58, %v1960_v51  ;;  %v1976_v60 = vshrl.u32 %v3977_v2, %v1961_v0  ;;  %v545_v61 = vmul.u32 %v4226_v43, %v529_v31  ;;  %v1962_v62 = vshrl.u32 %v3972_v48, %v1961_v0 }
 0x181   : > { %v1971_v63 = vor.u32 %v1970_v53, %v1969_v39  ;;  %vm1978_vm7 = vcmp.lt.s32.totalorder %v4237_v50, 1  ;;  %vm547_vm8 = vc.u32 %v4262_v38, %v4265_v40  ;;  %v548_v1 = vadd.s32 1, %v4266_v41 }
 0x182   : > { %v1974_v3 = vor.u32 %v1973_v57, %v1972_v55  ;;  %vm1979_vm9 = vcmp.lt.s32.totalorder %v4237_v50, 2  ;;  %v1977_v6 = vor.u32 %v1976_v60, %v1975_v59  ;;  %vm1980_vm10 = vcmp.lt.s32.totalorder %v4237_v50, 3 }
 0x183   : > { %vm1981_vm11 = vcmp.lt.s32.totalorder %v4237_v50, 4  ;;  %v1986_v51 = vsel %vm1978_vm7, %v1965_v47, %v1968_v49  ;;  %v549_v43 = vsel %vm547_vm8, %v548_v1, %v4266_v41  ;;  %v1990_v0 = vsel %vm1978_vm7, %v1968_v49, %v1971_v63 }
 0x184   : > { %v1983_v7 = vsel %vm1981_vm11, %v1971_v63, 2102212464  ;;  %v1987_v8 = vsel %vm1981_vm11, %v1974_v3, 920167782  ;;  %v550_v9 = vadd.s32 %v549_v43, %v545_v61  ;;  %v1982_v10 = vsel %vm1978_vm7, %v1962_v62, %v1965_v47 }
 0x185   : > { %v1988_v11 = vsel %vm1980_vm10, %v1971_v63, %v1987_v8  ;;  %v1991_v18 = vsel %vm1981_vm11, %v1977_v6, 1326507024  ;;  %v1984_v21 = vsel %vm1980_vm10, %v1968_v49, %v1983_v7  ;;  %v606_v24 = vsel %vm605_vm5, %v4234_v46, 0 }
 0x186   : > { %v1989_v22 = vsel %vm1979_vm9, %v1986_v51, %v1988_v11  ;;  %v1992_v23 = vsel %vm1980_vm10, %v1974_v3, %v1991_v18  ;;  %v551_v25 = vadd.s32 536870912, %v550_v9  ;;  %v2053_v32 = vand.u32 2139095040, %v4224_v42 }
 0x187   : > { %v1993_v26 = vsel %vm1979_vm9, %v1990_v0, %v1992_v23  ;;  %v4291_v27 = vmul.u32.u64.low %v4228_v44, %v1989_v22  ;;  %v4292_v28 = vmul.u32.u64.high %v4228_v44, %v1989_v22, %v4291_v27  ;;  %v1985_v46 = vsel %vm1979_vm9, %v1982_v10, %v1984_v21 }
 0x188   : > { %v4298_v30 = vmul.u32.u64.low %v4228_v44, %v1993_v26  ;;  %v4299_v31 = vmul.u32.u64.high %v4228_v44, %v1993_v26, %v4298_v30  ;;  %v552_v33 = vshrl.u32 %v551_v25, 30  ;;  %v608_v34 = vand.u32 31, %v606_v24 }
 0x189   : > { %v2050_v36 = vand.u32 2147483647, %v4224_v42  ;;  %v602_v41 = vor.u32 8388608, %v4232_v45  ;;  %v2004_v49 = vadd.s32 1, %v4292_v28  ;;  %v2001_v50 = vmul.u32 %v4228_v44, %v1985_v46 }
 0x18a   : > { %v553_v47 = vshll.u32 %v552_v33, 30  ;;  %v609_v39 = vsub.s32 32, %v608_v34  ;;  %vm2003_vm14 = vc.u32 %v4299_v31, %v4291_v27  ;;  %v2054_v55 = vshrl.u32 %v2053_v32, 23 }
 0x18b   : > { %v576_v45 = vsub.s32 4, %v552_v33  ;;  %v2005_v59 = vsel %vm2003_vm14, %v2004_v49, %v4292_v28  ;;  %v4322_v60 = vand.u32 8388607, %v2050_v36  ;;  %v546_v17 = vadd.s32 %v4265_v40, %v4262_v38 }
 0x18c   : > { %v4317_v57 = vsub.s32 %v550_v9, %v553_v47  ;;  %v2006_v61 = vadd.s32 %v2005_v59, %v2001_v50  ;;  %v612_v62 = vshrl.u32 %v3973_v52, %v609_v39  ;;  %v4326_v63 = vshll.u32 %v602_v41, 8 }
 0x18d   : > { %v4329_v1 = vshrl.u32 %v606_v24, 5  ;;  %v615_v3 = vshrl.u32 %v3974_v54, %v609_v39  ;;  %v618_v6 = vshrl.u32 %v3975_v56, %v609_v39  ;;  %v611_v43 = vshll.u32 %v3972_v48, %v608_v34 }
 0x18e   : > { %v556_v44 = vsub.s32 0, %v4317_v57  ;;  %v2007_v51 = vadd.s32 536870912, %v2006_v61  ;;  %v614_v7 = vshll.u32 %v3973_v52, %v608_v34  ;;  %v3425_v8 = vadd.s32 4294967169, %v2054_v55 }
 0x18f   : > { %v577_v40 = vsel %vm492_vm12, %v576_v45, %v552_v33  ;;  %v617_v0 = vshll.u32 %v3974_v54, %v608_v34  ;;  %v621_v9 = vshrl.u32 %v3976_v58, %v609_v39  ;;  %v613_v11 = vor.u32 %v612_v62, %v611_v43 }
 0x190   : > { %v3366_v38 = vmin.u32 %v556_v44, %v4317_v57  ;;  %v2008_v10 = vshrl.u32 %v2007_v51, 30  ;;  %v620_v18 = vshll.u32 %v3975_v56, %v608_v34  ;;  %v624_v21 = vshrl.u32 %v3977_v2, %v609_v39 }
 0x191   : > { %v616_v23 = vor.u32 %v615_v3, %v614_v7  ;;  %v619_v24 = vor.u32 %v618_v6, %v617_v0  ;;  %v623_v25 = vshll.u32 %v3976_v58, %v608_v34  ;;  %vm626_vm15 = vcmp.lt.s32.totalorder %v4329_v1, 1 }
 0x192   : > { %v558_v22 = vclz %v3366_v38  ;;  %v2009_v26 = vshll.u32 %v2008_v10, 30  ;;  %v622_v28 = vor.u32 %v621_v9, %v620_v18  ;;  %v2058_v30 = vor.u32 8388608, %v4322_v60 }
 0x193   : > { %v579_v33 = vsel %vm4310_vm13, 0, %v577_v40  ;;  %v625_v46 = vor.u32 %v624_v21, %v623_v25  ;;  %vm629_vm0 = vcmp.lt.s32.totalorder %v4329_v1, 4  ;;  %vm627_vm1 = vcmp.lt.s32.totalorder %v4329_v1, 2 }
 0x194   : > { %v3367_v32 = vadd.s32 4294967294, %v558_v22  ;;  %v4348_v41 = vsub.s32 %v2006_v61, %v2009_v26  ;;  %vm628_vm2 = vcmp.lt.s32.totalorder %v4329_v1, 3  ;;  %v635_v34 = vsel %vm629_vm0, %v622_v28, 920167782 }
 0x195   : > { %vm1948_vm4 = vcmp.lt.s32.totalorder %v4201_v13, 0  ;;  %v610_v47 = vshrl.u32 %v3972_v48, %v609_v39  ;;  %v634_v49 = vsel %vm626_vm15, %v613_v11, %v616_v23  ;;  %v636_v50 = vsel %vm628_vm2, %v619_v24, %v635_v34  ;;  %v4392_v34 = vpop.f32.mrb[4].mxu1 }
 0x196   : > { %vm3368_vm3 = vcmp.lt.s32.totalorder %v3367_v32, 0  ;;  %v583_v45 = vadd.s32 3, %v579_v33  ;;  %v2012_v59 = vsub.s32 0, %v4348_v41  ;;  %v638_v61 = vsel %vm626_vm15, %v616_v23, %v619_v24 }
 0x197   : > { %v561_v55 = vsel %vm3368_vm3, 0, %v3367_v32  ;;  %v631_v3 = vsel %vm629_vm0, %v619_v24, 2102212464  ;;  %v639_v39 = vsel %vm629_vm0, %v625_v46, 1326507024  ;;  %v637_v43 = vsel %vm627_vm1, %v634_v49, %v636_v50 }
 0x198   : > { %v562_v62 = vsub.s32 32, %v561_v55  ;;  %v566_v44 = vsub.s32 4294967266, %v561_v55  ;;  %v563_v6 = vshll.u32 %v4317_v57, %v561_v55  ;;  %v3422_v51 = vmin.u32 %v2012_v59, %v4348_v41 }
 0x199   : > { %v640_v7 = vsel %vm628_vm2, %v622_v28, %v639_v39  ;;  %v2060_v9 = vadd.s32 1, %v3425_v8  ;;  %v2032_v21 = vsub.s32 4, %v2008_v10  ;;  %v630_v22 = vsel %vm626_vm15, %v610_v47, %v613_v11 }
 0x19a   : > { %v564_v38 = vshrl.u32 %v546_v17, %v562_v62  ;;  %v567_v40 = vadd.s32 127, %v566_v44  ;;  %v641_v0 = vsel %vm627_vm1, %v638_v61, %v640_v7  ;;  %v2014_v18 = vclz %v3422_v51 }
 0x19b   : > { %v632_v57 = vsel %vm628_vm2, %v616_v23, %v631_v3  ;;  %v4380_v26 = vmul.u32.u64.low %v4326_v63, %v641_v0  ;;  %v4381_v32 = vmul.u32.u64.high %v4326_v63, %v641_v0, %v4380_v26  ;;  %vm2061_vm5 = vcmp.gt.s32.totalorder %v2060_v9, 0 }
 0x19c   : > { %v565_v24 = vor.u32 %v564_v38, %v563_v6  ;;  %v568_v25 = vshll.u32 %v567_v40, 23  ;;  %v3423_v17 = vadd.s32 4294967294, %v2014_v18  ;;  %v2002_v11 = vadd.s32 %v4291_v27, %v4299_v31 }
 0x19d   : > { %v4384_v28 = vmul.u32.u64.low %v4326_v63, %v637_v43  ;;  %v4385_v33 = vmul.u32.u64.high %v4326_v63, %v637_v43, %v4384_v28  ;;  %v633_v23 = vsel %vm627_vm1, %v630_v22, %v632_v57  ;;  %v2062_v46 = vsel %vm2061_vm5, %v2060_v9, 0 }
 0x19e   : > { %v569_v8 = vor.u32 4788187, %v568_v25  ;;  %v4394_v47 = vand.u32 3, %v583_v45  ;;  %vm3424_vm6 = vcmp.lt.s32.totalorder %v3423_v17, 0  ;;  %v4398_v49 = vsel %vm1948_vm4, %v2032_v21, %v2008_v10 }
 0x19f   : > { %v2064_v50 = vand.u32 31, %v2062_v46  ;;  %v572_v59 = vcvt.s32.f32 %v565_v24  ;;  %v2017_v61 = vsel %vm3424_vm6, 0, %v3423_v17  ;;  %vm651_vm7 = vc.u32 %v4381_v32, %v4384_v28 }
 0x1a0   : > { %v570_v55 = vand.u32 2147483647, %v569_v8  ;;  %v2018_v27 = vsub.s32 32, %v2017_v61  ;;  %v2022_v31 = vsub.s32 4294967266, %v2017_v61  ;;  %v649_v1 = vmul.u32 %v4326_v63, %v633_v23 }
 0x1a1   : > { %v652_v62 = vadd.s32 1, %v4385_v33  ;;  %v2019_v44 = vshll.u32 %v4348_v41, %v2017_v61  ;;  %v4405_v3 = vshrl.u32 %v2062_v46, 5  ;;  %v2065_v10 = vsub.s32 32, %v2064_v50 }
 0x1a2   : > { %v573_v45 = vmul.f32 %v572_v59, %v570_v55  ;;  %v2020_v39 = vshrl.u32 %v2002_v11, %v2018_v27  ;;  %v2023_v6 = vadd.s32 127, %v2022_v31  ;;  %v2067_v43 = vshll.u32 %v3972_v48, %v2064_v50 }
 0x1a3   : > { %v653_v51 = vsel %vm651_vm7, %v652_v62, %v4385_v33  ;;  %v2068_v40 = vshrl.u32 %v3973_v52, %v2065_v10  ;;  %v2070_v63 = vshll.u32 %v3973_v52, %v2064_v50  ;;  %v2071_v18 = vshrl.u32 %v3974_v54, %v2065_v10 }
 0x1a4   : > { %v574_v7 = vxor.u32 2147483648, %v573_v45  ;;  %v654_v38 = vadd.s32 %v653_v51, %v649_v1  ;;  %v2021_v0 = vor.u32 %v2020_v39, %v2019_v44  ;;  %v2024_v9 = vshll.u32 %v2023_v6, 23 }
 0x1a5   : > { %v2073_v41 = vshll.u32 %v3974_v54, %v2064_v50  ;;  %v2074_v57 = vshrl.u32 %v3975_v56, %v2065_v10  ;;  %v2076_v24 = vshll.u32 %v3975_v56, %v2064_v50  ;;  %v2069_v33 = vor.u32 %v2068_v40, %v2067_v43 }
 0x1a6   : > { %v575_v21 = vsel %vm492_vm12, %v574_v7, %v573_v45  ;;  %v655_v22 = vadd.s32 536870912, %v654_v38  ;;  %v2025_v26 = vor.u32 4788187, %v2024_v9  ;;  %v2028_v17 = vcvt.s32.f32 %v2021_v0 }
 0x1a7   : > { %v578_v25 = vsel %vm4310_vm13, %v4199_v12, %v575_v21  ;;  %v2072_v11 = vor.u32 %v2071_v18, %v2070_v63  ;;  %v2077_v23 = vshrl.u32 %v3976_v58, %v2065_v10  ;;  %v2079_v55 = vshll.u32 %v3976_v58, %v2064_v50 }
 0x1a8   : > { %3717 = vcosq.f32 %v578_v25  ;;  %v4420_v8 = vshrl.u32 %v655_v22, 30  ;;  %v2026_v46 = vand.u32 2147483647, %v2025_v26  ;;  %v2080_v59 = vshrl.u32 %v3977_v2, %v2065_v10 }
 0x1a9   : > { %3719 = vsinq.f32 %v578_v25  ;;  %v2078_v27 = vor.u32 %v2077_v23, %v2076_v24  ;;  %vm4428_vm8 = vcmp.le.f32.partialorder %v1946_v20, 0.7853982  ;;  %v2075_v1 = vor.u32 %v2074_v57, %v2073_v41 }
 0x1aa   : > { %v657_v61 = vshll.u32 %v4420_v8, 30  ;;  %v2029_v31 = vmul.f32 %v2028_v17, %v2026_v46  ;;  %vm589_vm9 = vcmp.eq.s32.totalorder %v4394_v47, 2  ;;  %v2035_v62 = vsel %vm4428_vm8, 0, %v4398_v49 }
 0x1ab   : > { %vm2082_vm10 = vcmp.lt.s32.totalorder %v4405_v3, 1  ;;  %v4441_v45 = vshll.u32 %v2058_v30, 8  ;;  %vm586_vm11 = vcmp.eq.s32.totalorder %v4394_v47, 0  ;;  %v2081_v44 = vor.u32 %v2080_v59, %v2079_v55 }
 0x1ac   : > { %v4436_v50 = vsub.s32 %v654_v38, %v657_v61  ;;  %v2030_v20 = vxor.u32 2147483648, %v2029_v31  ;;  %vm2085_vm12 = vcmp.lt.s32.totalorder %v4405_v3, 4  ;;  %v2090_v39 = vsel %vm2082_vm10, %v2069_v33, %v2072_v11 }
 0x1ad   : > { %vm585_vm13 = vcmp.lt.s32.totalorder %v4394_v47, 2  ;;  %v2066_v6 = vshrl.u32 %v3972_v48, %v2065_v10  ;;  %vm2084_vm14 = vcmp.lt.s32.totalorder %v4405_v3, 3  ;;  %v2091_v60 = vsel %vm2085_vm12, %v2078_v27, 920167782 }
 0x1ae   : > { %v660_v49 = vsub.s32 0, %v4436_v50  ;;  %vm582_vm15 = vweird.f32 %v4199_v12  ;;  %v2031_v30 = vsel %vm1948_vm4, %v2030_v20, %v2029_v31  ;;  %vm596_vm0 = vcmp.lt.s32.totalorder %v4203_v14, 0 }
 0x1af   : > { %vm2083_vm1 = vcmp.lt.s32.totalorder %v4405_v3, 2  ;;  %v2087_v51 = vsel %vm2085_vm12, %v2075_v1, 2102212464  ;;  %v2092_v10 = vsel %vm2084_vm14, %v2075_v1, %v2091_v60  ;;  %v2034_v43 = vsel %vm4428_vm8, %v4201_v13, %v2031_v30 }
 0x1b0   : > { %v3370_v7 = vmin.u32 %v660_v49, %v4436_v50  ;;  %v2093_v38 = vsel %vm2083_vm1, %v2090_v39, %v2092_v10  ;;  %v2094_v40 = vsel %vm2082_vm10, %v2072_v11, %v2075_v1  ;;  %3721 = vcosq.f32 %v2034_v43 }
 0x1b1   : > { %v2095_v63 = vsel %vm2085_vm12, %v2081_v44, 1326507024  ;;  %v4473_v0 = vmul.u32.u64.low %v4441_v45, %v2093_v38  ;;  %v4474_v9 = vmul.u32.u64.high %v4441_v45, %v2093_v38, %v4473_v0  ;;  %3723 = vsinq.f32 %v2034_v43 }
 0x1b2   : > { %v3718_v18 = vpop.eup %3717  ;;  %vm4480_vm2 = vcmp.le.f32.partialorder %v594_v35, 0.7853982  ;;  %v662_v21 = vclz %v3370_v7  ;;  %v2086_v22 = vsel %vm2082_vm10, %v2066_v6, %v2069_v33  ;;  %v2088_v57 = vsel %vm2084_vm14, %v2072_v11, %v2087_v51  ;;  %v4495_v33 = vpop.f32.mrb[5].mxu0 }
 0x1b3   : > { %v3720_v24 = vpop.eup %3719  ;;  %v590_v25 = vxor.u32 2147483648, %v3718_v18  ;;  %v2039_v26 = vadd.s32 3, %v2035_v62  ;;  %v680_v17 = vsub.s32 4, %v4420_v8  ;;  %v2096_v23 = vsel %vm2084_vm14, %v2078_v27, %v2095_v63 }
 0x1b4   : > { %v587_v46 = vxor.u32 2147483648, %v3720_v24  ;;  %v3371_v35 = vadd.s32 4294967294, %v662_v21  ;;  %v2097_v55 = vsel %vm2083_vm1, %v2094_v40, %v2096_v23  ;;  %v394_v59 = vadd.f32 %v4205_v15, %v4192_v4 }
 0x1b5   : > { %v591_v11 = vsel %vm589_vm9, %v590_v25, %v3720_v24  ;;  %v2089_v61 = vsel %vm2083_vm1, %v2086_v22, %v2088_v57  ;;  %v4502_v53 = vmul.u32.u64.low %v4441_v45, %v2097_v55  ;;  %v4503_v27 = vmul.u32.u64.high %v4441_v45, %v2097_v55, %v4502_v53 }
 0x1b6   : > { %v588_v31 = vsel %vm586_vm11, %v3718_v18, %v587_v46  ;;  %vm3372_vm3 = vcmp.lt.s32.totalorder %v3371_v35, 0  ;;  %v2108_v1 = vadd.s32 1, %v4474_v9  ;;  %v4508_v15 = vmul.f32 30.0, %v394_v59 }
 0x1b7   : > { %v592_v62 = vsel %vm585_vm13, %v588_v31, %v591_v11  ;;  %v2040_v20 = vand.u32 3, %v2039_v26  ;;  %v650_v3 = vadd.s32 %v4384_v28, %v4381_v32  ;;  %v665_v44 = vsel %vm3372_vm3, 0, %v3371_v35 }
 0x1b8   : > { %v593_v39 = vsel %vm582_vm15, nan, %v592_v62  ;;  %v666_v49 = vsub.s32 32, %v665_v44  ;;  %v670_v6 = vsub.s32 4294967266, %v665_v44  ;;  %v681_v60 = vsel %vm596_vm0, %v680_v17, %v4420_v8 }
 0x1b9   : > { %3194 = vst [vmem:[%s4521_s5] sm:$0xff] %v593_v39  ;;  %v667_v47 = vshll.u32 %v4436_v50, %v665_v44  ;;  %v2105_v30 = vmul.u32 %v4441_v45, %v2089_v61  ;;  %vm2107_vm4 = vc.u32 %v4503_v27, %v4473_v0  ;;  %v698_v12 = vand.u32 2147483647, %v4508_v15 }
 0x1ba   : > { %v668_v32 = vshrl.u32 %v650_v3, %v666_v49  ;;  %v671_v28 = vadd.s32 127, %v670_v6  ;;  %v2109_v51 = vsel %vm2107_vm4, %v2108_v1, %v4474_v9  ;;  %v701_v8 = vand.u32 2139095040, %v4508_v15  ;;  %v3722_v10 = vpop.eup %3721 }
 0x1bb   : > { %vm2038_vm5 = vweird.f32 %v4201_v13  ;;  %vm2042_vm6 = vcmp.eq.s32.totalorder %v2040_v20, 0  ;;  %v683_v50 = vsel %vm4480_vm2, 0, %v681_v60  ;;  %v2110_v43 = vadd.s32 %v2109_v51, %v2105_v30  ;;  %v3724_v45 = vpop.eup %3723 }
 0x1bc   : > { %v2046_v7 = vxor.u32 2147483648, %v3722_v10  ;;  %v669_v38 = vor.u32 %v668_v32, %v667_v47  ;;  %v672_v40 = vshll.u32 %v671_v28, 23  ;;  %v702_v63 = vshrl.u32 %v701_v8, 23 }
 0x1bd   : > { %v2043_v18 = vxor.u32 2147483648, %v3724_v45  ;;  %vm2045_vm7 = vcmp.eq.s32.totalorder %v2040_v20, 2  ;;  %v2111_v21 = vadd.s32 536870912, %v2110_v43  ;;  %v436_v9 = vadd.f32 %v4207_v16, %v4192_v4 }
 0x1be   : > { %v2047_v22 = vsel %vm2045_vm7, %v2046_v7, %v3724_v45  ;;  %v673_v57 = vor.u32 4788187, %v672_v40  ;;  %v3373_v24 = vadd.s32 4294967169, %v702_v63  ;;  %v705_v25 = vand.u32 8388607, %v698_v12 }
 0x1bf   : > { %vm2041_vm8 = vcmp.lt.s32.totalorder %v2040_v20, 2  ;;  %v2044_v26 = vsel %vm2042_vm6, %v3722_v10, %v2043_v18  ;;  %v687_v17 = vadd.s32 3, %v683_v50  ;;  %v2112_v23 = vshrl.u32 %v2111_v21, 30 }
 0x1c0   : > { %v2048_v46 = vsel %vm2041_vm8, %v2044_v26, %v2047_v22  ;;  %v674_v35 = vand.u32 2147483647, %v673_v57  ;;  %v676_v55 = vcvt.s32.f32 %v669_v38  ;;  %v708_v59 = vadd.s32 1, %v3373_v24 }
 0x1c1   : > { %v2049_v11 = vsel %vm2038_vm5, nan, %v2048_v46  ;;  %v2113_v16 = vshll.u32 %v2112_v23, 30  ;;  %v2136_v61 = vsub.s32 4, %v2112_v23  ;;  %v4541_v53 = vmul.f32 30.0, %v436_v9 }
 0x1c2   : > { %3208 = vst [vmem:[%s4521_s5 + $0x70] sm:$0xff] %v2049_v11  ;;  %v677_v31 = vmul.f32 %v676_v55, %v674_v35  ;;  %vm2052_vm9 = vcmp.lt.s32.totalorder %v4224_v42, 0  ;;  %v706_v1 = vor.u32 8388608, %v705_v25  ;;  %vm709_vm10 = vcmp.gt.s32.totalorder %v708_v59, 0 }
 0x1c3   : > { %v4545_v62 = vsub.s32 %v2110_v43, %v2113_v16  ;;  %v2137_v20 = vsel %vm2052_vm9, %v2136_v61, %v2112_v23  ;;  %v710_v3 = vsel %vm709_vm10, %v708_v59, 0  ;;  %v2154_v44 = vand.u32 2147483647, %v4541_v53 }
 0x1c4   : > { %v678_v13 = vxor.u32 2147483648, %v677_v31  ;;  %vm4552_vm11 = vcmp.le.f32.partialorder %v2050_v36, 0.7853982  ;;  %v712_v49 = vand.u32 31, %v710_v3  ;;  %v4556_v6 = vand.u32 3, %v687_v17 }
 0x1c5   : > { %v2116_v60 = vsub.s32 0, %v4545_v62  ;;  %v2139_v47 = vsel %vm4552_vm11, 0, %v2137_v20  ;;  %v2157_v30 = vand.u32 2139095040, %v4541_v53  ;;  %v2106_v28 = vadd.s32 %v4473_v0, %v4503_v27 }
 0x1c6   : > { %v679_v32 = vsel %vm596_vm0, %v678_v13, %v677_v31  ;;  %v713_v36 = vsub.s32 32, %v712_v49  ;;  %v4566_v51 = vshll.u32 %v706_v1, 8  ;;  %v4572_v50 = vshrl.u32 %v710_v3, 5 }
 0x1c7   : > { %v682_v8 = vsel %vm4480_vm2, %v4203_v14, %v679_v32  ;;  %v3426_v10 = vmin.u32 %v2116_v60, %v4545_v62  ;;  %v4576_v43 = vand.u32 8388607, %v2154_v44  ;;  %v4578_v45 = vadd.s32 3, %v2139_v47 }
 0x1c8   : > { %3725 = vcosq.f32 %v682_v8  ;;  %v716_v0 = vshrl.u32 %v3973_v52, %v713_v36  ;;  %v719_v27 = vshrl.u32 %v3974_v54, %v713_v36  ;;  %v715_v41 = vshll.u32 %v3972_v48, %v712_v49 }
 0x1c9   : > { %3727 = vsinq.f32 %v682_v8  ;;  %v2118_v7 = vclz %v3426_v10  ;;  %v2158_v38 = vshrl.u32 %v2157_v30, 23  ;;  %v714_v40 = vshrl.u32 %v3972_v48, %v713_v36 }
 0x1ca   : > { %v718_v63 = vshll.u32 %v3973_v52, %v712_v49  ;;  %v721_v18 = vshll.u32 %v3974_v54, %v712_v49  ;;  %v722_v21 = vshrl.u32 %v3975_v56, %v713_v36  ;;  %v717_v22 = vor.u32 %v716_v0, %v715_v41  ;;  %v4610_v41 = vpop.f32.mrb[5].mxu1 }
 0x1cb   : > { %v3427_v9 = vadd.s32 4294967294, %v2118_v7  ;;  %v724_v57 = vshll.u32 %v3975_v56, %v712_v49  ;;  %v725_v24 = vshrl.u32 %v3976_v58, %v713_v36  ;;  %vm693_vm12 = vcmp.eq.s32.totalorder %v4556_v6, 2 }
 0x1cc   : > { %v720_v25 = vor.u32 %v719_v27, %v718_v63  ;;  %v723_v26 = vor.u32 %v722_v21, %v721_v18  ;;  %v727_v17 = vshll.u32 %v3976_v58, %v712_v49  ;;  %v728_v23 = vshrl.u32 %v3977_v2, %v713_v36 }
 0x1cd   : > { %vm690_vm13 = vcmp.eq.s32.totalorder %v4556_v6, 0  ;;  %vm3428_vm14 = vcmp.lt.s32.totalorder %v3427_v9, 0  ;;  %v726_v46 = vor.u32 %v725_v24, %v724_v57  ;;  %vm730_vm15 = vcmp.lt.s32.totalorder %v4572_v50, 1 }
 0x1ce   : > { %vm731_vm0 = vcmp.lt.s32.totalorder %v4572_v50, 2  ;;  %vm689_vm1 = vcmp.lt.s32.totalorder %v4556_v6, 2  ;;  %v2121_v35 = vsel %vm3428_vm14, 0, %v3427_v9  ;;  %v729_v55 = vor.u32 %v728_v23, %v727_v17 }
 0x1cf   : > { %vm732_vm2 = vcmp.lt.s32.totalorder %v4572_v50, 3  ;;  %vm733_vm3 = vcmp.lt.s32.totalorder %v4572_v50, 4  ;;  %vm686_vm4 = vweird.f32 %v4203_v14  ;;  %v2122_v59 = vsub.s32 32, %v2121_v35 }
 0x1d0   : > { %v2126_v11 = vsub.s32 4294967266, %v2121_v35  ;;  %v734_v16 = vsel %vm730_vm15, %v714_v40, %v717_v22  ;;  %v735_v61 = vsel %vm733_vm3, %v723_v26, 2102212464  ;;  %v2123_v31 = vshll.u32 %v4545_v62, %v2121_v35 }
 0x1d1   : > { %v738_v1 = vsel %vm730_vm15, %v717_v22, %v720_v25  ;;  %v739_v20 = vsel %vm733_vm3, %v726_v46, 920167782  ;;  %v742_v3 = vsel %vm730_vm15, %v720_v25, %v723_v26  ;;  %v2124_v13 = vshrl.u32 %v2106_v28, %v2122_v59 }
 0x1d2   : > { %v2127_v49 = vadd.s32 127, %v2126_v11  ;;  %v740_v60 = vsel %vm732_vm2, %v723_v26, %v739_v20  ;;  %v743_v47 = vsel %vm733_vm3, %v729_v55, 1326507024  ;;  %v3726_v30 = vpop.eup %3725  ;;  %v736_v32 = vsel %vm732_vm2, %v720_v25, %v735_v61 }
 0x1d3   : > { %v741_v36 = vsel %vm731_vm0, %v738_v1, %v740_v60  ;;  %v744_v8 = vsel %vm732_vm2, %v726_v46, %v743_v47  ;;  %v3429_v62 = vadd.s32 4294967169, %v2158_v38  ;;  %v3728_v10 = vpop.eup %3727  ;;  %v694_v0 = vxor.u32 2147483648, %v3726_v30 }
 0x1d4   : > { %v2125_v27 = vor.u32 %v2124_v13, %v2123_v31  ;;  %v2128_v28 = vshll.u32 %v2127_v49, 23  ;;  %v745_v7 = vsel %vm731_vm0, %v742_v3, %v744_v8  ;;  %v691_v40 = vxor.u32 2147483648, %v3728_v10 }
 0x1d5   : > { %v4613_v63 = vmul.u32.u64.low %v4566_v51, %v745_v7  ;;  %v4614_v18 = vmul.u32.u64.high %v4566_v51, %v745_v7, %v4613_v63  ;;  %v2164_v21 = vadd.s32 1, %v3429_v62  ;;  %v695_v9 = vsel %vm693_vm12, %v694_v0, %v3728_v10 }
 0x1d6   : > { %v2129_v38 = vor.u32 4788187, %v2128_v28  ;;  %v737_v22 = vsel %vm731_vm0, %v734_v16, %v736_v32  ;;  %v2162_v57 = vor.u32 8388608, %v4576_v43  ;;  %v692_v24 = vsel %vm690_vm13, %v3726_v30, %v691_v40 }
 0x1d7   : > { %v4624_v25 = vmul.u32.u64.low %v4566_v51, %v741_v36  ;;  %v4625_v26 = vmul.u32.u64.high %v4566_v51, %v741_v36, %v4624_v25  ;;  %vm2165_vm5 = vcmp.gt.s32.totalorder %v2164_v21, 0  ;;  %v696_v17 = vsel %vm689_vm1, %v692_v24, %v695_v9 }
 0x1d8   : > { %v2130_v23 = vand.u32 2147483647, %v2129_v38  ;;  %v2132_v46 = vcvt.s32.f32 %v2125_v27  ;;  %v2166_v35 = vsel %vm2165_vm5, %v2164_v21, 0  ;;  %v697_v50 = vsel %vm686_vm4, nan, %v696_v17 }
 0x1d9   : > { %v396_v43 = vadd.f32 %v4211_v19, %v4194_v5  ;;  %3195 = vst [vmem:[%s4521_s5 + $0x8] sm:$0xff] %v697_v50  ;;  %v4636_v59 = vand.u32 3, %v4578_v45  ;;  %vm755_vm6 = vc.u32 %v4614_v18, %v4624_v25  ;;  %v2168_v11 = vand.u32 31, %v2166_v35 }
 0x1da   : > { %v2133_v55 = vmul.f32 %v2132_v46, %v2130_v23  ;;  %v753_v6 = vmul.u32 %v4566_v51, %v737_v22  ;;  %v756_v16 = vadd.s32 1, %v4625_v26  ;;  %v2167_v61 = vshrl.u32 %v2166_v35, 5 }
 0x1db   : > { %v4642_v31 = vshll.u32 %v2162_v57, 8  ;;  %v2169_v1 = vsub.s32 32, %v2168_v11  ;;  %v2171_v19 = vshll.u32 %v3972_v48, %v2168_v11  ;;  %v2174_v20 = vshll.u32 %v3973_v52, %v2168_v11 }
 0x1dc   : > { %v2134_v14 = vxor.u32 2147483648, %v2133_v55  ;;  %v757_v45 = vsel %vm755_vm6, %v756_v16, %v4625_v26  ;;  %v2177_v3 = vshll.u32 %v3974_v54, %v2168_v11  ;;  %v2180_v13 = vshll.u32 %v3975_v56, %v2168_v11 }
 0x1dd   : > { %v2183_v49 = vshll.u32 %v3976_v58, %v2168_v11  ;;  %v758_v60 = vadd.s32 %v757_v45, %v753_v6  ;;  %v2170_v47 = vshrl.u32 %v3972_v48, %v2169_v1  ;;  %v2172_v30 = vshrl.u32 %v3973_v52, %v2169_v1 }
 0x1de   : > { %v2135_v51 = vsel %vm2052_vm9, %v2134_v14, %v2133_v55  ;;  %v2175_v36 = vshrl.u32 %v3974_v54, %v2169_v1  ;;  %v2178_v8 = vshrl.u32 %v3975_v56, %v2169_v1  ;;  %v2181_v62 = vshrl.u32 %v3976_v58, %v2169_v1 }
 0x1df   : > { %v2138_v32 = vsel %vm4552_vm11, %v4224_v42, %v2135_v51  ;;  %v759_v10 = vadd.s32 536870912, %v758_v60  ;;  %v2173_v0 = vor.u32 %v2172_v30, %v2171_v19  ;;  %v2184_v27 = vshrl.u32 %v3977_v2, %v2169_v1 }
 0x1e0   : > { %3729 = vcosq.f32 %v2138_v32  ;;  %v2176_v28 = vor.u32 %v2175_v36, %v2174_v20  ;;  %v2179_v7 = vor.u32 %v2178_v8, %v2177_v3  ;;  %v2182_v40 = vor.u32 %v2181_v62, %v2180_v13  ;;  %v4694_v36 = vpop.f32.mrb[6].mxu0 }
 0x1e1   : > { %3731 = vsinq.f32 %v2138_v32  ;;  %v760_v63 = vshrl.u32 %v759_v10, 30  ;;  %v2185_v21 = vor.u32 %v2184_v27, %v2183_v49  ;;  %vm2186_vm7 = vcmp.lt.s32.totalorder %v2167_v61, 1 }
 0x1e2   : > { %vm2189_vm8 = vcmp.lt.s32.totalorder %v2167_v61, 4  ;;  %vm2188_vm9 = vcmp.lt.s32.totalorder %v2167_v61, 3  ;;  %v2194_v9 = vsel %vm2186_vm7, %v2173_v0, %v2176_v28  ;;  %vm2187_vm10 = vcmp.lt.s32.totalorder %v2167_v61, 2 }
 0x1e3   : > { %v2191_v39 = vsel %vm2189_vm8, %v2179_v7, 2102212464  ;;  %v2195_v38 = vsel %vm2189_vm8, %v2182_v40, 920167782  ;;  %v761_v22 = vshll.u32 %v760_v63, 30  ;;  %v2198_v24 = vsel %vm2186_vm7, %v2176_v28, %v2179_v7 }
 0x1e4   : > { %v2196_v57 = vsel %vm2188_vm9, %v2179_v7, %v2195_v38  ;;  %v2190_v26 = vsel %vm2186_vm7, %v2170_v47, %v2173_v0  ;;  %v2199_v23 = vsel %vm2189_vm8, %v2185_v21, 1326507024  ;;  %v4662_v46 = vmul.f32 30.0, %v396_v43 }
 0x1e5   : > { %v2197_v17 = vsel %vm2187_vm10, %v2194_v9, %v2196_v57  ;;  %v4664_v35 = vsub.s32 %v758_v60, %v761_v22  ;;  %v784_v50 = vsub.s32 4, %v760_v63  ;;  %v2192_v55 = vsel %vm2188_vm9, %v2176_v28, %v2191_v39 }
 0x1e6   : > { %v2200_v11 = vsel %vm2188_vm9, %v2182_v40, %v2199_v23  ;;  %v4668_v16 = vmul.u32.u64.low %v4642_v31, %v2197_v17  ;;  %v4669_v14 = vmul.u32.u64.high %v4642_v31, %v2197_v17, %v4668_v16  ;;  %v438_v43 = vadd.f32 %v4222_v37, %v4194_v5 }
 0x1e7   : > { %v2201_v6 = vsel %vm2187_vm10, %v2198_v24, %v2200_v11  ;;  %v764_v1 = vsub.s32 0, %v4664_v35  ;;  %vm700_vm11 = vcmp.lt.s32.totalorder %v4508_v15, 0  ;;  %v2193_v45 = vsel %vm2187_vm10, %v2190_v26, %v2192_v55 }
 0x1e8   : > { %v4673_v19 = vmul.u32.u64.low %v4642_v31, %v2201_v6  ;;  %v4674_v20 = vmul.u32.u64.high %v4642_v31, %v2201_v6, %v4673_v19  ;;  %v802_v3 = vand.u32 2147483647, %v4662_v46  ;;  %v805_v13 = vand.u32 2139095040, %v4662_v46 }
 0x1e9   : > { %vm2145_vm12 = vcmp.lt.s32.totalorder %v4636_v59, 2  ;;  %vm4685_vm13 = vcmp.le.f32.partialorder %v698_v12, 0.7853982  ;;  %v3374_v60 = vmin.u32 %v764_v1, %v4664_v35  ;;  %v785_v37 = vsel %vm700_vm11, %v784_v50, %v760_v63 }
 0x1ea   : > { %v3730_v49 = vpop.eup %3729  ;;  %vm2146_vm14 = vcmp.eq.s32.totalorder %v4636_v59, 0  ;;  %v2212_v30 = vadd.s32 1, %v4669_v14  ;;  %v806_v32 = vshrl.u32 %v805_v13, 23  ;;  %vm2149_vm15 = vcmp.eq.s32.totalorder %v4636_v59, 2 }
 0x1eb   : > { %v3732_v61 = vpop.eup %3731  ;;  %v2150_v47 = vxor.u32 2147483648, %v3730_v49  ;;  %v766_v12 = vclz %v3374_v60  ;;  %v2209_v62 = vmul.u32 %v4642_v31, %v2193_v45  ;;  %v787_v0 = vsel %vm4685_vm13, 0, %v785_v37 }
 0x1ec   : > { %v2147_v8 = vxor.u32 2147483648, %v3732_v61  ;;  %vm2211_vm0 = vc.u32 %v4674_v20, %v4668_v16  ;;  %v809_v27 = vand.u32 8388607, %v802_v3  ;;  %v3377_v63 = vadd.s32 4294967169, %v806_v32 }
 0x1ed   : > { %v2151_v10 = vsel %vm2149_vm15, %v2150_v47, %v3732_v61  ;;  %v3375_v7 = vadd.s32 4294967294, %v766_v12  ;;  %v2213_v40 = vsel %vm2211_vm0, %v2212_v30, %v4669_v14  ;;  %vm2142_vm1 = vweird.f32 %v4224_v42 }
 0x1ee   : > { %v2148_v28 = vsel %vm2146_vm14, %v3730_v49, %v2147_v8  ;;  %v2214_v21 = vadd.s32 %v2213_v40, %v2209_v62  ;;  %v4707_v39 = vmul.f32 30.0, %v438_v43  ;;  %v812_v38 = vadd.s32 1, %v3377_v63 }
 0x1ef   : > { %v2152_v31 = vsel %vm2145_vm12, %v2148_v28, %v2151_v10  ;;  %vm3376_vm2 = vcmp.lt.s32.totalorder %v3375_v7, 0  ;;  %v754_v22 = vadd.s32 %v4624_v25, %v4614_v18  ;;  %v791_v24 = vadd.s32 3, %v787_v0 }
 0x1f0   : > { %v2153_v9 = vsel %vm2142_vm1, nan, %v2152_v31  ;;  %v769_v57 = vsel %vm3376_vm2, 0, %v3375_v7  ;;  %v2215_v26 = vadd.s32 536870912, %v2214_v21  ;;  %v810_v50 = vor.u32 8388608, %v809_v27 }
 0x1f1   : > { %3209 = vst [vmem:[%s4521_s5 + $0x78] sm:$0xff] %v2153_v9  ;;  %v770_v17 = vsub.s32 32, %v769_v57  ;;  %v774_v23 = vsub.s32 4294967266, %v769_v57  ;;  %vm813_vm3 = vcmp.gt.s32.totalorder %v812_v38, 0  ;;  %v2258_v55 = vand.u32 2147483647, %v4707_v39 }
 0x1f2   : > { %v4712_v42 = vshrl.u32 %v2215_v26, 30  ;;  %v814_v59 = vsel %vm813_vm3, %v812_v38, 0  ;;  %v2261_v11 = vand.u32 2139095040, %v4707_v39  ;;  %v771_v6 = vshll.u32 %v4664_v35, %v769_v57 }
 0x1f3   : > { %v772_v14 = vshrl.u32 %v754_v22, %v770_v17  ;;  %v775_v1 = vadd.s32 127, %v774_v23  ;;  %v816_v19 = vand.u32 31, %v814_v59  ;;  %v4718_v13 = vand.u32 3, %v791_v24 }
 0x1f4   : > { %v2217_v18 = vshll.u32 %v4712_v42, 30  ;;  %v2210_v49 = vadd.s32 %v4668_v16, %v4674_v20  ;;  %v4723_v37 = vshll.u32 %v810_v50, 8  ;;  %v4725_v47 = vshrl.u32 %v814_v59, 5 }
 0x1f5   : > { %v773_v25 = vor.u32 %v772_v14, %v771_v6  ;;  %v776_v43 = vshll.u32 %v775_v1, 23  ;;  %v817_v45 = vsub.s32 32, %v816_v19  ;;  %v2262_v35 = vshrl.u32 %v2261_v11, 23  ;;  %v4749_v11 = vpop.f32.mrb[6].mxu1 }
 0x1f6   : > { %v4721_v60 = vsub.s32 %v2214_v21, %v2217_v18  ;;  %v4729_v30 = vand.u32 8388607, %v2258_v55  ;;  %v825_v16 = vshll.u32 %v3974_v54, %v816_v19  ;;  %v819_v28 = vshll.u32 %v3972_v48, %v816_v19 }
 0x1f7   : > { %v777_v61 = vor.u32 4788187, %v776_v43  ;;  %v820_v8 = vshrl.u32 %v3973_v52, %v817_v45  ;;  %v823_v12 = vshrl.u32 %v3974_v54, %v817_v45  ;;  %v780_v62 = vcvt.s32.f32 %v773_v25 }
 0x1f8   : > { %v2220_v32 = vsub.s32 0, %v4721_v60  ;;  %v826_v10 = vshrl.u32 %v3975_v56, %v817_v45  ;;  %v829_v0 = vshrl.u32 %v3976_v58, %v817_v45  ;;  %v822_v7 = vshll.u32 %v3973_v52, %v816_v19 }
 0x1f9   : > { %v778_v20 = vand.u32 2147483647, %v777_v61  ;;  %v828_v40 = vshll.u32 %v3975_v56, %v816_v19  ;;  %v2240_v31 = vsub.s32 4, %v4712_v42  ;;  %v3433_v9 = vadd.s32 4294967169, %v2262_v35 }
 0x1fa   : > { %v3430_v27 = vmin.u32 %v2220_v32, %v4721_v60  ;;  %v827_v21 = vor.u32 %v826_v10, %v825_v16  ;;  %vm2156_vm4 = vcmp.lt.s32.totalorder %v4541_v53, 0  ;;  %v821_v22 = vor.u32 %v820_v8, %v819_v28 }
 0x1fb   : > { %v781_v63 = vmul.f32 %v780_v62, %v778_v20  ;;  %v824_v57 = vor.u32 %v823_v12, %v822_v7  ;;  %v830_v24 = vor.u32 %v829_v0, %v828_v40  ;;  %v818_v17 = vshrl.u32 %v3972_v48, %v817_v45 }
 0x1fc   : > { %v2222_v38 = vclz %v3430_v27  ;;  %v831_v23 = vshll.u32 %v3976_v58, %v816_v19  ;;  %v832_v50 = vshrl.u32 %v3977_v2, %v817_v45  ;;  %vm834_vm5 = vcmp.lt.s32.totalorder %v4725_v47, 1 }
 0x1fd   : > { %v782_v26 = vxor.u32 2147483648, %v781_v63  ;;  %vm835_vm6 = vcmp.lt.s32.totalorder %v4725_v47, 2  ;;  %vm837_vm7 = vcmp.lt.s32.totalorder %v4725_v47, 4  ;;  %vm4755_vm8 = vcmp.le.f32.partialorder %v2154_v44, 0.7853982 }
 0x1fe   : > { %v3431_v59 = vadd.s32 4294967294, %v2222_v38  ;;  %v833_v1 = vor.u32 %v832_v50, %v831_v23  ;;  %vm836_vm9 = vcmp.lt.s32.totalorder %v4725_v47, 3  ;;  %v839_v19 = vsel %vm837_vm7, %v827_v21, 2102212464 }
 0x1ff   : > { %v783_v6 = vsel %vm700_vm11, %v782_v26, %v781_v63  ;;  %v842_v25 = vsel %vm834_vm5, %v821_v22, %v824_v57  ;;  %v843_v44 = vsel %vm837_vm7, %v830_v24, 920167782  ;;  %v838_v45 = vsel %vm834_vm5, %v818_v17, %v821_v22 }
 0x200   : > { %v786_v18 = vsel %vm4685_vm13, %v4508_v15, %v783_v6  ;;  %vm3432_vm10 = vcmp.lt.s32.totalorder %v3431_v59, 0  ;;  %v844_v61 = vsel %vm836_vm9, %v827_v21, %v843_v44  ;;  %v840_v51 = vsel %vm836_vm9, %v824_v57, %v839_v19 }
 0x201   : > { %3733 = vcosq.f32 %v786_v18  ;;  %v2225_v43 = vsel %vm3432_vm10, 0, %v3431_v59  ;;  %v845_v12 = vsel %vm835_vm6, %v842_v25, %v844_v61  ;;  %v846_v16 = vsel %vm834_vm5, %v824_v57, %v827_v21 }
 0x202   : > { %3735 = vsinq.f32 %v786_v18  ;;  %v2226_v35 = vsub.s32 32, %v2225_v43  ;;  %v2230_v32 = vsub.s32 4294967266, %v2225_v43  ;;  %v2227_v8 = vshll.u32 %v4721_v60, %v2225_v43 }
 0x203   : > { %v847_v20 = vsel %vm837_vm7, %v833_v1, 1326507024  ;;  %v2268_v27 = vadd.s32 1, %v3433_v9  ;;  %v2241_v28 = vsel %vm2156_vm4, %v2240_v31, %v4712_v42  ;;  %vm793_vm11 = vcmp.lt.s32.totalorder %v4718_v13, 2 }
 0x204   : > { %v2228_v62 = vshrl.u32 %v2210_v49, %v2226_v35  ;;  %v2231_v10 = vadd.s32 127, %v2230_v32  ;;  %v848_v0 = vsel %vm836_vm9, %v830_v24, %v847_v20  ;;  %v841_v9 = vsel %vm835_vm6, %v838_v45, %v840_v51 }
 0x205   : > { %v849_v60 = vsel %vm835_vm6, %v846_v16, %v848_v0  ;;  %v4790_v7 = vmul.u32.u64.low %v4723_v37, %v845_v12  ;;  %v4791_v40 = vmul.u32.u64.high %v4723_v37, %v845_v12, %v4790_v7  ;;  %vm2269_vm12 = vcmp.gt.s32.totalorder %v2268_v27, 0 }
 0x206   : > { %v2229_v63 = vor.u32 %v2228_v62, %v2227_v8  ;;  %v2232_v21 = vshll.u32 %v2231_v10, 23  ;;  %v4795_v49 = vmul.u32.u64.low %v4723_v37, %v849_v60  ;;  %v4796_v38 = vmul.u32.u64.high %v4723_v37, %v849_v60, %v4795_v49 }
 0x207   : > { %v400_v42 = vadd.f32 %v4295_v29, %v4192_v4  ;;  %vm790_vm13 = vweird.f32 %v4508_v15  ;;  %vm794_vm14 = vcmp.eq.s32.totalorder %v4718_v13, 0  ;;  %v2243_v22 = vsel %vm4755_vm8, 0, %v2241_v28 }
 0x208   : > { %v2233_v31 = vor.u32 4788187, %v2232_v21  ;;  %v2270_v57 = vsel %vm2269_vm12, %v2268_v27, 0  ;;  %vm797_vm15 = vcmp.eq.s32.totalorder %v4718_v13, 2  ;;  %v860_v24 = vadd.s32 1, %v4791_v40 }
 0x209   : > { %v2266_v47 = vor.u32 8388608, %v4729_v30  ;;  %v2272_v26 = vand.u32 31, %v2270_v57  ;;  %v2236_v23 = vcvt.s32.f32 %v2229_v63  ;;  %v857_v29 = vmul.u32 %v4723_v37, %v841_v9 }
 0x20a   : > { %v2234_v17 = vand.u32 2147483647, %v2233_v31  ;;  %vm859_vm0 = vc.u32 %v4796_v38, %v4790_v7  ;;  %v2247_v59 = vadd.s32 3, %v2243_v22  ;;  %v4816_v61 = vshrl.u32 %v2270_v57, 5 }
 0x20b   : > { %v3734_v50 = vpop.eup %3733  ;;  %v861_v6 = vsel %vm859_vm0, %v860_v24, %v4791_v40  ;;  %v2273_v1 = vsub.s32 32, %v2272_v26  ;;  %v2275_v19 = vshll.u32 %v3972_v48, %v2272_v26  ;;  %v2278_v30 = vshll.u32 %v3973_v52, %v2272_v26 }
 0x20c   : > { %v3736_v18 = vpop.eup %3735  ;;  %v798_v25 = vxor.u32 2147483648, %v3734_v50  ;;  %v2237_v44 = vmul.f32 %v2236_v23, %v2234_v17  ;;  %v862_v43 = vadd.s32 %v861_v6, %v857_v29  ;;  %v2281_v12 = vshll.u32 %v3974_v54, %v2272_v26 }
 0x20d   : > { %v795_v45 = vxor.u32 2147483648, %v3736_v18  ;;  %v2276_v37 = vshrl.u32 %v3973_v52, %v2273_v1  ;;  %v2279_v35 = vshrl.u32 %v3974_v54, %v2273_v1  ;;  %v2282_v62 = vshrl.u32 %v3975_v56, %v2273_v1 }
 0x20e   : > { %v799_v32 = vsel %vm797_vm15, %v798_v25, %v3736_v18  ;;  %v2238_v51 = vxor.u32 2147483648, %v2237_v44  ;;  %v863_v8 = vadd.s32 536870912, %v862_v43  ;;  %v2284_v10 = vshll.u32 %v3975_v56, %v2272_v26 }
 0x20f   : > { %v796_v16 = vsel %vm794_vm14, %v3734_v50, %v795_v45  ;;  %v2277_v20 = vor.u32 %v2276_v37, %v2275_v19  ;;  %v2280_v60 = vor.u32 %v2279_v35, %v2278_v30  ;;  %v2285_v21 = vshrl.u32 %v3976_v58, %v2273_v1 }
 0x210   : > { %v800_v0 = vsel %vm793_vm11, %v796_v16, %v799_v32  ;;  %v2239_v27 = vsel %vm2156_vm4, %v2238_v51, %v2237_v44  ;;  %v864_v28 = vshrl.u32 %v863_v8, 30  ;;  %v2287_v49 = vshll.u32 %v3976_v58, %v2272_v26  ;;  %v4882_v8 = vpop.f32.mrb[7].mxu0 }
 0x211   : > { %v801_v40 = vsel %vm790_vm13, nan, %v800_v0  ;;  %v2242_v63 = vsel %vm4755_vm8, %v4541_v53, %v2239_v27  ;;  %v2288_v9 = vshrl.u32 %v3977_v2, %v2273_v1  ;;  %vm804_vm1 = vcmp.lt.s32.totalorder %v4662_v46, 0 }
 0x212   : > { %3196 = vst [vmem:[%s4521_s5 + $0x10] sm:$0xff] %v801_v40  ;;  %3737 = vcosq.f32 %v2242_v63  ;;  %v865_v13 = vshll.u32 %v864_v28, 30  ;;  %v2283_v31 = vor.u32 %v2282_v62, %v2281_v12  ;;  %v2286_v22 = vor.u32 %v2285_v21, %v2284_v10 }
 0x213   : > { %3739 = vsinq.f32 %v2242_v63  ;;  %v2248_v15 = vand.u32 3, %v2247_v59  ;;  %v2289_v24 = vor.u32 %v2288_v9, %v2287_v49  ;;  %vm2290_vm2 = vcmp.lt.s32.totalorder %v4816_v61, 1 }
 0x214   : > { %v4841_v57 = vsub.s32 %v862_v43, %v865_v13  ;;  %vm2293_vm3 = vcmp.lt.s32.totalorder %v4816_v61, 4  ;;  %v2298_v14 = vsel %vm2290_vm2, %v2277_v20, %v2280_v60  ;;  %v2306_v26 = vshll.u32 %v2266_v47, 8 }
 0x215   : > { %v4847_v17 = vmul.f32 30.0, %v400_v42  ;;  %vm4851_vm4 = vcmp.le.f32.partialorder %v802_v3, 0.7853982  ;;  %v2274_v50 = vshrl.u32 %v3972_v48, %v2273_v1  ;;  %vm2292_vm5 = vcmp.lt.s32.totalorder %v4816_v61, 3 }
 0x216   : > { %v868_v29 = vsub.s32 0, %v4841_v57  ;;  %v2299_v59 = vsel %vm2293_vm3, %v2286_v22, 920167782  ;;  %vm2291_vm6 = vcmp.lt.s32.totalorder %v4816_v61, 2  ;;  %v2295_v6 = vsel %vm2293_vm3, %v2283_v31, 2102212464 }
 0x217   : > { %v2300_v42 = vsel %vm2292_vm5, %v2283_v31, %v2299_v59  ;;  %v2303_v47 = vsel %vm2293_vm3, %v2289_v24, 1326507024  ;;  %v888_v3 = vsub.s32 4, %v864_v28  ;;  %v2302_v25 = vsel %vm2290_vm2, %v2280_v60, %v2283_v31 }
 0x218   : > { %v3378_v19 = vmin.u32 %v868_v29, %v4841_v57  ;;  %v2301_v18 = vsel %vm2291_vm6, %v2298_v14, %v2300_v42  ;;  %vm2246_vm7 = vweird.f32 %v4541_v53  ;;  %v2304_v1 = vsel %vm2292_vm5, %v2286_v22, %v2303_v47 }
 0x219   : > { %v4869_v44 = vmul.u32.u64.low %v2306_v26, %v2301_v18  ;;  %v4870_v43 = vmul.u32.u64.high %v2306_v26, %v2301_v18, %v4869_v44  ;;  %v442_v30 = vadd.f32 %v4392_v34, %v4192_v4  ;;  %vm2249_vm8 = vcmp.lt.s32.totalorder %v2248_v15, 2 }
 0x21a   : > { %v870_v45 = vclz %v3378_v19  ;;  %v2294_v37 = vsel %vm2290_vm2, %v2274_v50, %v2277_v20  ;;  %v2296_v35 = vsel %vm2292_vm5, %v2280_v60, %v2295_v6  ;;  %vm2250_vm9 = vcmp.eq.s32.totalorder %v2248_v15, 0 }
 0x21b   : > { %vm2253_vm10 = vcmp.eq.s32.totalorder %v2248_v15, 2  ;;  %v2305_v32 = vsel %vm2291_vm6, %v2302_v25, %v2304_v1  ;;  %v909_v51 = vand.u32 2139095040, %v4847_v17  ;;  %v889_v34 = vsel %vm804_vm1, %v888_v3, %v864_v28 }
 0x21c   : > { %v3738_v12 = vpop.eup %3737  ;;  %v3379_v16 = vadd.s32 4294967294, %v870_v45  ;;  %v4886_v62 = vmul.u32.u64.low %v2306_v26, %v2305_v32  ;;  %v4887_v10 = vmul.u32.u64.high %v2306_v26, %v2305_v32, %v4886_v62  ;;  %v2297_v27 = vsel %vm2291_vm6, %v2294_v37, %v2296_v35 }
 0x21d   : > { %v3740_v20 = vpop.eup %3739  ;;  %v2254_v0 = vxor.u32 2147483648, %v3738_v12  ;;  %v906_v60 = vand.u32 2147483647, %v4847_v17  ;;  %v910_v40 = vshrl.u32 %v909_v51, 23  ;;  %v858_v21 = vadd.s32 %v4790_v7, %v4796_v38 }
 0x21e   : > { %v2251_v63 = vxor.u32 2147483648, %v3740_v20  ;;  %vm3380_vm11 = vcmp.lt.s32.totalorder %v3379_v16, 0  ;;  %v2316_v49 = vadd.s32 1, %v4870_v43  ;;  %v891_v9 = vsel %vm4851_vm4, 0, %v889_v34 }
 0x21f   : > { %v2255_v28 = vsel %vm2253_vm10, %v2254_v0, %v3740_v20  ;;  %v873_v13 = vsel %vm3380_vm11, 0, %v3379_v16  ;;  %v3381_v31 = vadd.s32 4294967169, %v910_v40  ;;  %v2313_v14 = vmul.u32 %v2306_v26, %v2297_v27 }
 0x220   : > { %v2252_v61 = vsel %vm2250_vm9, %v3738_v12, %v2251_v63  ;;  %v874_v22 = vsub.s32 32, %v873_v13  ;;  %v878_v24 = vsub.s32 4294967266, %v873_v13  ;;  %v875_v7 = vshll.u32 %v4841_v57, %v873_v13 }
 0x221   : > { %v2256_v29 = vsel %vm2249_vm8, %v2252_v61, %v2255_v28  ;;  %vm2315_vm12 = vc.u32 %v4887_v10, %v4869_v44  ;;  %v916_v38 = vadd.s32 1, %v3381_v31  ;;  %v895_v47 = vadd.s32 3, %v891_v9 }
 0x222   : > { %v2257_v50 = vsel %vm2246_vm7, nan, %v2256_v29  ;;  %v876_v59 = vshrl.u32 %v858_v21, %v874_v22  ;;  %v879_v6 = vadd.s32 127, %v878_v24  ;;  %v2317_v42 = vsel %vm2315_vm12, %v2316_v49, %v4870_v43 }
 0x223   : > { %3210 = vst [vmem:[%s4521_s5 + $0x80] sm:$0xff] %v2257_v50  ;;  %v2318_v19 = vadd.s32 %v2317_v42, %v2313_v14  ;;  %vm917_vm13 = vcmp.gt.s32.totalorder %v916_v38, 0  ;;  %v913_v57 = vand.u32 8388607, %v906_v60  ;;  %v4909_v1 = vmul.f32 30.0, %v442_v30 }
 0x224   : > { %v877_v26 = vor.u32 %v876_v59, %v875_v7  ;;  %v880_v15 = vshll.u32 %v879_v6, 23  ;;  %v918_v3 = vsel %vm917_vm13, %v916_v38, 0  ;;  %v4913_v32 = vand.u32 3, %v895_v47 }
 0x225   : > { %v2319_v18 = vadd.s32 536870912, %v2318_v19  ;;  %v920_v25 = vand.u32 31, %v918_v3  ;;  %v914_v51 = vor.u32 8388608, %v913_v57  ;;  %v2365_v62 = vand.u32 2139095040, %v4909_v1 }
 0x226   : > { %v881_v53 = vor.u32 4788187, %v880_v15  ;;  %v884_v43 = vcvt.s32.f32 %v877_v26  ;;  %v919_v13 = vshrl.u32 %v918_v3, 5  ;;  %vm2260_vm0 = vcmp.lt.s32.totalorder %v4707_v39, 0 }
 0x227   : > { %v4911_v45 = vshrl.u32 %v2319_v18, 30  ;;  %v921_v37 = vsub.s32 32, %v920_v25  ;;  %v923_v16 = vshll.u32 %v3972_v48, %v920_v25  ;;  %v926_v63 = vshll.u32 %v3973_v52, %v920_v25 }
 0x228   : > { %v882_v35 = vand.u32 2147483647, %v881_v53  ;;  %v929_v21 = vshll.u32 %v3974_v54, %v920_v25  ;;  %v932_v9 = vshll.u32 %v3975_v56, %v920_v25  ;;  %v935_v31 = vshll.u32 %v3976_v58, %v920_v25 }
 0x229   : > { %v2321_v12 = vshll.u32 %v4911_v45, 30  ;;  %v924_v34 = vshrl.u32 %v3973_v52, %v921_v37  ;;  %v927_v30 = vshrl.u32 %v3974_v54, %v921_v37  ;;  %v930_v0 = vshrl.u32 %v3975_v56, %v921_v37 }
 0x22a   : > { %v885_v20 = vmul.f32 %v884_v43, %v882_v35  ;;  %v933_v27 = vshrl.u32 %v3976_v58, %v921_v37  ;;  %v936_v49 = vshrl.u32 %v3977_v2, %v921_v37  ;;  %v4932_v38 = vshll.u32 %v914_v51, 8  ;;  %v4941_v43 = vpop.f32.mrb[7].mxu1 }
 0x22b   : > { %v4922_v40 = vsub.s32 %v2318_v19, %v2321_v12  ;;  %v925_v22 = vor.u32 %v924_v34, %v923_v16  ;;  %v928_v24 = vor.u32 %v927_v30, %v926_v63  ;;  %v931_v14 = vor.u32 %v930_v0, %v929_v21 }
 0x22c   : > { %v886_v28 = vxor.u32 2147483648, %v885_v20  ;;  %v934_v7 = vor.u32 %v933_v27, %v932_v9  ;;  %v2366_v50 = vshrl.u32 %v2365_v62, 23  ;;  %v2344_v42 = vsub.s32 4, %v4911_v45 }
 0x22d   : > { %v2324_v61 = vsub.s32 0, %v4922_v40  ;;  %v937_v47 = vor.u32 %v936_v49, %v935_v31  ;;  %v922_v19 = vshrl.u32 %v3972_v48, %v921_v37  ;;  %vm938_vm14 = vcmp.lt.s32.totalorder %v919_v13, 1 }
 0x22e   : > { %v887_v29 = vsel %vm804_vm1, %v886_v28, %v885_v20  ;;  %vm941_vm15 = vcmp.lt.s32.totalorder %v919_v13, 4  ;;  %v946_v57 = vsel %vm938_vm14, %v925_v22, %v928_v24  ;;  %vm939_vm1 = vcmp.lt.s32.totalorder %v919_v13, 2 }
 0x22f   : > { %v890_v59 = vsel %vm4851_vm4, %v4662_v46, %v887_v29  ;;  %v3434_v6 = vmin.u32 %v2324_v61, %v4922_v40  ;;  %v943_v15 = vsel %vm941_vm15, %v931_v14, 2102212464  ;;  %vm940_vm2 = vcmp.lt.s32.totalorder %v919_v13, 3 }
 0x230   : > { %3741 = vcosq.f32 %v890_v59  ;;  %v947_v23 = vsel %vm941_vm15, %v934_v7, 920167782  ;;  %v950_v3 = vsel %vm938_vm14, %v928_v24, %v931_v14  ;;  %v942_v25 = vsel %vm938_vm14, %v922_v19, %v925_v22 }
 0x231   : > { %3743 = vsinq.f32 %v890_v59  ;;  %v2326_v26 = vclz %v3434_v6  ;;  %v948_v53 = vsel %vm940_vm2, %v931_v14, %v947_v23  ;;  %v951_v35 = vsel %vm941_vm15, %v937_v47, 1326507024 }
 0x232   : > { %vm4945_vm3 = vcmp.le.f32.partialorder %v2258_v55, 0.7853982  ;;  %v944_v51 = vsel %vm940_vm2, %v928_v24, %v943_v15  ;;  %v949_v12 = vsel %vm939_vm1, %v946_v57, %v948_v53  ;;  %v952_v16 = vsel %vm940_vm2, %v934_v7, %v951_v35 }
 0x233   : > { %v3435_v18 = vadd.s32 4294967294, %v2326_v26  ;;  %v3437_v34 = vadd.s32 4294967169, %v2366_v50  ;;  %vm898_vm4 = vcmp.eq.s32.totalorder %v4913_v32, 0  ;;  %v953_v62 = vsel %vm939_vm1, %v950_v3, %v952_v16 }
 0x234   : > { %v4953_v20 = vmul.u32.u64.low %v4932_v38, %v949_v12  ;;  %v4954_v30 = vmul.u32.u64.high %v4932_v38, %v949_v12, %v4953_v20  ;;  %vm897_vm6 = vcmp.lt.s32.totalorder %v4913_v32, 2  ;;  %vm894_vm7 = vweird.f32 %v4662_v46 }
 0x235   : > { %vm3436_vm5 = vcmp.lt.s32.totalorder %v3435_v18, 0  ;;  %v4959_v0 = vmul.u32.u64.low %v4932_v38, %v953_v62  ;;  %v4960_v27 = vmul.u32.u64.high %v4932_v38, %v953_v62, %v4959_v0  ;;  %v2372_v63 = vadd.s32 1, %v3437_v34 }
 0x236   : > { %v2329_v55 = vsel %vm3436_vm5, 0, %v3435_v18  ;;  %v2314_v21 = vadd.s32 %v4869_v44, %v4887_v10  ;;  %v945_v9 = vsel %vm939_vm1, %v942_v25, %v944_v51  ;;  %vm901_vm8 = vcmp.eq.s32.totalorder %v4913_v32, 2 }
 0x237   : > { %v2330_v49 = vsub.s32 32, %v2329_v55  ;;  %v2334_v28 = vsub.s32 4294967266, %v2329_v55  ;;  %v2331_v31 = vshll.u32 %v4922_v40, %v2329_v55  ;;  %v2362_v61 = vand.u32 2147483647, %v4909_v1 }
 0x238   : > { %vm2373_vm9 = vcmp.gt.s32.totalorder %v2372_v63, 0  ;;  %v964_v14 = vadd.s32 1, %v4954_v30  ;;  %v2345_v44 = vsel %vm2260_vm0, %v2344_v42, %v4911_v45  ;;  %v961_v10 = vmul.u32 %v4932_v38, %v945_v9 }
 0x239   : > { %v2332_v22 = vshrl.u32 %v2314_v21, %v2330_v49  ;;  %v2335_v24 = vadd.s32 127, %v2334_v28  ;;  %v2374_v29 = vsel %vm2373_vm9, %v2372_v63, 0  ;;  %vm963_vm10 = vc.u32 %v4960_v27, %v4953_v20 }
 0x23a   : > { %v3742_v7 = vpop.eup %3741  ;;  %v2376_v13 = vand.u32 31, %v2374_v29  ;;  %v965_v47 = vsel %vm963_vm10, %v964_v14, %v4954_v30  ;;  %v2369_v15 = vand.u32 8388607, %v2362_v61  ;;  %v2347_v42 = vsel %vm4945_vm3, 0, %v2345_v44 }
 0x23b   : > { %v3744_v40 = vpop.eup %3743  ;;  %v902_v50 = vxor.u32 2147483648, %v3742_v7  ;;  %v2333_v59 = vor.u32 %v2332_v22, %v2331_v31  ;;  %v2336_v6 = vshll.u32 %v2335_v24, 23  ;;  %v966_v26 = vadd.s32 %v965_v47, %v961_v10 }
 0x23c   : > { %v899_v19 = vxor.u32 2147483648, %v3744_v40  ;;  %v2377_v57 = vsub.s32 32, %v2376_v13  ;;  %v2379_v23 = vshll.u32 %v3972_v48, %v2376_v13  ;;  %v2382_v53 = vshll.u32 %v3973_v52, %v2376_v13 }
 0x23d   : > { %v903_v45 = vsel %vm901_vm8, %v902_v50, %v3744_v40  ;;  %v2337_v38 = vor.u32 4788187, %v2336_v6  ;;  %v2340_v18 = vcvt.s32.f32 %v2333_v59  ;;  %v967_v25 = vadd.s32 536870912, %v966_v26 }
 0x23e   : > { %v900_v3 = vsel %vm898_vm4, %v3742_v7, %v899_v19  ;;  %v2380_v12 = vshrl.u32 %v3973_v52, %v2377_v57  ;;  %v2383_v16 = vshrl.u32 %v3974_v54, %v2377_v57  ;;  %v2385_v30 = vshll.u32 %v3974_v54, %v2376_v13 }
 0x23f   : > { %v904_v35 = vsel %vm897_vm6, %v900_v3, %v903_v45  ;;  %v2338_v51 = vand.u32 2147483647, %v2337_v38  ;;  %v968_v62 = vshrl.u32 %v967_v25, 30  ;;  %v2386_v55 = vshrl.u32 %v3975_v56, %v2377_v57 }
 0x240   : > { %v905_v34 = vsel %vm894_vm7, nan, %v904_v35  ;;  %v2351_v63 = vadd.s32 3, %v2347_v42  ;;  %v2388_v21 = vshll.u32 %v3975_v56, %v2376_v13  ;;  %v2389_v32 = vshrl.u32 %v3976_v58, %v2377_v57 }
 0x241   : > { %3197 = vst [vmem:[%s4521_s5 + $0x18] sm:$0xff] %v905_v34  ;;  %v2341_v0 = vmul.f32 %v2340_v18, %v2338_v51  ;;  %v969_v49 = vshll.u32 %v968_v62, 30  ;;  %v2375_v28 = vshrl.u32 %v2374_v29, 5  ;;  %v2391_v9 = vshll.u32 %v3976_v58, %v2376_v13 }
 0x242   : > { %v2390_v22 = vor.u32 %v2389_v32, %v2388_v21  ;;  %v2392_v46 = vshrl.u32 %v3977_v2, %v2377_v57  ;;  %v402_v24 = vadd.f32 %v4495_v33, %v4194_v5  ;;  %v2381_v7 = vor.u32 %v2380_v12, %v2379_v23 }
 0x243   : > { %v2342_v31 = vxor.u32 2147483648, %v2341_v0  ;;  %v5002_v14 = vsub.s32 %v966_v26, %v969_v49  ;;  %v2384_v44 = vor.u32 %v2383_v16, %v2382_v53  ;;  %v2387_v10 = vor.u32 %v2386_v55, %v2385_v30 }
 0x244   : > { %v5006_v50 = vand.u32 3, %v2351_v63  ;;  %v2370_v29 = vor.u32 8388608, %v2369_v15  ;;  %v2393_v59 = vor.u32 %v2392_v46, %v2391_v9  ;;  %vm908_vm11 = vcmp.lt.s32.totalorder %v4847_v17, 0 }
 0x245   : > { %v2343_v40 = vsel %vm2260_vm0, %v2342_v31, %v2341_v0  ;;  %v972_v33 = vsub.s32 0, %v5002_v14  ;;  %v2378_v6 = vshrl.u32 %v3972_v48, %v2377_v57  ;;  %vm2397_vm12 = vcmp.lt.s32.totalorder %v2375_v28, 4 }
 0x246   : > { %v2346_v13 = vsel %vm4945_vm3, %v4707_v39, %v2343_v40  ;;  %vm2394_vm13 = vcmp.lt.s32.totalorder %v2375_v28, 1  ;;  %vm2396_vm14 = vcmp.lt.s32.totalorder %v2375_v28, 3  ;;  %v2403_v47 = vsel %vm2397_vm12, %v2390_v22, 920167782 }
 0x247   : > { %3745 = vcosq.f32 %v2346_v13  ;;  %v3382_v19 = vmin.u32 %v972_v33, %v5002_v14  ;;  %v2399_v26 = vsel %vm2397_vm12, %v2387_v10, 2102212464  ;;  %v2402_v15 = vsel %vm2394_vm13, %v2381_v7, %v2384_v44 }
 0x248   : > { %3747 = vsinq.f32 %v2346_v13  ;;  %v2404_v45 = vsel %vm2396_vm14, %v2387_v10, %v2403_v47  ;;  %v2406_v37 = vsel %vm2394_vm13, %v2384_v44, %v2387_v10  ;;  %v2407_v38 = vsel %vm2397_vm12, %v2393_v59, 1326507024 }
 0x249   : > { %v2410_v42 = vshll.u32 %v2370_v29, 8  ;;  %v974_v23 = vclz %v3382_v19  ;;  %v992_v3 = vsub.s32 4, %v968_v62  ;;  %vm2395_vm15 = vcmp.lt.s32.totalorder %v2375_v28, 2 }
 0x24a   : > { %v5016_v18 = vmul.f32 30.0, %v402_v24  ;;  %v2398_v57 = vsel %vm2394_vm13, %v2378_v6, %v2381_v7  ;;  %v2400_v25 = vsel %vm2396_vm14, %v2384_v44, %v2399_v26  ;;  %v2405_v53 = vsel %vm2395_vm15, %v2402_v15, %v2404_v45  ;;  %v5043_v24 = vpop.f32.mrb[8].mxu0 }
 0x24b   : > { %v2408_v35 = vsel %vm2396_vm14, %v2390_v22, %v2407_v38  ;;  %v3383_v51 = vadd.s32 4294967294, %v974_v23  ;;  %v5020_v16 = vmul.u32.u64.low %v2410_v42, %v2405_v53  ;;  %v5021_v34 = vmul.u32.u64.high %v2410_v42, %v2405_v53, %v5020_v16 }
 0x24c   : > { %v2409_v12 = vsel %vm2395_vm15, %v2406_v37, %v2408_v35  ;;  %vm2354_vm0 = vcmp.eq.s32.totalorder %v5006_v50, 0  ;;  %vm5026_vm1 = vcmp.le.f32.partialorder %v906_v60, 0.7853982  ;;  %vm2357_vm2 = vcmp.eq.s32.totalorder %v5006_v50, 2 }
 0x24d   : > { %v5030_v55 = vmul.u32.u64.low %v2410_v42, %v2409_v12  ;;  %v5031_v0 = vmul.u32.u64.high %v2410_v42, %v2409_v12, %v5030_v55  ;;  %vm3384_vm3 = vcmp.lt.s32.totalorder %v3383_v51, 0  ;;  %v2401_v63 = vsel %vm2395_vm15, %v2398_v57, %v2400_v25 }
 0x24e   : > { %v1013_v21 = vand.u32 2139095040, %v5016_v18  ;;  %v962_v32 = vadd.s32 %v4953_v20, %v4960_v27  ;;  %v977_v49 = vsel %vm3384_vm3, 0, %v3383_v51  ;;  %v993_v28 = vsel %vm908_vm11, %v992_v3, %v968_v62 }
 0x24f   : > { %v444_v60 = vadd.f32 %v4610_v41, %v4194_v5  ;;  %v978_v9 = vsub.s32 32, %v977_v49  ;;  %v982_v31 = vsub.s32 4294967266, %v977_v49  ;;  %v2420_v22 = vadd.s32 1, %v5021_v34 }
 0x250   : > { %v1010_v46 = vand.u32 2147483647, %v5016_v18  ;;  %v979_v44 = vshll.u32 %v5002_v14, %v977_v49  ;;  %v2417_v10 = vmul.u32 %v2410_v42, %v2401_v63  ;;  %vm2419_vm4 = vc.u32 %v5031_v0, %v5020_v16 }
 0x251   : > { %v3746_v7 = vpop.eup %3745  ;;  %v1014_v20 = vshrl.u32 %v1013_v21, 23  ;;  %v980_v40 = vshrl.u32 %v962_v32, %v978_v9  ;;  %v983_v29 = vadd.s32 127, %v982_v31  ;;  %v2421_v41 = vsel %vm2419_vm4, %v2420_v22, %v5021_v34 }
 0x252   : > { %v3748_v27 = vpop.eup %3747  ;;  %v2358_v62 = vxor.u32 2147483648, %v3746_v7  ;;  %v995_v13 = vsel %vm5026_vm1, 0, %v993_v28  ;;  %v2422_v33 = vadd.s32 %v2421_v41, %v2417_v10  ;;  %v1017_v26 = vand.u32 8388607, %v1010_v46 }
 0x253   : > { %v2355_v59 = vxor.u32 2147483648, %v3748_v27  ;;  %v3385_v6 = vadd.s32 4294967169, %v1014_v20  ;;  %v981_v14 = vor.u32 %v980_v40, %v979_v44  ;;  %v984_v19 = vshll.u32 %v983_v29, 23 }
 0x254   : > { %v2359_v47 = vsel %vm2357_vm2, %v2358_v62, %v3748_v27  ;;  %vm2353_vm5 = vcmp.lt.s32.totalorder %v5006_v50, 2  ;;  %v2423_v45 = vadd.s32 536870912, %v2422_v33  ;;  %vm2350_vm6 = vweird.f32 %v4707_v39 }
 0x255   : > { %v2356_v15 = vsel %vm2354_vm0, %v3746_v7, %v2355_v59  ;;  %v1020_v37 = vadd.s32 1, %v3385_v6  ;;  %v985_v42 = vor.u32 4788187, %v984_v19  ;;  %v999_v23 = vadd.s32 3, %v995_v13 }
 0x256   : > { %v2360_v38 = vsel %vm2353_vm5, %v2356_v15, %v2359_v47  ;;  %v5058_v57 = vshrl.u32 %v2423_v45, 30  ;;  %v5060_v25 = vmul.f32 30.0, %v444_v60  ;;  %v988_v35 = vcvt.s32.f32 %v981_v14  ;;  %v5095_v45 = vpop.f32.mrb[8].mxu1 }
 0x257   : > { %v2361_v3 = vsel %vm2350_vm6, nan, %v2360_v38  ;;  %vm1021_vm7 = vcmp.gt.s32.totalorder %v1020_v37, 0  ;;  %v986_v53 = vand.u32 2147483647, %v985_v42  ;;  %v1018_v51 = vor.u32 8388608, %v1017_v26 }
 0x258   : > { %3211 = vst [vmem:[%s4521_s5 + $0x88] sm:$0xff] %v2361_v3  ;;  %v1022_v12 = vsel %vm1021_vm7, %v1020_v37, 0  ;;  %v2425_v50 = vshll.u32 %v5058_v57, 30  ;;  %v5064_v63 = vand.u32 3, %v999_v23  ;;  %v5070_v32 = vadd.f32 %v4694_v36, %v4192_v4 }
 0x259   : > { %v1024_v34 = vand.u32 31, %v1022_v12  ;;  %v989_v55 = vmul.f32 %v988_v35, %v986_v53  ;;  %v2418_v28 = vadd.s32 %v5020_v16, %v5031_v0  ;;  %v5073_v60 = vshll.u32 %v1018_v51, 8 }
 0x25a   : > { %v5066_v39 = vsub.s32 %v2422_v33, %v2425_v50  ;;  %v2469_v9 = vand.u32 2139095040, %v5060_v25  ;;  %v1023_v22 = vshrl.u32 %v1022_v12, 5  ;;  %v2466_v6 = vand.u32 2147483647, %v5060_v25 }
 0x25b   : > { %v1025_v21 = vsub.s32 32, %v1024_v34  ;;  %v990_v49 = vxor.u32 2147483648, %v989_v55  ;;  %v1027_v7 = vshll.u32 %v3972_v48, %v1024_v34  ;;  %v1030_v36 = vshll.u32 %v3973_v52, %v1024_v34 }
 0x25c   : > { %v2428_v31 = vsub.s32 0, %v5066_v39  ;;  %v1033_v62 = vshll.u32 %v3974_v54, %v1024_v34  ;;  %v1036_v40 = vshll.u32 %v3975_v56, %v1024_v34  ;;  %v1039_v14 = vshll.u32 %v3976_v58, %v1024_v34 }
 0x25d   : > { %v1028_v44 = vshrl.u32 %v3973_v52, %v1025_v21  ;;  %v991_v10 = vsel %vm908_vm11, %v990_v49, %v989_v55  ;;  %v1031_v20 = vshrl.u32 %v3974_v54, %v1025_v21  ;;  %v1034_v16 = vshrl.u32 %v3975_v56, %v1025_v21 }
 0x25e   : > { %v994_v0 = vsel %vm5026_vm1, %v4847_v17, %v991_v10  ;;  %v3438_v27 = vmin.u32 %v2428_v31, %v5066_v39  ;;  %v1037_v59 = vshrl.u32 %v3976_v58, %v1025_v21  ;;  %v1026_v47 = vshrl.u32 %v3972_v48, %v1025_v21 }
 0x25f   : > { %3749 = vcosq.f32 %v994_v0  ;;  %v1029_v29 = vor.u32 %v1028_v44, %v1027_v7  ;;  %v1032_v41 = vor.u32 %v1031_v20, %v1030_v36  ;;  %v1035_v33 = vor.u32 %v1034_v16, %v1033_v62 }
 0x260   : > { %3751 = vsinq.f32 %v994_v0  ;;  %v2430_v13 = vclz %v3438_v27  ;;  %v1038_v30 = vor.u32 %v1037_v59, %v1036_v40  ;;  %v1040_v19 = vshrl.u32 %v3977_v2, %v1025_v21 }
 0x261   : > { %vm1042_vm8 = vcmp.lt.s32.totalorder %v1023_v22, 1  ;;  %vm1044_vm9 = vcmp.lt.s32.totalorder %v1023_v22, 3  ;;  %v2470_v15 = vshrl.u32 %v2469_v9, 23  ;;  %vm2364_vm10 = vcmp.lt.s32.totalorder %v4909_v1, 0 }
 0x262   : > { %v3439_v26 = vadd.s32 4294967294, %v2430_v13  ;;  %v1041_v37 = vor.u32 %v1040_v19, %v1039_v14  ;;  %vm1045_vm11 = vcmp.lt.s32.totalorder %v1023_v22, 4  ;;  %v1046_v38 = vsel %vm1042_vm8, %v1026_v47, %v1029_v29 }
 0x263   : > { %v1050_v42 = vsel %vm1042_vm8, %v1029_v29, %v1032_v41  ;;  %vm1002_vm12 = vcmp.eq.s32.totalorder %v5064_v63, 0  ;;  %v1047_v23 = vsel %vm1045_vm11, %v1035_v33, 2102212464  ;;  %v1051_v3 = vsel %vm1045_vm11, %v1038_v30, 920167782 }
 0x264   : > { %vm3440_vm13 = vcmp.lt.s32.totalorder %v3439_v26, 0  ;;  %v1054_v53 = vsel %vm1042_vm8, %v1032_v41, %v1035_v33  ;;  %vm1001_vm14 = vcmp.lt.s32.totalorder %v5064_v63, 2  ;;  %v1048_v51 = vsel %vm1044_vm9, %v1032_v41, %v1047_v23 }
 0x265   : > { %v2433_v35 = vsel %vm3440_vm13, 0, %v3439_v26  ;;  %v1052_v12 = vsel %vm1044_vm9, %v1035_v33, %v1051_v3  ;;  %v1055_v50 = vsel %vm1045_vm11, %v1041_v37, 1326507024  ;;  %vm998_vm15 = vweird.f32 %v4847_v17 }
 0x266   : > { %v2434_v34 = vsub.s32 32, %v2433_v35  ;;  %v2438_v55 = vsub.s32 4294967266, %v2433_v35  ;;  %v2448_v21 = vsub.s32 4, %v5058_v57  ;;  %vm1043_vm0 = vcmp.lt.s32.totalorder %v1023_v22, 2 }
 0x267   : > { %vm5106_vm1 = vcmp.le.f32.partialorder %v2362_v61, 0.7853982  ;;  %v2435_v9 = vshll.u32 %v5066_v39, %v2433_v35  ;;  %v1053_v31 = vsel %vm1043_vm0, %v1050_v42, %v1052_v12  ;;  %v1056_v7 = vsel %vm1044_vm9, %v1038_v30, %v1055_v50 }
 0x268   : > { %v3441_v44 = vadd.s32 4294967169, %v2470_v15  ;;  %v2436_v10 = vshrl.u32 %v2418_v28, %v2434_v34  ;;  %v2439_v36 = vadd.s32 127, %v2438_v55  ;;  %v1049_v20 = vsel %vm1043_vm0, %v1046_v38, %v1048_v51 }
 0x269   : > { %v1057_v16 = vsel %vm1043_vm0, %v1054_v53, %v1056_v7  ;;  %v3750_v0 = vpop.eup %3749  ;;  %v5117_v61 = vmul.u32.u64.low %v5073_v60, %v1053_v31  ;;  %v5118_v40 = vmul.u32.u64.high %v5073_v60, %v1053_v31, %v5117_v61  ;;  %vm1005_vm2 = vcmp.eq.s32.totalorder %v5064_v63, 2 }
 0x26a   : > { %v5113_v27 = vmul.u32.u64.low %v5073_v60, %v1057_v16  ;;  %v5114_v62 = vmul.u32.u64.high %v5073_v60, %v1057_v16, %v5113_v27  ;;  %v3752_v29 = vpop.eup %3751  ;;  %v1006_v39 = vxor.u32 2147483648, %v3750_v0  ;;  %v2437_v41 = vor.u32 %v2436_v10, %v2435_v9 }
 0x26b   : > { %v2440_v22 = vshll.u32 %v2439_v36, 23  ;;  %v2476_v59 = vadd.s32 1, %v3441_v44  ;;  %v1003_v13 = vxor.u32 2147483648, %v3752_v29  ;;  %v2473_v28 = vand.u32 8388607, %v2466_v6 }
 0x26c   : > { %v5125_v33 = vmul.f32 30.0, %v5070_v32  ;;  %v1007_v47 = vsel %vm1005_vm2, %v1006_v39, %v3752_v29  ;;  %v2449_v14 = vsel %vm2364_vm10, %v2448_v21, %v5058_v57  ;;  %v1065_v26 = vmul.u32 %v5073_v60, %v1049_v20 }
 0x26d   : > { %v2441_v30 = vor.u32 4788187, %v2440_v22  ;;  %vm2477_vm3 = vcmp.gt.s32.totalorder %v2476_v59, 0  ;;  %v1004_v19 = vsel %vm1002_vm12, %v3750_v0, %v1003_v13  ;;  %vm1067_vm4 = vc.u32 %v5114_v62, %v5117_v61 }
 0x26e   : > { %v1068_v15 = vadd.s32 1, %v5118_v40  ;;  %v1008_v32 = vsel %vm1001_vm14, %v1004_v19, %v1007_v47  ;;  %v2444_v38 = vcvt.s32.f32 %v2437_v41  ;;  %v2478_v42 = vsel %vm2477_vm3, %v2476_v59, 0 }
 0x26f   : > { %v2442_v37 = vand.u32 2147483647, %v2441_v30  ;;  %v1009_v57 = vsel %vm998_vm15, nan, %v1008_v32  ;;  %v2474_v3 = vor.u32 8388608, %v2473_v28  ;;  %v2480_v53 = vand.u32 31, %v2478_v42 }
 0x270   : > { %v1069_v23 = vsel %vm1067_vm4, %v1068_v15, %v5118_v40  ;;  %3198 = vst [vmem:[%s4521_s5 + $0x20] sm:$0xff] %v1009_v57  ;;  %v2451_v35 = vsel %vm5106_vm1, 0, %v2449_v14  ;;  %v1117_v12 = vand.u32 2139095040, %v5125_v33  ;;  %v5145_v63 = vshrl.u32 %v2478_v42, 5 }
 0x271   : > { %v2445_v60 = vmul.f32 %v2444_v38, %v2442_v37  ;;  %v1070_v51 = vadd.s32 %v1069_v23, %v1065_v26  ;;  %v2481_v50 = vsub.s32 32, %v2480_v53  ;;  %v2483_v34 = vshll.u32 %v3972_v48, %v2480_v53 }
 0x272   : > { %v2486_v17 = vshll.u32 %v3973_v52, %v2480_v53  ;;  %v2489_v9 = vshll.u32 %v3974_v54, %v2480_v53  ;;  %v2492_v31 = vshll.u32 %v3975_v56, %v2480_v53  ;;  %v2495_v36 = vshll.u32 %v3976_v58, %v2480_v53 }
 0x273   : > { %v2446_v55 = vxor.u32 2147483648, %v2445_v60  ;;  %v1071_v21 = vadd.s32 536870912, %v1070_v51  ;;  %v2484_v7 = vshrl.u32 %v3973_v52, %v2481_v50  ;;  %v2487_v44 = vshrl.u32 %v3974_v54, %v2481_v50 }
 0x274   : > { %v2490_v10 = vshrl.u32 %v3975_v56, %v2481_v50  ;;  %v2493_v0 = vshrl.u32 %v3976_v58, %v2481_v50  ;;  %v2496_v27 = vshrl.u32 %v3977_v2, %v2481_v50  ;;  %v1118_v41 = vshrl.u32 %v1117_v12, 23 }
 0x275   : > { %v2447_v20 = vsel %vm2364_vm10, %v2446_v55, %v2445_v60  ;;  %v5157_v16 = vshrl.u32 %v1071_v21, 30  ;;  %v2485_v29 = vor.u32 %v2484_v7, %v2483_v34  ;;  %v2488_v39 = vor.u32 %v2487_v44, %v2486_v17  ;;  %v5201_v44 = vpop.f32.mrb[9].mxu0 }
 0x276   : > { %v2450_v40 = vsel %vm5106_vm1, %v4909_v1, %v2447_v20  ;;  %v2494_v59 = vor.u32 %v2493_v0, %v2492_v31  ;;  %v2491_v13 = vor.u32 %v2490_v10, %v2489_v9  ;;  %v2497_v28 = vor.u32 %v2496_v27, %v2495_v36 }
 0x277   : > { %3753 = vcosq.f32 %v2450_v40  ;;  %v1073_v22 = vshll.u32 %v5157_v16, 30  ;;  %v2455_v47 = vadd.s32 3, %v2451_v35  ;;  %vm2498_vm5 = vcmp.lt.s32.totalorder %v5145_v63, 1 }
 0x278   : > { %3755 = vsinq.f32 %v2450_v40  ;;  %v2514_v14 = vshll.u32 %v2474_v3, 8  ;;  %v2482_v19 = vshrl.u32 %v3972_v48, %v2481_v50  ;;  %vm2501_vm6 = vcmp.lt.s32.totalorder %v5145_v63, 4 }
 0x279   : > { %v5165_v30 = vsub.s32 %v1070_v51, %v1073_v22  ;;  %v2506_v49 = vsel %vm2498_vm5, %v2485_v29, %v2488_v39  ;;  %v3389_v26 = vadd.s32 4294967169, %v1118_v41  ;;  %vm2499_vm7 = vcmp.lt.s32.totalorder %v5145_v63, 2 }
 0x27a   : > { %vm2500_vm8 = vcmp.lt.s32.totalorder %v5145_v63, 3  ;;  %v2507_v32 = vsel %vm2501_vm6, %v2494_v59, 920167782  ;;  %v2503_v37 = vsel %vm2501_vm6, %v2491_v13, 2102212464  ;;  %v2510_v42 = vsel %vm2498_vm5, %v2488_v39, %v2491_v13 }
 0x27b   : > { %v1076_v15 = vsub.s32 0, %v5165_v30  ;;  %v2508_v38 = vsel %vm2500_vm8, %v2491_v13, %v2507_v32  ;;  %v2511_v57 = vsel %vm2501_vm6, %v2497_v28, 1326507024  ;;  %v2456_v23 = vand.u32 3, %v2455_v47 }
 0x27c   : > { %v2509_v53 = vsel %vm2499_vm7, %v2506_v49, %v2508_v38  ;;  %v2512_v60 = vsel %vm2500_vm8, %v2494_v59, %v2511_v57  ;;  %vm2454_vm9 = vweird.f32 %v4909_v1  ;;  %vm1012_vm10 = vcmp.lt.s32.totalorder %v5016_v18, 0 }
 0x27d   : > { %v3386_v3 = vmin.u32 %v1076_v15, %v5165_v30  ;;  %v2513_v35 = vsel %vm2499_vm7, %v2510_v42, %v2512_v60  ;;  %v5188_v51 = vmul.u32.u64.low %v2514_v14, %v2509_v53  ;;  %v5189_v12 = vmul.u32.u64.high %v2514_v14, %v2509_v53, %v5188_v51 }
 0x27e   : > { %v2502_v34 = vsel %vm2498_vm5, %v2482_v19, %v2485_v29  ;;  %v2504_v17 = vsel %vm2500_vm8, %v2488_v39, %v2503_v37  ;;  %v1114_v55 = vand.u32 2147483647, %v5125_v33  ;;  %v1096_v21 = vsub.s32 4, %v5157_v16 }
 0x27f   : > { %v1078_v50 = vclz %v3386_v3  ;;  %v5198_v9 = vmul.u32.u64.low %v2514_v14, %v2513_v35  ;;  %v5199_v31 = vmul.u32.u64.high %v2514_v14, %v2513_v35, %v5198_v9  ;;  %v1124_v7 = vadd.s32 1, %v3389_v26 }
 0x280   : > { %vm2457_vm11 = vcmp.lt.s32.totalorder %v2456_v23, 2  ;;  %vm2458_vm12 = vcmp.eq.s32.totalorder %v2456_v23, 0  ;;  %vm2461_vm13 = vcmp.eq.s32.totalorder %v2456_v23, 2  ;;  %v2505_v27 = vsel %vm2499_vm7, %v2502_v34, %v2504_v17 }
 0x281   : > { %v3754_v10 = vpop.eup %3753  ;;  %v3387_v36 = vadd.s32 4294967294, %v1078_v50  ;;  %v2524_v40 = vadd.s32 1, %v5189_v12  ;;  %vm1125_vm14 = vcmp.gt.s32.totalorder %v1124_v7, 0  ;;  %v1066_v39 = vadd.s32 %v5117_v61, %v5114_v62 }
 0x282   : > { %v3756_v20 = vpop.eup %3755  ;;  %v2462_v0 = vxor.u32 2147483648, %v3754_v10  ;;  %v1126_v41 = vsel %vm1125_vm14, %v1124_v7, 0  ;;  %v1097_v13 = vsel %vm1012_vm10, %v1096_v21, %v5157_v16  ;;  %vm2523_vm0 = vc.u32 %v5199_v31, %v5188_v51 }
 0x283   : > { %v2459_v29 = vxor.u32 2147483648, %v3756_v20  ;;  %vm3388_vm15 = vcmp.lt.s32.totalorder %v3387_v36, 0  ;;  %v2521_v19 = vmul.u32 %v2514_v14, %v2505_v27  ;;  %v2525_v61 = vsel %vm2523_vm0, %v2524_v40, %v5189_v12 }
 0x284   : > { %v2463_v22 = vsel %vm2461_vm13, %v2462_v0, %v3756_v20  ;;  %v1081_v59 = vsel %vm3388_vm15, 0, %v3387_v36  ;;  %v1128_v26 = vand.u32 31, %v1126_v41  ;;  %vm5222_vm1 = vcmp.le.f32.partialorder %v1010_v46, 0.7853982 }
 0x285   : > { %v2460_v63 = vsel %vm2458_vm12, %v3754_v10, %v2459_v29  ;;  %v1082_v28 = vsub.s32 32, %v1081_v59  ;;  %v1086_v47 = vsub.s32 4294967266, %v1081_v59  ;;  %v1083_v62 = vshll.u32 %v5165_v30, %v1081_v59 }
 0x286   : > { %v2464_v49 = vsel %vm2457_vm11, %v2460_v63, %v2463_v22  ;;  %v2526_v37 = vadd.s32 %v2525_v61, %v2521_v19  ;;  %v1129_v14 = vsub.s32 32, %v1128_v26  ;;  %v448_v30 = vadd.f32 %v4749_v11, %v4192_v4 }
 0x287   : > { %v2465_v15 = vsel %vm2454_vm9, nan, %v2464_v49  ;;  %v1084_v32 = vshrl.u32 %v1066_v39, %v1082_v28  ;;  %v1087_v16 = vadd.s32 127, %v1086_v47  ;;  %v1121_v1 = vand.u32 8388607, %v1114_v55 }
 0x288   : > { %3212 = vst [vmem:[%s4521_s5 + $0x90] sm:$0xff] %v2465_v15  ;;  %v2527_v23 = vadd.s32 536870912, %v2526_v37  ;;  %v1099_v3 = vsel %vm5222_vm1, 0, %v1097_v13  ;;  %v1131_v53 = vshll.u32 %v3972_v48, %v1128_v26  ;;  %v1132_v46 = vshrl.u32 %v3973_v52, %v1129_v14 }
 0x289   : > { %v1085_v42 = vor.u32 %v1084_v32, %v1083_v62  ;;  %v1088_v57 = vshll.u32 %v1087_v16, 23  ;;  %v1135_v60 = vshrl.u32 %v3974_v54, %v1129_v14  ;;  %v1138_v50 = vshrl.u32 %v3975_v56, %v1129_v14 }
 0x28a   : > { %v2528_v12 = vshrl.u32 %v2527_v23, 30  ;;  %v1141_v11 = vshrl.u32 %v3976_v58, %v1129_v14  ;;  %v1127_v34 = vshrl.u32 %v1126_v41, 5  ;;  %v1134_v17 = vshll.u32 %v3973_v52, %v1128_v26 }
 0x28b   : > { %v1089_v35 = vor.u32 4788187, %v1088_v57  ;;  %v1137_v21 = vshll.u32 %v3974_v54, %v1128_v26  ;;  %v1140_v9 = vshll.u32 %v3975_v56, %v1128_v26  ;;  %v1092_v10 = vcvt.s32.f32 %v1085_v42 }
 0x28c   : > { %v2529_v36 = vshll.u32 %v2528_v12, 30  ;;  %v1133_v20 = vor.u32 %v1132_v46, %v1131_v53  ;;  %v1136_v0 = vor.u32 %v1135_v60, %v1134_v17  ;;  %v1143_v40 = vshll.u32 %v3976_v58, %v1128_v26 }
 0x28d   : > { %v1090_v7 = vand.u32 2147483647, %v1089_v35  ;;  %v1142_v27 = vor.u32 %v1141_v11, %v1140_v9  ;;  %v1144_v29 = vshrl.u32 %v3977_v2, %v1129_v14  ;;  %v1103_v22 = vadd.s32 3, %v1099_v3  ;;  %v5258_v3 = vpop.f32.mrb[9].mxu1 }
 0x28e   : > { %v5242_v59 = vsub.s32 %v2526_v37, %v2529_v36  ;;  %v1139_v41 = vor.u32 %v1138_v50, %v1137_v21  ;;  %v1122_v13 = vor.u32 8388608, %v1121_v1  ;;  %v1130_v63 = vshrl.u32 %v3972_v48, %v1129_v14 }
 0x28f   : > { %v1093_v39 = vmul.f32 %v1092_v10, %v1090_v7  ;;  %v1145_v28 = vor.u32 %v1144_v29, %v1143_v40  ;;  %v5245_v47 = vmul.f32 30.0, %v448_v30  ;;  %vm1146_vm2 = vcmp.lt.s32.totalorder %v1127_v34, 1 }
 0x290   : > { %v2532_v49 = vsub.s32 0, %v5242_v59  ;;  %vm1149_vm3 = vcmp.lt.s32.totalorder %v1127_v34, 4  ;;  %vm1147_vm4 = vcmp.lt.s32.totalorder %v1127_v34, 2  ;;  %vm1148_vm5 = vcmp.lt.s32.totalorder %v1127_v34, 3 }
 0x291   : > { %v1094_v19 = vxor.u32 2147483648, %v1093_v39  ;;  %v1154_v62 = vsel %vm1146_vm2, %v1133_v20, %v1136_v0  ;;  %v1155_v61 = vsel %vm1149_vm3, %v1142_v27, 920167782  ;;  %v1151_v32 = vsel %vm1149_vm3, %v1139_v41, 2102212464 }
 0x292   : > { %v3442_v15 = vmin.u32 %v2532_v49, %v5242_v59  ;;  %v1156_v16 = vsel %vm1148_vm5, %v1139_v41, %v1155_v61  ;;  %v1158_v30 = vsel %vm1146_vm2, %v1136_v0, %v1139_v41  ;;  %v1159_v42 = vsel %vm1149_vm3, %v1145_v28, 1326507024 }
 0x293   : > { %v1095_v26 = vsel %vm1012_vm10, %v1094_v19, %v1093_v39  ;;  %v1157_v14 = vsel %vm1147_vm4, %v1154_v62, %v1156_v16  ;;  %v2552_v23 = vsub.s32 4, %v2528_v12  ;;  %v1162_v1 = vshll.u32 %v1122_v13, 8 }
 0x294   : > { %v1098_v37 = vsel %vm5222_vm1, %v5016_v18, %v1095_v26  ;;  %v2534_v57 = vclz %v3442_v15  ;;  %v1150_v53 = vsel %vm1146_vm2, %v1130_v63, %v1133_v20  ;;  %v1152_v46 = vsel %vm1148_vm5, %v1136_v0, %v1151_v32 }
 0x295   : > { %3757 = vcosq.f32 %v1098_v37  ;;  %v1160_v60 = vsel %vm1148_vm5, %v1142_v27, %v1159_v42  ;;  %v5264_v50 = vmul.u32.u64.low %v1162_v1, %v1157_v14  ;;  %v5265_v11 = vmul.u32.u64.high %v1162_v1, %v1157_v14, %v5264_v50 }
 0x296   : > { %3759 = vsinq.f32 %v1098_v37  ;;  %v3443_v38 = vadd.s32 4294967294, %v2534_v57  ;;  %v1161_v35 = vsel %vm1147_vm4, %v1158_v30, %v1160_v60  ;;  %vm2468_vm6 = vcmp.lt.s32.totalorder %v5060_v25, 0 }
 0x297   : > { %v5268_v17 = vmul.u32.u64.low %v1162_v1, %v1161_v35  ;;  %v5269_v21 = vmul.u32.u64.high %v1162_v1, %v1161_v35, %v5268_v17  ;;  %v2573_v9 = vand.u32 2139095040, %v5245_v47  ;;  %v2553_v7 = vsel %vm2468_vm6, %v2552_v23, %v2528_v12 }
 0x298   : > { %vm3444_vm7 = vcmp.lt.s32.totalorder %v3443_v38, 0  ;;  %v1153_v10 = vsel %vm1147_vm4, %v1150_v53, %v1152_v46  ;;  %v1104_v36 = vand.u32 3, %v1103_v22  ;;  %vm5277_vm8 = vcmp.le.f32.partialorder %v2466_v6, 0.7853982 }
 0x299   : > { %v2537_v0 = vsel %vm3444_vm7, 0, %v3443_v38  ;;  %v2574_v27 = vshrl.u32 %v2573_v9, 23  ;;  %v2522_v40 = vadd.s32 %v5188_v51, %v5199_v31  ;;  %v1172_v41 = vadd.s32 1, %v5265_v11 }
 0x29a   : > { %v2538_v29 = vsub.s32 32, %v2537_v0  ;;  %v2542_v39 = vsub.s32 4294967266, %v2537_v0  ;;  %vm1102_vm9 = vweird.f32 %v5016_v18  ;;  %v2555_v12 = vsel %vm5277_vm8, 0, %v2553_v7 }
 0x29b   : > { %v1169_v34 = vmul.u32 %v1162_v1, %v1153_v10  ;;  %vm1171_vm10 = vc.u32 %v5269_v21, %v5264_v50  ;;  %v3445_v6 = vadd.s32 4294967169, %v2574_v27  ;;  %v2539_v22 = vshll.u32 %v5242_v59, %v2537_v0 }
 0x29c   : > { %v2540_v13 = vshrl.u32 %v2522_v40, %v2538_v29  ;;  %v2543_v63 = vadd.s32 127, %v2542_v39  ;;  %v1173_v28 = vsel %vm1171_vm10, %v1172_v41, %v5265_v11  ;;  %vm1105_vm11 = vcmp.lt.s32.totalorder %v1104_v36, 2 }
 0x29d   : > { %v1174_v51 = vadd.s32 %v1173_v28, %v1169_v34  ;;  %v2570_v31 = vand.u32 2147483647, %v5245_v47  ;;  %v2580_v19 = vadd.s32 1, %v3445_v6  ;;  %vm1106_vm12 = vcmp.eq.s32.totalorder %v1104_v36, 0 }
 0x29e   : > { %v2541_v62 = vor.u32 %v2540_v13, %v2539_v22  ;;  %v2544_v61 = vshll.u32 %v2543_v63, 23  ;;  %v408_v26 = vadd.f32 %v4882_v8, %v4194_v5  ;;  %v2559_v16 = vadd.s32 3, %v2555_v12 }
 0x29f   : > { %v3758_v49 = vpop.eup %3757  ;;  %v1175_v59 = vadd.s32 536870912, %v1174_v51  ;;  %vm2581_vm13 = vcmp.gt.s32.totalorder %v2580_v19, 0  ;;  %vm1109_vm14 = vcmp.eq.s32.totalorder %v1104_v36, 2  ;;  %v2577_v23 = vand.u32 8388607, %v2570_v31 }
 0x2a0   : > { %v3760_v15 = vpop.eup %3759  ;;  %v1110_v32 = vxor.u32 2147483648, %v3758_v49  ;;  %v2545_v14 = vor.u32 4788187, %v2544_v61  ;;  %v2582_v30 = vsel %vm2581_vm13, %v2580_v19, 0  ;;  %v2548_v8 = vcvt.s32.f32 %v2541_v62 }
 0x2a1   : > { %v1107_v37 = vxor.u32 2147483648, %v3760_v15  ;;  %v1176_v57 = vshrl.u32 %v1175_v59, 30  ;;  %v2584_v1 = vand.u32 31, %v2582_v30  ;;  %v5296_v60 = vmul.f32 30.0, %v408_v26 }
 0x2a2   : > { %v1111_v42 = vsel %vm1109_vm14, %v1110_v32, %v3760_v15  ;;  %v2546_v46 = vand.u32 2147483647, %v2545_v14  ;;  %v5299_v35 = vand.u32 3, %v2559_v16  ;;  %vm1116_vm15 = vcmp.lt.s32.totalorder %v5125_v33, 0 }
 0x2a3   : > { %v1108_v53 = vsel %vm1106_vm12, %v3758_v49, %v1107_v37  ;;  %v1177_v11 = vshll.u32 %v1176_v57, 30  ;;  %v2585_v17 = vsub.s32 32, %v2584_v1  ;;  %v1170_v10 = vadd.s32 %v5264_v50, %v5269_v21 }
 0x2a4   : > { %v1112_v38 = vsel %vm1105_vm11, %v1108_v53, %v1111_v42  ;;  %v2549_v7 = vmul.f32 %v2548_v8, %v2546_v46  ;;  %v2587_v0 = vshll.u32 %v3972_v48, %v2584_v1  ;;  %v2578_v40 = vor.u32 8388608, %v2577_v23 }
 0x2a5   : > { %v1113_v9 = vsel %vm1102_vm9, nan, %v1112_v38  ;;  %v5307_v27 = vsub.s32 %v1174_v51, %v1177_v11  ;;  %v2588_v36 = vshrl.u32 %v3973_v52, %v2585_v17  ;;  %v2590_v29 = vshll.u32 %v3973_v52, %v2584_v1 }
 0x2a6   : > { %3199 = vst [vmem:[%s4521_s5 + $0x28] sm:$0xff] %v1113_v9  ;;  %v2550_v39 = vxor.u32 2147483648, %v2549_v7  ;;  %v2591_v41 = vshrl.u32 %v3974_v54, %v2585_v17  ;;  %v2593_v12 = vshll.u32 %v3974_v54, %v2584_v1  ;;  %v1221_v18 = vand.u32 2139095040, %v5296_v60 }
 0x2a7   : > { %v1180_v34 = vsub.s32 0, %v5307_v27  ;;  %v1200_v50 = vsub.s32 4, %v1176_v57  ;;  %v2583_v21 = vshrl.u32 %v2582_v30, 5  ;;  %v2594_v6 = vshrl.u32 %v3975_v56, %v2585_v17 }
 0x2a8   : > { %v2551_v22 = vsel %vm2468_vm6, %v2550_v39, %v2549_v7  ;;  %v2589_v13 = vor.u32 %v2588_v36, %v2587_v0  ;;  %v2596_v63 = vshll.u32 %v3975_v56, %v2584_v1  ;;  %v2597_v28 = vshrl.u32 %v3976_v58, %v2585_v17 }
 0x2a9   : > { %v2554_v51 = vsel %vm5277_vm8, %v5060_v25, %v2551_v22  ;;  %v3390_v19 = vmin.u32 %v1180_v34, %v5307_v27  ;;  %v2592_v49 = vor.u32 %v2591_v41, %v2590_v29  ;;  %v2595_v62 = vor.u32 %v2594_v6, %v2593_v12 }
 0x2aa   : > { %3761 = vcosq.f32 %v2554_v51  ;;  %v2598_v61 = vor.u32 %v2597_v28, %v2596_v63  ;;  %v2599_v26 = vshll.u32 %v3976_v58, %v2584_v1  ;;  %v2600_v15 = vshrl.u32 %v3977_v2, %v2585_v17  ;;  %v5360_v28 = vpop.f32.mrb[10].mxu0 }
 0x2ab   : > { %3763 = vsinq.f32 %v2554_v51  ;;  %vm5328_vm0 = vcmp.le.f32.partialorder %v1114_v55, 0.7853982  ;;  %v1182_v16 = vclz %v3390_v19  ;;  %v5332_v20 = vshll.u32 %v2578_v40, 8 }
 0x2ac   : > { %v1218_v59 = vand.u32 2147483647, %v5296_v60  ;;  %v1201_v37 = vsel %vm1116_vm15, %v1200_v50, %v1176_v57  ;;  %v2586_v14 = vshrl.u32 %v3972_v48, %v2585_v17  ;;  %v2601_v30 = vor.u32 %v2600_v15, %v2599_v26 }
 0x2ad   : > { %v1222_v42 = vshrl.u32 %v1221_v18, 23  ;;  %v3391_v23 = vadd.s32 4294967294, %v1182_v16  ;;  %vm2602_vm1 = vcmp.lt.s32.totalorder %v2583_v21, 1  ;;  %vm2604_vm2 = vcmp.lt.s32.totalorder %v2583_v21, 3 }
 0x2ae   : > { %vm2605_vm3 = vcmp.lt.s32.totalorder %v2583_v21, 4  ;;  %v2610_v1 = vsel %vm2602_vm1, %v2589_v13, %v2592_v49  ;;  %v2614_v46 = vsel %vm2602_vm1, %v2592_v49, %v2595_v62  ;;  %vm2603_vm5 = vcmp.lt.s32.totalorder %v2583_v21, 2 }
 0x2af   : > { %v2607_v55 = vsel %vm2605_vm3, %v2595_v62, 2102212464  ;;  %v2611_v53 = vsel %vm2605_vm3, %v2598_v61, 920167782  ;;  %vm3392_vm4 = vcmp.lt.s32.totalorder %v3391_v23, 0  ;;  %vm2561_vm6 = vcmp.lt.s32.totalorder %v5299_v35, 2 }
 0x2b0   : > { %v2612_v8 = vsel %vm2604_vm2, %v2595_v62, %v2611_v53  ;;  %v2615_v38 = vsel %vm2605_vm3, %v2601_v30, 1326507024  ;;  %v1185_v57 = vsel %vm3392_vm4, 0, %v3391_v23  ;;  %v2606_v11 = vsel %vm2602_vm1, %v2586_v14, %v2589_v13 }
 0x2b1   : > { %v2613_v17 = vsel %vm2603_vm5, %v2610_v1, %v2612_v8  ;;  %v2616_v9 = vsel %vm2604_vm2, %v2598_v61, %v2615_v38  ;;  %vm2558_vm7 = vweird.f32 %v5060_v25  ;;  %v1186_v7 = vsub.s32 32, %v1185_v57 }
 0x2b2   : > { %v1190_v0 = vsub.s32 4294967266, %v1185_v57  ;;  %v2608_v40 = vsel %vm2604_vm2, %v2592_v49, %v2607_v55  ;;  %v2617_v36 = vsel %vm2603_vm5, %v2614_v46, %v2616_v9  ;;  %v1187_v18 = vshll.u32 %v5307_v27, %v1185_v57 }
 0x2b3   : > { %v5346_v29 = vmul.u32.u64.low %v5332_v20, %v2617_v36  ;;  %v5347_v39 = vmul.u32.u64.high %v5332_v20, %v2617_v36, %v5346_v29  ;;  %v5350_v41 = vmul.u32.u64.low %v5332_v20, %v2613_v17  ;;  %v5351_v12 = vmul.u32.u64.high %v5332_v20, %v2613_v17, %v5350_v41 }
 0x2b4   : > { %v1188_v34 = vshrl.u32 %v1170_v10, %v1186_v7  ;;  %v1191_v50 = vadd.s32 127, %v1190_v0  ;;  %v3393_v6 = vadd.s32 4294967169, %v1222_v42  ;;  %v3762_v22 = vpop.eup %3761  ;;  %vm2562_vm8 = vcmp.eq.s32.totalorder %v5299_v35, 0 }
 0x2b5   : > { %vm2565_vm9 = vcmp.eq.s32.totalorder %v5299_v35, 2  ;;  %v1203_v13 = vsel %vm5328_vm0, 0, %v1201_v37  ;;  %v2609_v63 = vsel %vm2603_vm5, %v2606_v11, %v2608_v40  ;;  %v3764_v51 = vpop.eup %3763  ;;  %v2566_v19 = vxor.u32 2147483648, %v3762_v22 }
 0x2b6   : > { %v1189_v49 = vor.u32 %v1188_v34, %v1187_v18  ;;  %v1192_v62 = vshll.u32 %v1191_v50, 23  ;;  %v1228_v27 = vadd.s32 1, %v3393_v6  ;;  %v2563_v10 = vxor.u32 2147483648, %v3764_v51 }
 0x2b7   : > { %vm2627_vm10 = vc.u32 %v5347_v39, %v5350_v41  ;;  %v2628_v61 = vadd.s32 1, %v5351_v12  ;;  %v5367_v26 = vand.u32 8388607, %v1218_v59  ;;  %v2567_v21 = vsel %vm2565_vm9, %v2566_v19, %v3764_v51 }
 0x2b8   : > { %v1193_v15 = vor.u32 4788187, %v1192_v62  ;;  %v2625_v16 = vmul.u32 %v5332_v20, %v2609_v63  ;;  %vm1229_vm11 = vcmp.gt.s32.totalorder %v1228_v27, 0  ;;  %v2564_v37 = vsel %vm2562_vm8, %v3762_v22, %v2563_v10 }
 0x2b9   : > { %v1207_v14 = vadd.s32 3, %v1203_v13  ;;  %v2629_v30 = vsel %vm2627_vm10, %v2628_v61, %v5351_v12  ;;  %v1230_v42 = vsel %vm1229_vm11, %v1228_v27, 0  ;;  %v2568_v23 = vsel %vm2561_vm6, %v2564_v37, %v2567_v21 }
 0x2ba   : > { %v1194_v55 = vand.u32 2147483647, %v1193_v15  ;;  %v1196_v1 = vcvt.s32.f32 %v1189_v49  ;;  %v2630_v53 = vadd.s32 %v2629_v30, %v2625_v16  ;;  %v2569_v46 = vsel %vm2558_vm7, nan, %v2568_v23 }
 0x2bb   : > { %v1232_v8 = vand.u32 31, %v1230_v42  ;;  %3213 = vst [vmem:[%s4521_s5 + $0x98] sm:$0xff] %v2569_v46  ;;  %v450_v57 = vadd.f32 %v4941_v43, %v4194_v5  ;;  %v5382_v11 = vadd.f32 %v5043_v24, %v4192_v4  ;;  %v5384_v17 = vand.u32 3, %v1207_v14 }
 0x2bc   : > { %v1197_v20 = vmul.f32 %v1196_v1, %v1194_v55  ;;  %v2631_v38 = vadd.s32 536870912, %v2630_v53  ;;  %v1226_v35 = vor.u32 8388608, %v5367_v26  ;;  %v1231_v9 = vshrl.u32 %v1230_v42, 5 }
 0x2bd   : > { %v1233_v7 = vsub.s32 32, %v1232_v8  ;;  %v1235_v40 = vshll.u32 %v3972_v48, %v1232_v8  ;;  %v1238_v36 = vshll.u32 %v3973_v52, %v1232_v8  ;;  %v1241_v12 = vshll.u32 %v3974_v54, %v1232_v8 }
 0x2be   : > { %v1198_v0 = vxor.u32 2147483648, %v1197_v20  ;;  %v2632_v25 = vshrl.u32 %v2631_v38, 30  ;;  %v1244_v50 = vshll.u32 %v3975_v56, %v1232_v8  ;;  %vm2572_vm12 = vcmp.lt.s32.totalorder %v5245_v47, 0 }
 0x2bf   : > { %v1236_v29 = vshrl.u32 %v3973_v52, %v1233_v7  ;;  %v1239_v43 = vshrl.u32 %v3974_v54, %v1233_v7  ;;  %v1242_v24 = vshrl.u32 %v3975_v56, %v1233_v7  ;;  %v1245_v6 = vshrl.u32 %v3976_v58, %v1233_v7 }
 0x2c0   : > { %v1199_v18 = vsel %vm1116_vm15, %v1198_v0, %v1197_v20  ;;  %v2633_v34 = vshll.u32 %v2632_v25, 30  ;;  %v5403_v62 = vmul.f32 30.0, %v450_v57  ;;  %v1247_v27 = vshll.u32 %v3976_v58, %v1232_v8 }
 0x2c1   : > { %v1202_v22 = vsel %vm5328_vm0, %v5125_v33, %v1199_v18  ;;  %v1237_v13 = vor.u32 %v1236_v29, %v1235_v40  ;;  %v1240_v63 = vor.u32 %v1239_v43, %v1238_v36  ;;  %v1243_v51 = vor.u32 %v1242_v24, %v1241_v12  ;;  %v5433_v36 = vpop.f32.mrb[10].mxu1 }
 0x2c2   : > { %3765 = vcosq.f32 %v1202_v22  ;;  %v5401_v19 = vsub.s32 %v2630_v53, %v2633_v34  ;;  %v1246_v49 = vor.u32 %v1245_v6, %v1244_v50  ;;  %v1248_v10 = vshrl.u32 %v3977_v2, %v1233_v7 }
 0x2c3   : > { %3767 = vsinq.f32 %v1202_v22  ;;  %vm1250_vm13 = vcmp.lt.s32.totalorder %v1231_v9, 1  ;;  %vm5409_vm14 = vcmp.le.f32.partialorder %v2570_v31, 0.7853982  ;;  %vm1251_vm15 = vcmp.lt.s32.totalorder %v1231_v9, 2 }
 0x2c4   : > { %v2636_v61 = vsub.s32 0, %v5401_v19  ;;  %vm1252_vm0 = vcmp.lt.s32.totalorder %v1231_v9, 3  ;;  %vm1253_vm1 = vcmp.lt.s32.totalorder %v1231_v9, 4  ;;  %v1249_v26 = vor.u32 %v1248_v10, %v1247_v27 }
 0x2c5   : > { %v1255_v21 = vsel %vm1253_vm1, %v1243_v51, 2102212464  ;;  %v1258_v15 = vsel %vm1250_vm13, %v1237_v13, %v1240_v63  ;;  %v1259_v16 = vsel %vm1253_vm1, %v1246_v49, 920167782  ;;  %v2656_v14 = vsub.s32 4, %v2632_v25 }
 0x2c6   : > { %v3446_v37 = vmin.u32 %v2636_v61, %v5401_v19  ;;  %v1234_v30 = vshrl.u32 %v3972_v48, %v1233_v7  ;;  %v1260_v31 = vsel %vm1252_vm0, %v1243_v51, %v1259_v16  ;;  %v1262_v23 = vsel %vm1250_vm13, %v1240_v63, %v1243_v51 }
 0x2c7   : > { %v1261_v42 = vsel %vm1251_vm15, %v1258_v15, %v1260_v31  ;;  %v1263_v55 = vsel %vm1253_vm1, %v1249_v26, 1326507024  ;;  %v1266_v1 = vshll.u32 %v1226_v35, 8  ;;  %vm1209_vm2 = vcmp.lt.s32.totalorder %v5384_v17, 2 }
 0x2c8   : > { %v2638_v53 = vclz %v3446_v37  ;;  %v1254_v46 = vsel %vm1250_vm13, %v1234_v30, %v1237_v13  ;;  %v1256_v8 = vsel %vm1252_vm0, %v1240_v63, %v1255_v21  ;;  %vm1206_vm3 = vweird.f32 %v5125_v33 }
 0x2c9   : > { %vm1210_vm4 = vcmp.eq.s32.totalorder %v5384_v17, 0  ;;  %v1264_v20 = vsel %vm1252_vm0, %v1246_v49, %v1263_v55  ;;  %v5426_v38 = vmul.u32.u64.low %v1266_v1, %v1261_v42  ;;  %v5427_v57 = vmul.u32.u64.high %v1266_v1, %v1261_v42, %v5426_v38 }
 0x2ca   : > { %v3447_v7 = vadd.s32 4294967294, %v2638_v53  ;;  %v2657_v35 = vsel %vm2572_vm12, %v2656_v14, %v2632_v25  ;;  %v1265_v0 = vsel %vm1251_vm15, %v1262_v23, %v1264_v20  ;;  %v2677_v40 = vand.u32 2139095040, %v5403_v62 }
 0x2cb   : > { %vm1213_vm5 = vcmp.eq.s32.totalorder %v5384_v17, 2  ;;  %v1257_v29 = vsel %vm1251_vm15, %v1254_v46, %v1256_v8  ;;  %v5437_v43 = vmul.u32.u64.low %v1266_v1, %v1265_v0  ;;  %v5438_v12 = vmul.u32.u64.high %v1266_v1, %v1265_v0, %v5437_v43 }
 0x2cc   : > { %v3766_v24 = vpop.eup %3765  ;;  %v2626_v18 = vadd.s32 %v5350_v41, %v5347_v39  ;;  %vm3448_vm6 = vcmp.lt.s32.totalorder %v3447_v7, 0  ;;  %v2674_v25 = vand.u32 2147483647, %v5403_v62  ;;  %v2678_v34 = vshrl.u32 %v2677_v40, 23 }
 0x2cd   : > { %v3768_v50 = vpop.eup %3767  ;;  %v1214_v6 = vxor.u32 2147483648, %v3766_v24  ;;  %v2641_v22 = vsel %vm3448_vm6, 0, %v3447_v7  ;;  %v2659_v13 = vsel %vm5409_vm14, 0, %v2657_v35  ;;  %v1276_v9 = vadd.s32 1, %v5427_v57 }
 0x2ce   : > { %v1211_v63 = vxor.u32 2147483648, %v3768_v50  ;;  %v2642_v51 = vsub.s32 32, %v2641_v22  ;;  %v2646_v49 = vsub.s32 4294967266, %v2641_v22  ;;  %v1273_v27 = vmul.u32 %v1266_v1, %v1257_v29 }
 0x2cf   : > { %v1215_v10 = vsel %vm1213_vm5, %v1214_v6, %v3768_v50  ;;  %v2643_v39 = vshll.u32 %v5401_v19, %v2641_v22  ;;  %vm1275_vm7 = vc.u32 %v5438_v12, %v5426_v38  ;;  %v3449_v41 = vadd.s32 4294967169, %v2678_v34 }
 0x2d0   : > { %v1212_v61 = vsel %vm1210_vm4, %v3766_v24, %v1211_v63  ;;  %v2644_v26 = vshrl.u32 %v2626_v18, %v2642_v51  ;;  %v2647_v21 = vadd.s32 127, %v2646_v49  ;;  %v1277_v15 = vsel %vm1275_vm7, %v1276_v9, %v5427_v57 }
 0x2d1   : > { %v1216_v16 = vsel %vm1209_vm2, %v1212_v61, %v1215_v10  ;;  %v1278_v37 = vadd.s32 %v1277_v15, %v1273_v27  ;;  %v2684_v14 = vadd.s32 1, %v3449_v41  ;;  %v5456_v30 = vmul.f32 30.0, %v5382_v11 }
 0x2d2   : > { %v1217_v19 = vsel %vm1206_vm3, nan, %v1216_v16  ;;  %v2645_v31 = vor.u32 %v2644_v26, %v2643_v39  ;;  %v2648_v42 = vshll.u32 %v2647_v21, 23  ;;  %v2663_v23 = vadd.s32 3, %v2659_v13 }
 0x2d3   : > { %3200 = vst [vmem:[%s4521_s5 + $0x30] sm:$0xff] %v1217_v19  ;;  %v1279_v55 = vadd.s32 536870912, %v1278_v37  ;;  %v2681_v1 = vand.u32 8388607, %v2674_v25  ;;  %vm2685_vm8 = vcmp.gt.s32.totalorder %v2684_v14, 0  ;;  %vm1220_vm9 = vcmp.lt.s32.totalorder %v5296_v60, 0 }
 0x2d4   : > { %v2649_v53 = vor.u32 4788187, %v2648_v42  ;;  %v2686_v17 = vsel %vm2685_vm8, %v2684_v14, 0  ;;  %v2652_v20 = vcvt.s32.f32 %v2645_v31  ;;  %v5464_v57 = vand.u32 3, %v2663_v23 }
 0x2d5   : > { %v1280_v46 = vshrl.u32 %v1279_v55, 30  ;;  %v2688_v8 = vand.u32 31, %v2686_v17  ;;  %v1322_v33 = vand.u32 2147483647, %v5456_v30  ;;  %vm5469_vm10 = vcmp.le.f32.partialorder %v1218_v59, 0.7853982 }
 0x2d6   : > { %v2650_v11 = vand.u32 2147483647, %v2649_v53  ;;  %v2682_v0 = vor.u32 8388608, %v2681_v1  ;;  %v1325_v29 = vand.u32 2139095040, %v5456_v30  ;;  %v1274_v24 = vadd.s32 %v5426_v38, %v5438_v12 }
 0x2d7   : > { %v1281_v35 = vshll.u32 %v1280_v46, 30  ;;  %v2689_v40 = vsub.s32 32, %v2688_v8  ;;  %v1304_v18 = vsub.s32 4, %v1280_v46  ;;  %v2691_v34 = vshll.u32 %v3972_v48, %v2688_v8 }
 0x2d8   : > { %v2653_v43 = vmul.f32 %v2652_v20, %v2650_v11  ;;  %v2694_v59 = vshll.u32 %v3973_v52, %v2688_v8  ;;  %v2697_v22 = vshll.u32 %v3974_v54, %v2688_v8  ;;  %v2700_v51 = vshll.u32 %v3975_v56, %v2688_v8 }
 0x2d9   : > { %v5476_v50 = vsub.s32 %v1278_v37, %v1281_v35  ;;  %v2692_v6 = vshrl.u32 %v3973_v52, %v2689_v40  ;;  %v2695_v9 = vshrl.u32 %v3974_v54, %v2689_v40  ;;  %v2698_v63 = vshrl.u32 %v3975_v56, %v2689_v40 }
 0x2da   : > { %v2654_v13 = vxor.u32 2147483648, %v2653_v43  ;;  %v2701_v12 = vshrl.u32 %v3976_v58, %v2689_v40  ;;  %v5486_v49 = vshll.u32 %v2682_v0, 8  ;;  %v1326_v27 = vshrl.u32 %v1325_v29, 23 }
 0x2db   : > { %v1284_v38 = vsub.s32 0, %v5476_v50  ;;  %v1305_v39 = vsel %vm1220_vm9, %v1304_v18, %v1280_v46  ;;  %v2687_v41 = vshrl.u32 %v2686_v17, 5  ;;  %v2703_v61 = vshll.u32 %v3976_v58, %v2688_v8  ;;  %v5506_v46 = vpop.f32.mrb[11].mxu0 }
 0x2dc   : > { %v2655_v10 = vsel %vm2572_vm12, %v2654_v13, %v2653_v43  ;;  %v2693_v15 = vor.u32 %v2692_v6, %v2691_v34  ;;  %v2696_v16 = vor.u32 %v2695_v9, %v2694_v59  ;;  %v2699_v37 = vor.u32 %v2698_v63, %v2697_v22 }
 0x2dd   : > { %v2658_v26 = vsel %vm5409_vm14, %v5245_v47, %v2655_v10  ;;  %v3394_v21 = vmin.u32 %v1284_v38, %v5476_v50  ;;  %v2702_v14 = vor.u32 %v2701_v12, %v2700_v51  ;;  %v2704_v19 = vshrl.u32 %v3977_v2, %v2689_v40 }
 0x2de   : > { %3769 = vcosq.f32 %v2658_v26  ;;  %v3397_v42 = vadd.s32 4294967169, %v1326_v27  ;;  %v5500_v23 = vand.u32 8388607, %v1322_v33  ;;  %v1307_v32 = vsel %vm5469_vm10, 0, %v1305_v39 }
 0x2df   : > { %3771 = vsinq.f32 %v2658_v26  ;;  %v1286_v31 = vclz %v3394_v21  ;;  %v2690_v55 = vshrl.u32 %v3972_v48, %v2689_v40  ;;  %v2705_v1 = vor.u32 %v2704_v19, %v2703_v61 }
 0x2e0   : > { %vm2706_vm11 = vcmp.lt.s32.totalorder %v2687_v41, 1  ;;  %vm2708_vm12 = vcmp.lt.s32.totalorder %v2687_v41, 3  ;;  %vm2709_vm13 = vcmp.lt.s32.totalorder %v2687_v41, 4  ;;  %vm2707_vm15 = vcmp.lt.s32.totalorder %v2687_v41, 2 }
 0x2e1   : > { %v3395_v53 = vadd.s32 4294967294, %v1286_v31  ;;  %v2714_v17 = vsel %vm2706_vm11, %v2693_v15, %v2696_v16  ;;  %v2711_v8 = vsel %vm2709_vm13, %v2699_v37, 2102212464  ;;  %v2715_v11 = vsel %vm2709_vm13, %v2702_v14, 920167782 }
 0x2e2   : > { %v2718_v20 = vsel %vm2706_vm11, %v2696_v16, %v2699_v37  ;;  %v2719_v35 = vsel %vm2709_vm13, %v2705_v1, 1326507024  ;;  %v2716_v0 = vsel %vm2708_vm12, %v2699_v37, %v2715_v11  ;;  %vm2665_vm0 = vcmp.lt.s32.totalorder %v5464_v57, 2 }
 0x2e3   : > { %vm3396_vm14 = vcmp.lt.s32.totalorder %v3395_v53, 0  ;;  %v2720_v40 = vsel %vm2708_vm12, %v2702_v14, %v2719_v35  ;;  %v2710_v43 = vsel %vm2706_vm11, %v2690_v55, %v2693_v15  ;;  %v2717_v18 = vsel %vm2707_vm15, %v2714_v17, %v2716_v0 }
 0x2e4   : > { %v1289_v29 = vsel %vm3396_vm14, 0, %v3395_v53  ;;  %v2721_v34 = vsel %vm2707_vm15, %v2718_v20, %v2720_v40  ;;  %vm2662_vm1 = vweird.f32 %v5245_v47  ;;  %v2712_v22 = vsel %vm2708_vm12, %v2696_v16, %v2711_v8 }
 0x2e5   : > { %v1290_v6 = vsub.s32 32, %v1289_v29  ;;  %v1294_v59 = vsub.s32 4294967266, %v1289_v29  ;;  %v1332_v13 = vadd.s32 1, %v3397_v42  ;;  %v1291_v12 = vshll.u32 %v5476_v50, %v1289_v29 }
 0x2e6   : > { %v5518_v9 = vmul.u32.u64.low %v5486_v49, %v2721_v34  ;;  %v5519_v63 = vmul.u32.u64.high %v5486_v49, %v2721_v34, %v5518_v9  ;;  %v5522_v51 = vmul.u32.u64.low %v5486_v49, %v2717_v18  ;;  %v5523_v38 = vmul.u32.u64.high %v5486_v49, %v2717_v18, %v5522_v51 }
 0x2e7   : > { %v1292_v27 = vshrl.u32 %v1274_v24, %v1290_v6  ;;  %v1295_v10 = vadd.s32 127, %v1294_v59  ;;  %vm1333_vm2 = vcmp.gt.s32.totalorder %v1332_v13, 0  ;;  %vm2666_vm3 = vcmp.eq.s32.totalorder %v5464_v57, 0 }
 0x2e8   : > { %v3770_v39 = vpop.eup %3769  ;;  %vm2669_vm4 = vcmp.eq.s32.totalorder %v5464_v57, 2  ;;  %v2713_v61 = vsel %vm2707_vm15, %v2710_v43, %v2712_v22  ;;  %v1334_v26 = vsel %vm1333_vm2, %v1332_v13, 0  ;;  %v1330_v14 = vor.u32 8388608, %v5500_v23 }
 0x2e9   : > { %v3772_v21 = vpop.eup %3771  ;;  %v2670_v15 = vxor.u32 2147483648, %v3770_v39  ;;  %v1293_v16 = vor.u32 %v1292_v27, %v1291_v12  ;;  %v1296_v37 = vshll.u32 %v1295_v10, 23  ;;  %v1311_v31 = vadd.s32 3, %v1307_v32 }
 0x2ea   : > { %v2667_v19 = vxor.u32 2147483648, %v3772_v21  ;;  %vm2731_vm5 = vc.u32 %v5519_v63, %v5522_v51  ;;  %v2732_v24 = vadd.s32 1, %v5523_v38  ;;  %v2729_v41 = vmul.u32 %v5486_v49, %v2713_v61 }
 0x2eb   : > { %v2671_v50 = vsel %vm2669_vm4, %v2670_v15, %v3772_v21  ;;  %v1297_v42 = vor.u32 4788187, %v1296_v37  ;;  %v1336_v55 = vand.u32 31, %v1334_v26  ;;  %v1300_v53 = vcvt.s32.f32 %v1293_v16 }
 0x2ec   : > { %v2668_v1 = vsel %vm2666_vm3, %v3770_v39, %v2667_v19  ;;  %v2733_v17 = vsel %vm2731_vm5, %v2732_v24, %v5523_v38  ;;  %v454_v23 = vadd.f32 %v5095_v45, %v4192_v4  ;;  %v5544_v49 = vand.u32 3, %v1311_v31 }
 0x2ed   : > { %v2672_v32 = vsel %vm2665_vm0, %v2668_v1, %v2671_v50  ;;  %v1298_v8 = vand.u32 2147483647, %v1297_v42  ;;  %v2734_v11 = vadd.s32 %v2733_v17, %v2729_v41  ;;  %v1337_v20 = vsub.s32 32, %v1336_v55 }
 0x2ee   : > { %v2673_v35 = vsel %vm2662_vm1, nan, %v2672_v32  ;;  %v1335_v0 = vshrl.u32 %v1334_v26, 5  ;;  %v5548_v40 = vadd.f32 %v5201_v44, %v4194_v5  ;;  %v1339_v45 = vshll.u32 %v3972_v48, %v1336_v55 }
 0x2ef   : > { %3214 = vst [vmem:[%s4521_s5 + $0xa0] sm:$0xff] %v2673_v35  ;;  %v1301_v29 = vmul.f32 %v1300_v53, %v1298_v8  ;;  %v2735_v43 = vadd.s32 536870912, %v2734_v11  ;;  %v1340_v57 = vshrl.u32 %v3973_v52, %v1337_v20  ;;  %v1342_v18 = vshll.u32 %v3973_v52, %v1336_v55 }
 0x2f0   : > { %v1343_v34 = vshrl.u32 %v3974_v54, %v1337_v20  ;;  %v1346_v47 = vshrl.u32 %v3975_v56, %v1337_v20  ;;  %v1349_v6 = vshrl.u32 %v3976_v58, %v1337_v20  ;;  %v1345_v44 = vshll.u32 %v3974_v54, %v1336_v55 }
 0x2f1   : > { %v1302_v59 = vxor.u32 2147483648, %v1301_v29  ;;  %v2736_v22 = vshrl.u32 %v2735_v43, 30  ;;  %v1348_v13 = vshll.u32 %v3975_v56, %v1336_v55  ;;  %v1341_v9 = vor.u32 %v1340_v57, %v1339_v45  ;;  %v5582_v43 = vpop.f32.mrb[11].mxu1 }
 0x2f2   : > { %v1344_v38 = vor.u32 %v1343_v34, %v1342_v18  ;;  %v1351_v12 = vshll.u32 %v3976_v58, %v1336_v55  ;;  %v1352_v27 = vshrl.u32 %v3977_v2, %v1337_v20  ;;  %v1347_v61 = vor.u32 %v1346_v47, %v1345_v44 }
 0x2f3   : > { %v1303_v10 = vsel %vm1220_vm9, %v1302_v59, %v1301_v29  ;;  %v2737_v39 = vshll.u32 %v2736_v22, 30  ;;  %v1350_v26 = vor.u32 %v1349_v6, %v1348_v13  ;;  %v5566_v16 = vshll.u32 %v1330_v14, 8 }
 0x2f4   : > { %v1306_v21 = vsel %vm5469_vm10, %v5296_v60, %v1303_v10  ;;  %v1353_v15 = vor.u32 %v1352_v27, %v1351_v12  ;;  %v5568_v37 = vmul.f32 30.0, %v454_v23  ;;  %vm1354_vm6 = vcmp.lt.s32.totalorder %v1335_v0, 1 }
 0x2f5   : > { %3773 = vcosq.f32 %v1306_v21  ;;  %v5570_v19 = vsub.s32 %v2734_v11, %v2737_v39  ;;  %vm1355_vm7 = vcmp.lt.s32.totalorder %v1335_v0, 2  ;;  %v1338_v31 = vshrl.u32 %v3972_v48, %v1337_v20 }
 0x2f6   : > { %3775 = vsinq.f32 %v1306_v21  ;;  %vm1357_vm8 = vcmp.lt.s32.totalorder %v1335_v0, 4  ;;  %v1362_v24 = vsel %vm1354_vm6, %v1341_v9, %v1344_v38  ;;  %vm1356_vm9 = vcmp.lt.s32.totalorder %v1335_v0, 3 }
 0x2f7   : > { %v2740_v50 = vsub.s32 0, %v5570_v19  ;;  %v1359_v7 = vsel %vm1357_vm8, %v1347_v61, 2102212464  ;;  %v1363_v42 = vsel %vm1357_vm8, %v1350_v26, 920167782  ;;  %v2760_v41 = vsub.s32 4, %v2736_v22 }
 0x2f8   : > { %v1364_v14 = vsel %vm1356_vm9, %v1347_v61, %v1363_v42  ;;  %v1366_v55 = vsel %vm1354_vm6, %v1344_v38, %v1347_v61  ;;  %v1367_v1 = vsel %vm1357_vm8, %v1353_v15, 1326507024  ;;  %v1358_v17 = vsel %vm1354_vm6, %v1338_v31, %v1341_v9 }
 0x2f9   : > { %v3450_v53 = vmin.u32 %v2740_v50, %v5570_v19  ;;  %v1365_v23 = vsel %vm1355_vm7, %v1362_v24, %v1364_v14  ;;  %v1368_v32 = vsel %vm1356_vm9, %v1350_v26, %v1367_v1  ;;  %v1360_v8 = vsel %vm1356_vm9, %v1344_v38, %v1359_v7 }
 0x2fa   : > { %v1369_v11 = vsel %vm1355_vm7, %v1366_v55, %v1368_v32  ;;  %v5578_v20 = vmul.u32.u64.low %v5566_v16, %v1365_v23  ;;  %v5579_v35 = vmul.u32.u64.high %v5566_v16, %v1365_v23, %v5578_v20  ;;  %vm2676_vm10 = vcmp.lt.s32.totalorder %v5403_v62, 0 }
 0x2fb   : > { %v2742_v29 = vclz %v3450_v53  ;;  %vm1310_vm11 = vweird.f32 %v5296_v60  ;;  %vm5587_vm12 = vcmp.le.f32.partialorder %v2674_v25, 0.7853982  ;;  %v2761_v57 = vsel %vm2676_vm10, %v2760_v41, %v2736_v22 }
 0x2fc   : > { %v5594_v18 = vmul.u32.u64.low %v5566_v16, %v1369_v11  ;;  %v5595_v34 = vmul.u32.u64.high %v5566_v16, %v1369_v11, %v5594_v18  ;;  %vm1313_vm13 = vcmp.lt.s32.totalorder %v5544_v49, 2  ;;  %v1361_v6 = vsel %vm1355_vm7, %v1358_v17, %v1360_v8 }
 0x2fd   : > { %v3451_v47 = vadd.s32 4294967294, %v2742_v29  ;;  %v2781_v59 = vand.u32 2139095040, %v5568_v37  ;;  %vm1314_vm14 = vcmp.eq.s32.totalorder %v5544_v49, 0  ;;  %vm1317_vm15 = vcmp.eq.s32.totalorder %v5544_v49, 2 }
 0x2fe   : > { %v1380_v25 = vadd.s32 1, %v5579_v35  ;;  %v5604_v44 = vmul.f32 30.0, %v5548_v40  ;;  %v2730_v13 = vadd.s32 %v5522_v51, %v5519_v63  ;;  %v2763_v0 = vsel %vm5587_vm12, 0, %v2761_v57 }
 0x2ff   : > { %v3774_v22 = vpop.eup %3773  ;;  %vm3452_vm0 = vcmp.lt.s32.totalorder %v3451_v47, 0  ;;  %v2782_v9 = vshrl.u32 %v2781_v59, 23  ;;  %v1377_v10 = vmul.u32 %v5566_v16, %v1361_v6  ;;  %vm1379_vm1 = vc.u32 %v5595_v34, %v5578_v20 }
 0x300   : > { %v3776_v38 = vpop.eup %3775  ;;  %v1318_v12 = vxor.u32 2147483648, %v3774_v22  ;;  %v2745_v27 = vsel %vm3452_vm0, 0, %v3451_v47  ;;  %v2778_v26 = vand.u32 2147483647, %v5568_v37  ;;  %v1381_v21 = vsel %vm1379_vm1, %v1380_v25, %v5579_v35 }
 0x301   : > { %v1315_v39 = vxor.u32 2147483648, %v3776_v38  ;;  %v2746_v61 = vsub.s32 32, %v2745_v27  ;;  %v2750_v40 = vsub.s32 4294967266, %v2745_v27  ;;  %v2747_v51 = vshll.u32 %v5570_v19, %v2745_v27 }
 0x302   : > { %v1319_v63 = vsel %vm1317_vm15, %v1318_v12, %v3776_v38  ;;  %v3453_v15 = vadd.s32 4294967169, %v2782_v9  ;;  %v1382_v50 = vadd.s32 %v1381_v21, %v1377_v10  ;;  %v2767_v42 = vadd.s32 3, %v2763_v0 }
 0x303   : > { %v1316_v31 = vsel %vm1314_vm14, %v3774_v22, %v1315_v39  ;;  %v2748_v16 = vshrl.u32 %v2730_v13, %v2746_v61  ;;  %v2751_v24 = vadd.s32 127, %v2750_v40  ;;  %v1429_v14 = vand.u32 2139095040, %v5604_v44 }
 0x304   : > { %v1320_v7 = vsel %vm1313_vm13, %v1316_v31, %v1319_v63  ;;  %v2788_v41 = vadd.s32 1, %v3453_v15  ;;  %v1383_v53 = vadd.s32 536870912, %v1382_v50  ;;  %v2785_v17 = vand.u32 8388607, %v2778_v26 }
 0x305   : > { %v1321_v55 = vsel %vm1310_vm11, nan, %v1320_v7  ;;  %v2749_v19 = vor.u32 %v2748_v16, %v2747_v51  ;;  %v2752_v1 = vshll.u32 %v2751_v24, 23  ;;  %v5627_v49 = vand.u32 3, %v2767_v42 }
 0x306   : > { %3201 = vst [vmem:[%s4521_s5 + $0x38] sm:$0xff] %v1321_v55  ;;  %vm2789_vm2 = vcmp.gt.s32.totalorder %v2788_v41, 0  ;;  %v1384_v32 = vshrl.u32 %v1383_v53, 30  ;;  %v5631_v35 = vadd.f32 %v5258_v3, %v4194_v5  ;;  %vm1324_vm3 = vcmp.lt.s32.totalorder %v5456_v30, 0 }
 0x307   : > { %v2753_v23 = vor.u32 4788187, %v2752_v1  ;;  %v2790_v8 = vsel %vm2789_vm2, %v2788_v41, 0  ;;  %v2756_v29 = vcvt.s32.f32 %v2749_v19  ;;  %v1430_v18 = vshrl.u32 %v1429_v14, 23 }
 0x308   : > { %v2792_v11 = vand.u32 31, %v2790_v8  ;;  %v1385_v57 = vshll.u32 %v1384_v32, 30  ;;  %v1378_v47 = vadd.s32 %v5578_v20, %v5595_v34  ;;  %v2786_v6 = vor.u32 8388608, %v2785_v17 }
 0x309   : > { %v2754_v60 = vand.u32 2147483647, %v2753_v23  ;;  %v1426_v25 = vand.u32 2147483647, %v5604_v44  ;;  %v3401_v39 = vadd.s32 4294967169, %v1430_v18  ;;  %v1408_v61 = vsub.s32 4, %v1384_v32 }
 0x30a   : > { %v2793_v59 = vsub.s32 32, %v2792_v11  ;;  %v5636_v13 = vsub.s32 %v1382_v50, %v1385_v57  ;;  %v2795_v0 = vshll.u32 %v3972_v48, %v2792_v11  ;;  %v2798_v3 = vshll.u32 %v3973_v52, %v2792_v11 }
 0x30b   : > { %v2757_v22 = vmul.f32 %v2756_v29, %v2754_v60  ;;  %v2801_v12 = vshll.u32 %v3974_v54, %v2792_v11  ;;  %v2804_v27 = vshll.u32 %v3975_v56, %v2792_v11  ;;  %v2791_v40 = vshrl.u32 %v2790_v8, 5  ;;  %v5666_v29 = vpop.f32.mrb[12].mxu0 }
 0x30c   : > { %v2796_v9 = vshrl.u32 %v3973_v52, %v2793_v59  ;;  %v2799_v38 = vshrl.u32 %v3974_v54, %v2793_v59  ;;  %v1388_v34 = vsub.s32 0, %v5636_v13  ;;  %v2802_v10 = vshrl.u32 %v3975_v56, %v2793_v59 }
 0x30d   : > { %v2758_v20 = vxor.u32 2147483648, %v2757_v22  ;;  %v2805_v63 = vshrl.u32 %v3976_v58, %v2793_v59  ;;  %v2807_v51 = vshll.u32 %v3976_v58, %v2792_v11  ;;  %v2808_v42 = vshrl.u32 %v3977_v2, %v2793_v59 }
 0x30e   : > { %v3398_v15 = vmin.u32 %v1388_v34, %v5636_v13  ;;  %v2797_v31 = vor.u32 %v2796_v9, %v2795_v0  ;;  %v2800_v16 = vor.u32 %v2799_v38, %v2798_v3  ;;  %v2803_v50 = vor.u32 %v2802_v10, %v2801_v12 }
 0x30f   : > { %v2759_v21 = vsel %vm2676_vm10, %v2758_v20, %v2757_v22  ;;  %v2806_v7 = vor.u32 %v2805_v63, %v2804_v27  ;;  %v5655_v14 = vshll.u32 %v2786_v6, 8  ;;  %v1436_v55 = vadd.s32 1, %v3401_v39 }
 0x310   : > { %v2762_v24 = vsel %vm5587_vm12, %v5403_v62, %v2759_v21  ;;  %v1390_v41 = vclz %v3398_v15  ;;  %v1409_v19 = vsel %vm1324_vm3, %v1408_v61, %v1384_v32  ;;  %v2794_v1 = vshrl.u32 %v3972_v48, %v2793_v59 }
 0x311   : > { %3777 = vcosq.f32 %v2762_v24  ;;  %v2809_v53 = vor.u32 %v2808_v42, %v2807_v51  ;;  %vm5662_vm4 = vcmp.le.f32.partialorder %v1322_v33, 0.7853982  ;;  %vm2810_vm5 = vcmp.lt.s32.totalorder %v2791_v40, 1 }
 0x312   : > { %3779 = vsinq.f32 %v2762_v24  ;;  %v3399_v17 = vadd.s32 4294967294, %v1390_v41  ;;  %vm2812_vm6 = vcmp.lt.s32.totalorder %v2791_v40, 3  ;;  %vm2813_vm7 = vcmp.lt.s32.totalorder %v2791_v40, 4 }
 0x313   : > { %v2815_v23 = vsel %vm2813_vm7, %v2803_v50, 2102212464  ;;  %v2818_v8 = vsel %vm2810_vm5, %v2797_v31, %v2800_v16  ;;  %v2819_v11 = vsel %vm2813_vm7, %v2806_v7, 920167782  ;;  %v2822_v60 = vsel %vm2810_vm5, %v2800_v16, %v2803_v50 }
 0x314   : > { %vm3400_vm8 = vcmp.lt.s32.totalorder %v3399_v17, 0  ;;  %vm2811_vm9 = vcmp.lt.s32.totalorder %v2791_v40, 2  ;;  %v2820_v32 = vsel %vm2812_vm6, %v2803_v50, %v2819_v11  ;;  %v2823_v57 = vsel %vm2813_vm7, %v2809_v53, 1326507024 }
 0x315   : > { %v1393_v18 = vsel %vm3400_vm8, 0, %v3399_v17  ;;  %v2814_v33 = vsel %vm2810_vm5, %v2794_v1, %v2797_v31  ;;  %v2821_v6 = vsel %vm2811_vm9, %v2818_v8, %v2820_v32  ;;  %v2824_v59 = vsel %vm2812_vm6, %v2806_v7, %v2823_v57 }
 0x316   : > { %v1394_v22 = vsub.s32 32, %v1393_v18  ;;  %v1398_v0 = vsub.s32 4294967266, %v1393_v18  ;;  %v2816_v3 = vsel %vm2812_vm6, %v2800_v16, %v2815_v23  ;;  %v2825_v9 = vsel %vm2811_vm9, %v2822_v60, %v2824_v59 }
 0x317   : > { %vm2766_vm10 = vweird.f32 %v5403_v62  ;;  %v5675_v38 = vmul.u32.u64.low %v5655_v14, %v2825_v9  ;;  %v5676_v12 = vmul.u32.u64.high %v5655_v14, %v2825_v9, %v5675_v38  ;;  %v1395_v34 = vshll.u32 %v5636_v13, %v1393_v18 }
 0x318   : > { %v5679_v27 = vmul.u32.u64.low %v5655_v14, %v2821_v6  ;;  %v5680_v20 = vmul.u32.u64.high %v5655_v14, %v2821_v6, %v5679_v27  ;;  %v1396_v10 = vshrl.u32 %v1378_v47, %v1394_v22  ;;  %v1399_v39 = vadd.s32 127, %v1398_v0 }
 0x319   : > { %vm1437_vm11 = vcmp.gt.s32.totalorder %v1436_v55, 0  ;;  %vm2769_vm12 = vcmp.lt.s32.totalorder %v5627_v49, 2  ;;  %v2817_v61 = vsel %vm2811_vm9, %v2814_v33, %v2816_v3  ;;  %v1433_v63 = vand.u32 8388607, %v1426_v25 }
 0x31a   : > { %v1438_v51 = vsel %vm1437_vm11, %v1436_v55, 0  ;;  %vm2773_vm13 = vcmp.eq.s32.totalorder %v5627_v49, 2  ;;  %v1397_v15 = vor.u32 %v1396_v10, %v1395_v34  ;;  %v1400_v31 = vshll.u32 %v1399_v39, 23 }
 0x31b   : > { %v3778_v21 = vpop.eup %3777  ;;  %v1440_v16 = vand.u32 31, %v1438_v51  ;;  %v1411_v47 = vsel %vm5662_vm4, 0, %v1409_v19  ;;  %vm2835_vm14 = vc.u32 %v5676_v12, %v5679_v27  ;;  %v2836_v13 = vadd.s32 1, %v5680_v20 }
 0x31c   : > { %v3780_v24 = vpop.eup %3779  ;;  %v2774_v50 = vxor.u32 2147483648, %v3778_v21  ;;  %v1401_v7 = vor.u32 4788187, %v1400_v31  ;;  %v2833_v42 = vmul.u32 %v5655_v14, %v2817_v61  ;;  %vm2770_vm15 = vcmp.eq.s32.totalorder %v5627_v49, 0 }
 0x31d   : > { %v2771_v40 = vxor.u32 2147483648, %v3780_v24  ;;  %v1441_v41 = vsub.s32 32, %v1440_v16  ;;  %v2837_v1 = vsel %vm2835_vm14, %v2836_v13, %v5680_v20  ;;  %v1434_v53 = vor.u32 8388608, %v1433_v63 }
 0x31e   : > { %v2775_v55 = vsel %vm2773_vm13, %v2774_v50, %v3780_v24  ;;  %v1402_v23 = vand.u32 2147483647, %v1401_v7  ;;  %v1404_v19 = vcvt.s32.f32 %v1397_v15  ;;  %v2838_v8 = vadd.s32 %v2837_v1, %v2833_v42 }
 0x31f   : > { %v2772_v17 = vsel %vm2770_vm15, %v3778_v21, %v2771_v40  ;;  %v1415_v60 = vadd.s32 3, %v1411_v47  ;;  %v1444_v32 = vshrl.u32 %v3973_v52, %v1441_v41  ;;  %v1447_v14 = vshrl.u32 %v3974_v54, %v1441_v41 }
 0x320   : > { %v2776_v11 = vsel %vm2769_vm12, %v2772_v17, %v2775_v55  ;;  %v1405_v18 = vmul.f32 %v1404_v19, %v1402_v23  ;;  %v2839_v33 = vadd.s32 536870912, %v2838_v8  ;;  %v1439_v6 = vshrl.u32 %v1438_v51, 5 }
 0x321   : > { %v2777_v57 = vsel %vm2766_vm10, nan, %v2776_v11  ;;  %v1443_v59 = vshll.u32 %v3972_v48, %v1440_v16  ;;  %v1446_v22 = vshll.u32 %v3973_v52, %v1440_v16  ;;  %v1450_v0 = vshrl.u32 %v3975_v56, %v1441_v41 }
 0x322   : > { %3215 = vst [vmem:[%s4521_s5 + $0xa8] sm:$0xff] %v2777_v57  ;;  %v1453_v49 = vshrl.u32 %v3976_v58, %v1441_v41  ;;  %v1406_v3 = vxor.u32 2147483648, %v1405_v18  ;;  %v2840_v9 = vshrl.u32 %v2839_v33, 30  ;;  %v1449_v38 = vshll.u32 %v3974_v54, %v1440_v16 }
 0x323   : > { %v1452_v20 = vshll.u32 %v3975_v56, %v1440_v16  ;;  %v1445_v62 = vor.u32 %v1444_v32, %v1443_v59  ;;  %v1448_v34 = vor.u32 %v1447_v14, %v1446_v22  ;;  %v1455_v10 = vshll.u32 %v3976_v58, %v1440_v16 }
 0x324   : > { %v1456_v39 = vshrl.u32 %v3977_v2, %v1441_v41  ;;  %v1407_v61 = vsel %vm1324_vm3, %v1406_v3, %v1405_v18  ;;  %v2841_v63 = vshll.u32 %v2840_v9, 30  ;;  %v5715_v21 = vmul.f32 30.0, %v5631_v35 }
 0x325   : > { %v1454_v51 = vor.u32 %v1453_v49, %v1452_v20  ;;  %v1410_v15 = vsel %vm5662_vm4, %v5456_v30, %v1407_v61  ;;  %v5720_v31 = vand.u32 3, %v1415_v60  ;;  %v1451_v24 = vor.u32 %v1450_v0, %v1449_v38 }
 0x326   : > { %v1457_v50 = vor.u32 %v1456_v39, %v1455_v10  ;;  %3781 = vcosq.f32 %v1410_v15  ;;  %v5722_v16 = vsub.s32 %v2838_v8, %v2841_v63  ;;  %vm1458_vm0 = vcmp.lt.s32.totalorder %v1439_v6, 1  ;;  %v5757_v10 = vpop.f32.mrb[13].mxu0 }
 0x327   : > { %v1474_v47 = vshll.u32 %v1434_v53, 8  ;;  %3783 = vsinq.f32 %v1410_v15  ;;  %v1442_v13 = vshrl.u32 %v3972_v48, %v1441_v41  ;;  %vm1461_vm1 = vcmp.lt.s32.totalorder %v1439_v6, 4 }
 0x328   : > { %v1466_v35 = vsel %vm1458_vm0, %v1445_v62, %v1448_v34  ;;  %v2844_v40 = vsub.s32 0, %v5722_v16  ;;  %vm1459_vm2 = vcmp.lt.s32.totalorder %v1439_v6, 2  ;;  %vm1460_vm3 = vcmp.lt.s32.totalorder %v1439_v6, 3 }
 0x329   : > { %v1467_v45 = vsel %vm1461_vm1, %v1454_v51, 920167782  ;;  %v1463_v7 = vsel %vm1461_vm1, %v1451_v24, 2102212464  ;;  %v1470_v55 = vsel %vm1458_vm0, %v1448_v34, %v1451_v24  ;;  %v1471_v1 = vsel %vm1461_vm1, %v1457_v50, 1326507024 }
 0x32a   : > { %v1468_v42 = vsel %vm1460_vm3, %v1451_v24, %v1467_v45  ;;  %v3454_v17 = vmin.u32 %v2844_v40, %v5722_v16  ;;  %v2864_v23 = vsub.s32 4, %v2840_v9  ;;  %v1472_v19 = vsel %vm1460_vm3, %v1454_v51, %v1471_v1 }
 0x32b   : > { %v1469_v53 = vsel %vm1459_vm2, %v1466_v35, %v1468_v42  ;;  %v1473_v41 = vsel %vm1459_vm2, %v1470_v55, %v1472_v19  ;;  %v2885_v60 = vand.u32 2139095040, %v5715_v21  ;;  %v1462_v14 = vsel %vm1458_vm0, %v1442_v13, %v1445_v62 }
 0x32c   : > { %v5731_v8 = vmul.u32.u64.low %v1474_v47, %v1469_v53  ;;  %v5732_v11 = vmul.u32.u64.high %v1474_v47, %v1469_v53, %v5731_v8  ;;  %v2846_v32 = vclz %v3454_v17  ;;  %v1464_v57 = vsel %vm1460_vm3, %v1448_v34, %v1463_v7 }
 0x32d   : > { %vm1414_vm4 = vweird.f32 %v5456_v30  ;;  %vm2780_vm5 = vcmp.lt.s32.totalorder %v5568_v37, 0  ;;  %v5738_v18 = vmul.u32.u64.low %v1474_v47, %v1473_v41  ;;  %v5739_v33 = vmul.u32.u64.high %v1474_v47, %v1473_v41, %v5738_v18 }
 0x32e   : > { %v2886_v59 = vshrl.u32 %v2885_v60, 23  ;;  %vm5743_vm6 = vcmp.le.f32.partialorder %v2778_v26, 0.7853982  ;;  %v3455_v0 = vadd.s32 4294967294, %v2846_v32  ;;  %v2865_v49 = vsel %vm2780_vm5, %v2864_v23, %v2840_v9 }
 0x32f   : > { %v2882_v3 = vand.u32 2147483647, %v5715_v21  ;;  %vm1417_vm7 = vcmp.lt.s32.totalorder %v5720_v31, 2  ;;  %v1465_v38 = vsel %vm1459_vm2, %v1462_v14, %v1464_v57  ;;  %v1484_v20 = vadd.s32 1, %v5732_v11 }
 0x330   : > { %v3457_v62 = vadd.s32 4294967169, %v2886_v59  ;;  %v3782_v34 = vpop.eup %3781  ;;  %vm1418_vm8 = vcmp.eq.s32.totalorder %v5720_v31, 0  ;;  %vm1421_vm9 = vcmp.eq.s32.totalorder %v5720_v31, 2  ;;  %v2834_v26 = vadd.s32 %v5679_v27, %v5676_v12 }
 0x331   : > { %vm3456_vm10 = vcmp.lt.s32.totalorder %v3455_v0, 0  ;;  %v3784_v9 = vpop.eup %3783  ;;  %v1422_v39 = vxor.u32 2147483648, %v3782_v34  ;;  %v2867_v6 = vsel %vm5743_vm6, 0, %v2865_v49  ;;  %vm1483_vm11 = vc.u32 %v5739_v33, %v5731_v8 }
 0x332   : > { %v2849_v61 = vsel %vm3456_vm10, 0, %v3455_v0  ;;  %v1419_v63 = vxor.u32 2147483648, %v3784_v9  ;;  %v1481_v24 = vmul.u32 %v1474_v47, %v1465_v38  ;;  %v1485_v12 = vsel %vm1483_vm11, %v1484_v20, %v5732_v11 }
 0x333   : > { %v2850_v51 = vsub.s32 32, %v2849_v61  ;;  %v2854_v15 = vsub.s32 4294967266, %v2849_v61  ;;  %v1423_v50 = vsel %vm1421_vm9, %v1422_v39, %v3784_v9  ;;  %v2851_v13 = vshll.u32 %v5722_v16, %v2849_v61 }
 0x334   : > { %v2892_v27 = vadd.s32 1, %v3457_v62  ;;  %v1420_v35 = vsel %vm1418_vm8, %v3782_v34, %v1419_v63  ;;  %v1486_v7 = vadd.s32 %v1485_v12, %v1481_v24  ;;  %v2871_v55 = vadd.s32 3, %v2867_v6 }
 0x335   : > { %v2852_v40 = vshrl.u32 %v2834_v26, %v2850_v51  ;;  %v2855_v45 = vadd.s32 127, %v2854_v15  ;;  %v1424_v42 = vsel %vm1417_vm7, %v1420_v35, %v1423_v50  ;;  %v418_v47 = vadd.f32 %v5360_v28, %v4192_v4 }
 0x336   : > { %vm2893_vm12 = vcmp.gt.s32.totalorder %v2892_v27, 0  ;;  %v1425_v16 = vsel %vm1414_vm4, nan, %v1424_v42  ;;  %v1487_v23 = vadd.s32 536870912, %v1486_v7  ;;  %v2889_v53 = vand.u32 8388607, %v2882_v3 }
 0x337   : > { %v2853_v1 = vor.u32 %v2852_v40, %v2851_v13  ;;  %v2856_v17 = vshll.u32 %v2855_v45, 23  ;;  %3202 = vst [vmem:[%s4521_s5 + $0x40] sm:$0xff] %v1425_v16  ;;  %v2894_v19 = vsel %vm2893_vm12, %v2892_v27, 0  ;;  %v5777_v31 = vand.u32 3, %v2871_v55 }
 0x338   : > { %v5775_v11 = vshrl.u32 %v1487_v23, 30  ;;  %v2896_v60 = vand.u32 31, %v2894_v19  ;;  %v5780_v30 = vmul.f32 30.0, %v418_v47  ;;  %v1482_v57 = vadd.s32 %v5731_v8, %v5739_v33 }
 0x339   : > { %v2857_v41 = vor.u32 4788187, %v2856_v17  ;;  %v2860_v14 = vcvt.s32.f32 %v2853_v1  ;;  %v2890_v18 = vor.u32 8388608, %v2889_v53  ;;  %v5785_v0 = vadd.f32 %v5433_v36, %v4192_v4 }
 0x33a   : > { %v1489_v28 = vshll.u32 %v5775_v11, 30  ;;  %v2897_v59 = vsub.s32 32, %v2896_v60  ;;  %v2899_v20 = vshll.u32 %v3972_v48, %v2896_v60  ;;  %v2902_v62 = vshll.u32 %v3973_v52, %v2896_v60 }
 0x33b   : > { %v2858_v32 = vand.u32 2147483647, %v2857_v41  ;;  %v2905_v9 = vshll.u32 %v3974_v54, %v2896_v60  ;;  %v2908_v8 = vshll.u32 %v3975_v56, %v2896_v60  ;;  %v1533_v61 = vand.u32 2139095040, %v5780_v30 }
 0x33c   : > { %v5787_v38 = vsub.s32 %v1486_v7, %v1489_v28  ;;  %v2900_v34 = vshrl.u32 %v3973_v52, %v2897_v59  ;;  %v2903_v26 = vshrl.u32 %v3974_v54, %v2897_v59  ;;  %v2906_v36 = vshrl.u32 %v3975_v56, %v2897_v59 }
 0x33d   : > { %v2861_v49 = vmul.f32 %v2860_v14, %v2858_v32  ;;  %v2895_v6 = vshrl.u32 %v2894_v19, 5  ;;  %v2909_v63 = vshrl.u32 %v3976_v58, %v2897_v59  ;;  %v2911_v51 = vshll.u32 %v3976_v58, %v2896_v60 }
 0x33e   : > { %v1492_v39 = vsub.s32 0, %v5787_v38  ;;  %v5800_v15 = vshll.u32 %v2890_v18, 8  ;;  %v2901_v13 = vor.u32 %v2900_v34, %v2899_v20  ;;  %v2904_v12 = vor.u32 %v2903_v26, %v2902_v62 }
 0x33f   : > { %v2862_v33 = vxor.u32 2147483648, %v2861_v49  ;;  %v2907_v35 = vor.u32 %v2906_v36, %v2905_v9  ;;  %v2910_v40 = vor.u32 %v2909_v63, %v2908_v8  ;;  %v2912_v45 = vshrl.u32 %v3977_v2, %v2897_v59 }
 0x340   : > { %v3402_v50 = vmin.u32 %v1492_v39, %v5787_v38  ;;  %v1530_v42 = vand.u32 2147483647, %v5780_v30  ;;  %v1534_v55 = vshrl.u32 %v1533_v61, 23  ;;  %vm1428_vm13 = vcmp.lt.s32.totalorder %v5604_v44, 0 }
 0x341   : > { %v2863_v24 = vsel %vm2780_vm5, %v2862_v33, %v2861_v49  ;;  %v2898_v47 = vshrl.u32 %v3972_v48, %v2897_v59  ;;  %v2913_v16 = vor.u32 %v2912_v45, %v2911_v51  ;;  %vm2914_vm14 = vcmp.lt.s32.totalorder %v2895_v6, 1 }
 0x342   : > { %v2866_v27 = vsel %vm5743_vm6, %v5568_v37, %v2863_v24  ;;  %v1494_v7 = vclz %v3402_v50  ;;  %vm2916_vm15 = vcmp.lt.s32.totalorder %v2895_v6, 3  ;;  %vm2917_vm0 = vcmp.lt.s32.totalorder %v2895_v6, 4 }
 0x343   : > { %3785 = vcosq.f32 %v2866_v27  ;;  %v2922_v22 = vsel %vm2914_vm14, %v2901_v13, %v2904_v12  ;;  %v2919_v17 = vsel %vm2917_vm0, %v2907_v35, 2102212464  ;;  %v2923_v23 = vsel %vm2917_vm0, %v2910_v40, 920167782 }
 0x344   : > { %3787 = vsinq.f32 %v2866_v27  ;;  %v3403_v1 = vadd.s32 4294967294, %v1494_v7  ;;  %v2926_v53 = vsel %vm2914_vm14, %v2904_v12, %v2907_v35  ;;  %v2927_v19 = vsel %vm2917_vm0, %v2913_v16, 1326507024 }
 0x345   : > { %vm5816_vm1 = vcmp.le.f32.partialorder %v1426_v25, 0.7853982  ;;  %vm2915_vm3 = vcmp.lt.s32.totalorder %v2895_v6, 2  ;;  %v2924_v60 = vsel %vm2916_vm15, %v2907_v35, %v2923_v23  ;;  %v2928_v32 = vsel %vm2916_vm15, %v2910_v40, %v2927_v19 }
 0x346   : > { %vm3404_vm2 = vcmp.lt.s32.totalorder %v3403_v1, 0  ;;  %v1512_v28 = vsub.s32 4, %v5775_v11  ;;  %v2925_v18 = vsel %vm2915_vm3, %v2922_v22, %v2924_v60  ;;  %v2929_v59 = vsel %vm2915_vm3, %v2926_v53, %v2928_v32 }
 0x347   : > { %v1497_v14 = vsel %vm3404_vm2, 0, %v3403_v1  ;;  %vm2873_vm4 = vcmp.lt.s32.totalorder %v5777_v31, 2  ;;  %v2918_v20 = vsel %vm2914_vm14, %v2898_v47, %v2901_v13  ;;  %v2920_v62 = vsel %vm2916_vm15, %v2904_v12, %v2919_v17 }
 0x348   : > { %v1498_v49 = vsub.s32 32, %v1497_v14  ;;  %v1502_v25 = vsub.s32 4294967266, %v1497_v14  ;;  %v5829_v34 = vmul.u32.u64.low %v5800_v15, %v2929_v59  ;;  %v5830_v26 = vmul.u32.u64.high %v5800_v15, %v2929_v59, %v5829_v34 }
 0x349   : > { %v5833_v9 = vmul.u32.u64.low %v5800_v15, %v2925_v18  ;;  %v5834_v8 = vmul.u32.u64.high %v5800_v15, %v2925_v18, %v5833_v9  ;;  %v1499_v33 = vshll.u32 %v5787_v38, %v1497_v14  ;;  %v3405_v61 = vadd.s32 4294967169, %v1534_v55 }
 0x34a   : > { %v1500_v39 = vshrl.u32 %v1482_v57, %v1498_v49  ;;  %v1503_v36 = vadd.s32 127, %v1502_v25  ;;  %vm2874_vm5 = vcmp.eq.s32.totalorder %v5777_v31, 0  ;;  %vm2877_vm6 = vcmp.eq.s32.totalorder %v5777_v31, 2 }
 0x34b   : > { %v2921_v63 = vsel %vm2915_vm3, %v2918_v20, %v2920_v62  ;;  %v5842_v51 = vmul.f32 30.0, %v5785_v0  ;;  %v1513_v12 = vsel %vm1428_vm13, %v1512_v28, %v5775_v11  ;;  %v1540_v38 = vadd.s32 1, %v3405_v61 }
 0x34c   : > { %v1501_v50 = vor.u32 %v1500_v39, %v1499_v33  ;;  %v1504_v13 = vshll.u32 %v1503_v36, 23  ;;  %vm2939_vm7 = vc.u32 %v5830_v26, %v5833_v9  ;;  %v2940_v35 = vadd.s32 1, %v5834_v8 }
 0x34d   : > { %v3786_v24 = vpop.eup %3785  ;;  %v1537_v6 = vand.u32 8388607, %v1530_v42  ;;  %v2937_v45 = vmul.u32 %v5800_v15, %v2921_v63  ;;  %vm1541_vm8 = vcmp.gt.s32.totalorder %v1540_v38, 0  ;;  %v1515_v7 = vsel %vm5816_vm1, 0, %v1513_v12 }
 0x34e   : > { %v3788_v57 = vpop.eup %3787  ;;  %v2878_v27 = vxor.u32 2147483648, %v3786_v24  ;;  %v1505_v40 = vor.u32 4788187, %v1504_v13  ;;  %v2941_v55 = vsel %vm2939_vm7, %v2940_v35, %v5834_v8  ;;  %v1542_v47 = vsel %vm1541_vm8, %v1540_v38, 0 }
 0x34f   : > { %v2875_v0 = vxor.u32 2147483648, %v3788_v57  ;;  %v1508_v22 = vcvt.s32.f32 %v1501_v50  ;;  %v2942_v17 = vadd.s32 %v2941_v55, %v2937_v45  ;;  %vm2870_vm9 = vweird.f32 %v5568_v37 }
 0x350   : > { %v2879_v11 = vsel %vm2877_vm6, %v2878_v27, %v3788_v57  ;;  %v1506_v1 = vand.u32 2147483647, %v1505_v40  ;;  %v1544_v23 = vand.u32 31, %v1542_v47  ;;  %v1538_v32 = vor.u32 8388608, %v1537_v6 }
 0x351   : > { %v2876_v16 = vsel %vm2874_vm5, %v3786_v24, %v2875_v0  ;;  %v2943_v60 = vadd.s32 536870912, %v2942_v17  ;;  %v1519_v14 = vadd.s32 3, %v1515_v7  ;;  %v1543_v28 = vshrl.u32 %v1542_v47, 5 }
 0x352   : > { %v2880_v15 = vsel %vm2873_vm4, %v2876_v16, %v2879_v11  ;;  %v1509_v19 = vmul.f32 %v1508_v22, %v1506_v1  ;;  %v1545_v18 = vsub.s32 32, %v1544_v23  ;;  %v2989_v59 = vand.u32 2139095040, %v5842_v51 }
 0x353   : > { %v2881_v53 = vsel %vm2870_vm9, nan, %v2880_v15  ;;  %v5865_v25 = vshrl.u32 %v2943_v60, 30  ;;  %v1547_v20 = vshll.u32 %v3972_v48, %v1544_v23  ;;  %v1550_v37 = vshll.u32 %v3973_v52, %v1544_v23 }
 0x354   : > { %3216 = vst [vmem:[%s4521_s5 + $0xb0] sm:$0xff] %v2881_v53  ;;  %v1510_v49 = vxor.u32 2147483648, %v1509_v19  ;;  %v1548_v31 = vshrl.u32 %v3973_v52, %v1545_v18  ;;  %v1551_v62 = vshrl.u32 %v3974_v54, %v1545_v18  ;;  %v1553_v34 = vshll.u32 %v3974_v54, %v1544_v23 }
 0x355   : > { %v1554_v8 = vshrl.u32 %v3975_v56, %v1545_v18  ;;  %v2945_v39 = vshll.u32 %v5865_v25, 30  ;;  %v1556_v36 = vshll.u32 %v3975_v56, %v1544_v23  ;;  %v1557_v61 = vshrl.u32 %v3976_v58, %v1545_v18 }
 0x356   : > { %v1511_v33 = vsel %vm1428_vm13, %v1510_v49, %v1509_v19  ;;  %v1549_v24 = vor.u32 %v1548_v31, %v1547_v20  ;;  %v5883_v13 = vadd.f32 %v5506_v46, %v4194_v5  ;;  %v1552_v38 = vor.u32 %v1551_v62, %v1550_v37 }
 0x357   : > { %v1514_v63 = vsel %vm5816_vm1, %v5604_v44, %v1511_v33  ;;  %v1555_v50 = vor.u32 %v1554_v8, %v1553_v34  ;;  %v5885_v12 = vsub.s32 %v2942_v17, %v2945_v39  ;;  %v1558_v57 = vor.u32 %v1557_v61, %v1556_v36 }
 0x358   : > { %3789 = vcosq.f32 %v1514_v63  ;;  %v5887_v27 = vand.u32 3, %v1519_v14  ;;  %v1559_v35 = vshll.u32 %v3976_v58, %v1544_v23  ;;  %v1560_v6 = vshrl.u32 %v3977_v2, %v1545_v18 }
 0x359   : > { %3791 = vsinq.f32 %v1514_v63  ;;  %vm2884_vm10 = vcmp.lt.s32.totalorder %v5715_v21, 0  ;;  %v2948_v41 = vsub.s32 0, %v5885_v12  ;;  %vm1565_vm11 = vcmp.lt.s32.totalorder %v1543_v28, 4 }
 0x35a   : > { %v5893_v0 = vshll.u32 %v1538_v32, 8  ;;  %v2990_v46 = vshrl.u32 %v2989_v59, 23  ;;  %v1546_v40 = vshrl.u32 %v3972_v48, %v1545_v18  ;;  %v1561_v45 = vor.u32 %v1560_v6, %v1559_v35 }
 0x35b   : > { %vm1562_vm12 = vcmp.lt.s32.totalorder %v1543_v28, 1  ;;  %v1567_v11 = vsel %vm1565_vm11, %v1555_v50, 2102212464  ;;  %v3458_v7 = vmin.u32 %v2948_v41, %v5885_v12  ;;  %vm1564_vm13 = vcmp.lt.s32.totalorder %v1543_v28, 3 }
 0x35c   : > { %v1570_v55 = vsel %vm1562_vm12, %v1549_v24, %v1552_v38  ;;  %v1571_v47 = vsel %vm1565_vm11, %v1558_v57, 920167782  ;;  %vm1522_vm14 = vcmp.eq.s32.totalorder %v5887_v27, 0  ;;  %v1574_v1 = vsel %vm1562_vm12, %v1552_v38, %v1555_v50 }
 0x35d   : > { %v1572_v16 = vsel %vm1564_vm13, %v1555_v50, %v1571_v47  ;;  %v1575_v22 = vsel %vm1565_vm11, %v1561_v45, 1326507024  ;;  %v2986_v17 = vand.u32 2147483647, %v5842_v51  ;;  %vm1521_vm15 = vcmp.lt.s32.totalorder %v5887_v27, 2 }
 0x35e   : > { %v2950_v15 = vclz %v3458_v7  ;;  %vm1563_vm0 = vcmp.lt.s32.totalorder %v1543_v28, 2  ;;  %v1566_v23 = vsel %vm1562_vm12, %v1546_v40, %v1549_v24  ;;  %v1568_v53 = vsel %vm1564_vm13, %v1552_v38, %v1567_v11 }
 0x35f   : > { %vm1518_vm1 = vweird.f32 %v5604_v44  ;;  %v2968_v19 = vsub.s32 4, %v5865_v25  ;;  %v1573_v60 = vsel %vm1563_vm0, %v1570_v55, %v1572_v16  ;;  %v1576_v32 = vsel %vm1564_vm13, %v1558_v57, %v1575_v22 }
 0x360   : > { %v3461_v14 = vadd.s32 4294967169, %v2990_v46  ;;  %vm5907_vm2 = vcmp.le.f32.partialorder %v2882_v3, 0.7853982  ;;  %v3459_v59 = vadd.s32 4294967294, %v2950_v15  ;;  %v1577_v49 = vsel %vm1563_vm0, %v1574_v1, %v1576_v32 }
 0x361   : > { %v5912_v20 = vmul.u32.u64.low %v5893_v0, %v1573_v60  ;;  %v5913_v37 = vmul.u32.u64.high %v5893_v0, %v1573_v60, %v5912_v20  ;;  %v1569_v31 = vsel %vm1563_vm0, %v1566_v23, %v1568_v53  ;;  %vm1525_vm3 = vcmp.eq.s32.totalorder %v5887_v27, 2 }
 0x362   : > { %v5917_v62 = vmul.u32.u64.low %v5893_v0, %v1577_v49  ;;  %v5918_v34 = vmul.u32.u64.high %v5893_v0, %v1577_v49, %v5917_v62  ;;  %v2996_v28 = vadd.s32 1, %v3461_v14  ;;  %v3790_v8 = vpop.eup %3789  ;;  %v2938_v3 = vadd.s32 %v5833_v9, %v5830_v26 }
 0x363   : > { %vm3460_vm4 = vcmp.lt.s32.totalorder %v3459_v59, 0  ;;  %v2993_v33 = vand.u32 8388607, %v2986_v17  ;;  %v3792_v39 = vpop.eup %3791  ;;  %v1526_v36 = vxor.u32 2147483648, %v3790_v8  ;;  %v2969_v63 = vsel %vm2884_vm10, %v2968_v19, %v5865_v25 }
 0x364   : > { %v2953_v61 = vsel %vm3460_vm4, 0, %v3459_v59  ;;  %vm2997_vm5 = vcmp.gt.s32.totalorder %v2996_v28, 0  ;;  %v1523_v24 = vxor.u32 2147483648, %v3792_v39  ;;  %v1585_v57 = vmul.u32 %v5893_v0, %v1569_v31 }
 0x365   : > { %v2954_v50 = vsub.s32 32, %v2953_v61  ;;  %v2958_v38 = vsub.s32 4294967266, %v2953_v61  ;;  %v1527_v35 = vsel %vm1525_vm3, %v1526_v36, %v3792_v39  ;;  %v2955_v26 = vshll.u32 %v5885_v12, %v2953_v61 }
 0x366   : > { %vm1587_vm6 = vc.u32 %v5918_v34, %v5912_v20  ;;  %v1588_v9 = vadd.s32 1, %v5913_v37  ;;  %v1524_v6 = vsel %vm1522_vm14, %v3790_v8, %v1523_v24  ;;  %v2998_v46 = vsel %vm2997_vm5, %v2996_v28, 0 }
 0x367   : > { %v2956_v41 = vshrl.u32 %v2938_v3, %v2954_v50  ;;  %v2959_v25 = vadd.s32 127, %v2958_v38  ;;  %v1528_v40 = vsel %vm1521_vm15, %v1524_v6, %v1527_v35  ;;  %v3000_v45 = vand.u32 31, %v2998_v46 }
 0x368   : > { %v1589_v0 = vsel %vm1587_vm6, %v1588_v9, %v5913_v37  ;;  %v5939_v11 = vmul.f32 30.0, %v5883_v13  ;;  %v1529_v12 = vsel %vm1518_vm1, nan, %v1528_v40  ;;  %v2971_v16 = vsel %vm5907_vm2, 0, %v2969_v63 }
 0x369   : > { %v2957_v7 = vor.u32 %v2956_v41, %v2955_v26  ;;  %v2960_v55 = vshll.u32 %v2959_v25, 23  ;;  %v1590_v47 = vadd.s32 %v1589_v0, %v1585_v57  ;;  %3203 = vst [vmem:[%s4521_s5 + $0x48] sm:$0xff] %v1529_v12  ;;  %v2994_v1 = vor.u32 8388608, %v2993_v33 }
 0x36a   : > { %v3001_v22 = vsub.s32 32, %v3000_v45  ;;  %v3003_v27 = vshll.u32 %v3972_v48, %v3000_v45  ;;  %v3006_v53 = vshll.u32 %v3973_v52, %v3000_v45  ;;  %v3009_v13 = vshll.u32 %v3974_v54, %v3000_v45 }
 0x36b   : > { %v2961_v15 = vor.u32 4788187, %v2960_v55  ;;  %v1591_v23 = vadd.s32 536870912, %v1590_v47  ;;  %v2964_v19 = vcvt.s32.f32 %v2957_v7  ;;  %v3012_v32 = vshll.u32 %v3975_v56, %v3000_v45 }
 0x36c   : > { %v3004_v44 = vshrl.u32 %v3973_v52, %v3001_v22  ;;  %v3007_v60 = vshrl.u32 %v3974_v54, %v3001_v22  ;;  %v3010_v49 = vshrl.u32 %v3975_v56, %v3001_v22  ;;  %v3013_v37 = vshrl.u32 %v3976_v58, %v3001_v22 }
 0x36d   : > { %v2962_v14 = vand.u32 2147483647, %v2961_v15  ;;  %v1592_v59 = vshrl.u32 %v1591_v23, 30  ;;  %v2999_v31 = vshrl.u32 %v2998_v46, 5  ;;  %v3015_v62 = vshll.u32 %v3976_v58, %v3000_v45 }
 0x36e   : > { %v3016_v28 = vshrl.u32 %v3977_v2, %v3001_v22  ;;  %v3005_v33 = vor.u32 %v3004_v44, %v3003_v27  ;;  %v3008_v39 = vor.u32 %v3007_v60, %v3006_v53  ;;  %v2975_v36 = vadd.s32 3, %v2971_v16 }
 0x36f   : > { %v2965_v8 = vmul.f32 %v2964_v19, %v2962_v14  ;;  %v1593_v3 = vshll.u32 %v1592_v59, 30  ;;  %vm1532_vm7 = vcmp.lt.s32.totalorder %v5780_v30, 0  ;;  %v3014_v61 = vor.u32 %v3013_v37, %v3012_v32 }
 0x370   : > { %v1637_v63 = vand.u32 2139095040, %v5939_v11  ;;  %v3011_v38 = vor.u32 %v3010_v49, %v3009_v13  ;;  %v3034_v57 = vshll.u32 %v2994_v1, 8  ;;  %v1616_v35 = vsub.s32 4, %v1592_v59 }
 0x371   : > { %v2966_v24 = vxor.u32 2147483648, %v2965_v8  ;;  %v5958_v50 = vsub.s32 %v1590_v47, %v1593_v3  ;;  %v3002_v26 = vshrl.u32 %v3972_v48, %v3001_v22  ;;  %v3017_v9 = vor.u32 %v3016_v28, %v3015_v62 }
 0x372   : > { %vm3018_vm8 = vcmp.lt.s32.totalorder %v2999_v31, 1  ;;  %vm3021_vm9 = vcmp.lt.s32.totalorder %v2999_v31, 4  ;;  %vm3019_vm11 = vcmp.lt.s32.totalorder %v2999_v31, 2  ;;  %vm3020_vm12 = vcmp.lt.s32.totalorder %v2999_v31, 3 }
 0x373   : > { %v2967_v6 = vsel %vm2884_vm10, %v2966_v24, %v2965_v8  ;;  %v1596_v41 = vsub.s32 0, %v5958_v50  ;;  %v3026_v25 = vsel %vm3018_vm8, %v3005_v33, %v3008_v39  ;;  %v3027_v40 = vsel %vm3021_vm9, %v3014_v61, 920167782 }
 0x374   : > { %v2970_v46 = vsel %vm5907_vm2, %v5715_v21, %v2967_v6  ;;  %v3023_v45 = vsel %vm3021_vm9, %v3011_v38, 2102212464  ;;  %v3028_v12 = vsel %vm3020_vm12, %v3011_v38, %v3027_v40  ;;  %v3030_v55 = vsel %vm3018_vm8, %v3008_v39, %v3011_v38 }
 0x375   : > { %3793 = vcosq.f32 %v2970_v46  ;;  %v3406_v0 = vmin.u32 %v1596_v41, %v5958_v50  ;;  %v3029_v7 = vsel %vm3019_vm11, %v3026_v25, %v3028_v12  ;;  %v3031_v47 = vsel %vm3021_vm9, %v3017_v9, 1326507024 }
 0x376   : > { %3795 = vsinq.f32 %v2970_v46  ;;  %v2976_v16 = vand.u32 3, %v2975_v36  ;;  %v1617_v18 = vsel %vm1532_vm7, %v1616_v35, %v1592_v59  ;;  %v3022_v22 = vsel %vm3018_vm8, %v3002_v26, %v3005_v33 }
 0x377   : > { %v1598_v1 = vclz %v3406_v0  ;;  %v3024_v27 = vsel %vm3020_vm12, %v3008_v39, %v3023_v45  ;;  %v3032_v15 = vsel %vm3020_vm12, %v3014_v61, %v3031_v47  ;;  %v1638_v44 = vshrl.u32 %v1637_v63, 23 }
 0x378   : > { %v5974_v23 = vmul.u32.u64.low %v3034_v57, %v3029_v7  ;;  %v5975_v53 = vmul.u32.u64.high %v3034_v57, %v3029_v7, %v5974_v23  ;;  %v3033_v19 = vsel %vm3019_vm11, %v3030_v55, %v3032_v15  ;;  %vm5981_vm10 = vcmp.le.f32.partialorder %v1530_v42, 0.7853982 }
 0x379   : > { %v3407_v13 = vadd.s32 4294967294, %v1598_v1  ;;  %v5985_v32 = vmul.u32.u64.low %v3034_v57, %v3033_v19  ;;  %v5986_v14 = vmul.u32.u64.high %v3034_v57, %v3033_v19, %v5985_v32  ;;  %v462_v59 = vadd.f32 %v5582_v43, %v4194_v5 }
 0x37a   : > { %v1619_v49 = vsel %vm5981_vm10, 0, %v1617_v18  ;;  %v3025_v37 = vsel %vm3019_vm11, %v3022_v22, %v3024_v27  ;;  %v3409_v62 = vadd.s32 4294967169, %v1638_v44  ;;  %vm2974_vm14 = vweird.f32 %v5715_v21 }
 0x37b   : > { %vm3408_vm13 = vcmp.lt.s32.totalorder %v3407_v13, 0  ;;  %vm2978_vm15 = vcmp.eq.s32.totalorder %v2976_v16, 0  ;;  %v3044_v28 = vadd.s32 1, %v5975_v53  ;;  %v1634_v8 = vand.u32 2147483647, %v5939_v11 }
 0x37c   : > { %v1601_v42 = vsel %vm3408_vm13, 0, %v3407_v13  ;;  %v1586_v3 = vadd.s32 %v5912_v20, %v5918_v34  ;;  %v1644_v39 = vadd.s32 1, %v3409_v62  ;;  %v1623_v61 = vadd.s32 3, %v1619_v49 }
 0x37d   : > { %v1602_v33 = vsub.s32 32, %v1601_v42  ;;  %v1606_v43 = vsub.s32 4294967266, %v1601_v42  ;;  %v1603_v36 = vshll.u32 %v5958_v50, %v1601_v42  ;;  %v3041_v31 = vmul.u32 %v3034_v57, %v3025_v37 }
 0x37e   : > { %vm3043_vm0 = vc.u32 %v5986_v14, %v5974_v23  ;;  %vm1645_vm1 = vcmp.gt.s32.totalorder %v1644_v39, 0  ;;  %v1641_v20 = vand.u32 8388607, %v1634_v8  ;;  %vm2981_vm2 = vcmp.eq.s32.totalorder %v2976_v16, 2 }
 0x37f   : > { %v3794_v63 = vpop.eup %3793  ;;  %v1604_v24 = vshrl.u32 %v1586_v3, %v1602_v33  ;;  %v1607_v38 = vadd.s32 127, %v1606_v43  ;;  %v3045_v35 = vsel %vm3043_vm0, %v3044_v28, %v5975_v53  ;;  %v1646_v34 = vsel %vm1645_vm1, %v1644_v39, 0 }
 0x380   : > { %v3796_v26 = vpop.eup %3795  ;;  %v2982_v9 = vxor.u32 2147483648, %v3794_v63  ;;  %v3046_v6 = vadd.s32 %v3045_v35, %v3041_v31  ;;  %v1648_v40 = vand.u32 31, %v1646_v34  ;;  %v6004_v0 = vmul.f32 30.0, %v462_v59 }
 0x381   : > { %v2979_v41 = vxor.u32 2147483648, %v3796_v26  ;;  %v1605_v50 = vor.u32 %v1604_v24, %v1603_v36  ;;  %v1608_v57 = vshll.u32 %v1607_v38, 23  ;;  %vm2977_vm3 = vcmp.lt.s32.totalorder %v2976_v16, 2 }
 0x382   : > { %v2983_v25 = vsel %vm2981_vm2, %v2982_v9, %v3796_v26  ;;  %v3047_v46 = vadd.s32 536870912, %v3046_v6  ;;  %v6007_v7 = vand.u32 3, %v1623_v61  ;;  %v1642_v1 = vor.u32 8388608, %v1641_v20 }
 0x383   : > { %v2980_v45 = vsel %vm2978_vm15, %v3794_v63, %v2979_v41  ;;  %v1609_v12 = vor.u32 4788187, %v1608_v57  ;;  %v1649_v18 = vsub.s32 32, %v1648_v40  ;;  %v1612_v15 = vcvt.s32.f32 %v1605_v50 }
 0x384   : > { %v2984_v55 = vsel %vm2977_vm3, %v2980_v45, %v2983_v25  ;;  %v3048_v47 = vshrl.u32 %v3047_v46, 30  ;;  %vm2988_vm4 = vcmp.lt.s32.totalorder %v5842_v51, 0  ;;  %v3090_v53 = vand.u32 2147483647, %v6004_v0 }
 0x385   : > { %v2985_v22 = vsel %vm2974_vm14, nan, %v2984_v55  ;;  %v1610_v27 = vand.u32 2147483647, %v1609_v12  ;;  %v1647_v16 = vshrl.u32 %v1646_v34, 5  ;;  %v1652_v19 = vshrl.u32 %v3973_v52, %v1649_v18 }
 0x386   : > { %3217 = vst [vmem:[%s4521_s5 + $0xb8] sm:$0xff] %v2985_v22  ;;  %v3049_v13 = vshll.u32 %v3048_v47, 30  ;;  %v3093_v44 = vand.u32 2139095040, %v6004_v0  ;;  %v1651_v59 = vshll.u32 %v3972_v48, %v1648_v40  ;;  %v1655_v49 = vshrl.u32 %v3974_v54, %v1649_v18 }
 0x387   : > { %v1613_v32 = vmul.f32 %v1612_v15, %v1610_v27  ;;  %v1658_v21 = vshrl.u32 %v3975_v56, %v1649_v18  ;;  %v1654_v62 = vshll.u32 %v3973_v52, %v1648_v40  ;;  %v1657_v42 = vshll.u32 %v3974_v54, %v1648_v40 }
 0x388   : > { %v6019_v37 = vsub.s32 %v3046_v6, %v3049_v13  ;;  %v1661_v28 = vshrl.u32 %v3976_v58, %v1649_v18  ;;  %v3072_v33 = vsub.s32 4, %v3048_v47  ;;  %v1660_v43 = vshll.u32 %v3975_v56, %v1648_v40 }
 0x389   : > { %v1614_v3 = vxor.u32 2147483648, %v1613_v32  ;;  %v6025_v39 = vshll.u32 %v1642_v1, 8  ;;  %v1653_v61 = vor.u32 %v1652_v19, %v1651_v59  ;;  %v1656_v31 = vor.u32 %v1655_v49, %v1654_v62 }
 0x38a   : > { %v3052_v36 = vsub.s32 0, %v6019_v37  ;;  %v1659_v63 = vor.u32 %v1658_v21, %v1657_v42  ;;  %vm6032_vm5 = vcmp.le.f32.partialorder %v2986_v17, 0.7853982  ;;  %v1662_v35 = vor.u32 %v1661_v28, %v1660_v43 }
 0x38b   : > { %v1615_v24 = vsel %vm1532_vm7, %v1614_v3, %v1613_v32  ;;  %v1663_v26 = vshll.u32 %v3976_v58, %v1648_v40  ;;  %v1664_v9 = vshrl.u32 %v3977_v2, %v1649_v18  ;;  %vm1666_vm6 = vcmp.lt.s32.totalorder %v1647_v16, 1 }
 0x38c   : > { %v1618_v6 = vsel %vm5981_vm10, %v5780_v30, %v1615_v24  ;;  %v3462_v20 = vmin.u32 %v3052_v36, %v6019_v37  ;;  %v3094_v34 = vshrl.u32 %v3093_v44, 23  ;;  %v1650_v41 = vshrl.u32 %v3972_v48, %v1649_v18 }
 0x38d   : > { %3797 = vcosq.f32 %v1618_v6  ;;  %v1665_v17 = vor.u32 %v1664_v9, %v1663_v26  ;;  %vm1669_vm7 = vcmp.lt.s32.totalorder %v1647_v16, 4  ;;  %v3073_v57 = vsel %vm2988_vm4, %v3072_v33, %v3048_v47 }
 0x38e   : > { %3799 = vsinq.f32 %v1618_v6  ;;  %v3054_v50 = vclz %v3462_v20  ;;  %v1671_v25 = vsel %vm1669_vm7, %v1659_v63, 2102212464  ;;  %vm1667_vm8 = vcmp.lt.s32.totalorder %v1647_v16, 2 }
 0x38f   : > { %vm1668_vm9 = vcmp.lt.s32.totalorder %v1647_v16, 3  ;;  %v1674_v60 = vsel %vm1666_vm6, %v1653_v61, %v1656_v31  ;;  %v1675_v46 = vsel %vm1669_vm7, %v1662_v35, 920167782  ;;  %v1670_v45 = vsel %vm1666_vm6, %v1650_v41, %v1653_v61 }
 0x390   : > { %v3463_v40 = vadd.s32 4294967294, %v3054_v50  ;;  %v1676_v12 = vsel %vm1668_vm9, %v1659_v63, %v1675_v46  ;;  %v1678_v55 = vsel %vm1666_vm6, %v1656_v31, %v1659_v63  ;;  %v1672_v1 = vsel %vm1668_vm9, %v1656_v31, %v1671_v25 }
 0x391   : > { %v1677_v18 = vsel %vm1667_vm8, %v1674_v60, %v1676_v12  ;;  %v1679_v22 = vsel %vm1669_vm7, %v1665_v17, 1326507024  ;;  %v3465_v27 = vadd.s32 4294967169, %v3094_v34  ;;  %v3042_v19 = vadd.s32 %v5974_v23, %v5986_v14 }
 0x392   : > { %vm3464_vm11 = vcmp.lt.s32.totalorder %v3463_v40, 0  ;;  %v1680_v15 = vsel %vm1668_vm9, %v1662_v35, %v1679_v22  ;;  %v6050_v47 = vmul.u32.u64.low %v6025_v39, %v1677_v18  ;;  %v6051_v13 = vmul.u32.u64.high %v6025_v39, %v1677_v18, %v6050_v47 }
 0x393   : > { %v3057_v44 = vsel %vm3464_vm11, 0, %v3463_v40  ;;  %v1681_v32 = vsel %vm1667_vm8, %v1678_v55, %v1680_v15  ;;  %v3100_v59 = vadd.s32 1, %v3465_v27  ;;  %vm1622_vm12 = vweird.f32 %v5780_v30 }
 0x394   : > { %v3058_v49 = vsub.s32 32, %v3057_v44  ;;  %v3062_v21 = vsub.s32 4294967266, %v3057_v44  ;;  %v3075_v62 = vsel %vm6032_vm5, 0, %v3073_v57  ;;  %v1673_v42 = vsel %vm1667_vm8, %v1670_v45, %v1672_v1 }
 0x395   : > { %v3059_v28 = vshll.u32 %v6019_v37, %v3057_v44  ;;  %v6063_v3 = vmul.u32.u64.low %v6025_v39, %v1681_v32  ;;  %v6064_v33 = vmul.u32.u64.high %v6025_v39, %v1681_v32, %v6063_v3  ;;  %vm3101_vm10 = vcmp.gt.s32.totalorder %v3100_v59, 0 }
 0x396   : > { %v3060_v23 = vshrl.u32 %v3042_v19, %v3058_v49  ;;  %v3063_v14 = vadd.s32 127, %v3062_v21  ;;  %v1692_v43 = vadd.s32 1, %v6051_v13  ;;  %v3102_v36 = vsel %vm3101_vm10, %v3100_v59, 0 }
 0x397   : > { %v3798_v61 = vpop.eup %3797  ;;  %vm1625_vm13 = vcmp.lt.s32.totalorder %v6007_v7, 2  ;;  %vm1626_vm14 = vcmp.eq.s32.totalorder %v6007_v7, 0  ;;  %vm1629_vm15 = vcmp.eq.s32.totalorder %v6007_v7, 2  ;;  %v3104_v16 = vand.u32 31, %v3102_v36 }
 0x398   : > { %v3800_v31 = vpop.eup %3799  ;;  %v1630_v37 = vxor.u32 2147483648, %v3798_v61  ;;  %v3061_v63 = vor.u32 %v3060_v23, %v3059_v28  ;;  %v3064_v24 = vshll.u32 %v3063_v14, 23  ;;  %v3079_v35 = vadd.s32 3, %v3075_v62 }
 0x399   : > { %v1627_v26 = vxor.u32 2147483648, %v3800_v31  ;;  %v1689_v9 = vmul.u32 %v6025_v39, %v1673_v42  ;;  %vm1691_vm0 = vc.u32 %v6064_v33, %v6050_v47  ;;  %v3105_v6 = vsub.s32 32, %v3104_v16 }
 0x39a   : > { %v1631_v20 = vsel %vm1629_vm15, %v1630_v37, %v3800_v31  ;;  %v3065_v34 = vor.u32 4788187, %v3064_v24  ;;  %v1693_v41 = vsel %vm1691_vm0, %v1692_v43, %v6051_v13  ;;  %v3097_v17 = vand.u32 8388607, %v3090_v53 }
 0x39b   : > { %v1628_v50 = vsel %vm1626_vm14, %v3798_v61, %v1627_v26  ;;  %v3068_v57 = vcvt.s32.f32 %v3061_v63  ;;  %v1694_v25 = vadd.s32 %v1693_v41, %v1689_v9  ;;  %v3107_v60 = vshll.u32 %v3972_v48, %v3104_v16 }
 0x39c   : > { %v1632_v39 = vsel %vm1625_vm13, %v1628_v50, %v1631_v20  ;;  %v3066_v46 = vand.u32 2147483647, %v3065_v34  ;;  %v3108_v40 = vshrl.u32 %v3973_v52, %v3105_v6  ;;  %v3110_v45 = vshll.u32 %v3973_v52, %v3104_v16 }
 0x39d   : > { %v1633_v12 = vsel %vm1622_vm12, nan, %v1632_v39  ;;  %v1695_v55 = vadd.s32 536870912, %v1694_v25  ;;  %v3111_v1 = vshrl.u32 %v3974_v54, %v3105_v6  ;;  %v3113_v18 = vshll.u32 %v3974_v54, %v3104_v16 }
 0x39e   : > { %3204 = vst [vmem:[%s4521_s5 + $0x50] sm:$0xff] %v1633_v12  ;;  %v3069_v22 = vmul.f32 %v3068_v57, %v3066_v46  ;;  %v3098_v27 = vor.u32 8388608, %v3097_v17  ;;  %v3114_v15 = vshrl.u32 %v3975_v56, %v3105_v6  ;;  %v3116_v7 = vshll.u32 %v3975_v56, %v3104_v16 }
 0x39f   : > { %v1696_v13 = vshrl.u32 %v1695_v55, 30  ;;  %v3117_v19 = vshrl.u32 %v3976_v58, %v3105_v6  ;;  %v3119_v44 = vshll.u32 %v3976_v58, %v3104_v16  ;;  %v424_v30 = vadd.f32 %v5666_v29, %v4192_v4 }
 0x3a0   : > { %v3070_v32 = vxor.u32 2147483648, %v3069_v22  ;;  %v6094_v59 = vand.u32 3, %v3079_v35  ;;  %vm1636_vm1 = vcmp.lt.s32.totalorder %v5939_v11, 0  ;;  %v3103_v49 = vshrl.u32 %v3102_v36, 5 }
 0x3a1   : > { %v3120_v21 = vshrl.u32 %v3977_v2, %v3105_v6  ;;  %v1697_v62 = vshll.u32 %v1696_v13, 30  ;;  %v3109_v42 = vor.u32 %v3108_v40, %v3107_v60  ;;  %v3112_v28 = vor.u32 %v3111_v1, %v3110_v45 }
 0x3a2   : > { %v3115_v3 = vor.u32 %v3114_v15, %v3113_v18  ;;  %v3071_v23 = vsel %vm2988_vm4, %v3070_v32, %v3069_v22  ;;  %v3118_v14 = vor.u32 %v3117_v19, %v3116_v7  ;;  %v3138_v61 = vshll.u32 %v3098_v27, 8 }
 0x3a3   : > { %v3121_v43 = vor.u32 %v3120_v21, %v3119_v44  ;;  %v3074_v4 = vsel %vm6032_vm5, %v5842_v51, %v3071_v23  ;;  %v6103_v29 = vsub.s32 %v1694_v25, %v1697_v62  ;;  %v3106_v36 = vshrl.u32 %v3972_v48, %v3105_v6 }
 0x3a4   : > { %v6106_v16 = vmul.f32 30.0, %v424_v30  ;;  %3801 = vcosq.f32 %v3074_v4  ;;  %v1720_v31 = vsub.s32 4, %v1696_v13  ;;  %vm3122_vm2 = vcmp.lt.s32.totalorder %v3103_v49, 1 }
 0x3a5   : > { %vm3125_vm3 = vcmp.lt.s32.totalorder %v3103_v49, 4  ;;  %3803 = vsinq.f32 %v3074_v4  ;;  %v1700_v37 = vsub.s32 0, %v6103_v29  ;;  %v3130_v24 = vsel %vm3122_vm2, %v3109_v42, %v3112_v28 }
 0x3a6   : > { %v3127_v63 = vsel %vm3125_vm3, %v3115_v3, 2102212464  ;;  %vm3124_vm4 = vcmp.lt.s32.totalorder %v3103_v49, 3  ;;  %v3131_v35 = vsel %vm3125_vm3, %v3118_v14, 920167782  ;;  %v3134_v26 = vsel %vm3122_vm2, %v3112_v28, %v3115_v3 }
 0x3a7   : > { %v3135_v38 = vsel %vm3125_vm3, %v3121_v43, 1326507024  ;;  %v3410_v9 = vmin.u32 %v1700_v37, %v6103_v29  ;;  %vm3123_vm5 = vcmp.lt.s32.totalorder %v3103_v49, 2  ;;  %v3132_v20 = vsel %vm3124_vm4, %v3115_v3, %v3131_v35 }
 0x3a8   : > { %v3136_v6 = vsel %vm3124_vm4, %v3118_v14, %v3135_v38  ;;  %v3126_v34 = vsel %vm3122_vm2, %v3106_v36, %v3109_v42  ;;  %v3128_v41 = vsel %vm3124_vm4, %v3112_v28, %v3127_v63  ;;  %v3133_v17 = vsel %vm3123_vm5, %v3130_v24, %v3132_v20 }
 0x3a9   : > { %v3137_v50 = vsel %vm3123_vm5, %v3134_v26, %v3136_v6  ;;  %v1702_v57 = vclz %v3410_v9  ;;  %v1721_v25 = vsel %vm1636_vm1, %v1720_v31, %v1696_v13  ;;  %v3129_v12 = vsel %vm3123_vm5, %v3126_v34, %v3128_v41 }
 0x3aa   : > { %v6112_v60 = vmul.u32.u64.low %v3138_v61, %v3137_v50  ;;  %v6113_v39 = vmul.u32.u64.high %v3138_v61, %v3137_v50, %v6112_v60  ;;  %v6115_v46 = vmul.u32.u64.low %v3138_v61, %v3133_v17  ;;  %v6116_v40 = vmul.u32.u64.high %v3138_v61, %v3133_v17, %v6115_v46 }
 0x3ab   : > { %v3411_v45 = vadd.s32 4294967294, %v1702_v57  ;;  %v1741_v55 = vand.u32 2139095040, %v6106_v16  ;;  %vm3082_vm6 = vcmp.eq.s32.totalorder %v6094_v59, 0  ;;  %vm3085_vm7 = vcmp.eq.s32.totalorder %v6094_v59, 2 }
 0x3ac   : > { %vm6124_vm8 = vcmp.le.f32.partialorder %v1634_v8, 0.7853982  ;;  %v1690_v18 = vadd.s32 %v6050_v47, %v6064_v33  ;;  %v3145_v13 = vmul.u32 %v3138_v61, %v3129_v12  ;;  %vm3147_vm11 = vc.u32 %v6113_v39, %v6115_v46 }
 0x3ad   : > { %vm3412_vm9 = vcmp.lt.s32.totalorder %v3411_v45, 0  ;;  %v1723_v22 = vsel %vm6124_vm8, 0, %v1721_v25  ;;  %v1742_v27 = vshrl.u32 %v1741_v55, 23  ;;  %v3148_v19 = vadd.s32 1, %v6116_v40 }
 0x3ae   : > { %v3802_v15 = vpop.eup %3801  ;;  %v1705_v7 = vsel %vm3412_vm9, 0, %v3411_v45  ;;  %v1738_v49 = vand.u32 2147483647, %v6106_v16  ;;  %vm3078_vm12 = vweird.f32 %v5842_v51  ;;  %vm3081_vm10 = vcmp.lt.s32.totalorder %v6094_v59, 2 }
 0x3af   : > { %v3804_v8 = vpop.eup %3803  ;;  %v3086_v44 = vxor.u32 2147483648, %v3802_v15  ;;  %v1706_v30 = vsub.s32 32, %v1705_v7  ;;  %v1710_v32 = vsub.s32 4294967266, %v1705_v7  ;;  %v1707_v33 = vshll.u32 %v6103_v29, %v1705_v7 }
 0x3b0   : > { %v3083_v47 = vxor.u32 2147483648, %v3804_v8  ;;  %v3149_v21 = vsel %vm3147_vm11, %v3148_v19, %v6116_v40  ;;  %v3413_v62 = vadd.s32 4294967169, %v1742_v27  ;;  %v1727_v37 = vadd.s32 3, %v1723_v22 }
 0x3b1   : > { %v3087_v42 = vsel %vm3085_vm7, %v3086_v44, %v3804_v8  ;;  %v1708_v28 = vshrl.u32 %v1690_v18, %v1706_v30  ;;  %v1711_v3 = vadd.s32 127, %v1710_v32  ;;  %v3150_v23 = vadd.s32 %v3149_v21, %v3145_v13 }
 0x3b2   : > { %v3084_v14 = vsel %vm3082_vm6, %v3802_v15, %v3083_v47  ;;  %v1748_v43 = vadd.s32 1, %v3413_v62  ;;  %v426_v63 = vadd.f32 %v5757_v10, %v4194_v5  ;;  %v1745_v51 = vand.u32 8388607, %v1738_v49 }
 0x3b3   : > { %v3088_v61 = vsel %vm3081_vm10, %v3084_v14, %v3087_v42  ;;  %v1709_v4 = vor.u32 %v1708_v28, %v1707_v33  ;;  %v1712_v29 = vshll.u32 %v1711_v3, 23  ;;  %v3151_v36 = vadd.s32 536870912, %v3150_v23 }
 0x3b4   : > { %v3089_v31 = vsel %vm3078_vm12, nan, %v3088_v61  ;;  %vm1749_vm13 = vcmp.gt.s32.totalorder %v1748_v43, 0  ;;  %v6152_v6 = vand.u32 3, %v1727_v37  ;;  %v1746_v5 = vor.u32 8388608, %v1745_v51 }
 0x3b5   : > { %3218 = vst [vmem:[%s4521_s5 + $0xc0] sm:$0xff] %v3089_v31  ;;  %v1713_v24 = vor.u32 4788187, %v1712_v29  ;;  %v6147_v35 = vshrl.u32 %v3151_v36, 30  ;;  %v1750_v59 = vsel %vm1749_vm13, %v1748_v43, 0  ;;  %v1716_v9 = vcvt.s32.f32 %v1709_v4 }
 0x3b6   : > { %v1752_v26 = vand.u32 31, %v1750_v59  ;;  %v6156_v10 = vmul.f32 30.0, %v426_v63  ;;  %v1751_v50 = vshrl.u32 %v1750_v59, 5  ;;  %v3146_v33 = vadd.s32 %v6115_v46, %v6113_v39 }
 0x3b7   : > { %v1714_v38 = vand.u32 2147483647, %v1713_v24  ;;  %v3153_v20 = vshll.u32 %v6147_v35, 30  ;;  %v1786_v62 = vshll.u32 %v1746_v5, 8  ;;  %vm1726_vm4 = vweird.f32 %v5939_v11 }
 0x3b8   : > { %v1753_v34 = vsub.s32 32, %v1752_v26  ;;  %v1755_v57 = vshll.u32 %v3972_v48, %v1752_v26  ;;  %v1758_v12 = vshll.u32 %v3973_v52, %v1752_v26  ;;  %v1761_v22 = vshll.u32 %v3974_v54, %v1752_v26 }
 0x3b9   : > { %v1717_v41 = vmul.f32 %v1716_v9, %v1714_v38  ;;  %v6154_v17 = vsub.s32 %v3150_v23, %v3153_v20  ;;  %v1764_v27 = vshll.u32 %v3975_v56, %v1752_v26  ;;  %v1767_v8 = vshll.u32 %v3976_v58, %v1752_v26 }
 0x3ba   : > { %v1756_v25 = vshrl.u32 %v3973_v52, %v1753_v34  ;;  %v1759_v60 = vshrl.u32 %v3974_v54, %v1753_v34  ;;  %v1762_v55 = vshrl.u32 %v3975_v56, %v1753_v34  ;;  %v1765_v15 = vshrl.u32 %v3976_v58, %v1753_v34 }
 0x3bb   : > { %v1718_v40 = vxor.u32 2147483648, %v1717_v41  ;;  %v3156_v45 = vsub.s32 0, %v6154_v17  ;;  %v1768_v47 = vshrl.u32 %v3977_v2, %v1753_v34  ;;  %v1754_v42 = vshrl.u32 %v3972_v48, %v1753_v34 }
 0x3bc   : > { %v1757_v18 = vor.u32 %v1756_v25, %v1755_v57  ;;  %v1760_v19 = vor.u32 %v1759_v60, %v1758_v12  ;;  %v1763_v30 = vor.u32 %v1762_v55, %v1761_v22  ;;  %v1766_v32 = vor.u32 %v1765_v15, %v1764_v27 }
 0x3bd   : > { %v1719_v7 = vsel %vm1636_vm1, %v1718_v40, %v1717_v41  ;;  %v3466_v13 = vmin.u32 %v3156_v45, %v6154_v17  ;;  %v1769_v28 = vor.u32 %v1768_v47, %v1767_v8  ;;  %v1845_v3 = vand.u32 2139095040, %v6156_v10 }
 0x3be   : > { %v1722_v44 = vsel %vm6124_vm8, %v5939_v11, %v1719_v7  ;;  %vm1770_vm14 = vcmp.lt.s32.totalorder %v1751_v50, 1  ;;  %vm1772_vm15 = vcmp.lt.s32.totalorder %v1751_v50, 3  ;;  %vm1773_vm0 = vcmp.lt.s32.totalorder %v1751_v50, 4 }
 0x3bf   : > { %3805 = vcosq.f32 %v1722_v44  ;;  %v3158_v21 = vclz %v3466_v13  ;;  %v1775_v1 = vsel %vm1773_vm0, %v1763_v30, 2102212464  ;;  %v1778_v14 = vsel %vm1770_vm14, %v1757_v18, %v1760_v19 }
 0x3c0   : > { %3807 = vsinq.f32 %v1722_v44  ;;  %v1779_v43 = vsel %vm1773_vm0, %v1766_v32, 920167782  ;;  %v1782_v61 = vsel %vm1770_vm14, %v1760_v19, %v1763_v30  ;;  %vm3092_vm1 = vcmp.lt.s32.totalorder %v6004_v0, 0 }
 0x3c1   : > { %v3467_v23 = vadd.s32 4294967294, %v3158_v21  ;;  %vm1771_vm3 = vcmp.lt.s32.totalorder %v1751_v50, 2  ;;  %v1780_v39 = vsel %vm1772_vm15, %v1763_v30, %v1779_v43  ;;  %v1783_v46 = vsel %vm1773_vm0, %v1769_v28, 1326507024 }
 0x3c2   : > { %v1774_v29 = vsel %vm1770_vm14, %v1754_v42, %v1757_v18  ;;  %v1781_v36 = vsel %vm1771_vm3, %v1778_v14, %v1780_v39  ;;  %v1784_v31 = vsel %vm1772_vm15, %v1766_v32, %v1783_v46  ;;  %v1776_v24 = vsel %vm1772_vm15, %v1760_v19, %v1775_v1 }
 0x3c3   : > { %vm3468_vm2 = vcmp.lt.s32.totalorder %v3467_v23, 0  ;;  %v1785_v51 = vsel %vm1771_vm3, %v1782_v61, %v1784_v31  ;;  %v6189_v38 = vmul.u32.u64.low %v1786_v62, %v1781_v36  ;;  %v6190_v9 = vmul.u32.u64.high %v1786_v62, %v1781_v36, %v6189_v38 }
 0x3c4   : > { %v3161_v4 = vsel %vm3468_vm2, 0, %v3467_v23  ;;  %v6186_v59 = vmul.u32.u64.low %v1786_v62, %v1785_v51  ;;  %v6187_v26 = vmul.u32.u64.high %v1786_v62, %v1785_v51, %v6186_v59  ;;  %v1846_v5 = vshrl.u32 %v1845_v3, 23 }
 0x3c5   : > { %v3162_v37 = vsub.s32 32, %v3161_v4  ;;  %v3166_v63 = vsub.s32 4294967266, %v3161_v4  ;;  %v3163_v20 = vshll.u32 %v6154_v17, %v3161_v4  ;;  %vm1729_vm5 = vcmp.lt.s32.totalorder %v6152_v6, 2 }
 0x3c6   : > { %vm1730_vm6 = vcmp.eq.s32.totalorder %v6152_v6, 0  ;;  %v3176_v57 = vsub.s32 4, %v6147_v35  ;;  %v1777_v25 = vsel %vm1771_vm3, %v1774_v29, %v1776_v24  ;;  %vm1733_vm7 = vcmp.eq.s32.totalorder %v6152_v6, 2 }
 0x3c7   : > { %v3164_v34 = vshrl.u32 %v3146_v33, %v3162_v37  ;;  %v3167_v41 = vadd.s32 127, %v3166_v63  ;;  %v3417_v12 = vadd.s32 4294967169, %v1846_v5  ;;  %vm1795_vm8 = vc.u32 %v6187_v26, %v6189_v38 }
 0x3c8   : > { %v1796_v17 = vadd.s32 1, %v6190_v9  ;;  %v1842_v22 = vand.u32 2147483647, %v6156_v10  ;;  %v1793_v7 = vmul.u32 %v1786_v62, %v1777_v25  ;;  %v3177_v8 = vsel %vm3092_vm1, %v3176_v57, %v6147_v35 }
 0x3c9   : > { %v3806_v60 = vpop.eup %3805  ;;  %v3165_v40 = vor.u32 %v3164_v34, %v3163_v20  ;;  %v3168_v45 = vshll.u32 %v3167_v41, 23  ;;  %v1852_v50 = vadd.s32 1, %v3417_v12  ;;  %vm6213_vm11 = vcmp.le.f32.partialorder %v3090_v53, 0.7853982 }
 0x3ca   : > { %v3808_v55 = vpop.eup %3807  ;;  %v1734_v18 = vxor.u32 2147483648, %v3806_v60  ;;  %v1797_v44 = vsel %vm1795_vm8, %v1796_v17, %v6190_v9  ;;  %v1849_v35 = vand.u32 8388607, %v1842_v22  ;;  %v3179_v3 = vsel %vm6213_vm11, 0, %v3177_v8 }
 0x3cb   : > { %v1731_v27 = vxor.u32 2147483648, %v3808_v55  ;;  %v3169_v15 = vor.u32 4788187, %v3168_v45  ;;  %v3172_v19 = vcvt.s32.f32 %v3165_v40  ;;  %v1798_v47 = vadd.s32 %v1797_v44, %v1793_v7 }
 0x3cc   : > { %v1735_v13 = vsel %vm1733_vm7, %v1734_v18, %v3808_v55  ;;  %vm1853_vm9 = vcmp.gt.s32.totalorder %v1852_v50, 0  ;;  %v3183_v53 = vadd.s32 3, %v3179_v3  ;;  %v1850_v46 = vor.u32 8388608, %v1849_v35 }
 0x3cd   : > { %v1732_v30 = vsel %vm1730_vm6, %v3806_v60, %v1731_v27  ;;  %v3170_v32 = vand.u32 2147483647, %v3169_v15  ;;  %v1854_v62 = vsel %vm1853_vm9, %v1852_v50, 0  ;;  %v1799_v23 = vadd.s32 536870912, %v1798_v47 }
 0x3ce   : > { %v1736_v33 = vsel %vm1729_vm5, %v1732_v30, %v1735_v13  ;;  %v1856_v6 = vand.u32 31, %v1854_v62  ;;  %v1855_v51 = vshrl.u32 %v1854_v62, 5  ;;  %v3184_v25 = vand.u32 3, %v3183_v53 }
 0x3cf   : > { %v1737_v42 = vsel %vm1726_vm4, nan, %v1736_v33  ;;  %v3173_v28 = vmul.f32 %v3172_v19, %v3170_v32  ;;  %v6224_v14 = vshrl.u32 %v1799_v23, 30  ;;  %v1890_v45 = vshll.u32 %v1850_v46, 8 }
 0x3d0   : > { %3205 = vst [vmem:[%s4521_s5 + $0x58] sm:$0xff] %v1737_v42  ;;  %v1857_v43 = vsub.s32 32, %v1856_v6  ;;  %v1859_v11 = vshll.u32 %v3972_v48, %v1856_v6  ;;  %v1862_v36 = vshll.u32 %v3973_v52, %v1856_v6  ;;  %v1865_v63 = vshll.u32 %v3974_v54, %v1856_v6 }
 0x3d1   : > { %v3174_v1 = vxor.u32 2147483648, %v3173_v28  ;;  %v1801_v39 = vshll.u32 %v6224_v14, 30  ;;  %v1868_v9 = vshll.u32 %v3975_v56, %v1856_v6  ;;  %v1871_v5 = vshll.u32 %v3976_v58, %v1856_v6 }
 0x3d2   : > { %v1860_v29 = vshrl.u32 %v3973_v52, %v1857_v43  ;;  %v1863_v31 = vshrl.u32 %v3974_v54, %v1857_v43  ;;  %v1866_v24 = vshrl.u32 %v3975_v56, %v1857_v43  ;;  %v1869_v52 = vshrl.u32 %v3976_v58, %v1857_v43 }
 0x3d3   : > { %v3175_v61 = vsel %vm3092_vm1, %v3174_v1, %v3173_v28  ;;  %v6236_v37 = vsub.s32 %v1798_v47, %v1801_v39  ;;  %v1872_v57 = vshrl.u32 %v3977_v2, %v1857_v43  ;;  %vm1874_vm12 = vcmp.lt.s32.totalorder %v1855_v51, 1 }
 0x3d4   : > { %v3178_v4 = vsel %vm6213_vm11, %v6004_v0, %v3175_v61  ;;  %v1861_v59 = vor.u32 %v1860_v29, %v1859_v11  ;;  %v1864_v34 = vor.u32 %v1863_v31, %v1862_v36  ;;  %v1867_v41 = vor.u32 %v1866_v24, %v1865_v63 }
 0x3d5   : > { %3809 = vcosq.f32 %v3178_v4  ;;  %v1804_v20 = vsub.s32 0, %v6236_v37  ;;  %v1870_v60 = vor.u32 %v1869_v52, %v1868_v9  ;;  %v1873_v40 = vor.u32 %v1872_v57, %v1871_v5 }
 0x3d6   : > { %3811 = vsinq.f32 %v3178_v4  ;;  %vm1876_vm10 = vcmp.lt.s32.totalorder %v1855_v51, 3  ;;  %vm1877_vm13 = vcmp.lt.s32.totalorder %v1855_v51, 4  ;;  %v1882_v56 = vsel %vm1874_vm12, %v1861_v59, %v1864_v34 }
 0x3d7   : > { %v3414_v54 = vmin.u32 %v1804_v20, %v6236_v37  ;;  %v1886_v55 = vsel %vm1874_vm12, %v1864_v34, %v1867_v41  ;;  %v1858_v18 = vshrl.u32 %v3972_v48, %v1857_v43  ;;  %v1879_v17 = vsel %vm1877_vm13, %v1867_v41, 2102212464 }
 0x3d8   : > { %v1883_v58 = vsel %vm1877_vm13, %v1870_v60, 920167782  ;;  %v1887_v27 = vsel %vm1877_vm13, %v1873_v40, 1326507024  ;;  %vm1875_vm14 = vcmp.lt.s32.totalorder %v1855_v51, 2  ;;  %vm3189_vm15 = vcmp.eq.s32.totalorder %v3184_v25, 2 }
 0x3d9   : > { %v1806_v12 = vclz %v3414_v54  ;;  %v1884_v15 = vsel %vm1876_vm10, %v1867_v41, %v1883_v58  ;;  %v1888_v7 = vsel %vm1876_vm10, %v1870_v60, %v1887_v27  ;;  %v1878_v50 = vsel %vm1874_vm12, %v1858_v18, %v1861_v59 }
 0x3da   : > { %v1885_v13 = vsel %vm1875_vm14, %v1882_v56, %v1884_v15  ;;  %v1889_v19 = vsel %vm1875_vm14, %v1886_v55, %v1888_v7  ;;  %v1880_v48 = vsel %vm1876_vm10, %v1864_v34, %v1879_v17  ;;  %v1794_v42 = vadd.s32 %v6189_v38, %v6187_v26 }
 0x3db   : > { %v3415_v2 = vadd.s32 4294967294, %v1806_v12  ;;  %v6255_v44 = vmul.u32.u64.low %v1890_v45, %v1889_v19  ;;  %v6256_v30 = vmul.u32.u64.high %v1890_v45, %v1889_v19, %v6255_v44  ;;  %vm3185_vm1 = vcmp.lt.s32.totalorder %v3184_v25, 2 }
 0x3dc   : > { %v6258_v21 = vmul.u32.u64.low %v1890_v45, %v1885_v13  ;;  %v6259_v35 = vmul.u32.u64.high %v1890_v45, %v1885_v13, %v6258_v21  ;;  %vm3186_vm2 = vcmp.eq.s32.totalorder %v3184_v25, 0  ;;  %v1881_v6 = vsel %vm1875_vm14, %v1878_v50, %v1880_v48 }
 0x3dd   : > { %vm3416_vm0 = vcmp.lt.s32.totalorder %v3415_v2, 0  ;;  %vm3182_vm3 = vweird.f32 %v6004_v0  ;;  %v1897_v4 = vmul.u32 %v1890_v45, %v1881_v6  ;;  %v1824_v51 = vsub.s32 4, %v6224_v14 }
 0x3de   : > { %v1809_v33 = vsel %vm3416_vm0, 0, %v3415_v2  ;;  %vm1899_vm4 = vc.u32 %v6256_v30, %v6258_v21  ;;  %v1900_v26 = vadd.s32 1, %v6259_v35  ;;  %vm1740_vm5 = vcmp.lt.s32.totalorder %v6106_v16, 0 }
 0x3df   : > { %v3810_v8 = vpop.eup %3809  ;;  %v1810_v28 = vsub.s32 32, %v1809_v33  ;;  %v1814_v3 = vsub.s32 4294967266, %v1809_v33  ;;  %v1811_v53 = vshll.u32 %v6236_v37, %v1809_v33  ;;  %v1825_v34 = vsel %vm1740_vm5, %v1824_v51, %v6224_v14 }
 0x3e0   : > { %v3812_v32 = vpop.eup %3811  ;;  %v3190_v47 = vxor.u32 2147483648, %v3810_v8  ;;  %v1901_v29 = vsel %vm1899_vm4, %v1900_v26, %v6259_v35  ;;  %vm1739_vm6 = vcmp.le.f32.partialorder %v1738_v49, 0.7853982  ;;  %v1898_v14 = vadd.s32 %v6258_v21, %v6256_v30 }
 0x3e1   : > { %v3187_v62 = vxor.u32 2147483648, %v3812_v32  ;;  %v1812_v43 = vshrl.u32 %v1794_v42, %v1810_v28  ;;  %v1815_v61 = vadd.s32 127, %v1814_v3  ;;  %v1902_v31 = vadd.s32 %v1901_v29, %v1897_v4 }
 0x3e2   : > { %v3191_v23 = vsel %vm3189_vm15, %v3190_v47, %v3812_v32  ;;  %v1827_v57 = vsel %vm1739_vm6, 0, %v1825_v34  ;;  %vm1830_vm12 = vweird.f32 %v6106_v16  ;;  %vm1844_vm10 = vcmp.lt.s32.totalorder %v6156_v10, 0 }
 0x3e3   : > { %v3188_v1 = vsel %vm3186_vm2, %v3810_v8, %v3187_v62  ;;  %v1813_v46 = vor.u32 %v1812_v43, %v1811_v53  ;;  %v1816_v11 = vshll.u32 %v1815_v61, 23  ;;  %v1903_v24 = vadd.s32 536870912, %v1902_v31 }
 0x3e4   : > { %v3192_v39 = vsel %vm3185_vm1, %v3188_v1, %v3191_v23  ;;  %v1831_v60 = vadd.s32 3, %v1827_v57  ;;  %vm1843_vm13 = vcmp.le.f32.partialorder %v1842_v22, 0.7853982  ;;  %vm1934_vm1 = vweird.f32 %v6156_v10 }
 0x3e5   : > { %v3193_v38 = vsel %vm3182_vm3, nan, %v3192_v39  ;;  %v1817_v36 = vor.u32 4788187, %v1816_v11  ;;  %v1820_v37 = vcvt.s32.f32 %v1813_v46  ;;  %v1904_v59 = vshrl.u32 %v1903_v24, 30 }
 0x3e6   : > { %3219 = vst [vmem:[%s4521_s5 + $0xc8] sm:$0xff] %v3193_v38  ;;  %v1832_v12 = vand.u32 3, %v1831_v60 }
 0x3e7   : > { %v1818_v63 = vand.u32 2147483647, %v1817_v36  ;;  %v1905_v20 = vshll.u32 %v1904_v59, 30  ;;  %v1928_v21 = vsub.s32 4, %v1904_v59 }
 0x3e8   : > { %vm1837_vm8 = vcmp.eq.s32.totalorder %v1832_v12, 2  ;;  %vm1834_vm9 = vcmp.eq.s32.totalorder %v1832_v12, 0  ;;  %vm1833_vm11 = vcmp.lt.s32.totalorder %v1832_v12, 2 }
 0x3e9   : > { %v1821_v0 = vmul.f32 %v1820_v37, %v1818_v63  ;;  %v1906_v52 = vsub.s32 %v1902_v31, %v1905_v20  ;;  %v1929_v42 = vsel %vm1844_vm10, %v1928_v21, %v1904_v59 }
 0x3eb   : > { %v1822_v9 = vxor.u32 2147483648, %v1821_v0  ;;  %v1908_v25 = vsub.s32 0, %v1906_v52 }
 0x3ed   : > { %v1823_v41 = vsel %vm1740_vm5, %v1822_v9, %v1821_v0  ;;  %v3418_v54 = vmin.u32 %v1908_v25, %v1906_v52 }
 0x3ee   : > { %v1826_v5 = vsel %vm1739_vm6, %v6106_v16, %v1823_v41  ;;  %v1931_v16 = vsel %vm1843_vm13, 0, %v1929_v42 }
 0x3ef   : > { %3813 = vcosq.f32 %v1826_v5  ;;  %v1910_v40 = vclz %v3418_v54  ;;  %v1935_v3 = vadd.s32 3, %v1931_v16 }
 0x3f0   : > { %3815 = vsinq.f32 %v1826_v5 }
 0x3f1   : > { %v3419_v45 = vadd.s32 4294967294, %v1910_v40  ;;  %v1936_v23 = vand.u32 3, %v1935_v3 }
 0x3f3   : > { %vm3420_vm7 = vcmp.lt.s32.totalorder %v3419_v45, 0  ;;  %vm1941_vm14 = vcmp.eq.s32.totalorder %v1936_v23, 2  ;;  %vm1938_vm15 = vcmp.eq.s32.totalorder %v1936_v23, 0  ;;  %vm1937_vm0 = vcmp.lt.s32.totalorder %v1936_v23, 2 }
 0x3f4   : > { %v1913_v56 = vsel %vm3420_vm7, 0, %v3419_v45 }
 0x3f5   : > { %v1914_v18 = vsub.s32 32, %v1913_v56  ;;  %v1918_v49 = vsub.s32 4294967266, %v1913_v56  ;;  %v1915_v2 = vshll.u32 %v1906_v52, %v1913_v56 }
 0x3f7   : > { %v1916_v15 = vshrl.u32 %v1898_v14, %v1914_v18  ;;  %v1919_v7 = vadd.s32 127, %v1918_v49 }
 0x3f9   : > { %v3814_v55 = vpop.eup %3813  ;;  %v1917_v19 = vor.u32 %v1916_v15, %v1915_v2  ;;  %v1920_v8 = vshll.u32 %v1919_v7, 23 }
 0x3fa   : > { %v3816_v17 = vpop.eup %3815  ;;  %v1838_v58 = vxor.u32 2147483648, %v3814_v55 }
 0x3fb   : > { %v1835_v27 = vxor.u32 2147483648, %v3816_v17  ;;  %v1921_v30 = vor.u32 4788187, %v1920_v8  ;;  %v1924_v47 = vcvt.s32.f32 %v1917_v19 }
 0x3fc   : > { %v1839_v50 = vsel %vm1837_vm8, %v1838_v58, %v3816_v17 }
 0x3fd   : > { %v1836_v13 = vsel %vm1834_vm9, %v3814_v55, %v1835_v27  ;;  %v1922_v32 = vand.u32 2147483647, %v1921_v30 }
 0x3fe   : > { %v1840_v48 = vsel %vm1833_vm11, %v1836_v13, %v1839_v50 }
 0x3ff   : > { %v1841_v44 = vsel %vm1830_vm12, nan, %v1840_v48  ;;  %v1925_v33 = vmul.f32 %v1924_v47, %v1922_v32 }
 0x400   : > { %3206 = vst [vmem:[%s4521_s5 + $0x60] sm:$0xff] %v1841_v44 }
 0x401   : > { %v1926_v35 = vxor.u32 2147483648, %v1925_v33 }
 0x403   : > { %v1927_v62 = vsel %vm1844_vm10, %v1926_v35, %v1925_v33 }
 0x404   : > { %v1930_v28 = vsel %vm1843_vm13, %v6156_v10, %v1927_v62 }
 0x405   : > { %3817 = vcosq.f32 %v1930_v28 }
 0x406   : > { %3819 = vsinq.f32 %v1930_v28 }
 0x40f   : > { %v3818_v6 = vpop.eup %3817 }
 0x410   : > { %v3820_v1 = vpop.eup %3819  ;;  %v1942_v53 = vxor.u32 2147483648, %v3818_v6  ;;  %3227 = sbr.rel (!%p6421_p10) target bundleno = 1075 (0x433), region = 44 }
 0x411   : > { %v1939_v43 = vxor.u32 2147483648, %v3820_v1 }
 0x412   : > { %v1943_v61 = vsel %vm1941_vm14, %v1942_v53, %v3820_v1 }
 0x413   : > { %v1940_v22 = vsel %vm1938_vm15, %v3818_v6, %v1939_v43 }
 0x414   : > { %v1944_v39 = vsel %vm1937_vm0, %v1940_v22, %v1943_v61 }
 0x415   : > { %v1945_v26 = vsel %vm1934_vm1, nan, %v1944_v39 }
 0x416   : > { %3207 = vst [vmem:[%s4521_s5 + $0x68] sm:$0xff] %v1945_v26 }
 0x417   : > { %s6433_s30 = smov (!%p3231_p12, %s3230_s30), 13 }
 0x418   : > { %s6290_s18 = sshll.u32 %s6433_s30, 8 }
 0x419   : > { %s3236_s22 = ssub.s32 3328, %s6290_s18 }
 0x41a   : > { %3237 = vsyncadd %s3221_s11, %s3236_s22  ;;  %p3471_p13 = scmp.ne.s32.totalorder %s6290_s18, 0  ;;  %s3482_s26 = smul.u32 3328, %s3955_s15 }
 0x41b   : > { %s3244_s21 = sshll.u32 %s4521_s5, 4  ;;  %s3978_s10 = smov [#allocation7]   ;;  %s6303_s21 = int_to_ptr.vmem [resolvable:$true] %s3244_s21 }
 0x41c   : > { %s6301_s7 = scalar_lea.hbm %s6357_s3, %s3482_s26  ;;  %s3877_s9 = scalar_lea.vmem %s6303_s21, %s6290_s18 }
 0x41d   : > { %p3878_p1 = scmp.ne.s32.totalorder %s6303_s21, %s3877_s9  ;;  %s3881_s4 = sshll.u32 %s3978_s10, 4  ;;  %s3882_s4 = int_to_ptr.vmem [resolvable:$false] %s3881_s4 }
 0x41e   : > { %s3883_s15 = scalar_lea.vmem %s3882_s4, 6656  ;;  %p3884_p8 = scmp.lt.s32.totalorder %s6303_s21, %s3882_s4 }
 0x41f   : > { %p3879_p11 = pnand %p3878_p1, %p3471_p13  ;;  %p3885_p9 = scmp.lt.s32.totalorder %s3883_s15, %s3877_s9 }
 0x421   : > { %p3880_p4 = pneg %p3879_p11  ;;  %p3886_p2 = por %p3885_p9, %p3884_p8 }
 0x423   : > { %p3887_p6 = pnand %p3886_p2, %p3880_p4 }
 0x425   : > { %3890 = shalt.err (!%p3887_p6)
}
 0x426   : > { %s3891_s23 = scalar_lea.hbm %s6301_s7, %s6290_s18  ;;  %s3895_s5 = scalar_lea.hbm %s6357_s3, 6400 }
 0x427   : > { %p3892_p0 = scmp.ne.s32.totalorder %s6301_s7, %s3891_s23  ;;  %p3896_p10 = scmp.lt.u32.totalorder %s6301_s7, %s6357_s3 }
 0x428   : > { %p3897_p12 = scmp.lt.u32.totalorder %s3895_s5, %s3891_s23  ;;  %p3899_p11 = scmp.lt.u32.totalorder %s3891_s23, %s6301_s7 }
 0x429   : > { %p3893_p7 = pnand %p3892_p0, %p3471_p13 }
 0x42a   : > { %p3898_p1 = por %p3897_p12, %p3896_p10 }
 0x42b   : > { %p3894_p5 = pneg %p3893_p7 }
 0x42c   : > { %p3900_p4 = por %p3899_p11, %p3898_p1 }
 0x42e   : > { %p3901_p8 = pnand %p3900_p4, %p3894_p5 }
 0x430   : > { %3904 = shalt.err (!%p3901_p8)
}
 0x431   : > { %s3979_s22 = smov 256   ;;  %s3980_s26 = smov 16  }
 0x432   : > { %3250 = dma.vmem_to_hbm [thread:$0]  (%p3471_p13), %s6303_s21, %s6290_s18, %s6301_s7, %s3221_s11, %s3979_s22, %s3979_s22, %s3980_s26  }
 0x433 PF: > { %s3259_s24 = sand.u32 1, %s3943_s12   ;;  %p6422_p9 = scmp.ne.s32.totalorder %s6366_s28, 0 }
 0x434   : > { %s3260_s6 = scalar_lea.sflag [#allocation4], %s3259_s24 }
 0x435   : > { %p3649_p2 = pnand %p3357_p3, %p6422_p9 }
 0x437   : > { %3938 = dma.done.wait (!%p3649_p2), %s3260_s6, 3328  }
 0x438   : > { %3940 = vsyncadd (!%p3649_p2), %s3260_s6, 4294963968  ;;  %s20_s17 = sadd.s32 1, %s3963_s17   ;;  %s6423_s12 = smov %s3947_s13 }
 0x439   : > { %p17_p6 = scmp.ge.s32.totalorder %s20_s17, 4   ;;  %s6424_s13 = smov %s3951_s14 }
 0x43a   : > { %s6425_s14 = smov %s4063_s27  ;;  %s6426_s15 = smov %s3959_s16 }
 0x43b   : > { %s6427_s16 = smov %s6429_s20  ;;  %19 = sbr.rel (!%p17_p6) target bundleno = 7 (0x7), region = 85 }
 0x442   :  { %3265 = vsyncpa [#allocation3], 1 }
 0x443   :  { %3267 = vsyncpa [#allocation3 + $0x1], 1 }
 0x444   :  { %3268 = vsyncpa [#allocation6], 1 }
 0x445   :  { %3269 = vsyncpa [#allocation4], 1 }
 0x446   :  { %3271 = vsyncpa [#allocation4 + $0x1], 1 }

</bundles_post_ra>
